<compile_context>
chip_gen: v6e
topology: v6e:2x2x1
jax: 0.10.0
libtpu: 0.0.40
codegen_flags: <defaults>
</compile_context>

<pallas_src>
import jax
import jax.numpy as jnp
from jax import lax
from jax.experimental import pallas as pl
from jax.experimental.pallas import tpu as pltpu

NUM_CLASSES = 8
CLS_PAD = 128          # lane-dense classifier output width (sliced back to 8)
HIDDEN = 1024          # rgbdNet2 / sliceNet2 stand-in output features
BN_EPS = 1e-5


# ----------------------------------------------------------------------------
# Fused Pallas kernel: both branches + BatchNorm2d(2) + classifier in VMEM
# ----------------------------------------------------------------------------
def _envnet2_fused_kernel(
    x2_ref, x1_ref,                 # (B, Din) f32 flattened branch inputs
    w_sl_ref, b_sl_ref,             # sliceNet2 stand-in: (Din, 1024) bf16, (1, 1024) f32
    w_rg_ref, b_rg_ref,             # rgbdNet2  stand-in: (Din, 1024) bf16, (1, 1024) f32
    wc0_ref, wc1_ref, bc_ref,       # classifier stand-in split by channel block (bf16), bias (1, 128) f32
    gamma_ref, beta_ref,            # BatchNorm2d(2) affine params, SMEM (2,) f32
    o_ref,                          # (B, 128) f32 output (lane padded)
):
    # --- branch matmuls on the MXU (bf16 inputs, f32 accumulation) ---
    # x2 = self.sliceNet(x2)
    f2 = jnp.tanh(
        jnp.dot(x2_ref[...].astype(jnp.bfloat16), w_sl_ref[...],
                preferred_element_type=jnp.float32) + b_sl_ref[...])
    # x1 = self.rgbdNet(x1)
    f1 = jnp.tanh(
        jnp.dot(x1_ref[...].astype(jnp.bfloat16), w_rg_ref[...],
                preferred_element_type=jnp.float32) + b_rg_ref[...])

    # --- BatchNorm2d(2), training-mode biased batch stats per channel ---
    # torch.cat((x2, x1), dim=1): channel 0 <- f2 (slice), channel 1 <- f1 (rgbd)
    m0 = jnp.mean(f2, axis=(0, 1), keepdims=True)                      # (1, 1)
    v0 = jnp.mean(jnp.square(f2 - m0), axis=(0, 1), keepdims=True)
    m1 = jnp.mean(f1, axis=(0, 1), keepdims=True)
    v1 = jnp.mean(jnp.square(f1 - m1), axis=(0, 1), keepdims=True)

    s0 = gamma_ref[0] * lax.rsqrt(v0 + BN_EPS)                         # (1, 1)
    s1 = gamma_ref[1] * lax.rsqrt(v1 + BN_EPS)
    t0 = beta_ref[0] - m0 * s0
    t1 = beta_ref[1] - m1 * s1

    # BN folded into affine per channel block; cast to bf16 for the MXU.
    n0 = (f2 * s0 + t0).astype(jnp.bfloat16)                           # (B, 1024)
    n1 = (f1 * s1 + t1).astype(jnp.bfloat16)

    # --- classifier: (B, 2048) @ (2048, 128) as two channel-block dots ---
    y = jnp.dot(n0, wc0_ref[...], preferred_element_type=jnp.float32)
    y = y + jnp.dot(n1, wc1_ref[...], preferred_element_type=jnp.float32)
    o_ref[...] = (y + bc_ref[...]).astype(o_ref.dtype)


def envnet2_forward(params, x2, x1):
    B = x1.shape[0]
    x1f = x1.reshape(B, -1).astype(jnp.float32)   # (B, C*H*W), torch.reshape order
    x2f = x2.reshape(B, -1).astype(jnp.float32)
    Din = x1f.shape[1]

    cost = pl.CostEstimate(
        flops=int(2 * (2 * B * Din * HIDDEN) + 2 * (2 * B * HIDDEN * CLS_PAD)),
        transcendentals=int(2 * B * HIDDEN),
        bytes_accessed=int(
            2 * B * Din * 4                      # branch inputs (f32)
            + 2 * Din * HIDDEN * 2               # branch weights (bf16)
            + 2 * HIDDEN * 4                     # branch biases (f32)
            + 2 * HIDDEN * CLS_PAD * 2           # classifier weights (bf16)
            + CLS_PAD * 4 + 4 * 4                # classifier bias + BN params
            + B * CLS_PAD * 4                    # output
        ),
    )

    out = pl.pallas_call(
        _envnet2_fused_kernel,
        out_shape=jax.ShapeDtypeStruct((B, CLS_PAD), jnp.float32),
        grid=(1,),
        in_specs=[
            pl.BlockSpec((B, Din), lambda i: (0, 0)),          # x2 flat
            pl.BlockSpec((B, Din), lambda i: (0, 0)),          # x1 flat
            pl.BlockSpec((Din, HIDDEN), lambda i: (0, 0)),     # w_slice (bf16)
            pl.BlockSpec((1, HIDDEN), lambda i: (0, 0)),       # b_slice
            pl.BlockSpec((Din, HIDDEN), lambda i: (0, 0)),     # w_rgbd (bf16)
            pl.BlockSpec((1, HIDDEN), lambda i: (0, 0)),       # b_rgbd
            pl.BlockSpec((HIDDEN, CLS_PAD), lambda i: (0, 0)), # w_cls channel 0
            pl.BlockSpec((HIDDEN, CLS_PAD), lambda i: (0, 0)), # w_cls channel 1
            pl.BlockSpec((1, CLS_PAD), lambda i: (0, 0)),      # b_cls (padded)
            pl.BlockSpec(memory_space=pltpu.MemorySpace.SMEM), # bn_gamma (2,)
            pl.BlockSpec(memory_space=pltpu.MemorySpace.SMEM), # bn_beta  (2,)
        ],
        out_specs=pl.BlockSpec((B, CLS_PAD), lambda i: (0, 0)),
        compiler_params=pltpu.CompilerParams(
            dimension_semantics=("arbitrary",),
            vmem_limit_bytes=32 * 1024 * 1024,
        ),
        cost_estimate=cost,
    )(
        x2f, x1f,
        params["w_slice"], params["b_slice"].reshape(1, HIDDEN),
        params["w_rgbd"], params["b_rgbd"].reshape(1, HIDDEN),
        params["w_cls_c0"], params["w_cls_c1"],
        params["b_cls_pad"].reshape(1, CLS_PAD),
        params["bn_gamma"], params["bn_beta"],
    )
    return out[:, :NUM_CLASSES]


# ----------------------------------------------------------------------------
# Parameters (deterministic stand-ins for the unavailable sub-networks)
# ----------------------------------------------------------------------------
def init_params(key):
    k1, k2, k3 = jax.random.split(key, 3)
    feat_in = 4 * 16 * 16  # flattened 4-channel 16x16 input

    # TODO(synk): rgbdNet2 / sliceNet2 definitions unavailable; stand-ins are
    # single FC(1024)+tanh layers producing the required (B, 1, 32, 32) shape.
    w_rgbd = (0.02 * jax.random.normal(k1, (feat_in, HIDDEN), jnp.float32)).astype(jnp.bfloat16)
    w_slice = (0.02 * jax.random.normal(k2, (feat_in, HIDDEN), jnp.float32)).astype(jnp.bfloat16)

    # TODO(synk): claasifierNet1 definition unavailable; stand-in = FC(8).
    # Stored pre-split by input-channel block and lane-padded 8 -> 128.
    w_cls = 0.02 * jax.random.normal(k3, (2 * HIDDEN, NUM_CLASSES), jnp.float32)
    w_cls_pad = jnp.zeros((2 * HIDDEN, CLS_PAD), jnp.float32).at[:, :NUM_CLASSES].set(w_cls)
    w_cls_pad = w_cls_pad.astype(jnp.bfloat16)

    return {
        "w_rgbd": w_rgbd,
        "b_rgbd": jnp.zeros((HIDDEN,), jnp.float32),
        "w_slice": w_slice,
        "b_slice": jnp.zeros((HIDDEN,), jnp.float32),
        # nn.BatchNorm2d(2) affine params (default init: gamma=1, beta=0).
        "bn_gamma": jnp.ones((2,), jnp.float32),
        "bn_beta": jnp.zeros((2,), jnp.float32),
        "w_cls_c0": w_cls_pad[:HIDDEN, :],       # multiplies channel 0 (slice branch)
        "w_cls_c1": w_cls_pad[HIDDEN:, :],       # multiplies channel 1 (rgbd branch)
        "b_cls_pad": jnp.zeros((CLS_PAD,), jnp.float32),
    }


if __name__ == "__main__":
    key = jax.random.PRNGKey(0)
    kp, kx1, kx2 = jax.random.split(key, 3)
    params = init_params(kp)

    # Small deterministic inputs: batch=2, 4 channels, 16x16 spatial (NCHW).
    x1 = jax.random.normal(kx1, (2, 4, 16, 16), jnp.float32)  # RGBD branch
    x2 = jax.random.normal(kx2, (2, 4, 16, 16), jnp.float32)  # slice branch

    out = jax.jit(envnet2_forward)(params, x2, x1)
    out = jax.block_until_ready(out)
    assert out.shape == (2, NUM_CLASSES)
    assert jnp.all(jnp.isfinite(out))
    print("KERNEL_OK")
</pallas_src>

<mosaic_0001>
module attributes {stable_mosaic.version = 11 : i64} {
  func.func @_envnet2_fused_kernel(%arg0: i32, %arg1: memref<2x1024xf32, #tpu.memory_space<vmem>>, %arg2: memref<2x1024xf32, #tpu.memory_space<vmem>>, %arg3: memref<1024x1024xbf16, #tpu.memory_space<vmem>>, %arg4: memref<1x1024xf32, #tpu.memory_space<vmem>>, %arg5: memref<1024x1024xbf16, #tpu.memory_space<vmem>>, %arg6: memref<1x1024xf32, #tpu.memory_space<vmem>>, %arg7: memref<1024x128xbf16, #tpu.memory_space<vmem>>, %arg8: memref<1024x128xbf16, #tpu.memory_space<vmem>>, %arg9: memref<1x128xf32, #tpu.memory_space<vmem>>, %arg10: memref<2xf32, #tpu.memory_space<smem>>, %arg11: memref<2xf32, #tpu.memory_space<smem>>, %arg12: memref<2x128xf32, #tpu.memory_space<vmem>>) attributes {dimension_semantics = [#tpu.dimension_semantics<arbitrary>], iteration_bounds = array<i64: 1>, scalar_prefetch = 0 : i64, scratch_operands = 0 : i64, tpu.core_type = #tpu.core_type<tc>, window_params = [{pipeline_mode = #tpu.pipeline_mode<synchronous>, transform_indices = @transform_0, window_bounds = array<i64: 2, 1024>}, {pipeline_mode = #tpu.pipeline_mode<synchronous>, transform_indices = @transform_1, window_bounds = array<i64: 2, 1024>}, {pipeline_mode = #tpu.pipeline_mode<synchronous>, transform_indices = @transform_2, window_bounds = array<i64: 1024, 1024>}, {pipeline_mode = #tpu.pipeline_mode<synchronous>, transform_indices = @transform_3, window_bounds = array<i64: 1, 1024>}, {pipeline_mode = #tpu.pipeline_mode<synchronous>, transform_indices = @transform_4, window_bounds = array<i64: 1024, 1024>}, {pipeline_mode = #tpu.pipeline_mode<synchronous>, transform_indices = @transform_5, window_bounds = array<i64: 1, 1024>}, {pipeline_mode = #tpu.pipeline_mode<synchronous>, transform_indices = @transform_6, window_bounds = array<i64: 1024, 128>}, {pipeline_mode = #tpu.pipeline_mode<synchronous>, transform_indices = @transform_7, window_bounds = array<i64: 1024, 128>}, {pipeline_mode = #tpu.pipeline_mode<synchronous>, transform_indices = @transform_8, window_bounds = array<i64: 1, 128>}, {transform_indices = @transform_9, window_bounds = array<i64: 2>}, {transform_indices = @transform_10, window_bounds = array<i64: 2>}, {pipeline_mode = #tpu.pipeline_mode<synchronous>, transform_indices = @transform_11, window_bounds = array<i64: 2, 128>}]} {
    %c0 = arith.constant 0 : index
    %c0_0 = arith.constant 0 : index
    %0 = vector.load %arg1[%c0, %c0_0] : memref<2x1024xf32, #tpu.memory_space<vmem>>, vector<2x1024xf32>
    %1 = arith.truncf %0 : vector<2x1024xf32> to vector<2x1024xbf16>
    %c0_1 = arith.constant 0 : index
    %c0_2 = arith.constant 0 : index
    %2 = vector.load %arg3[%c0_1, %c0_2] : memref<1024x1024xbf16, #tpu.memory_space<vmem>>, vector<1024x1024xbf16>
    %cst = arith.constant dense<0.000000e+00> : vector<2x1024xf32>
    %3 = tpu.matmul %1, %2, %cst {dimension_numbers = #tpu.dot_dimension_numbers<[1], [0], [0], [1], [0, 0, 1, 1], [], []>} : vector<2x1024xbf16>, vector<1024x1024xbf16>, vector<2x1024xf32> -> vector<2x1024xf32>
    %c0_3 = arith.constant 0 : index
    %c0_4 = arith.constant 0 : index
    %4 = vector.load %arg4[%c0_3, %c0_4] : memref<1x1024xf32, #tpu.memory_space<vmem>>, vector<1x1024xf32>
    %5 = vector.broadcast %4 : vector<1x1024xf32> to vector<2x1024xf32>
    %6 = arith.addf %3, %5 : vector<2x1024xf32>
    %7 = math.tanh %6 : vector<2x1024xf32>
    %c0_5 = arith.constant 0 : index
    %c0_6 = arith.constant 0 : index
    %8 = vector.load %arg2[%c0_5, %c0_6] : memref<2x1024xf32, #tpu.memory_space<vmem>>, vector<2x1024xf32>
    %9 = arith.truncf %8 : vector<2x1024xf32> to vector<2x1024xbf16>
    %c0_7 = arith.constant 0 : index
    %c0_8 = arith.constant 0 : index
    %10 = vector.load %arg5[%c0_7, %c0_8] : memref<1024x1024xbf16, #tpu.memory_space<vmem>>, vector<1024x1024xbf16>
    %cst_9 = arith.constant dense<0.000000e+00> : vector<2x1024xf32>
    %11 = tpu.matmul %9, %10, %cst_9 {dimension_numbers = #tpu.dot_dimension_numbers<[1], [0], [0], [1], [0, 0, 1, 1], [], []>} : vector<2x1024xbf16>, vector<1024x1024xbf16>, vector<2x1024xf32> -> vector<2x1024xf32>
    %c0_10 = arith.constant 0 : index
    %c0_11 = arith.constant 0 : index
    %12 = vector.load %arg6[%c0_10, %c0_11] : memref<1x1024xf32, #tpu.memory_space<vmem>>, vector<1x1024xf32>
    %13 = vector.broadcast %12 : vector<1x1024xf32> to vector<2x1024xf32>
    %14 = arith.addf %11, %13 : vector<2x1024xf32>
    %15 = math.tanh %14 : vector<2x1024xf32>
    %16 = vector.shape_cast %7 : vector<2x1024xf32> to vector<1x2x1024xf32>
    %cst_12 = arith.constant dense<0.000000e+00> : vector<1xf32>
    %17 = vector.multi_reduction <add>, %16, %cst_12 [1, 2] : vector<1x2x1024xf32> to vector<1xf32>
    %18 = vector.shape_cast %17 : vector<1xf32> to vector<1x1x1xf32>
    %19 = vector.extract %18[0, 0, 0] : f32 from vector<1x1x1xf32>
    %20 = vector.broadcast %19 : f32 to vector<1x1xf32>
    %cst_13 = arith.constant 2.048000e+03 : f32
    %21 = vector.broadcast %cst_13 : f32 to vector<1x1xf32>
    %22 = arith.divf %20, %21 : vector<1x1xf32>
    %23 = vector.broadcast %22 : vector<1x1xf32> to vector<2x1024xf32>
    %24 = arith.subf %7, %23 : vector<2x1024xf32>
    %25 = arith.mulf %24, %24 : vector<2x1024xf32>
    %26 = vector.shape_cast %25 : vector<2x1024xf32> to vector<1x2x1024xf32>
    %cst_14 = arith.constant dense<0.000000e+00> : vector<1xf32>
    %27 = vector.multi_reduction <add>, %26, %cst_14 [1, 2] : vector<1x2x1024xf32> to vector<1xf32>
    %28 = vector.shape_cast %27 : vector<1xf32> to vector<1x1x1xf32>
    %29 = vector.extract %28[0, 0, 0] : f32 from vector<1x1x1xf32>
    %30 = vector.broadcast %29 : f32 to vector<1x1xf32>
    %cst_15 = arith.constant 2.048000e+03 : f32
    %31 = vector.broadcast %cst_15 : f32 to vector<1x1xf32>
    %32 = arith.divf %30, %31 : vector<1x1xf32>
    %33 = vector.shape_cast %15 : vector<2x1024xf32> to vector<1x2x1024xf32>
    %cst_16 = arith.constant dense<0.000000e+00> : vector<1xf32>
    %34 = vector.multi_reduction <add>, %33, %cst_16 [1, 2] : vector<1x2x1024xf32> to vector<1xf32>
    %35 = vector.shape_cast %34 : vector<1xf32> to vector<1x1x1xf32>
    %36 = vector.extract %35[0, 0, 0] : f32 from vector<1x1x1xf32>
    %37 = vector.broadcast %36 : f32 to vector<1x1xf32>
    %cst_17 = arith.constant 2.048000e+03 : f32
    %38 = vector.broadcast %cst_17 : f32 to vector<1x1xf32>
    %39 = arith.divf %37, %38 : vector<1x1xf32>
    %40 = vector.broadcast %39 : vector<1x1xf32> to vector<2x1024xf32>
    %41 = arith.subf %15, %40 : vector<2x1024xf32>
    %42 = arith.mulf %41, %41 : vector<2x1024xf32>
    %43 = vector.shape_cast %42 : vector<2x1024xf32> to vector<1x2x1024xf32>
    %cst_18 = arith.constant dense<0.000000e+00> : vector<1xf32>
    %44 = vector.multi_reduction <add>, %43, %cst_18 [1, 2] : vector<1x2x1024xf32> to vector<1xf32>
    %45 = vector.shape_cast %44 : vector<1xf32> to vector<1x1x1xf32>
    %46 = vector.extract %45[0, 0, 0] : f32 from vector<1x1x1xf32>
    %47 = vector.broadcast %46 : f32 to vector<1x1xf32>
    %cst_19 = arith.constant 2.048000e+03 : f32
    %48 = vector.broadcast %cst_19 : f32 to vector<1x1xf32>
    %49 = arith.divf %47, %48 : vector<1x1xf32>
    %c0_20 = arith.constant 0 : index
    %50 = memref.load %arg10[%c0_20] : memref<2xf32, #tpu.memory_space<smem>>
    %cst_21 = arith.constant 9.99999974E-6 : f32
    %51 = vector.broadcast %cst_21 : f32 to vector<1x1xf32>
    %52 = arith.addf %32, %51 : vector<1x1xf32>
    %53 = math.rsqrt %52 : vector<1x1xf32>
    %54 = vector.broadcast %50 : f32 to vector<1x1xf32>
    %55 = arith.mulf %54, %53 : vector<1x1xf32>
    %c1 = arith.constant 1 : index
    %56 = memref.load %arg10[%c1] : memref<2xf32, #tpu.memory_space<smem>>
    %cst_22 = arith.constant 9.99999974E-6 : f32
    %57 = vector.broadcast %cst_22 : f32 to vector<1x1xf32>
    %58 = arith.addf %49, %57 : vector<1x1xf32>
    %59 = math.rsqrt %58 : vector<1x1xf32>
    %60 = vector.broadcast %56 : f32 to vector<1x1xf32>
    %61 = arith.mulf %60, %59 : vector<1x1xf32>
    %c0_23 = arith.constant 0 : index
    %62 = memref.load %arg11[%c0_23] : memref<2xf32, #tpu.memory_space<smem>>
    %63 = arith.mulf %22, %55 : vector<1x1xf32>
    %64 = vector.broadcast %62 : f32 to vector<1x1xf32>
    %65 = arith.subf %64, %63 : vector<1x1xf32>
    %c1_24 = arith.constant 1 : index
    %66 = memref.load %arg11[%c1_24] : memref<2xf32, #tpu.memory_space<smem>>
    %67 = arith.mulf %39, %61 : vector<1x1xf32>
    %68 = vector.broadcast %66 : f32 to vector<1x1xf32>
    %69 = arith.subf %68, %67 : vector<1x1xf32>
    %70 = vector.broadcast %55 : vector<1x1xf32> to vector<2x1024xf32>
    %71 = arith.mulf %7, %70 : vector<2x1024xf32>
    %72 = vector.broadcast %65 : vector<1x1xf32> to vector<2x1024xf32>
    %73 = arith.addf %71, %72 : vector<2x1024xf32>
    %74 = arith.truncf %73 : vector<2x1024xf32> to vector<2x1024xbf16>
    %75 = vector.broadcast %61 : vector<1x1xf32> to vector<2x1024xf32>
    %76 = arith.mulf %15, %75 : vector<2x1024xf32>
    %77 = vector.broadcast %69 : vector<1x1xf32> to vector<2x1024xf32>
    %78 = arith.addf %76, %77 : vector<2x1024xf32>
    %79 = arith.truncf %78 : vector<2x1024xf32> to vector<2x1024xbf16>
    %c0_25 = arith.constant 0 : index
    %c0_26 = arith.constant 0 : index
    %80 = vector.load %arg7[%c0_25, %c0_26] : memref<1024x128xbf16, #tpu.memory_space<vmem>>, vector<1024x128xbf16>
    %cst_27 = arith.constant dense<0.000000e+00> : vector<2x128xf32>
    %81 = tpu.matmul %74, %80, %cst_27 {dimension_numbers = #tpu.dot_dimension_numbers<[1], [0], [0], [1], [0, 0, 1, 1], [], []>} : vector<2x1024xbf16>, vector<1024x128xbf16>, vector<2x128xf32> -> vector<2x128xf32>
    %c0_28 = arith.constant 0 : index
    %c0_29 = arith.constant 0 : index
    %82 = vector.load %arg8[%c0_28, %c0_29] : memref<1024x128xbf16, #tpu.memory_space<vmem>>, vector<1024x128xbf16>
    %cst_30 = arith.constant dense<0.000000e+00> : vector<2x128xf32>
    %83 = tpu.matmul %79, %82, %cst_30 {dimension_numbers = #tpu.dot_dimension_numbers<[1], [0], [0], [1], [0, 0, 1, 1], [], []>} : vector<2x1024xbf16>, vector<1024x128xbf16>, vector<2x128xf32> -> vector<2x128xf32>
    %84 = arith.addf %81, %83 : vector<2x128xf32>
    %c0_31 = arith.constant 0 : index
    %c0_32 = arith.constant 0 : index
    %85 = vector.load %arg9[%c0_31, %c0_32] : memref<1x128xf32, #tpu.memory_space<vmem>>, vector<1x128xf32>
    %86 = vector.broadcast %85 : vector<1x128xf32> to vector<2x128xf32>
    %87 = arith.addf %84, %86 : vector<2x128xf32>
    %c0_33 = arith.constant 0 : index
    %c0_34 = arith.constant 0 : index
    %88 = vector.load %arg12[%c0_33, %c0_34] : memref<2x128xf32, #tpu.memory_space<vmem>>, vector<2x128xf32>
    tpu.vector_store %arg12[%c0_33, %c0_34], %87 {strides = array<i32>} : memref<2x128xf32, #tpu.memory_space<vmem>>, vector<2x128xf32>,
    return
  }
  func.func @transform_0(%arg0: i32) -> (i32, i32) {
    %c0_i32 = arith.constant 0 : i32
    %c0_i32_0 = arith.constant 0 : i32
    %c0_i32_1 = arith.constant 0 : i32
    return %c0_i32, %c0_i32_0 : i32, i32
  }
  func.func @transform_1(%arg0: i32) -> (i32, i32) {
    %c0_i32 = arith.constant 0 : i32
    %c0_i32_0 = arith.constant 0 : i32
    %c0_i32_1 = arith.constant 0 : i32
    return %c0_i32, %c0_i32_0 : i32, i32
  }
  func.func @transform_2(%arg0: i32) -> (i32, i32) {
    %c0_i32 = arith.constant 0 : i32
    %c0_i32_0 = arith.constant 0 : i32
    %c0_i32_1 = arith.constant 0 : i32
    return %c0_i32, %c0_i32_0 : i32, i32
  }
  func.func @transform_3(%arg0: i32) -> (i32, i32) {
    %c0_i32 = arith.constant 0 : i32
    %c0_i32_0 = arith.constant 0 : i32
    %c0_i32_1 = arith.constant 0 : i32
    return %c0_i32, %c0_i32_0 : i32, i32
  }
  func.func @transform_4(%arg0: i32) -> (i32, i32) {
    %c0_i32 = arith.constant 0 : i32
    %c0_i32_0 = arith.constant 0 : i32
    %c0_i32_1 = arith.constant 0 : i32
    return %c0_i32, %c0_i32_0 : i32, i32
  }
  func.func @transform_5(%arg0: i32) -> (i32, i32) {
    %c0_i32 = arith.constant 0 : i32
    %c0_i32_0 = arith.constant 0 : i32
    %c0_i32_1 = arith.constant 0 : i32
    return %c0_i32, %c0_i32_0 : i32, i32
  }
  func.func @transform_6(%arg0: i32) -> (i32, i32) {
    %c0_i32 = arith.constant 0 : i32
    %c0_i32_0 = arith.constant 0 : i32
    %c0_i32_1 = arith.constant 0 : i32
    return %c0_i32, %c0_i32_0 : i32, i32
  }
  func.func @transform_7(%arg0: i32) -> (i32, i32) {
    %c0_i32 = arith.constant 0 : i32
    %c0_i32_0 = arith.constant 0 : i32
    %c0_i32_1 = arith.constant 0 : i32
    return %c0_i32, %c0_i32_0 : i32, i32
  }
  func.func @transform_8(%arg0: i32) -> (i32, i32) {
    %c0_i32 = arith.constant 0 : i32
    %c0_i32_0 = arith.constant 0 : i32
    %c0_i32_1 = arith.constant 0 : i32
    return %c0_i32, %c0_i32_0 : i32, i32
  }
  func.func @transform_9(%arg0: i32) -> i32 {
    %c0_i32 = arith.constant 0 : i32
    %c0_i32_0 = arith.constant 0 : i32
    return %c0_i32 : i32
  }
  func.func @transform_10(%arg0: i32) -> i32 {
    %c0_i32 = arith.constant 0 : i32
    %c0_i32_0 = arith.constant 0 : i32
    return %c0_i32 : i32
  }
  func.func @transform_11(%arg0: i32) -> (i32, i32) {
    %c0_i32 = arith.constant 0 : i32
    %c0_i32_0 = arith.constant 0 : i32
    %c0_i32_1 = arith.constant 0 : i32
    return %c0_i32, %c0_i32_0 : i32, i32
  }
}

</mosaic_0001>

<bundles_post_ra>
// kernel: envnet2_forward.1
= control target key start
LH: loop header
LB: loop body
LE: loop exit
PB: predicated region body
PF: predicated region fallthrough
CT: control target
= control target key end

     0   :  { %16 = vsyncpa [#allocation3], 0  ;;  %s11700_s0 = inlined_call_operand.vmem [shape: f32[2,1024], index: 0, kind: input, shape index: {}]   ;;  %s11701_s1 = inlined_call_operand.vmem [shape: f32[2,1024], index: 1, kind: input, shape index: {}]   ;;  %s11702_s2 = inlined_call_operand.hbm [shape: bf16[1024,1024], index: 2, kind: input, shape index: {}]   ;;  %s11703_s3 = inlined_call_operand.hbm [shape: f32[1,1024], index: 3, kind: input, shape index: {}]   ;;  %s11704_s4 = inlined_call_operand.hbm [shape: bf16[1024,1024], index: 4, kind: input, shape index: {}]   ;;  %s11705_s5 = inlined_call_operand.hbm [shape: f32[1,1024], index: 5, kind: input, shape index: {}]   ;;  %s11706_s6 = inlined_call_operand.hbm [shape: bf16[1024,128], index: 6, kind: input, shape index: {}]   ;;  %s11707_s7 = inlined_call_operand.hbm [shape: bf16[1024,128], index: 7, kind: input, shape index: {}]   ;;  %s11708_s8 = inlined_call_operand.hbm [shape: f32[1,128], index: 8, kind: input, shape index: {}]   ;;  %s11709_s9 = inlined_call_operand.hbm [shape: f32[2], index: 9, kind: input, shape index: {}]   ;;  %s11710_s10 = inlined_call_operand.hbm [shape: f32[2], index: 10, kind: input, shape index: {}]   ;;  %s11711_s11 = inlined_call_operand.hbm [shape: f32[2,128], index: 11, kind: output, shape index: {}]  }
   0x1   :  { %17 = vsyncpa [#allocation7], 0 }
   0x2   :  { %18 = vsyncpa [#allocation10], 0 }
   0x3   :  { %19 = vsyncpa [#allocation13], 0 }
   0x4   :  { %20 = vsyncpa [#allocation5], 0 }
   0x5   :  { %21 = vsyncpa [#allocation17], 0 }
   0x6   :  { %22 = vsyncpa [#allocation4], 0  ;;  %s11106_s17 = smov [#allocation6]   ;;  %s11107_s19 = smov [#allocation9]  }
   0x7   :  { %s45_s18 = sshll.u32 %s11106_s17, 4  ;;  %s67_s20 = sshll.u32 %s11107_s19, 4  ;;  %s46_s18 = int_to_ptr.vmem [resolvable:$true] %s45_s18  ;;  %s68_s20 = int_to_ptr.vmem [resolvable:$true] %s67_s20 }
   0x8   :  { %s10924_s21 = scalar_lea.vmem %s46_s18, 128  ;;  %p10929_p1 = scmp.lt.s32.totalorder %s46_s18, %s46_s18 }
   0x9   :  { %p10925_p0 = scmp.ne.s32.totalorder %s46_s18, %s10924_s21  ;;  %p10930_p2 = scmp.lt.s32.totalorder %s10924_s21, %s10924_s21 }
   0xb   :  { %p10931_p3 = por %p10930_p2, %p10929_p1 }
   0xd   :  { %p10932_p4 = pnand %p10931_p3, %p10925_p0 }
   0xf   :  { %10935 = shalt.err (!%p10932_p4)
}
  0x10   :  { %48 = dma.hbm_to_vmem [thread:$0]  %s11703_s3, 128, %s46_s18, [#allocation7]  }
  0x11   :  { %s10944_s24 = scalar_lea.vmem %s68_s20, 128  ;;  %p10949_p6 = scmp.lt.s32.totalorder %s68_s20, %s68_s20 }
  0x12   :  { %p10945_p5 = scmp.ne.s32.totalorder %s68_s20, %s10944_s24  ;;  %p10950_p7 = scmp.lt.s32.totalorder %s10944_s24, %s10944_s24 }
  0x14   :  { %p10951_p8 = por %p10950_p7, %p10949_p6 }
  0x16   :  { %p10952_p9 = pnand %p10951_p8, %p10945_p5 }
  0x18   :  { %10955 = shalt.err (!%p10952_p9)
}
  0x19   :  { %70 = dma.hbm_to_vmem [thread:$0]  %s11705_s5, 128, %s68_s20, [#allocation10]  }
  0x1a   :  { %s11108_s27 = smov [#allocation12]   ;;  %s11109_s29 = smov [#allocation2]  }
  0x1b   :  { %s88_s28 = sshll.u32 %s11108_s27, 4  ;;  %s32_s30 = sshll.u32 %s11109_s29, 4  ;;  %s89_s28 = int_to_ptr.vmem [resolvable:$true] %s88_s28  ;;  %s33_s30 = int_to_ptr.vmem [resolvable:$true] %s32_s30 }
  0x1c   :  { %s10964_s12 = scalar_lea.vmem %s89_s28, 8192  ;;  %p10969_p11 = scmp.lt.s32.totalorder %s89_s28, %s89_s28 }
  0x1d   :  { %p10965_p10 = scmp.ne.s32.totalorder %s89_s28, %s10964_s12  ;;  %p10970_p12 = scmp.lt.s32.totalorder %s10964_s12, %s10964_s12 }
  0x1f   :  { %p10971_p13 = por %p10970_p12, %p10969_p11 }
  0x21   :  { %p10972_p0 = pnand %p10971_p13, %p10965_p10 }
  0x23   :  { %10975 = shalt.err (!%p10972_p0)
}
  0x24   :  { %s11110_s3 = smov 64   ;;  %s11111_s13 = smov 4  }
  0x25   :  { %94 = dma.hbm_to_vmem [thread:$0]  %s11707_s7, 8192, %s89_s28, [#allocation13], %s11110_s3, %s11110_s3, %s11111_s13  }
  0x26   :  { %s10984_s15 = scalar_lea.vmem %s33_s30, 65536  ;;  %p10989_p2 = scmp.lt.s32.totalorder %s33_s30, %s33_s30 }
  0x27   :  { %p10985_p1 = scmp.ne.s32.totalorder %s33_s30, %s10984_s15  ;;  %p10990_p3 = scmp.lt.s32.totalorder %s10984_s15, %s10984_s15 }
  0x29   :  { %p10991_p4 = por %p10990_p3, %p10989_p2 }
  0x2b   :  { %p10992_p5 = pnand %p10991_p4, %p10985_p1 }
  0x2d   :  { %10995 = shalt.err (!%p10992_p5)
}
  0x2e   :  { %s11112_s16 = smov 512   ;;  %s11113_s17 = smov 32  }
  0x2f   :  { %38 = dma.hbm_to_vmem [thread:$0]  %s11702_s2, 65536, %s33_s30, [#allocation3], %s11112_s16, %s11112_s16, %s11113_s17  }
  0x30   :  { %s11114_s20 = smov [#allocation8]   ;;  %s11115_s22 = smov [#allocation11]  }
  0x31   :  { %s54_s21 = sshll.u32 %s11114_s20, 4  ;;  %s76_s23 = sshll.u32 %s11115_s22, 4  ;;  %s55_s21 = int_to_ptr.vmem [resolvable:$true] %s54_s21  ;;  %s77_s23 = int_to_ptr.vmem [resolvable:$true] %s76_s23 }
  0x32   :  { %s11004_s7 = scalar_lea.vmem %s55_s21, 65536  ;;  %p11009_p7 = scmp.lt.s32.totalorder %s55_s21, %s55_s21 }
  0x33   :  { %p11005_p6 = scmp.ne.s32.totalorder %s55_s21, %s11004_s7  ;;  %p11010_p8 = scmp.lt.s32.totalorder %s11004_s7, %s11004_s7 }
  0x35   :  { %p11011_p9 = por %p11010_p8, %p11009_p7 }
  0x37   :  { %p11012_p10 = pnand %p11011_p9, %p11005_p6 }
  0x39   :  { %11015 = shalt.err (!%p11012_p10)
}
  0x3a   :  { %60 = dma.hbm_to_vmem [thread:$0]  %s11704_s4, 65536, %s55_s21, [#allocation7], %s11112_s16, %s11112_s16, %s11113_s17  }
  0x3b   :  { %s11024_s26 = scalar_lea.vmem %s77_s23, 8192  ;;  %p11029_p12 = scmp.lt.s32.totalorder %s77_s23, %s77_s23 }
  0x3c   :  { %p11025_p11 = scmp.ne.s32.totalorder %s77_s23, %s11024_s26  ;;  %p11030_p13 = scmp.lt.s32.totalorder %s11024_s26, %s11024_s26 }
  0x3e   :  { %p11031_p0 = por %p11030_p13, %p11029_p12 }
  0x40   :  { %p11032_p1 = pnand %p11031_p0, %p11025_p11 }
  0x42   :  { %11035 = shalt.err (!%p11032_p1)
}
  0x43   :  { %82 = dma.hbm_to_vmem [thread:$0]  %s11706_s6, 8192, %s77_s23, [#allocation10], %s11110_s3, %s11110_s3, %s11111_s13  }
  0x44   :  { %s11116_s28 = smov [#allocation14]  }
  0x45   :  { %s101_s29 = sshll.u32 %s11116_s28, 4  ;;  %s102_s29 = int_to_ptr.vmem [resolvable:$true] %s101_s29 }
  0x46   :  { %s11044_s30 = scalar_lea.vmem %s102_s29, 16  ;;  %s11048_s4 = scalar_lea.vmem %s102_s29, 32 }
  0x47   :  { %p11045_p2 = scmp.ne.s32.totalorder %s102_s29, %s11044_s30  ;;  %p11049_p3 = scmp.lt.s32.totalorder %s102_s29, %s102_s29 }
  0x48   :  { %p11050_p4 = scmp.lt.s32.totalorder %s11048_s4, %s11044_s30 }
  0x4a   :  { %p11051_p5 = por %p11050_p4, %p11049_p3 }
  0x4c   :  { %p11052_p6 = pnand %p11051_p5, %p11045_p2 }
  0x4e   :  { %11055 = shalt.err (!%p11052_p6)
}
  0x4f   :  { %104 = dma.hbm_to_vmem [thread:$0]  %s11708_s8, 16, %s102_s29, [#allocation13]  }
  0x50   :  { %s11117_s5 = smov [#allocation15]   ;;  %s11118_s6 = smov [#allocation16]  }
  0x51   :  { %112 = dma.hbm_to_smem %s11709_s9, 16, %s11117_s5, [#allocation5]  }
  0x52   :  { %120 = dma.hbm_to_smem %s11710_s10, 16, %s11118_s6, [#allocation17]  }
  0x53   :  { %11092 = dma.done.wait [#allocation3], 65536  }
  0x54   :  { %11093 = vsyncadd [#allocation3], 4294901760 }
  0x55   :  { %11094 = dma.done.wait [#allocation7], 65664  }
  0x56   :  { %11095 = vsyncadd [#allocation7], 4294901632 }
  0x57   :  { %11096 = dma.done.wait [#allocation10], 8320  }
  0x58   :  { %11097 = vsyncadd [#allocation10], 4294958976 }
  0x59   :  { %11098 = dma.done.wait [#allocation13], 8208  }
  0x5a   :  { %11099 = vsyncadd [#allocation13], 4294959088 }
  0x5b   :  { %11100 = dma.done.wait [#allocation5], 16  }
  0x5c   :  { %11101 = vsyncadd [#allocation5], 4294967280 }
  0x5d   :  { %11102 = dma.done.wait [#allocation17], 16  }
  0x5e   :  { %11103 = vsyncadd [#allocation17], 4294967280 }
  0x5f   :  { %148 = sfence }
  0x60   :  { %v260_v0 = vld [vmem:[#allocation2 + $0x1c0] sm:$0xff]  ;;  %v11119_v32 = vmov 1983009808   ;;  %v158_v34 = vlaneseq  ;;  %vm7814_vm0 = vcmask 1041408   ;;  %s7952_s22 = sld [smem:[#allocation15]]  ;;  %s11120_s2 = smov [#allocation18]  }
  0x61   :  { %v264_v1 = vld [vmem:[#allocation2 + $0x1e0] sm:$0xff]  ;;  %v156_v33 = vunpack.c.l.s4 %v11119_v32  ;;  %s7962_s23 = sld [smem:[#allocation16]]  ;;  %s9377_s27 = sshll.u32 %s11120_s2, 4  ;;  %s9378_s27 = int_to_ptr.vmem [resolvable:$true] %s9377_s27 }
  0x62   :  { %v388_v2 = vld [vmem:[#allocation2 + $0x5c0] sm:$0xff]  ;;  %v9448_v3 = vcombine.high %v260_v0, %v264_v1  ;;  %v9447_v5 = vcombine.low %v260_v0, %v264_v1  ;;  %v11214_v44 = vshrl.u32 %v158_v34, 7  ;;  %s10415_s25 = sld [smem:[#allocation15 + $0x1]]  ;;  %s11072_s28 = scalar_lea.vmem %s9378_s27, 32 }
  0x63   :  { %v392_v4 = vld [vmem:[#allocation2 + $0x5e0] sm:$0xff]  ;;  %v157_v43 = vunpack.c.0.s8 %v156_v33  ;;  %s10416_s26 = sld [smem:[#allocation16 + $0x1]]  ;;  %p11073_p7 = scmp.ne.s32.totalorder %s9378_s27, %s11072_s28 }
  0x64   :  { %v252_v6 = vld [vmem:[#allocation2 + $0x180] sm:$0xff]  ;;  %v9576_v8 = vcombine.high %v388_v2, %v392_v4  ;;  %v9575_v9 = vcombine.low %v388_v2, %v392_v4  ;;  %3318 = vmatprep.subr.bf16.mxu0 %v9448_v3  ;;  %p11077_p8 = scmp.lt.s32.totalorder %s9378_s27, %s9378_s27  ;;  %p11078_p9 = scmp.lt.s32.totalorder %s11072_s28, %s11072_s28 }
  0x65   :  { %v256_v7 = vld [vmem:[#allocation2 + $0x1a0] sm:$0xff]  ;;  %3319 = vmatpush1.bf16.msra.mxu0 %v9447_v5  ;;  %v11217_v53 = vsub.s32 %v157_v43, %v11214_v44 }
  0x66   :  { %v9440_v10 = vcombine.high %v252_v6, %v256_v7  ;;  %v380_v11 = vld [vmem:[#allocation2 + $0x580] sm:$0xff]  ;;  %3359 = vmatprep.subr.bf16.mxu1 %v9576_v8  ;;  %v9439_v18 = vcombine.low %v252_v6, %v256_v7  ;;  %p11079_p10 = por %p11078_p9, %p11077_p8 }
  0x67   :  { %v384_v12 = vld [vmem:[#allocation2 + $0x5a0] sm:$0xff]  ;;  %3360 = vmatpush1.bf16.msra.mxu1 %v9575_v9 }
  0x68   :  { %v244_v13 = vld [vmem:[#allocation2 + $0x140] sm:$0xff]  ;;  %v9568_v14 = vcombine.high %v380_v11, %v384_v12  ;;  %3320 = vmatprep.subr.bf16.mxu0 %v9440_v10  ;;  %v9567_v19 = vcombine.low %v380_v11, %v384_v12  ;;  %p11080_p11 = pnand %p11079_p10, %p11073_p7 }
  0x69   :  { %v248_v15 = vld [vmem:[#allocation2 + $0x160] sm:$0xff]  ;;  %3321 = vmatpush1.bf16.msra.mxu0 %v9439_v18 }
  0x6a   :  { %v372_v16 = vld [vmem:[#allocation2 + $0x540] sm:$0xff]  ;;  %v9432_v20 = vcombine.high %v244_v13, %v248_v15  ;;  %3361 = vmatprep.subr.bf16.mxu1 %v9568_v14  ;;  %v9431_v26 = vcombine.low %v244_v13, %v248_v15 }
  0x6b   :  { %v376_v17 = vld [vmem:[#allocation2 + $0x560] sm:$0xff]  ;;  %3362 = vmatpush1.bf16.msra.mxu1 %v9567_v19 }
  0x6c   :  { %v9560_v21 = vcombine.high %v372_v16, %v376_v17  ;;  %v236_v22 = vld [vmem:[#allocation2 + $0x100] sm:$0xff]  ;;  %3322 = vmatprep.subr.bf16.mxu0 %v9432_v20  ;;  %v9559_v27 = vcombine.low %v372_v16, %v376_v17 }
  0x6d   :  { %v240_v23 = vld [vmem:[#allocation2 + $0x120] sm:$0xff]  ;;  %3323 = vmatpush1.bf16.msra.mxu0 %v9431_v26 }
  0x6e   :  { %v364_v24 = vld [vmem:[#allocation2 + $0x500] sm:$0xff]  ;;  %v9424_v28 = vcombine.high %v236_v22, %v240_v23  ;;  %3363 = vmatprep.subr.bf16.mxu1 %v9560_v21  ;;  %v9423_v37 = vcombine.low %v236_v22, %v240_v23 }
  0x6f   :  { %v368_v25 = vld [vmem:[#allocation2 + $0x520] sm:$0xff]  ;;  %3364 = vmatpush1.bf16.msra.mxu1 %v9559_v27 }
  0x70   :  { %v9552_v29 = vcombine.high %v364_v24, %v368_v25  ;;  %v228_v30 = vld [vmem:[#allocation2 + $0xc0] sm:$0xff]  ;;  %3324 = vmatprep.subr.bf16.mxu0 %v9424_v28  ;;  %v9551_v38 = vcombine.low %v364_v24, %v368_v25 }
  0x71   :  { %v232_v31 = vld [vmem:[#allocation2 + $0xe0] sm:$0xff]  ;;  %3325 = vmatpush1.bf16.msra.mxu0 %v9423_v37 }
  0x72   :  { %v356_v35 = vld [vmem:[#allocation2 + $0x4c0] sm:$0xff]  ;;  %v9416_v39 = vcombine.high %v228_v30, %v232_v31  ;;  %3365 = vmatprep.subr.bf16.mxu1 %v9552_v29  ;;  %v9415_v47 = vcombine.low %v228_v30, %v232_v31 }
  0x73   :  { %v360_v36 = vld [vmem:[#allocation2 + $0x4e0] sm:$0xff]  ;;  %3366 = vmatpush1.bf16.msra.mxu1 %v9551_v38 }
  0x74   :  { %v9544_v40 = vcombine.high %v356_v35, %v360_v36  ;;  %v220_v41 = vld [vmem:[#allocation2 + $0x80] sm:$0xff]  ;;  %3326 = vmatprep.subr.bf16.mxu0 %v9416_v39  ;;  %v9543_v48 = vcombine.low %v356_v35, %v360_v36 }
  0x75   :  { %v224_v42 = vld [vmem:[#allocation2 + $0xa0] sm:$0xff]  ;;  %3327 = vmatpush1.bf16.msra.mxu0 %v9415_v47 }
  0x76   :  { %v348_v45 = vld [vmem:[#allocation2 + $0x480] sm:$0xff]  ;;  %v9408_v49 = vcombine.high %v220_v41, %v224_v42  ;;  %3367 = vmatprep.subr.bf16.mxu1 %v9544_v40  ;;  %v9407_v56 = vcombine.low %v220_v41, %v224_v42 }
  0x77   :  { %v352_v46 = vld [vmem:[#allocation2 + $0x4a0] sm:$0xff]  ;;  %3368 = vmatpush1.bf16.msra.mxu1 %v9543_v48 }
  0x78   :  { %v9536_v50 = vcombine.high %v348_v45, %v352_v46  ;;  %v212_v51 = vld [vmem:[#allocation2 + $0x40] sm:$0xff]  ;;  %3328 = vmatprep.subr.bf16.mxu0 %v9408_v49  ;;  %v9535_v57 = vcombine.low %v348_v45, %v352_v46 }
  0x79   :  { %v216_v52 = vld [vmem:[#allocation2 + $0x60] sm:$0xff]  ;;  %3329 = vmatpush1.bf16.msra.mxu0 %v9407_v56 }
  0x7a   :  { %v340_v54 = vld [vmem:[#allocation2 + $0x440] sm:$0xff]  ;;  %v9400_v58 = vcombine.high %v212_v51, %v216_v52  ;;  %3369 = vmatprep.subr.bf16.mxu1 %v9536_v50  ;;  %v9399_v3 = vcombine.low %v212_v51, %v216_v52 }
  0x7b   :  { %v344_v55 = vld [vmem:[#allocation2 + $0x460] sm:$0xff]  ;;  %3370 = vmatpush1.bf16.msra.mxu1 %v9535_v57 }
  0x7c   :  { %v150_v59 = vld [vmem:[%s11700_s0] sm:$0xff]  ;;  %v9528_v60 = vcombine.high %v340_v54, %v344_v55  ;;  %3330 = vmatprep.subr.bf16.mxu0 %v9400_v58  ;;  %v9527_v6 = vcombine.low %v340_v54, %v344_v55 }
  0x7d   :  { %v204_v61 = vld [vmem:[#allocation2] sm:$0xff]  ;;  %v11223_v63 = vrot.slane %v150_v59, %v11217_v53  ;;  %v154_v0 = vcombine.high %v150_v59, %v150_v59  ;;  %3331 = vmatpush1.bf16.msra.mxu0 %v9399_v3 }
  0x7e   :  { %v208_v62 = vld [vmem:[#allocation2 + $0x20] sm:$0xff]  ;;  %3371 = vmatprep.subr.bf16.mxu1 %v9528_v60 }
  0x7f   :  { %v332_v1 = vld [vmem:[#allocation2 + $0x400] sm:$0xff]  ;;  %v169_v4 = vcombine.high %v11223_v63, %v11223_v63  ;;  %v11228_v5 = vrot.slane %v154_v0, %v11217_v53  ;;  %v9392_v7 = vcombine.high %v204_v61, %v208_v62  ;;  %v9391_v15 = vcombine.low %v204_v61, %v208_v62  ;;  %3372 = vmatpush1.bf16.msra.mxu1 %v9527_v6 }
  0x80   :  { %v336_v2 = vld [vmem:[#allocation2 + $0x420] sm:$0xff] }
  0x81   :  { %v9520_v8 = vcombine.high %v332_v1, %v336_v2  ;;  %v324_v9 = vld [vmem:[#allocation2 + $0x3c0] sm:$0xff]  ;;  %v11230_v11 = vpack.c.bf16 %v169_v4, %v169_v4  ;;  %v170_v12 = vcombine.high %v11228_v5, %v11228_v5  ;;  %3332 = vmatprep.subr.bf16.mxu0 %v9392_v7  ;;  %v9519_v17 = vcombine.low %v332_v1, %v336_v2  ;;  %v151_v4 = vld [vmem:[%s11700_s0 + $0x8] sm:$0xff] }
  0x82   :  { %v328_v10 = vld [vmem:[#allocation2 + $0x3e0] sm:$0xff]  ;;  %3333 = vmatpush1.bf16.msra.mxu0 %v9391_v15 }
  0x83   :  { %v452_v13 = vld [vmem:[#allocation2 + $0x7c0] sm:$0xff]  ;;  %3350 = vmatprep.mubr.bf16.mxu0 %v11230_v11  ;;  %v11235_v16 = vpack.c.bf16 %v170_v12, %v170_v12  ;;  %v9512_v18 = vcombine.high %v324_v9, %v328_v10  ;;  %3373 = vmatprep.subr.bf16.mxu1 %v9520_v8  ;;  %v9511_v24 = vcombine.low %v324_v9, %v328_v10 }
  0x84   :  { %v456_v14 = vld [vmem:[#allocation2 + $0x7e0] sm:$0xff]  ;;  %3374 = vmatpush1.bf16.msra.mxu1 %v9519_v17 }
  0x85   :  { %v9640_v19 = vcombine.high %v452_v13, %v456_v14  ;;  %v316_v20 = vld [vmem:[#allocation2 + $0x380] sm:$0xff]  ;;  %3391 = vmatprep.mubr.bf16.mxu1 %v11235_v16  ;;  %3334 = vmatprep.subr.bf16.mxu0 %v9512_v18  ;;  %v9639_v25 = vcombine.low %v452_v13, %v456_v14  ;;  %v171_v14 = vcombine.high %v151_v4, %v151_v4 }
  0x86   :  { %v320_v21 = vld [vmem:[#allocation2 + $0x3a0] sm:$0xff]  ;;  %3335 = vmatpush2.bf16.msra.mxu0 %v9511_v24 }
  0x87   :  { %v444_v22 = vld [vmem:[#allocation2 + $0x780] sm:$0xff]  ;;  %v9504_v26 = vcombine.high %v316_v20, %v320_v21  ;;  %3375 = vmatprep.subr.bf16.mxu1 %v9640_v19  ;;  %v9503_v32 = vcombine.low %v316_v20, %v320_v21 }
  0x88   :  { %v448_v23 = vld [vmem:[#allocation2 + $0x7a0] sm:$0xff]  ;;  %3376 = vmatpush2.bf16.msra.mxu1 %v9639_v25  ;;  %v11245_v25 = vrot.slane %v171_v14, %v11217_v53 }
  0x89   :  { %v9632_v27 = vcombine.high %v444_v22, %v448_v23  ;;  %v308_v28 = vld [vmem:[#allocation2 + $0x340] sm:$0xff]  ;;  %3336 = vmatprep.subr.bf16.mxu0 %v9504_v26  ;;  %v9631_v33 = vcombine.low %v444_v22, %v448_v23  ;;  %v11242_v22 = vrot.slane %v151_v4, %v11217_v53 }
  0x8a   :  { %v312_v29 = vld [vmem:[#allocation2 + $0x360] sm:$0xff]  ;;  %3337 = vmatpush2.bf16.msra.mxu0 %v9503_v32 }
  0x8b   :  { %v436_v30 = vld [vmem:[#allocation2 + $0x740] sm:$0xff]  ;;  %v9496_v34 = vcombine.high %v308_v28, %v312_v29  ;;  %3377 = vmatprep.subr.bf16.mxu1 %v9632_v27  ;;  %v9495_v40 = vcombine.low %v308_v28, %v312_v29  ;;  %v186_v32 = vcombine.high %v11242_v22, %v11242_v22 }
  0x8c   :  { %v440_v31 = vld [vmem:[#allocation2 + $0x760] sm:$0xff]  ;;  %3378 = vmatpush2.bf16.msra.mxu1 %v9631_v33  ;;  %v11251_v33 = vpack.c.bf16 %v11223_v63, %v11223_v63 }
  0x8d   :  { %v9624_v35 = vcombine.high %v436_v30, %v440_v31  ;;  %v300_v36 = vld [vmem:[#allocation2 + $0x300] sm:$0xff]  ;;  %3338 = vmatprep.subr.bf16.mxu0 %v9496_v34  ;;  %v9623_v41 = vcombine.low %v436_v30, %v440_v31 }
  0x8e   :  { %v304_v37 = vld [vmem:[#allocation2 + $0x320] sm:$0xff]  ;;  %3339 = vmatpush2.bf16.msra.mxu0 %v9495_v40 }
  0x8f   :  { %v428_v38 = vld [vmem:[#allocation2 + $0x700] sm:$0xff]  ;;  %v9488_v42 = vcombine.high %v300_v36, %v304_v37  ;;  %3379 = vmatprep.subr.bf16.mxu1 %v9624_v35  ;;  %v9487_v49 = vcombine.low %v300_v36, %v304_v37  ;;  %v187_v36 = vcombine.high %v11245_v25, %v11245_v25  ;;  %v11257_v37 = vpack.c.bf16 %v11228_v5, %v11228_v5 }
  0x90   :  { %v432_v39 = vld [vmem:[#allocation2 + $0x720] sm:$0xff]  ;;  %3380 = vmatpush2.bf16.msra.mxu1 %v9623_v41 }
  0x91   :  { %v9616_v43 = vcombine.high %v428_v38, %v432_v39  ;;  %v292_v45 = vld [vmem:[#allocation2 + $0x2c0] sm:$0xff]  ;;  %3340 = vmatprep.subr.bf16.mxu0 %v9488_v42  ;;  %v9615_v50 = vcombine.low %v428_v38, %v432_v39 }
  0x92   :  { %v296_v46 = vld [vmem:[#allocation2 + $0x2e0] sm:$0xff]  ;;  %3341 = vmatpush2.bf16.msra.mxu0 %v9487_v49 }
  0x93   :  { %v420_v47 = vld [vmem:[#allocation2 + $0x6c0] sm:$0xff]  ;;  %v9480_v51 = vcombine.high %v292_v45, %v296_v46  ;;  %3381 = vmatprep.subr.bf16.mxu1 %v9616_v43  ;;  %v9479_v58 = vcombine.low %v292_v45, %v296_v46  ;;  %v11259_v46 = vpack.c.bf16 %v186_v32, %v186_v32 }
  0x94   :  { %v424_v48 = vld [vmem:[#allocation2 + $0x6e0] sm:$0xff]  ;;  %3382 = vmatpush2.bf16.msra.mxu1 %v9615_v50 }
  0x95   :  { %v9608_v52 = vcombine.high %v420_v47, %v424_v48  ;;  %v284_v54 = vld [vmem:[#allocation2 + $0x280] sm:$0xff]  ;;  %3342 = vmatprep.subr.bf16.mxu0 %v9480_v51  ;;  %v9607_v59 = vcombine.low %v420_v47, %v424_v48  ;;  %v11262_v47 = vpack.c.bf16 %v187_v36, %v187_v36 }
  0x96   :  { %v288_v55 = vld [vmem:[#allocation2 + $0x2a0] sm:$0xff]  ;;  %3343 = vmatpush2.bf16.msra.mxu0 %v9479_v58 }
  0x97   :  { %v412_v56 = vld [vmem:[#allocation2 + $0x680] sm:$0xff]  ;;  %v9472_v60 = vcombine.high %v284_v54, %v288_v55  ;;  %3383 = vmatprep.subr.bf16.mxu1 %v9608_v52  ;;  %v9471_v3 = vcombine.low %v284_v54, %v288_v55 }
  0x98   :  { %v416_v57 = vld [vmem:[#allocation2 + $0x6a0] sm:$0xff]  ;;  %3384 = vmatpush2.bf16.msra.mxu1 %v9607_v59 }
  0x99   :  { %v9600_v61 = vcombine.high %v412_v56, %v416_v57  ;;  %v276_v62 = vld [vmem:[#allocation2 + $0x240] sm:$0xff]  ;;  %3344 = vmatprep.subr.bf16.mxu0 %v9472_v60  ;;  %v9599_v6 = vcombine.low %v412_v56, %v416_v57 }
  0x9a   :  { %v280_v0 = vld [vmem:[#allocation2 + $0x260] sm:$0xff]  ;;  %3345 = vmatpush2.bf16.msra.mxu0 %v9471_v3 }
  0x9b   :  { %v404_v1 = vld [vmem:[#allocation2 + $0x640] sm:$0xff]  ;;  %v9464_v7 = vcombine.high %v276_v62, %v280_v0  ;;  %3385 = vmatprep.subr.bf16.mxu1 %v9600_v61  ;;  %v9463_v15 = vcombine.low %v276_v62, %v280_v0 }
  0x9c   :  { %v408_v2 = vld [vmem:[#allocation2 + $0x660] sm:$0xff]  ;;  %3386 = vmatpush2.bf16.msra.mxu1 %v9599_v6 }
  0x9d   :  { %v9592_v8 = vcombine.high %v404_v1, %v408_v2  ;;  %v268_v9 = vld [vmem:[#allocation2 + $0x200] sm:$0xff]  ;;  %3346 = vmatprep.subr.bf16.mxu0 %v9464_v7  ;;  %v9591_v17 = vcombine.low %v404_v1, %v408_v2 }
  0x9e   :  { %v272_v10 = vld [vmem:[#allocation2 + $0x220] sm:$0xff]  ;;  %3347 = vmatpush2.bf16.msra.mxu0 %v9463_v15 }
  0x9f   :  { %v396_v12 = vld [vmem:[#allocation2 + $0x600] sm:$0xff]  ;;  %v9456_v18 = vcombine.high %v268_v9, %v272_v10  ;;  %3387 = vmatprep.subr.bf16.mxu1 %v9592_v8  ;;  %v9455_v26 = vcombine.low %v268_v9, %v272_v10 }
  0xa0   :  { %v400_v13 = vld [vmem:[#allocation2 + $0x620] sm:$0xff]  ;;  %3388 = vmatpush2.bf16.msra.mxu1 %v9591_v17 }
  0xa1   :  { %v9584_v19 = vcombine.high %v396_v12, %v400_v13  ;;  %v516_v20 = vld [vmem:[#allocation2 + $0x9c0] sm:$0xff]  ;;  %3348 = vmatprep.subr.bf16.mxu0 %v9456_v18  ;;  %v9583_v27 = vcombine.low %v396_v12, %v400_v13 }
  0xa2   :  { %v520_v21 = vld [vmem:[#allocation2 + $0x9e0] sm:$0xff]  ;;  %3349 = vmatpush2.bf16.msra.mxu0 %v9455_v26 }
  0xa3   :  { %v644_v23 = vld [vmem:[#allocation2 + $0xdc0] sm:$0xff]  ;;  %v9704_v28 = vcombine.high %v516_v20, %v520_v21  ;;  %3389 = vmatprep.subr.bf16.mxu1 %v9584_v19  ;;  %v9703_v38 = vcombine.low %v516_v20, %v520_v21 }
  0xa4   :  { %v648_v24 = vld [vmem:[#allocation2 + $0xde0] sm:$0xff]  ;;  %3390 = vmatpush2.bf16.msra.mxu1 %v9583_v27 }
  0xa5   :  { %v9832_v29 = vcombine.high %v644_v23, %v648_v24  ;;  %v508_v30 = vld [vmem:[#allocation2 + $0x980] sm:$0xff]  ;;  %3400 = vmatprep.subr.bf16.mxu0 %v9704_v28  ;;  %v9831_v39 = vcombine.low %v644_v23, %v648_v24  ;;  %3351 = vmatmul.mubr.bf16.vlgmr.msra.gmra.mxu0 %v11251_v33 }
  0xa6   :  { %v512_v31 = vld [vmem:[#allocation2 + $0x9a0] sm:$0xff]  ;;  %3401 = vmatpush1.bf16.msra.mxu0 %v9703_v38  ;;  %3432 = vmatprep.mubr.bf16.mxu0 %v11259_v46 }
  0xa7   :  { %v636_v34 = vld [vmem:[#allocation2 + $0xd80] sm:$0xff]  ;;  %v9696_v40 = vcombine.high %v508_v30, %v512_v31  ;;  %3441 = vmatprep.subr.bf16.mxu1 %v9832_v29  ;;  %3392 = vmatmul.mubr.bf16.vlgmr.msra.gmra.mxu1 %v11257_v37  ;;  %v9695_v5 = vcombine.low %v508_v30, %v512_v31 }
  0xa8   :  { %v640_v35 = vld [vmem:[#allocation2 + $0xda0] sm:$0xff]  ;;  %3442 = vmatpush1.bf16.msra.mxu1 %v9831_v39  ;;  %3473 = vmatprep.mubr.bf16.mxu1 %v11262_v47 }
  0xa9   :  { %v500_v41 = vld [vmem:[#allocation2 + $0x940] sm:$0xff]  ;;  %v9824_v63 = vcombine.high %v636_v34, %v640_v35  ;;  %3402 = vmatprep.subr.bf16.mxu0 %v9696_v40  ;;  %v9823_v48 = vcombine.low %v636_v34, %v640_v35 }
  0xaa   :  { %v504_v42 = vld [vmem:[#allocation2 + $0x960] sm:$0xff]  ;;  %3403 = vmatpush1.bf16.msra.mxu0 %v9695_v5 }
  0xab   :  { %v628_v43 = vld [vmem:[#allocation2 + $0xd40] sm:$0xff]  ;;  %v9688_v49 = vcombine.high %v500_v41, %v504_v42  ;;  %3443 = vmatprep.subr.bf16.mxu1 %v9824_v63  ;;  %v9687_v56 = vcombine.low %v500_v41, %v504_v42 }
  0xac   :  { %v632_v45 = vld [vmem:[#allocation2 + $0xd60] sm:$0xff]  ;;  %3444 = vmatpush1.bf16.msra.mxu1 %v9823_v48 }
  0xad   :  { %v492_v50 = vld [vmem:[#allocation2 + $0x900] sm:$0xff]  ;;  %v9816_v54 = vcombine.high %v628_v43, %v632_v45  ;;  %3404 = vmatprep.subr.bf16.mxu0 %v9688_v49  ;;  %v9815_v57 = vcombine.low %v628_v43, %v632_v45 }
  0xae   :  { %v496_v51 = vld [vmem:[#allocation2 + $0x920] sm:$0xff]  ;;  %3405 = vmatpush1.bf16.msra.mxu0 %v9687_v56 }
  0xaf   :  { %v620_v52 = vld [vmem:[#allocation2 + $0xd00] sm:$0xff]  ;;  %v9680_v58 = vcombine.high %v492_v50, %v496_v51  ;;  %3445 = vmatprep.subr.bf16.mxu1 %v9816_v54  ;;  %v9679_v1 = vcombine.low %v492_v50, %v496_v51 }
  0xb0   :  { %v624_v55 = vld [vmem:[#allocation2 + $0xd20] sm:$0xff]  ;;  %3446 = vmatpush1.bf16.msra.mxu1 %v9815_v57 }
  0xb1   :  { %v484_v59 = vld [vmem:[#allocation2 + $0x8c0] sm:$0xff]  ;;  %v9808_v62 = vcombine.high %v620_v52, %v624_v55  ;;  %3406 = vmatprep.subr.bf16.mxu0 %v9680_v58  ;;  %v9807_v2 = vcombine.low %v620_v52, %v624_v55 }
  0xb2   :  { %v488_v60 = vld [vmem:[#allocation2 + $0x8e0] sm:$0xff]  ;;  %3407 = vmatpush1.bf16.msra.mxu0 %v9679_v1 }
  0xb3   :  { %v612_v61 = vld [vmem:[#allocation2 + $0xcc0] sm:$0xff]  ;;  %v9672_v3 = vcombine.high %v484_v59, %v488_v60  ;;  %3447 = vmatprep.subr.bf16.mxu1 %v9808_v62  ;;  %v9671_v10 = vcombine.low %v484_v59, %v488_v60 }
  0xb4   :  { %v616_v0 = vld [vmem:[#allocation2 + $0xce0] sm:$0xff]  ;;  %3448 = vmatpush1.bf16.msra.mxu1 %v9807_v2 }
  0xb5   :  { %v476_v4 = vld [vmem:[#allocation2 + $0x880] sm:$0xff]  ;;  %v9800_v8 = vcombine.high %v612_v61, %v616_v0  ;;  %3408 = vmatprep.subr.bf16.mxu0 %v9672_v3  ;;  %v9799_v12 = vcombine.low %v612_v61, %v616_v0 }
  0xb6   :  { %v480_v6 = vld [vmem:[#allocation2 + $0x8a0] sm:$0xff]  ;;  %3409 = vmatpush1.bf16.msra.mxu0 %v9671_v10 }
  0xb7   :  { %v604_v7 = vld [vmem:[#allocation2 + $0xc80] sm:$0xff]  ;;  %v9664_v13 = vcombine.high %v476_v4, %v480_v6  ;;  %3449 = vmatprep.subr.bf16.mxu1 %v9800_v8  ;;  %v9663_v20 = vcombine.low %v476_v4, %v480_v6 }
  0xb8   :  { %v608_v9 = vld [vmem:[#allocation2 + $0xca0] sm:$0xff]  ;;  %3450 = vmatpush1.bf16.msra.mxu1 %v9799_v12 }
  0xb9   :  { %v468_v14 = vld [vmem:[#allocation2 + $0x840] sm:$0xff]  ;;  %v9792_v18 = vcombine.high %v604_v7, %v608_v9  ;;  %3410 = vmatprep.subr.bf16.mxu0 %v9664_v13  ;;  %v9791_v21 = vcombine.low %v604_v7, %v608_v9 }
  0xba   :  { %v472_v15 = vld [vmem:[#allocation2 + $0x860] sm:$0xff]  ;;  %3411 = vmatpush1.bf16.msra.mxu0 %v9663_v20 }
  0xbb   :  { %v596_v17 = vld [vmem:[#allocation2 + $0xc40] sm:$0xff]  ;;  %v9656_v23 = vcombine.high %v468_v14, %v472_v15  ;;  %3451 = vmatprep.subr.bf16.mxu1 %v9792_v18  ;;  %v9655_v30 = vcombine.low %v468_v14, %v472_v15 }
  0xbc   :  { %v600_v19 = vld [vmem:[#allocation2 + $0xc60] sm:$0xff]  ;;  %3452 = vmatpush1.bf16.msra.mxu1 %v9791_v21 }
  0xbd   :  { %v460_v24 = vld [vmem:[#allocation2 + $0x800] sm:$0xff]  ;;  %v9784_v28 = vcombine.high %v596_v17, %v600_v19  ;;  %3412 = vmatprep.subr.bf16.mxu0 %v9656_v23  ;;  %v9783_v31 = vcombine.low %v596_v17, %v600_v19 }
  0xbe   :  { %v464_v26 = vld [vmem:[#allocation2 + $0x820] sm:$0xff]  ;;  %3413 = vmatpush1.bf16.msra.mxu0 %v9655_v30 }
  0xbf   :  { %v588_v27 = vld [vmem:[#allocation2 + $0xc00] sm:$0xff]  ;;  %v9648_v32 = vcombine.high %v460_v24, %v464_v26  ;;  %3453 = vmatprep.subr.bf16.mxu1 %v9784_v28  ;;  %v9647_v40 = vcombine.low %v460_v24, %v464_v26 }
  0xc0   :  { %v592_v29 = vld [vmem:[#allocation2 + $0xc20] sm:$0xff]  ;;  %3454 = vmatpush1.bf16.msra.mxu1 %v9783_v31 }
  0xc1   :  { %v580_v34 = vld [vmem:[#allocation2 + $0xbc0] sm:$0xff]  ;;  %v9776_v38 = vcombine.high %v588_v27, %v592_v29  ;;  %3414 = vmatprep.subr.bf16.mxu0 %v9648_v32  ;;  %v9775_v41 = vcombine.low %v588_v27, %v592_v29 }
  0xc2   :  { %v584_v35 = vld [vmem:[#allocation2 + $0xbe0] sm:$0xff]  ;;  %3415 = vmatpush1.bf16.msra.mxu0 %v9647_v40 }
  0xc3   :  { %v708_v36 = vld [vmem:[#allocation2 + $0xfc0] sm:$0xff]  ;;  %v9768_v42 = vcombine.high %v580_v34, %v584_v35  ;;  %3455 = vmatprep.subr.bf16.mxu1 %v9776_v38  ;;  %v9767_v49 = vcombine.low %v580_v34, %v584_v35 }
  0xc4   :  { %v712_v39 = vld [vmem:[#allocation2 + $0xfe0] sm:$0xff]  ;;  %3456 = vmatpush1.bf16.msra.mxu1 %v9775_v41 }
  0xc5   :  { %v572_v43 = vld [vmem:[#allocation2 + $0xb80] sm:$0xff]  ;;  %v9896_v5 = vcombine.high %v708_v36, %v712_v39  ;;  %3416 = vmatprep.subr.bf16.mxu0 %v9768_v42  ;;  %v9895_v50 = vcombine.low %v708_v36, %v712_v39 }
  0xc6   :  { %v576_v63 = vld [vmem:[#allocation2 + $0xba0] sm:$0xff]  ;;  %3417 = vmatpush2.bf16.msra.mxu0 %v9767_v49 }
  0xc7   :  { %v700_v45 = vld [vmem:[#allocation2 + $0xf80] sm:$0xff]  ;;  %v9760_v51 = vcombine.high %v572_v43, %v576_v63  ;;  %3457 = vmatprep.subr.bf16.mxu1 %v9896_v5  ;;  %v9759_v58 = vcombine.low %v572_v43, %v576_v63  ;;  %v265_v5 = vld [vmem:[#allocation2 + $0x1e8] sm:$0xff] }
  0xc8   :  { %v704_v48 = vld [vmem:[#allocation2 + $0xfa0] sm:$0xff]  ;;  %3458 = vmatpush2.bf16.msra.mxu1 %v9895_v50  ;;  %v393_v50 = vld [vmem:[#allocation2 + $0x5e8] sm:$0xff] }
  0xc9   :  { %v564_v52 = vld [vmem:[#allocation2 + $0xb40] sm:$0xff]  ;;  %v9888_v56 = vcombine.high %v700_v45, %v704_v48  ;;  %3418 = vmatprep.subr.bf16.mxu0 %v9760_v51  ;;  %v9887_v59 = vcombine.low %v700_v45, %v704_v48  ;;  %v261_v45 = vld [vmem:[#allocation2 + $0x1c8] sm:$0xff] }
  0xca   :  { %v568_v54 = vld [vmem:[#allocation2 + $0xb60] sm:$0xff]  ;;  %3419 = vmatpush2.bf16.msra.mxu0 %v9759_v58  ;;  %v389_v48 = vld [vmem:[#allocation2 + $0x5c8] sm:$0xff] }
  0xcb   :  { %v692_v55 = vld [vmem:[#allocation2 + $0xf40] sm:$0xff]  ;;  %v9752_v60 = vcombine.high %v564_v52, %v568_v54  ;;  %3459 = vmatprep.subr.bf16.mxu1 %v9888_v56  ;;  %v9751_v3 = vcombine.low %v564_v52, %v568_v54  ;;  %v9450_v54 = vcombine.high %v261_v45, %v265_v5  ;;  %v257_v56 = vld [vmem:[#allocation2 + $0x1a8] sm:$0xff]  ;;  %v9578_v58 = vcombine.high %v389_v48, %v393_v50 }
  0xcc   :  { %v696_v57 = vld [vmem:[#allocation2 + $0xf60] sm:$0xff]  ;;  %3460 = vmatpush2.bf16.msra.mxu1 %v9887_v59  ;;  %v385_v59 = vld [vmem:[#allocation2 + $0x5a8] sm:$0xff] }
  0xcd   :  { %v556_v61 = vld [vmem:[#allocation2 + $0xb00] sm:$0xff]  ;;  %v9880_v1 = vcombine.high %v692_v55, %v696_v57  ;;  %3420 = vmatprep.subr.bf16.mxu0 %v9752_v60  ;;  %v9879_v4 = vcombine.low %v692_v55, %v696_v57  ;;  %v253_v55 = vld [vmem:[#allocation2 + $0x188] sm:$0xff]  ;;  %v11269_v60 = vpack.c.bf16 %v11242_v22, %v11242_v22 }
  0xce   :  { %v560_v62 = vld [vmem:[#allocation2 + $0xb20] sm:$0xff]  ;;  %3421 = vmatpush2.bf16.msra.mxu0 %v9751_v3  ;;  %v381_v57 = vld [vmem:[#allocation2 + $0x588] sm:$0xff]  ;;  %v9441_v22 = vcombine.low %v253_v55, %v257_v56 }
  0xcf   :  { %v684_v0 = vld [vmem:[#allocation2 + $0xf00] sm:$0xff]  ;;  %v9744_v6 = vcombine.high %v556_v61, %v560_v62  ;;  %3461 = vmatprep.subr.bf16.mxu1 %v9880_v1  ;;  %v9743_v13 = vcombine.low %v556_v61, %v560_v62  ;;  %v11273_v61 = vpack.c.bf16 %v11245_v25, %v11245_v25  ;;  %v9449_v62 = vcombine.low %v261_v45, %v265_v5  ;;  %v249_v3 = vld [vmem:[#allocation2 + $0x168] sm:$0xff] }
  0xd0   :  { %v688_v2 = vld [vmem:[#allocation2 + $0xf20] sm:$0xff]  ;;  %3462 = vmatpush2.bf16.msra.mxu1 %v9879_v4  ;;  %v9442_v1 = vcombine.high %v253_v55, %v257_v56  ;;  %v9570_v4 = vcombine.high %v381_v57, %v385_v59  ;;  %v9569_v25 = vcombine.low %v381_v57, %v385_v59  ;;  %v325_v57 = vld [vmem:[#allocation2 + $0x3c8] sm:$0xff] }
  0xd1   :  { %v548_v7 = vld [vmem:[#allocation2 + $0xac0] sm:$0xff]  ;;  %v9872_v10 = vcombine.high %v684_v0, %v688_v2  ;;  %3422 = vmatprep.subr.bf16.mxu0 %v9744_v6  ;;  %v9871_v14 = vcombine.low %v684_v0, %v688_v2  ;;  %v9577_v0 = vcombine.low %v389_v48, %v393_v50  ;;  %v245_v2 = vld [vmem:[#allocation2 + $0x148] sm:$0xff] }
  0xd2   :  { %v552_v8 = vld [vmem:[#allocation2 + $0xae0] sm:$0xff]  ;;  %3423 = vmatpush2.bf16.msra.mxu0 %v9743_v13  ;;  %v373_v6 = vld [vmem:[#allocation2 + $0x548] sm:$0xff] }
  0xd3   :  { %v676_v9 = vld [vmem:[#allocation2 + $0xec0] sm:$0xff]  ;;  %v9736_v15 = vcombine.high %v548_v7, %v552_v8  ;;  %3463 = vmatprep.subr.bf16.mxu1 %v9872_v10  ;;  %v9735_v23 = vcombine.low %v548_v7, %v552_v8  ;;  %v377_v7 = vld [vmem:[#allocation2 + $0x568] sm:$0xff]  ;;  %v9434_v8 = vcombine.high %v245_v2, %v249_v3 }
  0xd4   :  { %v680_v12 = vld [vmem:[#allocation2 + $0xee0] sm:$0xff]  ;;  %3464 = vmatpush2.bf16.msra.mxu1 %v9871_v14  ;;  %v241_v10 = vld [vmem:[#allocation2 + $0x128] sm:$0xff]  ;;  %v9562_v13 = vcombine.high %v373_v6, %v377_v7 }
  0xd5   :  { %v540_v17 = vld [vmem:[#allocation2 + $0xa80] sm:$0xff]  ;;  %v9864_v20 = vcombine.high %v676_v9, %v680_v12  ;;  %3424 = vmatprep.subr.bf16.mxu0 %v9736_v15  ;;  %v9863_v24 = vcombine.low %v676_v9, %v680_v12  ;;  %v237_v9 = vld [vmem:[#allocation2 + $0x108] sm:$0xff]  ;;  %v9433_v15 = vcombine.low %v245_v2, %v249_v3 }
  0xd6   :  { %v544_v18 = vld [vmem:[#allocation2 + $0xaa0] sm:$0xff]  ;;  %3425 = vmatpush2.bf16.msra.mxu0 %v9735_v23  ;;  %v365_v12 = vld [vmem:[#allocation2 + $0x508] sm:$0xff] }
  0xd7   :  { %v668_v19 = vld [vmem:[#allocation2 + $0xe80] sm:$0xff]  ;;  %v9728_v26 = vcombine.high %v540_v17, %v544_v18  ;;  %3465 = vmatprep.subr.bf16.mxu1 %v9864_v20  ;;  %v9727_v32 = vcombine.low %v540_v17, %v544_v18  ;;  %v369_v14 = vld [vmem:[#allocation2 + $0x528] sm:$0xff]  ;;  %v9561_v17 = vcombine.low %v373_v6, %v377_v7  ;;  %v9426_v18 = vcombine.high %v237_v9, %v241_v10 }
  0xd8   :  { %v672_v21 = vld [vmem:[#allocation2 + $0xea0] sm:$0xff]  ;;  %3466 = vmatpush2.bf16.msra.mxu1 %v9863_v24  ;;  %v233_v20 = vld [vmem:[#allocation2 + $0xe8] sm:$0xff]  ;;  %v9554_v23 = vcombine.high %v365_v12, %v369_v14 }
  0xd9   :  { %v532_v27 = vld [vmem:[#allocation2 + $0xa40] sm:$0xff]  ;;  %v9856_v30 = vcombine.high %v668_v19, %v672_v21  ;;  %3426 = vmatprep.subr.bf16.mxu0 %v9728_v26  ;;  %v9855_v34 = vcombine.low %v668_v19, %v672_v21  ;;  %v229_v19 = vld [vmem:[#allocation2 + $0xc8] sm:$0xff]  ;;  %v9425_v26 = vcombine.low %v237_v9, %v241_v10 }
  0xda   :  { %v536_v28 = vld [vmem:[#allocation2 + $0xa60] sm:$0xff]  ;;  %3427 = vmatpush2.bf16.msra.mxu0 %v9727_v32  ;;  %v357_v21 = vld [vmem:[#allocation2 + $0x4c8] sm:$0xff] }
  0xdb   :  { %v660_v29 = vld [vmem:[#allocation2 + $0xe40] sm:$0xff]  ;;  %v9720_v35 = vcombine.high %v532_v27, %v536_v28  ;;  %3467 = vmatprep.subr.bf16.mxu1 %v9856_v30  ;;  %v9719_v42 = vcombine.low %v532_v27, %v536_v28  ;;  %v361_v24 = vld [vmem:[#allocation2 + $0x4e8] sm:$0xff]  ;;  %v9553_v27 = vcombine.low %v365_v12, %v369_v14  ;;  %v9418_v28 = vcombine.high %v229_v19, %v233_v20 }
  0xdc   :  { %v664_v31 = vld [vmem:[#allocation2 + $0xe60] sm:$0xff]  ;;  %3468 = vmatpush2.bf16.msra.mxu1 %v9855_v34  ;;  %v225_v30 = vld [vmem:[#allocation2 + $0xa8] sm:$0xff]  ;;  %v9546_v32 = vcombine.high %v357_v21, %v361_v24 }
  0xdd   :  { %v524_v36 = vld [vmem:[#allocation2 + $0xa00] sm:$0xff]  ;;  %v9848_v40 = vcombine.high %v660_v29, %v664_v31  ;;  %3428 = vmatprep.subr.bf16.mxu0 %v9720_v35  ;;  %v9847_v43 = vcombine.low %v660_v29, %v664_v31  ;;  %v221_v29 = vld [vmem:[#allocation2 + $0x88] sm:$0xff]  ;;  %v9417_v35 = vcombine.low %v229_v19, %v233_v20 }
  0xde   :  { %v528_v38 = vld [vmem:[#allocation2 + $0xa20] sm:$0xff]  ;;  %3429 = vmatpush2.bf16.msra.mxu0 %v9719_v42  ;;  %v349_v31 = vld [vmem:[#allocation2 + $0x488] sm:$0xff] }
  0xdf   :  { %v652_v39 = vld [vmem:[#allocation2 + $0xe00] sm:$0xff]  ;;  %v9712_v63 = vcombine.high %v524_v36, %v528_v38  ;;  %3469 = vmatprep.subr.bf16.mxu1 %v9848_v40  ;;  %v9711_v51 = vcombine.low %v524_v36, %v528_v38  ;;  %v353_v34 = vld [vmem:[#allocation2 + $0x4a8] sm:$0xff]  ;;  %v9545_v36 = vcombine.low %v357_v21, %v361_v24  ;;  %v9410_v38 = vcombine.high %v221_v29, %v225_v30 }
  0xe0   :  { %v656_v41 = vld [vmem:[#allocation2 + $0xe20] sm:$0xff]  ;;  %3470 = vmatpush2.bf16.msra.mxu1 %v9847_v43  ;;  %v217_v40 = vld [vmem:[#allocation2 + $0x68] sm:$0xff]  ;;  %v9538_v42 = vcombine.high %v349_v31, %v353_v34  ;;  %v9537_v45 = vcombine.low %v349_v31, %v353_v34 }
  0xe1   :  { %v9840_v49 = vcombine.high %v652_v39, %v656_v41  ;;  %3430 = vmatprep.subr.bf16.mxu0 %v9712_v63  ;;  %v9839_v52 = vcombine.low %v652_v39, %v656_v41  ;;  %v213_v39 = vld [vmem:[#allocation2 + $0x48] sm:$0xff]  ;;  %v9409_v63 = vcombine.low %v221_v29, %v225_v30 }
  0xe2   :  { %3431 = vmatpush2.bf16.msra.mxu0 %v9711_v51  ;;  %v341_v41 = vld [vmem:[#allocation2 + $0x448] sm:$0xff]  ;;  %v9402_v5 = vcombine.high %v213_v39, %v217_v40 }
  0xe3   :  { %3471 = vmatprep.subr.bf16.mxu1 %v9840_v49  ;;  %3482 = vmatprep.subr.bf16.mxu0 %v9450_v54  ;;  %v345_v43 = vld [vmem:[#allocation2 + $0x468] sm:$0xff]  ;;  %v9401_v54 = vcombine.low %v213_v39, %v217_v40 }
  0xe4   :  { %3472 = vmatpush2.bf16.msra.mxu1 %v9839_v52  ;;  %v205_v48 = vld [vmem:[#allocation2 + $0x8] sm:$0xff]  ;;  %v9530_v51 = vcombine.high %v341_v41, %v345_v43  ;;  %v9529_v55 = vcombine.low %v341_v41, %v345_v43 }
  0xe5   :  { %3523 = vmatprep.subr.bf16.mxu1 %v9578_v58  ;;  %3433 = vmatmul.mubr.bf16.vlgmr.msra.gmra.mxu0 %v11269_v60  ;;  %v209_v49 = vld [vmem:[#allocation2 + $0x28] sm:$0xff] }
  0xe6   :  { %3483 = vmatpush1.bf16.msra.mxu0 %v9449_v62  ;;  %3514 = vmatprep.mubr.bf16.mxu0 %v11230_v11  ;;  %v333_v50 = vld [vmem:[#allocation2 + $0x408] sm:$0xff]  ;;  %v9394_v56 = vcombine.high %v205_v48, %v209_v49 }
  0xe7   :  { %3474 = vmatmul.mubr.bf16.vlgmr.msra.gmra.mxu1 %v11273_v61  ;;  %3484 = vmatprep.subr.bf16.mxu0 %v9442_v1  ;;  %v337_v52 = vld [vmem:[#allocation2 + $0x428] sm:$0xff]  ;;  %v9393_v1 = vcombine.low %v205_v48, %v209_v49 }
  0xe8   :  { %3524 = vmatpush1.bf16.msra.mxu1 %v9577_v0  ;;  %3555 = vmatprep.mubr.bf16.mxu1 %v11235_v16  ;;  %v329_v58 = vld [vmem:[#allocation2 + $0x3e8] sm:$0xff]  ;;  %v9522_v62 = vcombine.high %v333_v50, %v337_v52  ;;  %v9521_v2 = vcombine.low %v333_v50, %v337_v52 }
  0xe9   :  { %3525 = vmatprep.subr.bf16.mxu1 %v9570_v4  ;;  %v453_v59 = vld [vmem:[#allocation2 + $0x7c8] sm:$0xff]  ;;  %v9514_v3 = vcombine.high %v325_v57, %v329_v58 }
  0xea   :  { %3485 = vmatpush1.bf16.msra.mxu0 %v9441_v22  ;;  %v457_v0 = vld [vmem:[#allocation2 + $0x7e8] sm:$0xff] }
  0xeb   :  { %3486 = vmatprep.subr.bf16.mxu0 %v9434_v8  ;;  %v317_v4 = vld [vmem:[#allocation2 + $0x388] sm:$0xff]  ;;  %v9642_v22 = vcombine.high %v453_v59, %v457_v0  ;;  %v9513_v8 = vcombine.low %v325_v57, %v329_v58  ;;  %v9641_v9 = vcombine.low %v453_v59, %v457_v0 }
  0xec   :  { %3526 = vmatpush1.bf16.msra.mxu1 %v9569_v25  ;;  %v321_v6 = vld [vmem:[#allocation2 + $0x3a8] sm:$0xff] }
  0xed   :  { %3527 = vmatprep.subr.bf16.mxu1 %v9562_v13  ;;  %v445_v7 = vld [vmem:[#allocation2 + $0x788] sm:$0xff]  ;;  %v9506_v10 = vcombine.high %v317_v4, %v321_v6 }
  0xee   :  { %3487 = vmatpush1.bf16.msra.mxu0 %v9433_v15  ;;  %v449_v25 = vld [vmem:[#allocation2 + $0x7a8] sm:$0xff] }
  0xef   :  { %3488 = vmatprep.subr.bf16.mxu0 %v9426_v18  ;;  %v309_v12 = vld [vmem:[#allocation2 + $0x348] sm:$0xff]  ;;  %v9634_v15 = vcombine.high %v445_v7, %v449_v25  ;;  %v9505_v18 = vcombine.low %v317_v4, %v321_v6  ;;  %v9633_v19 = vcombine.low %v445_v7, %v449_v25 }
  0xf0   :  { %3528 = vmatpush1.bf16.msra.mxu1 %v9561_v17  ;;  %v313_v13 = vld [vmem:[#allocation2 + $0x368] sm:$0xff] }
  0xf1   :  { %3529 = vmatprep.subr.bf16.mxu1 %v9554_v23  ;;  %v437_v14 = vld [vmem:[#allocation2 + $0x748] sm:$0xff]  ;;  %v9498_v20 = vcombine.high %v309_v12, %v313_v13 }
  0xf2   :  { %3489 = vmatpush1.bf16.msra.mxu0 %v9425_v26  ;;  %v441_v17 = vld [vmem:[#allocation2 + $0x768] sm:$0xff] }
  0xf3   :  { %3490 = vmatprep.subr.bf16.mxu0 %v9418_v28  ;;  %v301_v21 = vld [vmem:[#allocation2 + $0x308] sm:$0xff]  ;;  %v9626_v26 = vcombine.high %v437_v14, %v441_v17  ;;  %v9497_v28 = vcombine.low %v309_v12, %v313_v13  ;;  %v9625_v29 = vcombine.low %v437_v14, %v441_v17 }
  0xf4   :  { %3530 = vmatpush1.bf16.msra.mxu1 %v9553_v27  ;;  %v305_v23 = vld [vmem:[#allocation2 + $0x328] sm:$0xff] }
  0xf5   :  { %3531 = vmatprep.subr.bf16.mxu1 %v9546_v32  ;;  %v429_v24 = vld [vmem:[#allocation2 + $0x708] sm:$0xff]  ;;  %v9490_v30 = vcombine.high %v301_v21, %v305_v23 }
  0xf6   :  { %3491 = vmatpush1.bf16.msra.mxu0 %v9417_v35  ;;  %v433_v27 = vld [vmem:[#allocation2 + $0x728] sm:$0xff] }
  0xf7   :  { %3492 = vmatprep.subr.bf16.mxu0 %v9410_v38  ;;  %v293_v31 = vld [vmem:[#allocation2 + $0x2c8] sm:$0xff]  ;;  %v9618_v35 = vcombine.high %v429_v24, %v433_v27  ;;  %v9489_v38 = vcombine.low %v301_v21, %v305_v23  ;;  %v9617_v39 = vcombine.low %v429_v24, %v433_v27 }
  0xf8   :  { %3532 = vmatpush1.bf16.msra.mxu1 %v9545_v36  ;;  %v297_v32 = vld [vmem:[#allocation2 + $0x2e8] sm:$0xff] }
  0xf9   :  { %3533 = vmatprep.subr.bf16.mxu1 %v9538_v42  ;;  %v421_v34 = vld [vmem:[#allocation2 + $0x6c8] sm:$0xff]  ;;  %v9482_v40 = vcombine.high %v293_v31, %v297_v32 }
  0xfa   :  { %3493 = vmatpush1.bf16.msra.mxu0 %v9409_v63  ;;  %v425_v36 = vld [vmem:[#allocation2 + $0x6e8] sm:$0xff] }
  0xfb   :  { %3494 = vmatprep.subr.bf16.mxu0 %v9402_v5  ;;  %v285_v41 = vld [vmem:[#allocation2 + $0x288] sm:$0xff]  ;;  %v9610_v63 = vcombine.high %v421_v34, %v425_v36  ;;  %v9481_v5 = vcombine.low %v293_v31, %v297_v32  ;;  %v9609_v48 = vcombine.low %v421_v34, %v425_v36 }
  0xfc   :  { %3534 = vmatpush1.bf16.msra.mxu1 %v9537_v45  ;;  %v289_v42 = vld [vmem:[#allocation2 + $0x2a8] sm:$0xff] }
  0xfd   :  { %3535 = vmatprep.subr.bf16.mxu1 %v9530_v51  ;;  %v413_v43 = vld [vmem:[#allocation2 + $0x688] sm:$0xff]  ;;  %v9474_v49 = vcombine.high %v285_v41, %v289_v42 }
  0xfe   :  { %3495 = vmatpush1.bf16.msra.mxu0 %v9401_v54  ;;  %v417_v45 = vld [vmem:[#allocation2 + $0x6a8] sm:$0xff] }
  0xff   :  { %3496 = vmatprep.subr.bf16.mxu0 %v9394_v56  ;;  %v277_v50 = vld [vmem:[#allocation2 + $0x248] sm:$0xff]  ;;  %v9602_v54 = vcombine.high %v413_v43, %v417_v45  ;;  %v9473_v56 = vcombine.low %v285_v41, %v289_v42  ;;  %v9601_v57 = vcombine.low %v413_v43, %v417_v45 }
 0x100   :  { %3536 = vmatpush1.bf16.msra.mxu1 %v9529_v55  ;;  %v281_v51 = vld [vmem:[#allocation2 + $0x268] sm:$0xff] }
 0x101   :  { %3537 = vmatprep.subr.bf16.mxu1 %v9522_v62  ;;  %v405_v52 = vld [vmem:[#allocation2 + $0x648] sm:$0xff]  ;;  %v9466_v58 = vcombine.high %v277_v50, %v281_v51 }
 0x102   :  { %3497 = vmatpush1.bf16.msra.mxu0 %v9393_v1  ;;  %v409_v55 = vld [vmem:[#allocation2 + $0x668] sm:$0xff] }
 0x103   :  { %3498 = vmatprep.subr.bf16.mxu0 %v9514_v3  ;;  %v269_v59 = vld [vmem:[#allocation2 + $0x208] sm:$0xff]  ;;  %v9594_v1 = vcombine.high %v405_v52, %v409_v55  ;;  %v9465_v3 = vcombine.low %v277_v50, %v281_v51  ;;  %v9593_v4 = vcombine.low %v405_v52, %v409_v55 }
 0x104   :  { %3538 = vmatpush1.bf16.msra.mxu1 %v9521_v2  ;;  %v273_v62 = vld [vmem:[#allocation2 + $0x228] sm:$0xff] }
 0x105   :  { %3539 = vmatprep.subr.bf16.mxu1 %v9642_v22  ;;  %v397_v0 = vld [vmem:[#allocation2 + $0x608] sm:$0xff]  ;;  %v9458_v6 = vcombine.high %v269_v59, %v273_v62 }
 0x106   :  { %3499 = vmatpush2.bf16.msra.mxu0 %v9513_v8  ;;  %v401_v2 = vld [vmem:[#allocation2 + $0x628] sm:$0xff] }
 0x107   :  { %3500 = vmatprep.subr.bf16.mxu0 %v9506_v10  ;;  %v517_v7 = vld [vmem:[#allocation2 + $0x9c8] sm:$0xff]  ;;  %v9586_v8 = vcombine.high %v397_v0, %v401_v2  ;;  %v9457_v10 = vcombine.low %v269_v59, %v273_v62  ;;  %v9585_v12 = vcombine.low %v397_v0, %v401_v2 }
 0x108   :  { %3540 = vmatpush2.bf16.msra.mxu1 %v9641_v9  ;;  %v521_v22 = vld [vmem:[#allocation2 + $0x9e8] sm:$0xff] }
 0x109   :  { %3541 = vmatprep.subr.bf16.mxu1 %v9634_v15  ;;  %v645_v25 = vld [vmem:[#allocation2 + $0xdc8] sm:$0xff]  ;;  %v9706_v13 = vcombine.high %v517_v7, %v521_v22 }
 0x10a   :  { %3501 = vmatpush2.bf16.msra.mxu0 %v9505_v18  ;;  %v649_v9 = vld [vmem:[#allocation2 + $0xde8] sm:$0xff] }
 0x10b   :  { %3502 = vmatprep.subr.bf16.mxu0 %v9498_v20  ;;  %v509_v14 = vld [vmem:[#allocation2 + $0x988] sm:$0xff]  ;;  %v9834_v18 = vcombine.high %v645_v25, %v649_v9  ;;  %v9705_v20 = vcombine.low %v517_v7, %v521_v22  ;;  %v9833_v21 = vcombine.low %v645_v25, %v649_v9 }
 0x10c   :  { %3542 = vmatpush2.bf16.msra.mxu1 %v9633_v19  ;;  %v513_v15 = vld [vmem:[#allocation2 + $0x9a8] sm:$0xff] }
 0x10d   :  { %3543 = vmatprep.subr.bf16.mxu1 %v9626_v26  ;;  %v637_v17 = vld [vmem:[#allocation2 + $0xd88] sm:$0xff]  ;;  %v9698_v23 = vcombine.high %v509_v14, %v513_v15 }
 0x10e   :  { %3503 = vmatpush2.bf16.msra.mxu0 %v9497_v28  ;;  %v641_v19 = vld [vmem:[#allocation2 + $0xda8] sm:$0xff] }
 0x10f   :  { %3504 = vmatprep.subr.bf16.mxu0 %v9490_v30  ;;  %v9826_v24 = vcombine.high %v637_v17, %v641_v19  ;;  %v501_v26 = vld [vmem:[#allocation2 + $0x948] sm:$0xff]  ;;  %v9697_v30 = vcombine.low %v509_v14, %v513_v15  ;;  %v9825_v31 = vcombine.low %v637_v17, %v641_v19 }
 0x110   :  { %3544 = vmatpush2.bf16.msra.mxu1 %v9625_v29  ;;  %v505_v27 = vld [vmem:[#allocation2 + $0x968] sm:$0xff] }
 0x111   :  { %3545 = vmatprep.subr.bf16.mxu1 %v9618_v35  ;;  %v629_v28 = vld [vmem:[#allocation2 + $0xd48] sm:$0xff]  ;;  %v9690_v32 = vcombine.high %v501_v26, %v505_v27 }
 0x112   :  { %3505 = vmatpush2.bf16.msra.mxu0 %v9489_v38  ;;  %v633_v29 = vld [vmem:[#allocation2 + $0xd68] sm:$0xff] }
 0x113   :  { %3506 = vmatprep.subr.bf16.mxu0 %v9482_v40  ;;  %v9818_v34 = vcombine.high %v629_v28, %v633_v29  ;;  %v493_v35 = vld [vmem:[#allocation2 + $0x908] sm:$0xff]  ;;  %v9689_v40 = vcombine.low %v501_v26, %v505_v27  ;;  %v9817_v41 = vcombine.low %v629_v28, %v633_v29 }
 0x114   :  { %3546 = vmatpush2.bf16.msra.mxu1 %v9617_v39  ;;  %v497_v36 = vld [vmem:[#allocation2 + $0x928] sm:$0xff] }
 0x115   :  { %3547 = vmatprep.subr.bf16.mxu1 %v9610_v63  ;;  %v621_v38 = vld [vmem:[#allocation2 + $0xd08] sm:$0xff]  ;;  %v9682_v42 = vcombine.high %v493_v35, %v497_v36 }
 0x116   :  { %3507 = vmatpush2.bf16.msra.mxu0 %v9481_v5  ;;  %v625_v39 = vld [vmem:[#allocation2 + $0xd28] sm:$0xff] }
 0x117   :  { %3508 = vmatprep.subr.bf16.mxu0 %v9474_v49  ;;  %v9810_v43 = vcombine.high %v621_v38, %v625_v39  ;;  %v485_v63 = vld [vmem:[#allocation2 + $0x8c8] sm:$0xff]  ;;  %v9681_v49 = vcombine.low %v493_v35, %v497_v36  ;;  %v9809_v50 = vcombine.low %v621_v38, %v625_v39 }
 0x118   :  { %3548 = vmatpush2.bf16.msra.mxu1 %v9609_v48  ;;  %v489_v45 = vld [vmem:[#allocation2 + $0x8e8] sm:$0xff] }
 0x119   :  { %3549 = vmatprep.subr.bf16.mxu1 %v9602_v54  ;;  %v613_v5 = vld [vmem:[#allocation2 + $0xcc8] sm:$0xff]  ;;  %v9674_v51 = vcombine.high %v485_v63, %v489_v45 }
 0x11a   :  { %3509 = vmatpush2.bf16.msra.mxu0 %v9473_v56  ;;  %v617_v48 = vld [vmem:[#allocation2 + $0xce8] sm:$0xff] }
 0x11b   :  { %3510 = vmatprep.subr.bf16.mxu0 %v9466_v58  ;;  %v9802_v52 = vcombine.high %v613_v5, %v617_v48  ;;  %v477_v54 = vld [vmem:[#allocation2 + $0x888] sm:$0xff]  ;;  %v9673_v58 = vcombine.low %v485_v63, %v489_v45  ;;  %v9801_v59 = vcombine.low %v613_v5, %v617_v48 }
 0x11c   :  { %3550 = vmatpush2.bf16.msra.mxu1 %v9601_v57  ;;  %v481_v55 = vld [vmem:[#allocation2 + $0x8a8] sm:$0xff] }
 0x11d   :  { %3551 = vmatprep.subr.bf16.mxu1 %v9594_v1  ;;  %v605_v56 = vld [vmem:[#allocation2 + $0xc88] sm:$0xff]  ;;  %v9666_v62 = vcombine.high %v477_v54, %v481_v55 }
 0x11e   :  { %3511 = vmatpush2.bf16.msra.mxu0 %v9465_v3  ;;  %v609_v57 = vld [vmem:[#allocation2 + $0xca8] sm:$0xff] }
 0x11f   :  { %3512 = vmatprep.subr.bf16.mxu0 %v9458_v6  ;;  %v9794_v0 = vcombine.high %v605_v56, %v609_v57  ;;  %v469_v1 = vld [vmem:[#allocation2 + $0x848] sm:$0xff]  ;;  %v9665_v6 = vcombine.low %v477_v54, %v481_v55  ;;  %v9793_v7 = vcombine.low %v605_v56, %v609_v57 }
 0x120   :  { %3552 = vmatpush2.bf16.msra.mxu1 %v9593_v4  ;;  %v473_v2 = vld [vmem:[#allocation2 + $0x868] sm:$0xff] }
 0x121   :  { %3553 = vmatprep.subr.bf16.mxu1 %v9586_v8  ;;  %v597_v3 = vld [vmem:[#allocation2 + $0xc48] sm:$0xff]  ;;  %v9658_v22 = vcombine.high %v469_v1, %v473_v2 }
 0x122   :  { %3513 = vmatpush2.bf16.msra.mxu0 %v9457_v10  ;;  %v601_v4 = vld [vmem:[#allocation2 + $0xc68] sm:$0xff] }
 0x123   :  { %3564 = vmatprep.subr.bf16.mxu0 %v9706_v13  ;;  %v9786_v25 = vcombine.high %v597_v3, %v601_v4  ;;  %v461_v8 = vld [vmem:[#allocation2 + $0x808] sm:$0xff]  ;;  %v9657_v13 = vcombine.low %v469_v1, %v473_v2  ;;  %v9785_v14 = vcombine.low %v597_v3, %v601_v4 }
 0x124   :  { %3554 = vmatpush2.bf16.msra.mxu1 %v9585_v12  ;;  %v465_v9 = vld [vmem:[#allocation2 + $0x828] sm:$0xff] }
 0x125   :  { %3605 = vmatprep.subr.bf16.mxu1 %v9834_v18  ;;  %3515 = vmatmul.mubr.bf16.vlgmr.msra.gmra.mxu0 %v11251_v33  ;;  %v589_v10 = vld [vmem:[#allocation2 + $0xc08] sm:$0xff]  ;;  %v9650_v15 = vcombine.high %v461_v8, %v465_v9 }
 0x126   :  { %3565 = vmatpush1.bf16.msra.mxu0 %v9705_v20  ;;  %3596 = vmatprep.mubr.bf16.mxu0 %v11259_v46  ;;  %v593_v12 = vld [vmem:[#allocation2 + $0xc28] sm:$0xff] }
 0x127   :  { %3556 = vmatmul.mubr.bf16.vlgmr.msra.gmra.mxu1 %v11257_v37  ;;  %3566 = vmatprep.subr.bf16.mxu0 %v9698_v23  ;;  %v9778_v17 = vcombine.high %v589_v10, %v593_v12  ;;  %v581_v18 = vld [vmem:[#allocation2 + $0xbc8] sm:$0xff]  ;;  %v9649_v23 = vcombine.low %v461_v8, %v465_v9 }
 0x128   :  { %3606 = vmatpush1.bf16.msra.mxu1 %v9833_v21  ;;  %3637 = vmatprep.mubr.bf16.mxu1 %v11262_v47  ;;  %v585_v19 = vld [vmem:[#allocation2 + $0xbe8] sm:$0xff] }
 0x129   :  { %3607 = vmatprep.subr.bf16.mxu1 %v9826_v24  ;;  %v709_v20 = vld [vmem:[#allocation2 + $0xfc8] sm:$0xff]  ;;  %v9777_v24 = vcombine.low %v589_v10, %v593_v12  ;;  %v9770_v26 = vcombine.high %v581_v18, %v585_v19 }
 0x12a   :  { %3567 = vmatpush1.bf16.msra.mxu0 %v9697_v30  ;;  %v713_v21 = vld [vmem:[#allocation2 + $0xfe8] sm:$0xff] }
 0x12b   :  { %3568 = vmatprep.subr.bf16.mxu0 %v9690_v32  ;;  %v9898_v27 = vcombine.high %v709_v20, %v713_v21  ;;  %v573_v28 = vld [vmem:[#allocation2 + $0xb88] sm:$0xff]  ;;  %v9769_v32 = vcombine.low %v581_v18, %v585_v19 }
 0x12c   :  { %3608 = vmatpush1.bf16.msra.mxu1 %v9825_v31  ;;  %v577_v29 = vld [vmem:[#allocation2 + $0xba8] sm:$0xff] }
 0x12d   :  { %3609 = vmatprep.subr.bf16.mxu1 %v9818_v34  ;;  %v701_v30 = vld [vmem:[#allocation2 + $0xf88] sm:$0xff]  ;;  %v9897_v34 = vcombine.low %v709_v20, %v713_v21  ;;  %v9762_v35 = vcombine.high %v573_v28, %v577_v29 }
 0x12e   :  { %3569 = vmatpush1.bf16.msra.mxu0 %v9689_v40  ;;  %v705_v31 = vld [vmem:[#allocation2 + $0xfa8] sm:$0xff] }
 0x12f   :  { %3570 = vmatprep.subr.bf16.mxu0 %v9682_v42  ;;  %v9890_v36 = vcombine.high %v701_v30, %v705_v31  ;;  %v565_v38 = vld [vmem:[#allocation2 + $0xb48] sm:$0xff]  ;;  %v9761_v42 = vcombine.low %v573_v28, %v577_v29 }
 0x130   :  { %3610 = vmatpush1.bf16.msra.mxu1 %v9817_v41  ;;  %v569_v39 = vld [vmem:[#allocation2 + $0xb68] sm:$0xff] }
 0x131   :  { %3611 = vmatprep.subr.bf16.mxu1 %v9810_v43  ;;  %v693_v40 = vld [vmem:[#allocation2 + $0xf48] sm:$0xff]  ;;  %v9889_v43 = vcombine.low %v701_v30, %v705_v31  ;;  %v9754_v63 = vcombine.high %v565_v38, %v569_v39  ;;  %v262_v30 = vld [vmem:[#allocation2 + $0x1d0] sm:$0xff] }
 0x132   :  { %3571 = vmatpush1.bf16.msra.mxu0 %v9681_v49  ;;  %v697_v41 = vld [vmem:[#allocation2 + $0xf68] sm:$0xff]  ;;  %v266_v31 = vld [vmem:[#allocation2 + $0x1f0] sm:$0xff] }
 0x133   :  { %3572 = vmatprep.subr.bf16.mxu0 %v9674_v51  ;;  %v9882_v45 = vcombine.high %v693_v40, %v697_v41  ;;  %v557_v5 = vld [vmem:[#allocation2 + $0xb08] sm:$0xff]  ;;  %v9753_v51 = vcombine.low %v565_v38, %v569_v39  ;;  %v11284_v39 = vld [vmem:[#allocation6] sm:$0xff] }
 0x134   :  { %3612 = vmatpush1.bf16.msra.mxu1 %v9809_v50  ;;  %v561_v48 = vld [vmem:[#allocation2 + $0xb28] sm:$0xff] }
 0x135   :  { %3613 = vmatprep.subr.bf16.mxu1 %v9802_v52  ;;  %v685_v49 = vld [vmem:[#allocation2 + $0xf08] sm:$0xff]  ;;  %v9881_v52 = vcombine.low %v693_v40, %v697_v41  ;;  %v9746_v54 = vcombine.high %v557_v5, %v561_v48  ;;  %v9452_v40 = vcombine.high %v262_v30, %v266_v31 }
 0x136   :  { %3573 = vmatpush1.bf16.msra.mxu0 %v9673_v58  ;;  %v689_v50 = vld [vmem:[#allocation2 + $0xf28] sm:$0xff] }
 0x137   :  { %3574 = vmatprep.subr.bf16.mxu0 %v9666_v62  ;;  %v9874_v55 = vcombine.high %v685_v49, %v689_v50  ;;  %v549_v56 = vld [vmem:[#allocation2 + $0xac8] sm:$0xff]  ;;  %v9745_v62 = vcombine.low %v557_v5, %v561_v48  ;;  %v386_v5 = vld [vmem:[#allocation2 + $0x5b0] sm:$0xff] }
 0x138   :  { %3614 = vmatpush1.bf16.msra.mxu1 %v9801_v59  ;;  %v553_v57 = vld [vmem:[#allocation2 + $0xae8] sm:$0xff] }
 0x139   :  { %3615 = vmatprep.subr.bf16.mxu1 %v9794_v0  ;;  %v677_v58 = vld [vmem:[#allocation2 + $0xec8] sm:$0xff]  ;;  %v9873_v0 = vcombine.low %v685_v49, %v689_v50  ;;  %v9738_v1 = vcombine.high %v549_v56, %v553_v57  ;;  %v9451_v49 = vcombine.low %v262_v30, %v266_v31 }
 0x13a   :  { %3575 = vmatpush1.bf16.msra.mxu0 %v9665_v6  ;;  %v681_v59 = vld [vmem:[#allocation2 + $0xee8] sm:$0xff] }
 0x13b   :  { %3576 = vmatprep.subr.bf16.mxu0 %v9658_v22  ;;  %v9866_v2 = vcombine.high %v677_v58, %v681_v59  ;;  %v541_v3 = vld [vmem:[#allocation2 + $0xa88] sm:$0xff]  ;;  %v9737_v22 = vcombine.low %v549_v56, %v553_v57  ;;  %v250_v56 = vld [vmem:[#allocation2 + $0x170] sm:$0xff] }
 0x13c   :  { %3616 = vmatpush1.bf16.msra.mxu1 %v9793_v7  ;;  %v545_v4 = vld [vmem:[#allocation2 + $0xaa8] sm:$0xff] }
 0x13d   :  { %3617 = vmatprep.subr.bf16.mxu1 %v9786_v25  ;;  %v669_v6 = vld [vmem:[#allocation2 + $0xe88] sm:$0xff]  ;;  %v9865_v25 = vcombine.low %v677_v58, %v681_v59  ;;  %v9730_v8 = vcombine.high %v541_v3, %v545_v4  ;;  %v374_v58 = vld [vmem:[#allocation2 + $0x550] sm:$0xff] }
 0x13e   :  { %3577 = vmatpush1.bf16.msra.mxu0 %v9657_v13  ;;  %v673_v7 = vld [vmem:[#allocation2 + $0xea8] sm:$0xff]  ;;  %v378_v59 = vld [vmem:[#allocation2 + $0x570] sm:$0xff] }
 0x13f   :  { %3578 = vmatprep.subr.bf16.mxu0 %v9650_v15  ;;  %v9858_v9 = vcombine.high %v669_v6, %v673_v7  ;;  %v533_v10 = vld [vmem:[#allocation2 + $0xa48] sm:$0xff]  ;;  %v9729_v15 = vcombine.low %v541_v3, %v545_v4 }
 0x140   :  { %3618 = vmatpush1.bf16.msra.mxu1 %v9785_v14  ;;  %v537_v12 = vld [vmem:[#allocation2 + $0xa68] sm:$0xff] }
 0x141   :  { %3619 = vmatprep.subr.bf16.mxu1 %v9778_v17  ;;  %v661_v13 = vld [vmem:[#allocation2 + $0xe48] sm:$0xff]  ;;  %v9857_v17 = vcombine.low %v669_v6, %v673_v7  ;;  %v9722_v18 = vcombine.high %v533_v10, %v537_v12 }
 0x142   :  { %3579 = vmatpush1.bf16.msra.mxu0 %v9649_v23  ;;  %v665_v14 = vld [vmem:[#allocation2 + $0xe68] sm:$0xff] }
 0x143   :  { %3580 = vmatprep.subr.bf16.mxu0 %v9770_v26  ;;  %v9850_v19 = vcombine.high %v661_v13, %v665_v14  ;;  %v525_v20 = vld [vmem:[#allocation2 + $0xa08] sm:$0xff]  ;;  %v9721_v26 = vcombine.low %v533_v10, %v537_v12  ;;  %v366_v12 = vld [vmem:[#allocation2 + $0x510] sm:$0xff] }
 0x144   :  { %3620 = vmatpush1.bf16.msra.mxu1 %v9777_v24  ;;  %v529_v21 = vld [vmem:[#allocation2 + $0xa28] sm:$0xff] }
 0x145   :  { %3621 = vmatprep.subr.bf16.mxu1 %v9898_v27  ;;  %v653_v23 = vld [vmem:[#allocation2 + $0xe08] sm:$0xff]  ;;  %v9849_v27 = vcombine.low %v661_v13, %v665_v14  ;;  %v9714_v28 = vcombine.high %v525_v20, %v529_v21  ;;  %v370_v13 = vld [vmem:[#allocation2 + $0x530] sm:$0xff] }
 0x146   :  { %3581 = vmatpush2.bf16.msra.mxu0 %v9769_v32  ;;  %v657_v24 = vld [vmem:[#allocation2 + $0xe28] sm:$0xff]  ;;  %v390_v32 = vld [vmem:[#allocation2 + $0x5d0] sm:$0xff]  ;;  %v9555_v30 = vcombine.low %v366_v12, %v370_v13 }
 0x147   :  { %3582 = vmatprep.subr.bf16.mxu0 %v9762_v35  ;;  %v9842_v29 = vcombine.high %v653_v23, %v657_v24  ;;  %v9713_v35 = vcombine.low %v525_v20, %v529_v21  ;;  %v9841_v38 = vcombine.low %v653_v23, %v657_v24  ;;  %v9556_v23 = vcombine.high %v366_v12, %v370_v13  ;;  %v230_v24 = vld [vmem:[#allocation2 + $0xd0] sm:$0xff] }
 0x148   :  { %3622 = vmatpush2.bf16.msra.mxu1 %v9897_v34  ;;  %v394_v34 = vld [vmem:[#allocation2 + $0x5f0] sm:$0xff] }
 0x149   :  { %3623 = vmatprep.subr.bf16.mxu1 %v9890_v36  ;;  %v720_v36 = vsub.s32 0, %v11214_v44  ;;  %v9580_v41 = vcombine.high %v390_v32, %v394_v34  ;;  %v9579_v50 = vcombine.low %v390_v32, %v394_v34  ;;  %v222_v34 = vld [vmem:[#allocation2 + $0x90] sm:$0xff] }
 0x14a   :  { %3583 = vmatpush2.bf16.msra.mxu0 %v9761_v42  ;;  %v724_v42 = vsub.s32 1, %v11214_v44  ;;  %v318_v12 = vld [vmem:[#allocation2 + $0x390] sm:$0xff] }
 0x14b   :  { %3584 = vmatprep.subr.bf16.mxu0 %v9754_v63  ;;  %v258_v63 = vld [vmem:[#allocation2 + $0x1b0] sm:$0xff]  ;;  %v721_v48 = vrot.slane %v11284_v39, %v720_v36 }
 0x14c   :  { %3624 = vmatpush2.bf16.msra.mxu1 %v9889_v43  ;;  %v254_v43 = vld [vmem:[#allocation2 + $0x190] sm:$0xff] }
 0x14d   :  { %3625 = vmatprep.subr.bf16.mxu1 %v9882_v45  ;;  %v382_v45 = vld [vmem:[#allocation2 + $0x590] sm:$0xff] }
 0x14e   :  { %3585 = vmatpush2.bf16.msra.mxu0 %v9753_v51  ;;  %v9444_v51 = vcombine.high %v254_v43, %v258_v63  ;;  %v9571_v3 = vcombine.low %v382_v45, %v386_v5  ;;  %v322_v13 = vld [vmem:[#allocation2 + $0x3b0] sm:$0xff] }
 0x14f   :  { %3586 = vmatprep.subr.bf16.mxu0 %v9746_v54  ;;  %v9572_v54 = vcombine.high %v382_v45, %v386_v5  ;;  %v214_v5 = vld [vmem:[#allocation2 + $0x50] sm:$0xff] }
 0x150   :  { %3626 = vmatpush2.bf16.msra.mxu1 %v9881_v52  ;;  %v725_v52 = vrot.slane %v11284_v39, %v724_v42 }
 0x151   :  { %3627 = vmatprep.subr.bf16.mxu1 %v9874_v55  ;;  %v246_v55 = vld [vmem:[#allocation2 + $0x150] sm:$0xff] }
 0x152   :  { %3587 = vmatpush2.bf16.msra.mxu0 %v9745_v62  ;;  %v9436_v4 = vcombine.high %v246_v55, %v250_v56 }
 0x153   :  { %3588 = vmatprep.subr.bf16.mxu0 %v9738_v1  ;;  %v9443_v1 = vcombine.low %v254_v43, %v258_v63 }
 0x154   :  { %3628 = vmatpush2.bf16.msra.mxu1 %v9873_v0 }
 0x155   :  { %3629 = vmatprep.subr.bf16.mxu1 %v9866_v2 }
 0x156   :  { %3589 = vmatpush2.bf16.msra.mxu0 %v9737_v22 }
 0x157   :  { %3590 = vmatprep.subr.bf16.mxu0 %v9730_v8  ;;  %v238_v8 = vld [vmem:[#allocation2 + $0x110] sm:$0xff] }
 0x158   :  { %3630 = vmatpush2.bf16.msra.mxu1 %v9865_v25  ;;  %v9564_v25 = vcombine.high %v374_v58, %v378_v59 }
 0x159   :  { %3631 = vmatprep.subr.bf16.mxu1 %v9858_v9  ;;  %v242_v9 = vld [vmem:[#allocation2 + $0x130] sm:$0xff] }
 0x15a   :  { %3591 = vmatpush2.bf16.msra.mxu0 %v9729_v15  ;;  %v9428_v20 = vcombine.high %v238_v8, %v242_v9 }
 0x15b   :  { %3592 = vmatprep.subr.bf16.mxu0 %v9722_v18 }
 0x15c   :  { %3632 = vmatpush2.bf16.msra.mxu1 %v9857_v17  ;;  %v9435_v17 = vcombine.low %v246_v55, %v250_v56  ;;  %v206_v56 = vld [vmem:[#allocation2 + $0x10] sm:$0xff] }
 0x15d   :  { %3633 = vmatprep.subr.bf16.mxu1 %v9850_v19  ;;  %v9563_v19 = vcombine.low %v374_v58, %v378_v59  ;;  %v334_v58 = vld [vmem:[#allocation2 + $0x410] sm:$0xff] }
 0x15e   :  { %3593 = vmatpush2.bf16.msra.mxu0 %v9721_v26  ;;  %v234_v26 = vld [vmem:[#allocation2 + $0xf0] sm:$0xff] }
 0x15f   :  { %3594 = vmatprep.subr.bf16.mxu0 %v9714_v28  ;;  %v362_v28 = vld [vmem:[#allocation2 + $0x4f0] sm:$0xff]  ;;  %v9420_v31 = vcombine.high %v230_v24, %v234_v26 }
 0x160   :  { %3634 = vmatpush2.bf16.msra.mxu1 %v9849_v27  ;;  %v358_v27 = vld [vmem:[#allocation2 + $0x4d0] sm:$0xff] }
 0x161   :  { %3635 = vmatprep.subr.bf16.mxu1 %v9842_v29  ;;  %v9427_v29 = vcombine.low %v238_v8, %v242_v9  ;;  %v9548_v32 = vcombine.high %v358_v27, %v362_v28  ;;  %v9547_v43 = vcombine.low %v358_v27, %v362_v28  ;;  %v338_v59 = vld [vmem:[#allocation2 + $0x430] sm:$0xff]  ;;  %v9507_v28 = vcombine.low %v318_v12, %v322_v13 }
 0x162   :  { %3595 = vmatpush2.bf16.msra.mxu0 %v9713_v35  ;;  %v226_v35 = vld [vmem:[#allocation2 + $0xb0] sm:$0xff]  ;;  %v9523_v8 = vcombine.low %v334_v58, %v338_v59 }
 0x163   :  { %3646 = vmatprep.subr.bf16.mxu0 %v9452_v40  ;;  %v354_v40 = vld [vmem:[#allocation2 + $0x4b0] sm:$0xff]  ;;  %v9412_v63 = vcombine.high %v222_v34, %v226_v35 }
 0x164   :  { %3636 = vmatpush2.bf16.msra.mxu1 %v9841_v38  ;;  %v350_v38 = vld [vmem:[#allocation2 + $0x490] sm:$0xff] }
 0x165   :  { %3687 = vmatprep.subr.bf16.mxu1 %v9580_v41  ;;  %v3352_v57 = vpop.f32.mrf.mxu0  ;;  %3597 = vmatmul.mubr.bf16.vlgmr.msra.gmra.mxu0 %v11269_v60  ;;  %v9419_v41 = vcombine.low %v230_v24, %v234_v26  ;;  %v9540_v45 = vcombine.high %v350_v38, %v354_v40  ;;  %v314_v24 = vld [vmem:[#allocation2 + $0x370] sm:$0xff] }
 0x166   :  { %v3353_v62 = vadd.f32 %v3352_v57, %v721_v48  ;;  %3647 = vmatpush1.bf16.msra.mxu0 %v9451_v49  ;;  %3678 = vmatprep.mubr.bf16.mxu0 %v11230_v11  ;;  %v218_v48 = vld [vmem:[#allocation2 + $0x70] sm:$0xff] }
 0x167   :  { %v3393_v0 = vpop.f32.mrf.mxu1  ;;  %3638 = vmatmul.mubr.bf16.vlgmr.msra.gmra.mxu1 %v11273_v61  ;;  %v3354_v2 = vpop.f32.mrf.mxu0  ;;  %3648 = vmatprep.subr.bf16.mxu0 %v9444_v51  ;;  %v342_v49 = vld [vmem:[#allocation2 + $0x450] sm:$0xff]  ;;  %v9411_v51 = vcombine.low %v222_v34, %v226_v35 }
 0x168   :  { %3688 = vmatpush1.bf16.msra.mxu1 %v9579_v50  ;;  %v11295_v6 = vadd.f32 %v3393_v0, %v3353_v62  ;;  %v3355_v7 = vadd.f32 %v3354_v2, %v725_v52  ;;  %3719 = vmatprep.mubr.bf16.mxu1 %v11235_v16  ;;  %v346_v50 = vld [vmem:[#allocation2 + $0x470] sm:$0xff]  ;;  %v9539_v52 = vcombine.low %v350_v38, %v354_v40 }
 0x169   :  { %v3395_v22 = vpop.f32.mrf.mxu1  ;;  %3689 = vmatprep.subr.bf16.mxu1 %v9572_v54  ;;  %v3356_v10 = vpop.f32.mrf.mxu0  ;;  %v9404_v54 = vcombine.high %v214_v5, %v218_v48  ;;  %v9532_v55 = vcombine.high %v342_v49, %v346_v50  ;;  %v210_v57 = vld [vmem:[#allocation2 + $0x30] sm:$0xff]  ;;  %v9403_v62 = vcombine.low %v214_v5, %v218_v48  ;;  %v9531_v0 = vcombine.low %v342_v49, %v346_v50 }
 0x16a   :  { %v11299_v14 = vadd.f32 %v3395_v22, %v3355_v7  ;;  %3649 = vmatpush1.bf16.msra.mxu0 %v9443_v1  ;;  %v9396_v1 = vcombine.high %v206_v56, %v210_v57  ;;  %v9524_v2 = vcombine.high %v334_v58, %v338_v59  ;;  %v454_v7 = vld [vmem:[#allocation2 + $0x7d0] sm:$0xff] }
 0x16b   :  { %v3397_v15 = vpop.f32.mrf.mxu1  ;;  %v3357_v18 = vpop.f32.mrf.mxu0  ;;  %3650 = vmatprep.subr.bf16.mxu0 %v9436_v4  ;;  %v330_v4 = vld [vmem:[#allocation2 + $0x3f0] sm:$0xff] }
 0x16c   :  { %3690 = vmatpush1.bf16.msra.mxu1 %v9571_v3  ;;  %v326_v3 = vld [vmem:[#allocation2 + $0x3d0] sm:$0xff] }
 0x16d   :  { %v3398_v21 = vpop.f32.mrf.mxu1  ;;  %3691 = vmatprep.subr.bf16.mxu1 %v9564_v25  ;;  %v458_v22 = vld [vmem:[#allocation2 + $0x7f0] sm:$0xff]  ;;  %v9395_v25 = vcombine.low %v206_v56, %v210_v57  ;;  %v9516_v9 = vcombine.high %v326_v3, %v330_v4  ;;  %v9515_v18 = vcombine.low %v326_v3, %v330_v4 }
 0x16e   :  { %3651 = vmatpush1.bf16.msra.mxu0 %v9435_v17  ;;  %v9644_v10 = vcombine.high %v454_v7, %v458_v22  ;;  %v446_v15 = vld [vmem:[#allocation2 + $0x790] sm:$0xff] }
 0x16f   :  { %3652 = vmatprep.subr.bf16.mxu0 %v9428_v20  ;;  %v450_v17 = vld [vmem:[#allocation2 + $0x7b0] sm:$0xff]  ;;  %v9508_v20 = vcombine.high %v318_v12, %v322_v13 }
 0x170   :  { %3692 = vmatpush1.bf16.msra.mxu1 %v9563_v19  ;;  %v9643_v19 = vcombine.low %v454_v7, %v458_v22  ;;  %v9636_v21 = vcombine.high %v446_v15, %v450_v17  ;;  %v438_v26 = vld [vmem:[#allocation2 + $0x750] sm:$0xff] }
 0x171   :  { %3693 = vmatprep.subr.bf16.mxu1 %v9556_v23  ;;  %v310_v23 = vld [vmem:[#allocation2 + $0x350] sm:$0xff] }
 0x172   :  { %3653 = vmatpush1.bf16.msra.mxu0 %v9427_v29  ;;  %v442_v27 = vld [vmem:[#allocation2 + $0x770] sm:$0xff]  ;;  %v9635_v29 = vcombine.low %v446_v15, %v450_v17  ;;  %v9499_v40 = vcombine.low %v310_v23, %v314_v24 }
 0x173   :  { %3654 = vmatprep.subr.bf16.mxu0 %v9420_v31  ;;  %v9628_v31 = vcombine.high %v438_v26, %v442_v27  ;;  %v306_v34 = vld [vmem:[#allocation2 + $0x330] sm:$0xff] }
 0x174   :  { %3694 = vmatpush1.bf16.msra.mxu1 %v9555_v30  ;;  %v9500_v30 = vcombine.high %v310_v23, %v314_v24  ;;  %v430_v35 = vld [vmem:[#allocation2 + $0x710] sm:$0xff] }
 0x175   :  { %3695 = vmatprep.subr.bf16.mxu1 %v9548_v32  ;;  %v302_v32 = vld [vmem:[#allocation2 + $0x310] sm:$0xff] }
 0x176   :  { %3655 = vmatpush1.bf16.msra.mxu0 %v9419_v41  ;;  %v434_v38 = vld [vmem:[#allocation2 + $0x730] sm:$0xff]  ;;  %v9627_v41 = vcombine.low %v438_v26, %v442_v27  ;;  %v9491_v50 = vcombine.low %v302_v32, %v306_v34 }
 0x177   :  { %3656 = vmatprep.subr.bf16.mxu0 %v9412_v63  ;;  %v9620_v63 = vcombine.high %v430_v35, %v434_v38  ;;  %v298_v5 = vld [vmem:[#allocation2 + $0x2f0] sm:$0xff] }
 0x178   :  { %3696 = vmatpush1.bf16.msra.mxu1 %v9547_v43  ;;  %v9492_v43 = vcombine.high %v302_v32, %v306_v34  ;;  %v422_v48 = vld [vmem:[#allocation2 + $0x6d0] sm:$0xff] }
 0x179   :  { %3697 = vmatprep.subr.bf16.mxu1 %v9540_v45  ;;  %v294_v45 = vld [vmem:[#allocation2 + $0x2d0] sm:$0xff] }
 0x17a   :  { %3657 = vmatpush1.bf16.msra.mxu0 %v9411_v51  ;;  %v426_v49 = vld [vmem:[#allocation2 + $0x6f0] sm:$0xff]  ;;  %v9619_v51 = vcombine.low %v430_v35, %v434_v38  ;;  %v9483_v59 = vcombine.low %v294_v45, %v298_v5 }
 0x17b   :  { %3658 = vmatprep.subr.bf16.mxu0 %v9404_v54  ;;  %v9612_v54 = vcombine.high %v422_v48, %v426_v49  ;;  %v290_v56 = vld [vmem:[#allocation2 + $0x2b0] sm:$0xff] }
 0x17c   :  { %3698 = vmatpush1.bf16.msra.mxu1 %v9539_v52  ;;  %v9484_v52 = vcombine.high %v294_v45, %v298_v5  ;;  %v414_v57 = vld [vmem:[#allocation2 + $0x690] sm:$0xff] }
 0x17d   :  { %3699 = vmatprep.subr.bf16.mxu1 %v9532_v55  ;;  %v286_v55 = vld [vmem:[#allocation2 + $0x290] sm:$0xff] }
 0x17e   :  { %3659 = vmatpush1.bf16.msra.mxu0 %v9403_v62  ;;  %v418_v58 = vld [vmem:[#allocation2 + $0x6b0] sm:$0xff]  ;;  %v9611_v62 = vcombine.low %v422_v48, %v426_v49  ;;  %v9475_v22 = vcombine.low %v286_v55, %v290_v56 }
 0x17f   :  { %3660 = vmatprep.subr.bf16.mxu0 %v9396_v1  ;;  %v9604_v1 = vcombine.high %v414_v57, %v418_v58  ;;  %v282_v3 = vld [vmem:[#allocation2 + $0x270] sm:$0xff] }
 0x180   :  { %3700 = vmatpush1.bf16.msra.mxu1 %v9531_v0  ;;  %v9476_v0 = vcombine.high %v286_v55, %v290_v56  ;;  %v406_v4 = vld [vmem:[#allocation2 + $0x650] sm:$0xff] }
 0x181   :  { %3701 = vmatprep.subr.bf16.mxu1 %v9524_v2  ;;  %v278_v2 = vld [vmem:[#allocation2 + $0x250] sm:$0xff] }
 0x182   :  { %3661 = vmatpush1.bf16.msra.mxu0 %v9395_v25  ;;  %v410_v7 = vld [vmem:[#allocation2 + $0x670] sm:$0xff]  ;;  %v9603_v25 = vcombine.low %v414_v57, %v418_v58  ;;  %v9467_v17 = vcombine.low %v278_v2, %v282_v3 }
 0x183   :  { %3662 = vmatprep.subr.bf16.mxu0 %v9516_v9  ;;  %v9596_v9 = vcombine.high %v406_v4, %v410_v7  ;;  %v274_v12 = vld [vmem:[#allocation2 + $0x230] sm:$0xff] }
 0x184   :  { %3702 = vmatpush1.bf16.msra.mxu1 %v9523_v8  ;;  %v9468_v8 = vcombine.high %v278_v2, %v282_v3  ;;  %v398_v13 = vld [vmem:[#allocation2 + $0x610] sm:$0xff] }
 0x185   :  { %3703 = vmatprep.subr.bf16.mxu1 %v9644_v10  ;;  %v270_v10 = vld [vmem:[#allocation2 + $0x210] sm:$0xff] }
 0x186   :  { %3663 = vmatpush2.bf16.msra.mxu0 %v9515_v18  ;;  %v402_v15 = vld [vmem:[#allocation2 + $0x630] sm:$0xff]  ;;  %v9595_v18 = vcombine.low %v406_v4, %v410_v7  ;;  %v9459_v27 = vcombine.low %v270_v10, %v274_v12 }
 0x187   :  { %3664 = vmatprep.subr.bf16.mxu0 %v9508_v20  ;;  %v9588_v20 = vcombine.high %v398_v13, %v402_v15  ;;  %v522_v23 = vld [vmem:[#allocation2 + $0x9f0] sm:$0xff] }
 0x188   :  { %3704 = vmatpush2.bf16.msra.mxu1 %v9643_v19  ;;  %v9460_v19 = vcombine.high %v270_v10, %v274_v12  ;;  %v646_v24 = vld [vmem:[#allocation2 + $0xdd0] sm:$0xff] }
 0x189   :  { %3705 = vmatprep.subr.bf16.mxu1 %v9636_v21  ;;  %v518_v21 = vld [vmem:[#allocation2 + $0x9d0] sm:$0xff] }
 0x18a   :  { %3665 = vmatpush2.bf16.msra.mxu0 %v9507_v28  ;;  %v650_v26 = vld [vmem:[#allocation2 + $0xdf0] sm:$0xff]  ;;  %v9587_v28 = vcombine.low %v398_v13, %v402_v15  ;;  %v9707_v38 = vcombine.low %v518_v21, %v522_v23 }
 0x18b   :  { %3666 = vmatprep.subr.bf16.mxu0 %v9500_v30  ;;  %v9836_v30 = vcombine.high %v646_v24, %v650_v26  ;;  %v514_v32 = vld [vmem:[#allocation2 + $0x9b0] sm:$0xff] }
 0x18c   :  { %3706 = vmatpush2.bf16.msra.mxu1 %v9635_v29  ;;  %v9708_v29 = vcombine.high %v518_v21, %v522_v23  ;;  %v638_v34 = vld [vmem:[#allocation2 + $0xd90] sm:$0xff] }
 0x18d   :  { %3707 = vmatprep.subr.bf16.mxu1 %v9628_v31  ;;  %v510_v31 = vld [vmem:[#allocation2 + $0x990] sm:$0xff] }
 0x18e   :  { %3667 = vmatpush2.bf16.msra.mxu0 %v9499_v40  ;;  %v642_v35 = vld [vmem:[#allocation2 + $0xdb0] sm:$0xff]  ;;  %v9835_v40 = vcombine.low %v646_v24, %v650_v26 }
 0x18f   :  { %3668 = vmatprep.subr.bf16.mxu0 %v9492_v43  ;;  %v9828_v43 = vcombine.high %v638_v34, %v642_v35  ;;  %v506_v45 = vld [vmem:[#allocation2 + $0x970] sm:$0xff]  ;;  %v9827_v55 = vcombine.low %v638_v34, %v642_v35 }
 0x190   :  { %3708 = vmatpush2.bf16.msra.mxu1 %v9627_v41  ;;  %v9700_v41 = vcombine.high %v510_v31, %v514_v32  ;;  %v630_v48 = vld [vmem:[#allocation2 + $0xd50] sm:$0xff] }
 0x191   :  { %3709 = vmatprep.subr.bf16.mxu1 %v9620_v63  ;;  %v502_v63 = vld [vmem:[#allocation2 + $0x950] sm:$0xff] }
 0x192   :  { %3669 = vmatpush2.bf16.msra.mxu0 %v9491_v50  ;;  %v634_v49 = vld [vmem:[#allocation2 + $0xd70] sm:$0xff]  ;;  %v9692_v56 = vcombine.high %v502_v63, %v506_v45 }
 0x193   :  { %3670 = vmatprep.subr.bf16.mxu0 %v9484_v52  ;;  %v9699_v52 = vcombine.low %v510_v31, %v514_v32  ;;  %v622_v2 = vld [vmem:[#allocation2 + $0xd10] sm:$0xff] }
 0x194   :  { %3710 = vmatpush2.bf16.msra.mxu1 %v9619_v51  ;;  %v626_v3 = vld [vmem:[#allocation2 + $0xd30] sm:$0xff] }
 0x195   :  { %3711 = vmatprep.subr.bf16.mxu1 %v9612_v54  ;;  %v9812_v10 = vcombine.high %v622_v2, %v626_v3  ;;  %v486_v12 = vld [vmem:[#allocation2 + $0x8d0] sm:$0xff] }
 0x196   :  { %3671 = vmatpush2.bf16.msra.mxu0 %v9483_v59  ;;  %v490_v13 = vld [vmem:[#allocation2 + $0x8f0] sm:$0xff] }
 0x197   :  { %3672 = vmatprep.subr.bf16.mxu0 %v9476_v0  ;;  %v494_v0 = vld [vmem:[#allocation2 + $0x910] sm:$0xff] }
 0x198   :  { %3712 = vmatpush2.bf16.msra.mxu1 %v9611_v62  ;;  %v9820_v62 = vcombine.high %v630_v48, %v634_v49  ;;  %v614_v15 = vld [vmem:[#allocation2 + $0xcd0] sm:$0xff] }
 0x199   :  { %3713 = vmatprep.subr.bf16.mxu1 %v9604_v1  ;;  %v498_v1 = vld [vmem:[#allocation2 + $0x930] sm:$0xff] }
 0x19a   :  { %3673 = vmatpush2.bf16.msra.mxu0 %v9475_v22  ;;  %v9691_v22 = vcombine.low %v502_v63, %v506_v45  ;;  %v478_v23 = vld [vmem:[#allocation2 + $0x890] sm:$0xff] }
 0x19b   :  { %3674 = vmatprep.subr.bf16.mxu0 %v9468_v8  ;;  %v9684_v8 = vcombine.high %v494_v0, %v498_v1  ;;  %v482_v24 = vld [vmem:[#allocation2 + $0x8b0] sm:$0xff] }
 0x19c   :  { %3714 = vmatpush2.bf16.msra.mxu1 %v9603_v25  ;;  %v606_v26 = vld [vmem:[#allocation2 + $0xc90] sm:$0xff] }
 0x19d   :  { %3715 = vmatprep.subr.bf16.mxu1 %v9596_v9  ;;  %v470_v32 = vld [vmem:[#allocation2 + $0x850] sm:$0xff] }
 0x19e   :  { %3675 = vmatpush2.bf16.msra.mxu0 %v9467_v17  ;;  %v618_v17 = vld [vmem:[#allocation2 + $0xcf0] sm:$0xff] }
 0x19f   :  { %3676 = vmatprep.subr.bf16.mxu0 %v9460_v19  ;;  %v9811_v19 = vcombine.low %v622_v2, %v626_v3  ;;  %v9804_v21 = vcombine.high %v614_v15, %v618_v17  ;;  %v474_v34 = vld [vmem:[#allocation2 + $0x870] sm:$0xff] }
 0x1a0   :  { %3716 = vmatpush2.bf16.msra.mxu1 %v9595_v18  ;;  %v9683_v18 = vcombine.low %v494_v0, %v498_v1  ;;  %v598_v35 = vld [vmem:[#allocation2 + $0xc50] sm:$0xff] }
 0x1a1   :  { %3717 = vmatprep.subr.bf16.mxu1 %v9588_v20  ;;  %v9676_v20 = vcombine.high %v486_v12, %v490_v13  ;;  %v462_v45 = vld [vmem:[#allocation2 + $0x810] sm:$0xff] }
 0x1a2   :  { %3677 = vmatpush2.bf16.msra.mxu0 %v9459_v27  ;;  %v610_v27 = vld [vmem:[#allocation2 + $0xcb0] sm:$0xff] }
 0x1a3   :  { %3728 = vmatprep.subr.bf16.mxu0 %v9708_v29  ;;  %v9803_v29 = vcombine.low %v614_v15, %v618_v17  ;;  %v9796_v31 = vcombine.high %v606_v26, %v610_v27  ;;  %v574_v2 = vld [vmem:[#allocation2 + $0xb90] sm:$0xff] }
 0x1a4   :  { %3718 = vmatpush2.bf16.msra.mxu1 %v9587_v28  ;;  %v9675_v28 = vcombine.low %v486_v12, %v490_v13  ;;  %v578_v3 = vld [vmem:[#allocation2 + $0xbb0] sm:$0xff] }
 0x1a5   :  { %3769 = vmatprep.subr.bf16.mxu1 %v9836_v30  ;;  %v3434_v5 = vpop.f32.mrf.mxu0  ;;  %3679 = vmatmul.mubr.bf16.vlgmr.msra.gmra.mxu0 %v11251_v33  ;;  %v9668_v30 = vcombine.high %v478_v23, %v482_v24  ;;  %v570_v12 = vld [vmem:[#allocation2 + $0xb70] sm:$0xff]  ;;  %v9763_v17 = vcombine.low %v574_v2, %v578_v3 }
 0x1a6   :  { %v3435_v50 = vadd.f32 %v3434_v5, %v11295_v6  ;;  %3729 = vmatpush1.bf16.msra.mxu0 %v9707_v38  ;;  %3760 = vmatprep.mubr.bf16.mxu0 %v11259_v46  ;;  %v602_v38 = vld [vmem:[#allocation2 + $0xc70] sm:$0xff] }
 0x1a7   :  { %v3475_v51 = vpop.f32.mrf.mxu1  ;;  %3720 = vmatmul.mubr.bf16.vlgmr.msra.gmra.mxu1 %v11257_v37  ;;  %v3436_v54 = vpop.f32.mrf.mxu0  ;;  %3730 = vmatprep.subr.bf16.mxu0 %v9700_v41  ;;  %v9795_v41 = vcombine.low %v606_v26, %v610_v27  ;;  %v9788_v63 = vcombine.high %v598_v35, %v602_v38  ;;  %v466_v5 = vld [vmem:[#allocation2 + $0x830] sm:$0xff] }
 0x1a8   :  { %3770 = vmatpush1.bf16.msra.mxu1 %v9835_v40  ;;  %v11304_v57 = vadd.f32 %v3475_v51, %v3435_v50  ;;  %v3437_v58 = vadd.f32 %v3436_v54, %v11299_v14  ;;  %3801 = vmatprep.mubr.bf16.mxu1 %v11262_v47  ;;  %v9819_v14 = vcombine.low %v630_v48, %v634_v49  ;;  %v590_v48 = vld [vmem:[#allocation2 + $0xc10] sm:$0xff] }
 0x1a9   :  { %v3477_v59 = vpop.f32.mrf.mxu1  ;;  %3771 = vmatprep.subr.bf16.mxu1 %v9828_v43  ;;  %v3438_v6 = vpop.f32.mrf.mxu0  ;;  %v9667_v40 = vcombine.low %v478_v23, %v482_v24  ;;  %v9660_v43 = vcombine.high %v470_v32, %v474_v34  ;;  %v594_v49 = vld [vmem:[#allocation2 + $0xc30] sm:$0xff]  ;;  %v9659_v50 = vcombine.low %v470_v32, %v474_v34  ;;  %v9787_v51 = vcombine.low %v598_v35, %v602_v38 }
 0x1aa   :  { %v11309_v4 = vadd.f32 %v3477_v59, %v3437_v58  ;;  %3731 = vmatpush1.bf16.msra.mxu0 %v9699_v52  ;;  %v9652_v52 = vcombine.high %v462_v45, %v466_v5  ;;  %v9780_v54 = vcombine.high %v590_v48, %v594_v49  ;;  %v710_v58 = vld [vmem:[#allocation2 + $0xfd0] sm:$0xff]  ;;  %v9779_v0 = vcombine.low %v590_v48, %v594_v49 }
 0x1ab   :  { %v3479_v7 = vpop.f32.mrf.mxu1  ;;  %v3439_v25 = vpop.f32.mrf.mxu0  ;;  %3732 = vmatprep.subr.bf16.mxu0 %v9692_v56  ;;  %v586_v56 = vld [vmem:[#allocation2 + $0xbf0] sm:$0xff] }
 0x1ac   :  { %3772 = vmatpush1.bf16.msra.mxu1 %v9827_v55  ;;  %v582_v55 = vld [vmem:[#allocation2 + $0xbd0] sm:$0xff]  ;;  %10877 = vtanh.f32 %v11309_v4 }
 0x1ad   :  { %v3480_v9 = vpop.f32.mrf.mxu1  ;;  %3773 = vmatprep.subr.bf16.mxu1 %v9820_v62  ;;  %v714_v59 = vld [vmem:[#allocation2 + $0xff0] sm:$0xff]  ;;  %v9651_v62 = vcombine.low %v462_v45, %v466_v5  ;;  %v9772_v1 = vcombine.high %v582_v55, %v586_v56  ;;  %v9771_v25 = vcombine.low %v582_v55, %v586_v56  ;;  %10879 = vtanh.f32 %v11304_v57 }
 0x1ae   :  { %3733 = vmatpush1.bf16.msra.mxu0 %v9691_v22  ;;  %v9900_v6 = vcombine.high %v710_v58, %v714_v59  ;;  %v702_v7 = vld [vmem:[#allocation2 + $0xf90] sm:$0xff] }
 0x1af   :  { %3734 = vmatprep.subr.bf16.mxu0 %v9684_v8  ;;  %v706_v22 = vld [vmem:[#allocation2 + $0xfb0] sm:$0xff]  ;;  %v9764_v8 = vcombine.high %v574_v2, %v578_v3 }
 0x1b0   :  { %3774 = vmatpush1.bf16.msra.mxu1 %v9819_v14  ;;  %v9899_v14 = vcombine.low %v710_v58, %v714_v59  ;;  %v9892_v9 = vcombine.high %v702_v7, %v706_v22  ;;  %v694_v13 = vld [vmem:[#allocation2 + $0xf50] sm:$0xff] }
 0x1b1   :  { %3775 = vmatprep.subr.bf16.mxu1 %v9812_v10  ;;  %v566_v10 = vld [vmem:[#allocation2 + $0xb50] sm:$0xff] }
 0x1b2   :  { %3735 = vmatpush1.bf16.msra.mxu0 %v9683_v18  ;;  %v698_v15 = vld [vmem:[#allocation2 + $0xf70] sm:$0xff]  ;;  %v9891_v18 = vcombine.low %v702_v7, %v706_v22  ;;  %v9755_v27 = vcombine.low %v566_v10, %v570_v12 }
 0x1b3   :  { %3736 = vmatprep.subr.bf16.mxu0 %v9676_v20  ;;  %v9884_v20 = vcombine.high %v694_v13, %v698_v15  ;;  %v562_v23 = vld [vmem:[#allocation2 + $0xb30] sm:$0xff] }
 0x1b4   :  { %3776 = vmatpush1.bf16.msra.mxu1 %v9811_v19  ;;  %v9756_v19 = vcombine.high %v566_v10, %v570_v12  ;;  %v686_v24 = vld [vmem:[#allocation2 + $0xf10] sm:$0xff]  ;;  %v267_v10 = vld [vmem:[#allocation2 + $0x1f8] sm:$0xff] }
 0x1b5   :  { %3777 = vmatprep.subr.bf16.mxu1 %v9804_v21  ;;  %v558_v21 = vld [vmem:[#allocation2 + $0xb10] sm:$0xff]  ;;  %v391_v12 = vld [vmem:[#allocation2 + $0x5d8] sm:$0xff] }
 0x1b6   :  { %3737 = vmatpush1.bf16.msra.mxu0 %v9675_v28  ;;  %v690_v26 = vld [vmem:[#allocation2 + $0xf30] sm:$0xff]  ;;  %v9883_v28 = vcombine.low %v694_v13, %v698_v15  ;;  %v9747_v38 = vcombine.low %v558_v21, %v562_v23  ;;  %v395_v13 = vld [vmem:[#allocation2 + $0x5f8] sm:$0xff] }
 0x1b7   :  { %3738 = vmatprep.subr.bf16.mxu0 %v9668_v30  ;;  %v9876_v30 = vcombine.high %v686_v24, %v690_v26  ;;  %v554_v32 = vld [vmem:[#allocation2 + $0xaf0] sm:$0xff] }
 0x1b8   :  { %3778 = vmatpush1.bf16.msra.mxu1 %v9803_v29  ;;  %v9748_v29 = vcombine.high %v558_v21, %v562_v23  ;;  %v678_v34 = vld [vmem:[#allocation2 + $0xed0] sm:$0xff]  ;;  %v732_v21 = vsub.s32 3, %v11214_v44  ;;  %v255_v23 = vld [vmem:[#allocation2 + $0x198] sm:$0xff] }
 0x1b9   :  { %3779 = vmatprep.subr.bf16.mxu1 %v9796_v31  ;;  %v550_v31 = vld [vmem:[#allocation2 + $0xad0] sm:$0xff] }
 0x1ba   :  { %3739 = vmatpush1.bf16.msra.mxu0 %v9667_v40  ;;  %v682_v35 = vld [vmem:[#allocation2 + $0xef0] sm:$0xff]  ;;  %v9875_v40 = vcombine.low %v686_v24, %v690_v26  ;;  %v9739_v49 = vcombine.low %v550_v31, %v554_v32  ;;  %v259_v24 = vld [vmem:[#allocation2 + $0x1b8] sm:$0xff] }
 0x1bb   :  { %3740 = vmatprep.subr.bf16.mxu0 %v9660_v43  ;;  %v9868_v43 = vcombine.high %v678_v34, %v682_v35  ;;  %v546_v45 = vld [vmem:[#allocation2 + $0xab0] sm:$0xff]  ;;  %v383_v26 = vld [vmem:[#allocation2 + $0x598] sm:$0xff] }
 0x1bc   :  { %3780 = vmatpush1.bf16.msra.mxu1 %v9795_v41  ;;  %v9740_v41 = vcombine.high %v550_v31, %v554_v32  ;;  %v670_v5 = vld [vmem:[#allocation2 + $0xe90] sm:$0xff]  ;;  %v9446_v31 = vcombine.high %v255_v23, %v259_v24  ;;  %v733_v32 = vrot.slane %v11284_v39, %v732_v21 }
 0x1bd   :  { %3781 = vmatprep.subr.bf16.mxu1 %v9788_v63  ;;  %v542_v63 = vld [vmem:[#allocation2 + $0xa90] sm:$0xff] }
 0x1be   :  { %3741 = vmatpush1.bf16.msra.mxu0 %v9659_v50  ;;  %v674_v48 = vld [vmem:[#allocation2 + $0xeb0] sm:$0xff]  ;;  %v9867_v50 = vcombine.low %v678_v34, %v682_v35  ;;  %v9731_v59 = vcombine.low %v542_v63, %v546_v45  ;;  %v247_v35 = vld [vmem:[#allocation2 + $0x158] sm:$0xff] }
 0x1bf   :  { %3742 = vmatprep.subr.bf16.mxu0 %v9652_v52  ;;  %v9860_v52 = vcombine.high %v670_v5, %v674_v48  ;;  %v538_v55 = vld [vmem:[#allocation2 + $0xa70] sm:$0xff] }
 0x1c0   :  { %3782 = vmatpush1.bf16.msra.mxu1 %v9787_v51  ;;  %v9732_v51 = vcombine.high %v542_v63, %v546_v45  ;;  %v662_v56 = vld [vmem:[#allocation2 + $0xe50] sm:$0xff] }
 0x1c1   :  { %3783 = vmatprep.subr.bf16.mxu1 %v9780_v54  ;;  %v534_v54 = vld [vmem:[#allocation2 + $0xa50] sm:$0xff] }
 0x1c2   :  { %3743 = vmatpush1.bf16.msra.mxu0 %v9651_v62  ;;  %v666_v58 = vld [vmem:[#allocation2 + $0xe70] sm:$0xff]  ;;  %v9859_v62 = vcombine.low %v670_v5, %v674_v48  ;;  %v9723_v22 = vcombine.low %v534_v54, %v538_v55  ;;  %v9445_v5 = vcombine.low %v255_v23, %v259_v24 }
 0x1c3   :  { %3744 = vmatprep.subr.bf16.mxu0 %v9772_v1  ;;  %v9852_v1 = vcombine.high %v662_v56, %v666_v58  ;;  %v530_v2 = vld [vmem:[#allocation2 + $0xa30] sm:$0xff] }
 0x1c4   :  { %3784 = vmatpush1.bf16.msra.mxu1 %v9779_v0  ;;  %v9724_v0 = vcombine.high %v534_v54, %v538_v55  ;;  %v654_v3 = vld [vmem:[#allocation2 + $0xe10] sm:$0xff]  ;;  %v239_v55 = vld [vmem:[#allocation2 + $0x118] sm:$0xff] }
 0x1c5   :  { %3785 = vmatprep.subr.bf16.mxu1 %v9900_v6  ;;  %v526_v6 = vld [vmem:[#allocation2 + $0xa10] sm:$0xff] }
 0x1c6   :  { %3745 = vmatpush2.bf16.msra.mxu0 %v9771_v25  ;;  %v658_v7 = vld [vmem:[#allocation2 + $0xe30] sm:$0xff]  ;;  %v9851_v25 = vcombine.low %v662_v56, %v666_v58  ;;  %v9715_v15 = vcombine.low %v526_v6, %v530_v2  ;;  %v243_v56 = vld [vmem:[#allocation2 + $0x138] sm:$0xff] }
 0x1c7   :  { %3746 = vmatprep.subr.bf16.mxu0 %v9764_v8  ;;  %v9844_v8 = vcombine.high %v654_v3, %v658_v7  ;;  %v4353_v57 = vld [vmem:[#allocation8 + $0x9e8] sm:$0xff] }
 0x1c8   :  { %3786 = vmatpush2.bf16.msra.mxu1 %v9899_v14  ;;  %v9716_v14 = vcombine.high %v526_v6, %v530_v2 }
 0x1c9   :  { %3787 = vmatprep.subr.bf16.mxu1 %v9892_v9  ;;  %v263_v9 = vld [vmem:[#allocation2 + $0x1d8] sm:$0xff] }
 0x1ca   :  { %3747 = vmatpush2.bf16.msra.mxu0 %v9763_v17  ;;  %v728_v17 = vsub.s32 2, %v11214_v44 }
 0x1cb   :  { %3748 = vmatprep.subr.bf16.mxu0 %v9756_v19  ;;  %v9454_v19 = vcombine.high %v263_v9, %v267_v10 }
 0x1cc   :  { %3788 = vmatpush2.bf16.msra.mxu1 %v9891_v18  ;;  %v9843_v18 = vcombine.low %v654_v3, %v658_v7  ;;  %v9430_v7 = vcombine.high %v239_v55, %v243_v56 }
 0x1cd   :  { %3789 = vmatprep.subr.bf16.mxu1 %v9884_v20  ;;  %v9582_v20 = vcombine.high %v391_v12, %v395_v13 }
 0x1ce   :  { %3749 = vmatpush2.bf16.msra.mxu0 %v9755_v27  ;;  %v387_v27 = vld [vmem:[#allocation2 + $0x5b8] sm:$0xff] }
 0x1cf   :  { %3750 = vmatprep.subr.bf16.mxu0 %v9748_v29  ;;  %v9453_v29 = vcombine.low %v263_v9, %v267_v10  ;;  %v9574_v34 = vcombine.high %v383_v26, %v387_v27  ;;  %v363_v9 = vld [vmem:[#allocation2 + $0x4f8] sm:$0xff]  ;;  %v9429_v10 = vcombine.low %v239_v55, %v243_v56 }
 0x1d0   :  { %3790 = vmatpush2.bf16.msra.mxu1 %v9883_v28  ;;  %v729_v28 = vrot.slane %v11284_v39, %v728_v17 }
 0x1d1   :  { %3791 = vmatprep.subr.bf16.mxu1 %v9876_v30  ;;  %v9581_v30 = vcombine.low %v391_v12, %v395_v13 }
 0x1d2   :  { %3751 = vmatpush2.bf16.msra.mxu0 %v9747_v38  ;;  %v251_v38 = vld [vmem:[#allocation2 + $0x178] sm:$0xff] }
 0x1d3   :  { %3752 = vmatprep.subr.bf16.mxu0 %v9740_v41  ;;  %v375_v41 = vld [vmem:[#allocation2 + $0x558] sm:$0xff]  ;;  %v9437_v6 = vcombine.low %v247_v35, %v251_v38 }
 0x1d4   :  { %3792 = vmatpush2.bf16.msra.mxu1 %v9875_v40 }
 0x1d5   :  { %3793 = vmatprep.subr.bf16.mxu1 %v9868_v43  ;;  %v379_v43 = vld [vmem:[#allocation2 + $0x578] sm:$0xff] }
 0x1d6   :  { %3753 = vmatpush2.bf16.msra.mxu0 %v9739_v49  ;;  %v9573_v49 = vcombine.low %v383_v26, %v387_v27  ;;  %v9566_v54 = vcombine.high %v375_v41, %v379_v43  ;;  %v9565_v3 = vcombine.low %v375_v41, %v379_v43  ;;  %v211_v41 = vld [vmem:[#allocation2 + $0x38] sm:$0xff] }
 0x1d7   :  { %3754 = vmatprep.subr.bf16.mxu0 %v9732_v51  ;;  %v335_v43 = vld [vmem:[#allocation2 + $0x418] sm:$0xff] }
 0x1d8   :  { %3794 = vmatpush2.bf16.msra.mxu1 %v9867_v50  ;;  %v9438_v50 = vcombine.high %v247_v35, %v251_v38 }
 0x1d9   :  { %3795 = vmatprep.subr.bf16.mxu1 %v9860_v52 }
 0x1da   :  { %3755 = vmatpush2.bf16.msra.mxu0 %v9731_v59  ;;  %v367_v59 = vld [vmem:[#allocation2 + $0x518] sm:$0xff] }
 0x1db   :  { %3756 = vmatprep.subr.bf16.mxu0 %v9724_v0 }
 0x1dc   :  { %3796 = vmatpush2.bf16.msra.mxu1 %v9859_v62  ;;  %v371_v62 = vld [vmem:[#allocation2 + $0x538] sm:$0xff] }
 0x1dd   :  { %3797 = vmatprep.subr.bf16.mxu1 %v9852_v1 }
 0x1de   :  { %3757 = vmatpush2.bf16.msra.mxu0 %v9723_v22 }
 0x1df   :  { %3758 = vmatprep.subr.bf16.mxu0 %v9716_v14  ;;  %v231_v14 = vld [vmem:[#allocation2 + $0xd8] sm:$0xff] }
 0x1e0   :  { %3798 = vmatpush2.bf16.msra.mxu1 %v9851_v25  ;;  %v9558_v25 = vcombine.high %v367_v59, %v371_v62 }
 0x1e1   :  { %3799 = vmatprep.subr.bf16.mxu1 %v9844_v8  ;;  %v359_v8 = vld [vmem:[#allocation2 + $0x4d8] sm:$0xff] }
 0x1e2   :  { %3759 = vmatpush2.bf16.msra.mxu0 %v9715_v15  ;;  %v9550_v13 = vcombine.high %v359_v8, %v363_v9  ;;  %v223_v15 = vld [vmem:[#allocation2 + $0x98] sm:$0xff]  ;;  %v9549_v24 = vcombine.low %v359_v8, %v363_v9 }
 0x1e3   :  { %3810 = vmatprep.subr.bf16.mxu0 %v9454_v19  ;;  %v351_v19 = vld [vmem:[#allocation2 + $0x498] sm:$0xff] }
 0x1e4   :  { %3800 = vmatpush2.bf16.msra.mxu1 %v9843_v18  ;;  %v227_v18 = vld [vmem:[#allocation2 + $0xb8] sm:$0xff] }
 0x1e5   :  { %3851 = vmatprep.subr.bf16.mxu1 %v9582_v20  ;;  %v3516_v40 = vpop.f32.mrf.mxu0  ;;  %3761 = vmatmul.mubr.bf16.vlgmr.msra.gmra.mxu0 %v11269_v60  ;;  %v355_v20 = vld [vmem:[#allocation2 + $0x4b8] sm:$0xff]  ;;  %v9414_v26 = vcombine.high %v223_v15, %v227_v18 }
 0x1e6   :  { %v3517_v63 = vadd.f32 %v3516_v40, %v729_v28  ;;  %3811 = vmatpush1.bf16.msra.mxu0 %v9453_v29  ;;  %3842 = vmatprep.mubr.bf16.mxu0 %v11230_v11  ;;  %v235_v11 = vld [vmem:[#allocation2 + $0xf8] sm:$0xff]  ;;  %v9542_v27 = vcombine.high %v351_v19, %v355_v20 }
 0x1e7   :  { %v3557_v45 = vpop.f32.mrf.mxu1  ;;  %3802 = vmatmul.mubr.bf16.vlgmr.msra.gmra.mxu1 %v11273_v61  ;;  %v3518_v48 = vpop.f32.mrf.mxu0  ;;  %3812 = vmatprep.subr.bf16.mxu0 %v9446_v31  ;;  %v9422_v12 = vcombine.high %v231_v14, %v235_v11  ;;  %v9421_v23 = vcombine.low %v231_v14, %v235_v11  ;;  %v215_v28 = vld [vmem:[#allocation2 + $0x58] sm:$0xff] }
 0x1e8   :  { %3852 = vmatpush1.bf16.msra.mxu1 %v9581_v30  ;;  %v11321_v39 = vadd.f32 %v3557_v45, %v3517_v63  ;;  %v3519_v51 = vadd.f32 %v3518_v48, %v733_v32  ;;  %3883 = vmatprep.mubr.bf16.mxu1 %v11235_v16  ;;  %v9557_v16 = vcombine.low %v367_v59, %v371_v62  ;;  %v219_v29 = vld [vmem:[#allocation2 + $0x78] sm:$0xff] }
 0x1e9   :  { %v3559_v52 = vpop.f32.mrf.mxu1  ;;  %3853 = vmatprep.subr.bf16.mxu1 %v9574_v34  ;;  %v3520_v58 = vpop.f32.mrf.mxu0  ;;  %v343_v30 = vld [vmem:[#allocation2 + $0x458] sm:$0xff]  ;;  %v9413_v32 = vcombine.low %v223_v15, %v227_v18  ;;  %v9541_v34 = vcombine.low %v351_v19, %v355_v20  ;;  %v9406_v35 = vcombine.high %v215_v28, %v219_v29  ;;  %v9405_v45 = vcombine.low %v215_v28, %v219_v29 }
 0x1ea   :  { %v11325_v0 = vadd.f32 %v3559_v52, %v3519_v51  ;;  %3813 = vmatpush1.bf16.msra.mxu0 %v9445_v5  ;;  %v347_v31 = vld [vmem:[#allocation2 + $0x478] sm:$0xff] }
 0x1eb   :  { %v3561_v1 = vpop.f32.mrf.mxu1  ;;  %v3521_v2 = vpop.f32.mrf.mxu0  ;;  %3814 = vmatprep.subr.bf16.mxu0 %v9438_v50  ;;  %v9534_v38 = vcombine.high %v343_v30, %v347_v31  ;;  %v207_v40 = vld [vmem:[#allocation2 + $0x18] sm:$0xff]  ;;  %v9533_v5 = vcombine.low %v343_v30, %v347_v31 }
 0x1ec   :  { %3854 = vmatpush1.bf16.msra.mxu1 %v9573_v49  ;;  %v339_v63 = vld [vmem:[#allocation2 + $0x438] sm:$0xff]  ;;  %v9398_v48 = vcombine.high %v207_v40, %v211_v41  ;;  %v9397_v55 = vcombine.low %v207_v40, %v211_v41 }
 0x1ed   :  { %v3562_v22 = vpop.f32.mrf.mxu1  ;;  %3855 = vmatprep.subr.bf16.mxu1 %v9566_v54  ;;  %v9526_v49 = vcombine.high %v335_v43, %v339_v63  ;;  %v327_v50 = vld [vmem:[#allocation2 + $0x3d8] sm:$0xff]  ;;  %v9525_v56 = vcombine.low %v335_v43, %v339_v63 }
 0x1ee   :  { %3815 = vmatpush1.bf16.msra.mxu0 %v9437_v6  ;;  %v331_v51 = vld [vmem:[#allocation2 + $0x3f8] sm:$0xff] }
 0x1ef   :  { %3816 = vmatprep.subr.bf16.mxu0 %v9430_v7  ;;  %v455_v52 = vld [vmem:[#allocation2 + $0x7d8] sm:$0xff]  ;;  %v9518_v58 = vcombine.high %v327_v50, %v331_v51 }
 0x1f0   :  { %3856 = vmatpush1.bf16.msra.mxu1 %v9565_v3  ;;  %v459_v54 = vld [vmem:[#allocation2 + $0x7f8] sm:$0xff]  ;;  %v9517_v3 = vcombine.low %v327_v50, %v331_v51 }
 0x1f1   :  { %3857 = vmatprep.subr.bf16.mxu1 %v9558_v25  ;;  %v9646_v59 = vcombine.high %v455_v52, %v459_v54  ;;  %v319_v62 = vld [vmem:[#allocation2 + $0x398] sm:$0xff]  ;;  %v9645_v7 = vcombine.low %v455_v52, %v459_v54 }
 0x1f2   :  { %3817 = vmatpush1.bf16.msra.mxu0 %v9429_v10  ;;  %v323_v1 = vld [vmem:[#allocation2 + $0x3b8] sm:$0xff] }
 0x1f3   :  { %3818 = vmatprep.subr.bf16.mxu0 %v9422_v12  ;;  %v447_v6 = vld [vmem:[#allocation2 + $0x798] sm:$0xff]  ;;  %v9510_v22 = vcombine.high %v319_v62, %v323_v1  ;;  %v9509_v10 = vcombine.low %v319_v62, %v323_v1 }
 0x1f4   :  { %3858 = vmatpush1.bf16.msra.mxu1 %v9557_v16  ;;  %v451_v2 = vld [vmem:[#allocation2 + $0x7b8] sm:$0xff] }
 0x1f5   :  { %3859 = vmatprep.subr.bf16.mxu1 %v9550_v13  ;;  %v9638_v25 = vcombine.high %v447_v6, %v451_v2  ;;  %v311_v14 = vld [vmem:[#allocation2 + $0x358] sm:$0xff]  ;;  %v9637_v16 = vcombine.low %v447_v6, %v451_v2 }
 0x1f6   :  { %3819 = vmatpush1.bf16.msra.mxu0 %v9421_v23  ;;  %v315_v11 = vld [vmem:[#allocation2 + $0x378] sm:$0xff] }
 0x1f7   :  { %3820 = vmatprep.subr.bf16.mxu0 %v9414_v26  ;;  %v439_v8 = vld [vmem:[#allocation2 + $0x758] sm:$0xff]  ;;  %v9502_v12 = vcombine.high %v311_v14, %v315_v11  ;;  %v9501_v23 = vcombine.low %v311_v14, %v315_v11 }
 0x1f8   :  { %3860 = vmatpush1.bf16.msra.mxu1 %v9549_v24  ;;  %v443_v9 = vld [vmem:[#allocation2 + $0x778] sm:$0xff] }
 0x1f9   :  { %3861 = vmatprep.subr.bf16.mxu1 %v9542_v27  ;;  %v9630_v13 = vcombine.high %v439_v8, %v443_v9  ;;  %v303_v15 = vld [vmem:[#allocation2 + $0x318] sm:$0xff]  ;;  %v9629_v24 = vcombine.low %v439_v8, %v443_v9 }
 0x1fa   :  { %3821 = vmatpush1.bf16.msra.mxu0 %v9413_v32  ;;  %v307_v18 = vld [vmem:[#allocation2 + $0x338] sm:$0xff] }
 0x1fb   :  { %3822 = vmatprep.subr.bf16.mxu0 %v9406_v35  ;;  %v431_v19 = vld [vmem:[#allocation2 + $0x718] sm:$0xff]  ;;  %v9494_v26 = vcombine.high %v303_v15, %v307_v18  ;;  %v9493_v32 = vcombine.low %v303_v15, %v307_v18 }
 0x1fc   :  { %3862 = vmatpush1.bf16.msra.mxu1 %v9541_v34  ;;  %v435_v20 = vld [vmem:[#allocation2 + $0x738] sm:$0xff] }
 0x1fd   :  { %3863 = vmatprep.subr.bf16.mxu1 %v9534_v38  ;;  %v9622_v27 = vcombine.high %v431_v19, %v435_v20  ;;  %v295_v28 = vld [vmem:[#allocation2 + $0x2d8] sm:$0xff]  ;;  %v9621_v34 = vcombine.low %v431_v19, %v435_v20 }
 0x1fe   :  { %3823 = vmatpush1.bf16.msra.mxu0 %v9405_v45  ;;  %v299_v29 = vld [vmem:[#allocation2 + $0x2f8] sm:$0xff] }
 0x1ff   :  { %3824 = vmatprep.subr.bf16.mxu0 %v9398_v48  ;;  %v423_v30 = vld [vmem:[#allocation2 + $0x6d8] sm:$0xff]  ;;  %v9486_v35 = vcombine.high %v295_v28, %v299_v29  ;;  %v9485_v45 = vcombine.low %v295_v28, %v299_v29 }
 0x200   :  { %3864 = vmatpush1.bf16.msra.mxu1 %v9533_v5  ;;  %v427_v31 = vld [vmem:[#allocation2 + $0x6f8] sm:$0xff] }
 0x201   :  { %3865 = vmatprep.subr.bf16.mxu1 %v9526_v49  ;;  %v9614_v38 = vcombine.high %v423_v30, %v427_v31  ;;  %v287_v40 = vld [vmem:[#allocation2 + $0x298] sm:$0xff]  ;;  %v9613_v5 = vcombine.low %v423_v30, %v427_v31 }
 0x202   :  { %3825 = vmatpush1.bf16.msra.mxu0 %v9397_v55  ;;  %v291_v41 = vld [vmem:[#allocation2 + $0x2b8] sm:$0xff] }
 0x203   :  { %3826 = vmatprep.subr.bf16.mxu0 %v9518_v58  ;;  %v415_v43 = vld [vmem:[#allocation2 + $0x698] sm:$0xff]  ;;  %v9478_v48 = vcombine.high %v287_v40, %v291_v41  ;;  %v9477_v55 = vcombine.low %v287_v40, %v291_v41 }
 0x204   :  { %3866 = vmatpush1.bf16.msra.mxu1 %v9525_v56  ;;  %v419_v63 = vld [vmem:[#allocation2 + $0x6b8] sm:$0xff] }
 0x205   :  { %3867 = vmatprep.subr.bf16.mxu1 %v9646_v59  ;;  %v9606_v49 = vcombine.high %v415_v43, %v419_v63  ;;  %v279_v50 = vld [vmem:[#allocation2 + $0x258] sm:$0xff]  ;;  %v9605_v56 = vcombine.low %v415_v43, %v419_v63 }
 0x206   :  { %3827 = vmatpush2.bf16.msra.mxu0 %v9517_v3  ;;  %v283_v51 = vld [vmem:[#allocation2 + $0x278] sm:$0xff] }
 0x207   :  { %3828 = vmatprep.subr.bf16.mxu0 %v9510_v22  ;;  %v407_v52 = vld [vmem:[#allocation2 + $0x658] sm:$0xff]  ;;  %v9470_v58 = vcombine.high %v279_v50, %v283_v51  ;;  %v9469_v3 = vcombine.low %v279_v50, %v283_v51 }
 0x208   :  { %3868 = vmatpush2.bf16.msra.mxu1 %v9645_v7  ;;  %v411_v54 = vld [vmem:[#allocation2 + $0x678] sm:$0xff] }
 0x209   :  { %3869 = vmatprep.subr.bf16.mxu1 %v9638_v25  ;;  %v9598_v59 = vcombine.high %v407_v52, %v411_v54  ;;  %v271_v62 = vld [vmem:[#allocation2 + $0x218] sm:$0xff]  ;;  %v9597_v7 = vcombine.low %v407_v52, %v411_v54 }
 0x20a   :  { %3829 = vmatpush2.bf16.msra.mxu0 %v9509_v10  ;;  %v275_v1 = vld [vmem:[#allocation2 + $0x238] sm:$0xff] }
 0x20b   :  { %3830 = vmatprep.subr.bf16.mxu0 %v9502_v12  ;;  %v399_v6 = vld [vmem:[#allocation2 + $0x618] sm:$0xff]  ;;  %v9462_v22 = vcombine.high %v271_v62, %v275_v1  ;;  %v9461_v10 = vcombine.low %v271_v62, %v275_v1 }
 0x20c   :  { %3870 = vmatpush2.bf16.msra.mxu1 %v9637_v16  ;;  %v403_v2 = vld [vmem:[#allocation2 + $0x638] sm:$0xff] }
 0x20d   :  { %3871 = vmatprep.subr.bf16.mxu1 %v9630_v13  ;;  %v9590_v25 = vcombine.high %v399_v6, %v403_v2  ;;  %v519_v14 = vld [vmem:[#allocation2 + $0x9d8] sm:$0xff]  ;;  %v9589_v16 = vcombine.low %v399_v6, %v403_v2 }
 0x20e   :  { %3831 = vmatpush2.bf16.msra.mxu0 %v9501_v23  ;;  %v523_v11 = vld [vmem:[#allocation2 + $0x9f8] sm:$0xff] }
 0x20f   :  { %3832 = vmatprep.subr.bf16.mxu0 %v9494_v26  ;;  %v647_v8 = vld [vmem:[#allocation2 + $0xdd8] sm:$0xff]  ;;  %v9710_v12 = vcombine.high %v519_v14, %v523_v11  ;;  %v9709_v23 = vcombine.low %v519_v14, %v523_v11 }
 0x210   :  { %3872 = vmatpush2.bf16.msra.mxu1 %v9629_v24  ;;  %v651_v9 = vld [vmem:[#allocation2 + $0xdf8] sm:$0xff] }
 0x211   :  { %3873 = vmatprep.subr.bf16.mxu1 %v9622_v27  ;;  %v9838_v13 = vcombine.high %v647_v8, %v651_v9  ;;  %v511_v15 = vld [vmem:[#allocation2 + $0x998] sm:$0xff]  ;;  %v9837_v24 = vcombine.low %v647_v8, %v651_v9 }
 0x212   :  { %3833 = vmatpush2.bf16.msra.mxu0 %v9493_v32  ;;  %v515_v18 = vld [vmem:[#allocation2 + $0x9b8] sm:$0xff] }
 0x213   :  { %3834 = vmatprep.subr.bf16.mxu0 %v9486_v35  ;;  %v639_v19 = vld [vmem:[#allocation2 + $0xd98] sm:$0xff]  ;;  %v9702_v26 = vcombine.high %v511_v15, %v515_v18 }
 0x214   :  { %3874 = vmatpush2.bf16.msra.mxu1 %v9621_v34  ;;  %v643_v20 = vld [vmem:[#allocation2 + $0xdb8] sm:$0xff] }
 0x215   :  { %3875 = vmatprep.subr.bf16.mxu1 %v9614_v38  ;;  %v9830_v27 = vcombine.high %v639_v19, %v643_v20  ;;  %v503_v28 = vld [vmem:[#allocation2 + $0x958] sm:$0xff]  ;;  %v9701_v38 = vcombine.low %v511_v15, %v515_v18  ;;  %v9829_v41 = vcombine.low %v639_v19, %v643_v20 }
 0x216   :  { %3835 = vmatpush2.bf16.msra.mxu0 %v9485_v45  ;;  %v507_v29 = vld [vmem:[#allocation2 + $0x978] sm:$0xff] }
 0x217   :  { %3836 = vmatprep.subr.bf16.mxu0 %v9478_v48  ;;  %v631_v31 = vld [vmem:[#allocation2 + $0xd58] sm:$0xff]  ;;  %v9694_v43 = vcombine.high %v503_v28, %v507_v29  ;;  %v9693_v54 = vcombine.low %v503_v28, %v507_v29 }
 0x218   :  { %3876 = vmatpush2.bf16.msra.mxu1 %v9613_v5  ;;  %v635_v32 = vld [vmem:[#allocation2 + $0xd78] sm:$0xff] }
 0x219   :  { %3877 = vmatprep.subr.bf16.mxu1 %v9606_v49  ;;  %v495_v48 = vld [vmem:[#allocation2 + $0x918] sm:$0xff] }
 0x21a   :  { %3837 = vmatpush2.bf16.msra.mxu0 %v9477_v55  ;;  %v499_v49 = vld [vmem:[#allocation2 + $0x938] sm:$0xff] }
 0x21b   :  { %3838 = vmatprep.subr.bf16.mxu0 %v9470_v58  ;;  %v627_v50 = vld [vmem:[#allocation2 + $0xd38] sm:$0xff]  ;;  %v9685_v2 = vcombine.low %v495_v48, %v499_v49 }
 0x21c   :  { %3878 = vmatpush2.bf16.msra.mxu1 %v9605_v56  ;;  %v9686_v56 = vcombine.high %v495_v48, %v499_v49  ;;  %v487_v62 = vld [vmem:[#allocation2 + $0x8d8] sm:$0xff] }
 0x21d   :  { %3879 = vmatprep.subr.bf16.mxu1 %v9598_v59  ;;  %v615_v1 = vld [vmem:[#allocation2 + $0xcd8] sm:$0xff] }
 0x21e   :  { %3839 = vmatpush2.bf16.msra.mxu0 %v9469_v3  ;;  %v619_v6 = vld [vmem:[#allocation2 + $0xcf8] sm:$0xff] }
 0x21f   :  { %3840 = vmatprep.subr.bf16.mxu0 %v9462_v22  ;;  %v479_v22 = vld [vmem:[#allocation2 + $0x898] sm:$0xff]  ;;  %v9805_v9 = vcombine.low %v615_v1, %v619_v6 }
 0x220   :  { %3880 = vmatpush2.bf16.msra.mxu1 %v9597_v7  ;;  %v9806_v7 = vcombine.high %v615_v1, %v619_v6  ;;  %v607_v14 = vld [vmem:[#allocation2 + $0xc98] sm:$0xff] }
 0x221   :  { %3881 = vmatprep.subr.bf16.mxu1 %v9590_v25  ;;  %v483_v25 = vld [vmem:[#allocation2 + $0x8b8] sm:$0xff] }
 0x222   :  { %3841 = vmatpush2.bf16.msra.mxu0 %v9461_v10  ;;  %v611_v11 = vld [vmem:[#allocation2 + $0xcb8] sm:$0xff]  ;;  %v9670_v10 = vcombine.high %v479_v22, %v483_v25  ;;  %v9669_v19 = vcombine.low %v479_v22, %v483_v25 }
 0x223   :  { %3892 = vmatprep.subr.bf16.mxu0 %v9710_v12  ;;  %v471_v12 = vld [vmem:[#allocation2 + $0x858] sm:$0xff]  ;;  %v9797_v20 = vcombine.low %v607_v14, %v611_v11 }
 0x224   :  { %3882 = vmatpush2.bf16.msra.mxu1 %v9589_v16  ;;  %v9798_v16 = vcombine.high %v607_v14, %v611_v11  ;;  %v599_v15 = vld [vmem:[#allocation2 + $0xc58] sm:$0xff] }
 0x225   :  { %3933 = vmatprep.subr.bf16.mxu1 %v9838_v13  ;;  %v3598_v30 = vpop.f32.mrf.mxu0  ;;  %3843 = vmatmul.mubr.bf16.vlgmr.msra.gmra.mxu0 %v11251_v33  ;;  %v9822_v33 = vcombine.high %v631_v31, %v635_v32  ;;  %v475_v13 = vld [vmem:[#allocation2 + $0x878] sm:$0xff] }
 0x226   :  { %v3599_v34 = vadd.f32 %v3598_v30, %v11321_v39  ;;  %3893 = vmatpush1.bf16.msra.mxu0 %v9709_v23  ;;  %3924 = vmatprep.mubr.bf16.mxu0 %v11259_v46  ;;  %v491_v46 = vld [vmem:[#allocation2 + $0x8f8] sm:$0xff]  ;;  %v9662_v23 = vcombine.high %v471_v12, %v475_v13  ;;  %v9661_v30 = vcombine.low %v471_v12, %v475_v13 }
 0x227   :  { %v3639_v35 = vpop.f32.mrf.mxu1  ;;  %3884 = vmatmul.mubr.bf16.vlgmr.msra.gmra.mxu1 %v11257_v37  ;;  %v3600_v40 = vpop.f32.mrf.mxu0  ;;  %3894 = vmatprep.subr.bf16.mxu0 %v9702_v26  ;;  %v623_v37 = vld [vmem:[#allocation2 + $0xd18] sm:$0xff]  ;;  %v9678_v3 = vcombine.high %v487_v62, %v491_v46  ;;  %v9677_v8 = vcombine.low %v487_v62, %v491_v46 }
 0x228   :  { %3934 = vmatpush1.bf16.msra.mxu1 %v9837_v24  ;;  %v11330_v63 = vadd.f32 %v3639_v35, %v3599_v34  ;;  %v3601_v45 = vadd.f32 %v3600_v40, %v11325_v0  ;;  %3965 = vmatprep.mubr.bf16.mxu1 %v11262_v47  ;;  %v9821_v0 = vcombine.low %v631_v31, %v635_v32  ;;  %v603_v18 = vld [vmem:[#allocation2 + $0xc78] sm:$0xff] }
 0x229   :  { %v3641_v5 = vpop.f32.mrf.mxu1  ;;  %3935 = vmatprep.subr.bf16.mxu1 %v9830_v27  ;;  %v3602_v39 = vpop.f32.mrf.mxu0  ;;  %v9814_v59 = vcombine.high %v623_v37, %v627_v50  ;;  %v9813_v47 = vcombine.low %v623_v37, %v627_v50  ;;  %v9790_v24 = vcombine.high %v599_v15, %v603_v18  ;;  %v463_v26 = vld [vmem:[#allocation2 + $0x818] sm:$0xff]  ;;  %v9789_v31 = vcombine.low %v599_v15, %v603_v18 }
 0x22a   :  { %v11335_v51 = vadd.f32 %v3641_v5, %v3601_v45  ;;  %3895 = vmatpush1.bf16.msra.mxu0 %v9701_v38  ;;  %v467_v27 = vld [vmem:[#allocation2 + $0x838] sm:$0xff]  ;;  %10881 = vtanh.f32 %v11330_v63 }
 0x22b   :  { %v3643_v52 = vpop.f32.mrf.mxu1  ;;  %v3603_v55 = vpop.f32.mrf.mxu0  ;;  %3896 = vmatprep.subr.bf16.mxu0 %v9694_v43  ;;  %v591_v28 = vld [vmem:[#allocation2 + $0xc18] sm:$0xff]  ;;  %v9654_v32 = vcombine.high %v463_v26, %v467_v27  ;;  %v9653_v43 = vcombine.low %v463_v26, %v467_v27 }
 0x22c   :  { %3936 = vmatpush1.bf16.msra.mxu1 %v9829_v41  ;;  %v595_v29 = vld [vmem:[#allocation2 + $0xc38] sm:$0xff]  ;;  %10883 = vtanh.f32 %v11335_v51 }
 0x22d   :  { %v3644_v58 = vpop.f32.mrf.mxu1  ;;  %3937 = vmatprep.subr.bf16.mxu1 %v9822_v33  ;;  %v9782_v34 = vcombine.high %v591_v28, %v595_v29  ;;  %v583_v35 = vld [vmem:[#allocation2 + $0xbd8] sm:$0xff]  ;;  %v9781_v45 = vcombine.low %v591_v28, %v595_v29 }
 0x22e   :  { %3897 = vmatpush1.bf16.msra.mxu0 %v9693_v54  ;;  %v587_v38 = vld [vmem:[#allocation2 + $0xbf8] sm:$0xff] }
 0x22f   :  { %3898 = vmatprep.subr.bf16.mxu0 %v9686_v56  ;;  %v711_v40 = vld [vmem:[#allocation2 + $0xfd8] sm:$0xff]  ;;  %v9774_v5 = vcombine.high %v583_v35, %v587_v38  ;;  %v9773_v50 = vcombine.low %v583_v35, %v587_v38  ;;  %v3982_v38 = vld [vmem:[%s11701_s1] sm:$0xff] }
 0x230   :  { %3938 = vmatpush1.bf16.msra.mxu1 %v9821_v0  ;;  %v715_v41 = vld [vmem:[#allocation2 + $0xff8] sm:$0xff] }
 0x231   :  { %3939 = vmatprep.subr.bf16.mxu1 %v9814_v59  ;;  %v9902_v33 = vcombine.high %v711_v40, %v715_v41  ;;  %v575_v48 = vld [vmem:[#allocation2 + $0xb98] sm:$0xff]  ;;  %v9901_v52 = vcombine.low %v711_v40, %v715_v41 }
 0x232   :  { %3899 = vmatpush1.bf16.msra.mxu0 %v9685_v2  ;;  %v579_v49 = vld [vmem:[#allocation2 + $0xbb8] sm:$0xff] }
 0x233   :  { %3900 = vmatprep.subr.bf16.mxu0 %v9678_v3  ;;  %v703_v39 = vld [vmem:[#allocation2 + $0xf98] sm:$0xff]  ;;  %v9766_v54 = vcombine.high %v575_v48, %v579_v49  ;;  %v9765_v62 = vcombine.low %v575_v48, %v579_v49  ;;  %v3986_v49 = vcombine.high %v3982_v38, %v3982_v38 }
 0x234   :  { %3940 = vmatpush1.bf16.msra.mxu1 %v9813_v47  ;;  %v707_v37 = vld [vmem:[#allocation2 + $0xfb8] sm:$0xff] }
 0x235   :  { %3941 = vmatprep.subr.bf16.mxu1 %v9806_v7  ;;  %v9894_v55 = vcombine.high %v703_v39, %v707_v37  ;;  %v567_v0 = vld [vmem:[#allocation2 + $0xb58] sm:$0xff]  ;;  %v9893_v46 = vcombine.low %v703_v39, %v707_v37 }
 0x236   :  { %3901 = vmatpush1.bf16.msra.mxu0 %v9677_v8  ;;  %v571_v56 = vld [vmem:[#allocation2 + $0xb78] sm:$0xff] }
 0x237   :  { %3902 = vmatprep.subr.bf16.mxu0 %v9670_v10  ;;  %v695_v58 = vld [vmem:[#allocation2 + $0xf58] sm:$0xff]  ;;  %v9758_v1 = vcombine.high %v567_v0, %v571_v56  ;;  %v9757_v22 = vcombine.low %v567_v0, %v571_v56  ;;  %v11341_v0 = vrot.slane %v3982_v38, %v11217_v53  ;;  %v4220_v56 = vld [vmem:[#allocation8 + $0x5c0] sm:$0xff] }
 0x238   :  { %3942 = vmatpush1.bf16.msra.mxu1 %v9805_v9  ;;  %v699_v59 = vld [vmem:[#allocation2 + $0xf78] sm:$0xff] }
 0x239   :  { %3943 = vmatprep.subr.bf16.mxu1 %v9798_v16  ;;  %v9886_v6 = vcombine.high %v695_v58, %v699_v59  ;;  %v559_v2 = vld [vmem:[#allocation2 + $0xb18] sm:$0xff]  ;;  %v9885_v25 = vcombine.low %v695_v58, %v699_v59  ;;  %v4224_v58 = vld [vmem:[#allocation8 + $0x5e0] sm:$0xff]  ;;  %v11344_v59 = vrot.slane %v3986_v49, %v11217_v53 }
 0x23a   :  { %3903 = vmatpush1.bf16.msra.mxu0 %v9669_v19  ;;  %v563_v47 = vld [vmem:[#allocation2 + $0xb38] sm:$0xff] }
 0x23b   :  { %3904 = vmatprep.subr.bf16.mxu0 %v9662_v23  ;;  %v687_v3 = vld [vmem:[#allocation2 + $0xf18] sm:$0xff]  ;;  %v9750_v14 = vcombine.high %v559_v2, %v563_v47  ;;  %v9749_v12 = vcombine.low %v559_v2, %v563_v47  ;;  %v10088_v2 = vcombine.high %v4220_v56, %v4224_v58  ;;  %v740_v47 = vsub.s32 5, %v11214_v44 }
 0x23c   :  { %3944 = vmatpush1.bf16.msra.mxu1 %v9797_v20  ;;  %v691_v7 = vld [vmem:[#allocation2 + $0xf38] sm:$0xff] }
 0x23d   :  { %3945 = vmatprep.subr.bf16.mxu1 %v9790_v24  ;;  %v9878_v11 = vcombine.high %v687_v3, %v691_v7  ;;  %v551_v8 = vld [vmem:[#allocation2 + $0xad8] sm:$0xff]  ;;  %v9877_v13 = vcombine.low %v687_v3, %v691_v7  ;;  %v4084_v3 = vld [vmem:[#allocation8 + $0x180] sm:$0xff] }
 0x23e   :  { %3905 = vmatpush1.bf16.msra.mxu0 %v9661_v30  ;;  %v555_v9 = vld [vmem:[#allocation2 + $0xaf8] sm:$0xff]  ;;  %v4088_v7 = vld [vmem:[#allocation8 + $0x1a0] sm:$0xff] }
 0x23f   :  { %3906 = vmatprep.subr.bf16.mxu0 %v9654_v32  ;;  %v679_v10 = vld [vmem:[#allocation2 + $0xed8] sm:$0xff]  ;;  %v9742_v15 = vcombine.high %v551_v8, %v555_v9  ;;  %v9741_v26 = vcombine.low %v551_v8, %v555_v9  ;;  %v10913_v8 = vld [vmem:[#allocation6] sm:$0xff] }
 0x240   :  { %3946 = vmatpush1.bf16.msra.mxu1 %v9789_v31  ;;  %v683_v16 = vld [vmem:[#allocation2 + $0xef8] sm:$0xff] }
 0x241   :  { %3947 = vmatprep.subr.bf16.mxu1 %v9782_v34  ;;  %v9870_v18 = vcombine.high %v679_v10, %v683_v16  ;;  %v543_v19 = vld [vmem:[#allocation2 + $0xa98] sm:$0xff]  ;;  %v9869_v27 = vcombine.low %v679_v10, %v683_v16  ;;  %v10087_v16 = vcombine.low %v4220_v56, %v4224_v58  ;;  %v4064_v56 = vld [vmem:[#allocation8 + $0xe0] sm:$0xff] }
 0x242   :  { %3907 = vmatpush1.bf16.msra.mxu0 %v9653_v43  ;;  %v547_v20 = vld [vmem:[#allocation2 + $0xab8] sm:$0xff]  ;;  %v4188_v58 = vld [vmem:[#allocation8 + $0x4c0] sm:$0xff] }
 0x243   :  { %3908 = vmatprep.subr.bf16.mxu0 %v9774_v5  ;;  %v671_v23 = vld [vmem:[#allocation2 + $0xe98] sm:$0xff]  ;;  %v9734_v28 = vcombine.high %v543_v19, %v547_v20  ;;  %v9733_v35 = vcombine.low %v543_v19, %v547_v20  ;;  %v4080_v19 = vld [vmem:[#allocation8 + $0x160] sm:$0xff] }
 0x244   :  { %3948 = vmatpush1.bf16.msra.mxu1 %v9781_v45  ;;  %v675_v24 = vld [vmem:[#allocation2 + $0xeb8] sm:$0xff] }
 0x245   :  { %3949 = vmatprep.subr.bf16.mxu1 %v9902_v33  ;;  %v9862_v29 = vcombine.high %v671_v23, %v675_v24  ;;  %v535_v30 = vld [vmem:[#allocation2 + $0xa58] sm:$0xff]  ;;  %v9861_v40 = vcombine.low %v671_v23, %v675_v24  ;;  %v4204_v24 = vld [vmem:[#allocation8 + $0x540] sm:$0xff] }
 0x246   :  { %3909 = vmatpush2.bf16.msra.mxu0 %v9773_v50  ;;  %v539_v31 = vld [vmem:[#allocation2 + $0xa78] sm:$0xff] }
 0x247   :  { %3910 = vmatprep.subr.bf16.mxu0 %v9766_v54  ;;  %v663_v32 = vld [vmem:[#allocation2 + $0xe58] sm:$0xff]  ;;  %v9726_v41 = vcombine.high %v535_v30, %v539_v31  ;;  %v9725_v39 = vcombine.low %v535_v30, %v539_v31  ;;  %v4092_v54 = vld [vmem:[#allocation8 + $0x1c0] sm:$0xff]  ;;  %v9951_v30 = vcombine.low %v4084_v3, %v4088_v7 }
 0x248   :  { %3950 = vmatpush2.bf16.msra.mxu1 %v9901_v52  ;;  %v667_v34 = vld [vmem:[#allocation2 + $0xe78] sm:$0xff] }
 0x249   :  { %3951 = vmatprep.subr.bf16.mxu1 %v9894_v55  ;;  %v9854_v43 = vcombine.high %v663_v32, %v667_v34  ;;  %v527_v45 = vld [vmem:[#allocation2 + $0xa18] sm:$0xff]  ;;  %v9853_v37 = vcombine.low %v663_v32, %v667_v34  ;;  %v4096_v55 = vld [vmem:[#allocation8 + $0x1e0] sm:$0xff] }
 0x24a   :  { %3911 = vmatpush2.bf16.msra.mxu0 %v9765_v62  ;;  %v531_v5 = vld [vmem:[#allocation2 + $0xa38] sm:$0xff]  ;;  %v9959_v10 = vcombine.low %v4092_v54, %v4096_v55 }
 0x24b   :  { %3912 = vmatprep.subr.bf16.mxu0 %v9758_v1  ;;  %v655_v33 = vld [vmem:[#allocation2 + $0xe18] sm:$0xff]  ;;  %v9718_v50 = vcombine.high %v527_v45, %v531_v5  ;;  %v9717_v62 = vcombine.low %v527_v45, %v531_v5  ;;  %v4196_v5 = vld [vmem:[#allocation8 + $0x500] sm:$0xff] }
 0x24c   :  { %3952 = vmatpush2.bf16.msra.mxu1 %v9893_v46  ;;  %v659_v48 = vld [vmem:[#allocation2 + $0xe38] sm:$0xff]  ;;  %v736_v46 = vsub.s32 4, %v11214_v44 }
 0x24d   :  { %3953 = vmatprep.subr.bf16.mxu1 %v9886_v6  ;;  %v9846_v52 = vcombine.high %v655_v33, %v659_v48  ;;  %v9845_v1 = vcombine.low %v655_v33, %v659_v48  ;;  %v9960_v6 = vcombine.high %v4092_v54, %v4096_v55  ;;  %v4060_v55 = vld [vmem:[#allocation8 + $0xc0] sm:$0xff] }
 0x24e   :  { %3913 = vmatpush2.bf16.msra.mxu0 %v9757_v22  ;;  %v4001_v22 = vcombine.high %v11341_v0, %v11341_v0  ;;  %v737_v9 = vrot.slane %v10913_v8, %v736_v46 }
 0x24f   :  { %3914 = vmatprep.subr.bf16.mxu0 %v9750_v14  ;;  %v4216_v14 = vld [vmem:[#allocation8 + $0x5a0] sm:$0xff] }
 0x250   :  { %3954 = vmatpush2.bf16.msra.mxu1 %v9885_v25  ;;  %v4212_v25 = vld [vmem:[#allocation8 + $0x580] sm:$0xff]  ;;  %v11356_v20 = vpack.c.bf16 %v4001_v22, %v4001_v22 }
 0x251   :  { %3955 = vmatprep.subr.bf16.mxu1 %v9878_v11  ;;  %v4002_v11 = vcombine.high %v11344_v59, %v11344_v59  ;;  %v10079_v32 = vcombine.low %v4212_v25, %v4216_v14  ;;  %v4056_v22 = vld [vmem:[#allocation8 + $0xa0] sm:$0xff] }
 0x252   :  { %3915 = vmatpush2.bf16.msra.mxu0 %v9749_v12  ;;  %v9952_v12 = vcombine.high %v4084_v3, %v4088_v7  ;;  %v4052_v7 = vld [vmem:[#allocation8 + $0x80] sm:$0xff] }
 0x253   :  { %3916 = vmatprep.subr.bf16.mxu0 %v9742_v15  ;;  %v10080_v15 = vcombine.high %v4212_v25, %v4216_v14  ;;  %v4180_v25 = vld [vmem:[#allocation8 + $0x480] sm:$0xff] }
 0x254   :  { %3956 = vmatpush2.bf16.msra.mxu1 %v9877_v13  ;;  %v741_v13 = vrot.slane %v10913_v8, %v740_v47  ;;  %v4184_v14 = vld [vmem:[#allocation8 + $0x4a0] sm:$0xff] }
 0x255   :  { %3957 = vmatprep.subr.bf16.mxu1 %v9870_v18  ;;  %v4076_v18 = vld [vmem:[#allocation8 + $0x140] sm:$0xff] }
 0x256   :  { %3917 = vmatpush2.bf16.msra.mxu0 %v9741_v26  ;;  %v4208_v26 = vld [vmem:[#allocation8 + $0x560] sm:$0xff]  ;;  %v9944_v34 = vcombine.high %v4076_v18, %v4080_v19  ;;  %v9943_v49 = vcombine.low %v4076_v18, %v4080_v19  ;;  %v9919_v18 = vcombine.low %v4052_v7, %v4056_v22  ;;  %v10047_v19 = vcombine.low %v4180_v25, %v4184_v14 }
 0x257   :  { %3918 = vmatprep.subr.bf16.mxu0 %v9734_v28 }
 0x258   :  { %3958 = vmatpush2.bf16.msra.mxu1 %v9869_v27  ;;  %v11359_v27 = vpack.c.bf16 %v4002_v11, %v4002_v11  ;;  %v9927_v11 = vcombine.low %v4060_v55, %v4064_v56 }
 0x259   :  { %3959 = vmatprep.subr.bf16.mxu1 %v9862_v29 }
 0x25a   :  { %3919 = vmatpush2.bf16.msra.mxu0 %v9733_v35 }
 0x25b   :  { %3920 = vmatprep.subr.bf16.mxu0 %v9726_v41  ;;  %v4068_v41 = vld [vmem:[#allocation8 + $0x100] sm:$0xff] }
 0x25c   :  { %3960 = vmatpush2.bf16.msra.mxu1 %v9861_v40 }
 0x25d   :  { %3961 = vmatprep.subr.bf16.mxu1 %v9854_v43  ;;  %v4072_v43 = vld [vmem:[#allocation8 + $0x120] sm:$0xff] }
 0x25e   :  { %3921 = vmatpush2.bf16.msra.mxu0 %v9725_v39 }
 0x25f   :  { %3922 = vmatprep.subr.bf16.mxu0 %v9718_v50  ;;  %v9936_v50 = vcombine.high %v4068_v41, %v4072_v43 }
 0x260   :  { %3962 = vmatpush2.bf16.msra.mxu1 %v9853_v37  ;;  %v10071_v37 = vcombine.low %v4204_v24, %v4208_v26 }
 0x261   :  { %3963 = vmatprep.subr.bf16.mxu1 %v9846_v52 }
 0x262   :  { %3923 = vmatpush2.bf16.msra.mxu0 %v9717_v62  ;;  %v4192_v62 = vld [vmem:[#allocation8 + $0x4e0] sm:$0xff] }
 0x263   :  { %7150 = vmatprep.subr.bf16.mxu0 %v9960_v6  ;;  %v10056_v3 = vcombine.high %v4188_v58, %v4192_v62  ;;  %v10055_v8 = vcombine.low %v4188_v58, %v4192_v62  ;;  %v4140_v58 = vld [vmem:[#allocation8 + $0x340] sm:$0xff] }
 0x264   :  { %3964 = vmatpush2.bf16.msra.mxu1 %v9845_v1  ;;  %v9935_v1 = vcombine.low %v4068_v41, %v4072_v43  ;;  %v4284_v41 = vld [vmem:[#allocation8 + $0x7c0] sm:$0xff] }
 0x265   :  { %7191 = vmatprep.subr.bf16.mxu1 %v10088_v2  ;;  %v3680_v23 = vpop.f32.mrf.mxu0  ;;  %3925 = vmatmul.mubr.bf16.vlgmr.msra.gmra.mxu0 %v11269_v60  ;;  %v10072_v60 = vcombine.high %v4204_v24, %v4208_v26  ;;  %v9928_v2 = vcombine.high %v4060_v55, %v4064_v56  ;;  %v4036_v26 = vld [vmem:[#allocation8] sm:$0xff] }
 0x266   :  { %v3681_v28 = vadd.f32 %v3680_v23, %v737_v9  ;;  %7151 = vmatpush1.bf16.msra.mxu0 %v9959_v10  ;;  %7182 = vmatprep.mubr.bf16.mxu0 %v11356_v20  ;;  %v9920_v9 = vcombine.high %v4052_v7, %v4056_v22  ;;  %v10048_v10 = vcombine.high %v4180_v25, %v4184_v14  ;;  %v4288_v43 = vld [vmem:[#allocation8 + $0x7e0] sm:$0xff] }
 0x267   :  { %v3721_v29 = vpop.f32.mrf.mxu1  ;;  %3966 = vmatmul.mubr.bf16.vlgmr.msra.gmra.mxu1 %v11273_v61  ;;  %v3682_v31 = vpop.f32.mrf.mxu0  ;;  %7152 = vmatprep.subr.bf16.mxu0 %v9952_v12  ;;  %v4200_v61 = vld [vmem:[#allocation8 + $0x520] sm:$0xff] }
 0x268   :  { %7192 = vmatpush1.bf16.msra.mxu1 %v10087_v16  ;;  %v11362_v35 = vadd.f32 %v3721_v29, %v3681_v28  ;;  %v3683_v38 = vadd.f32 %v3682_v31, %v741_v13  ;;  %7223 = vmatprep.mubr.bf16.mxu1 %v11359_v27  ;;  %v10064_v54 = vcombine.high %v4196_v5, %v4200_v61  ;;  %v4044_v16 = vld [vmem:[#allocation8 + $0x40] sm:$0xff] }
 0x269   :  { %v3723_v40 = vpop.f32.mrf.mxu1  ;;  %7193 = vmatprep.subr.bf16.mxu1 %v10080_v15  ;;  %v3684_v45 = vpop.f32.mrf.mxu0  ;;  %v10063_v6 = vcombine.low %v4196_v5, %v4200_v61  ;;  %v4048_v12 = vld [vmem:[#allocation8 + $0x60] sm:$0xff] }
 0x26a   :  { %v11366_v33 = vadd.f32 %v3723_v40, %v3683_v38  ;;  %7153 = vmatpush1.bf16.msra.mxu0 %v9951_v30  ;;  %v4172_v13 = vld [vmem:[#allocation8 + $0x440] sm:$0xff]  ;;  %v9912_v23 = vcombine.high %v4044_v16, %v4048_v12  ;;  %v9911_v31 = vcombine.low %v4044_v16, %v4048_v12 }
 0x26b   :  { %v3725_v48 = vpop.f32.mrf.mxu1  ;;  %v3685_v39 = vpop.f32.mrf.mxu0  ;;  %7154 = vmatprep.subr.bf16.mxu0 %v9944_v34  ;;  %v4176_v15 = vld [vmem:[#allocation8 + $0x460] sm:$0xff] }
 0x26c   :  { %7194 = vmatpush1.bf16.msra.mxu1 %v10079_v32  ;;  %v10040_v24 = vcombine.high %v4172_v13, %v4176_v15  ;;  %v4040_v28 = vld [vmem:[#allocation8 + $0x20] sm:$0xff]  ;;  %v10039_v32 = vcombine.low %v4172_v13, %v4176_v15  ;;  %v10152_v48 = vcombine.high %v4284_v41, %v4288_v43 }
 0x26d   :  { %v3726_v52 = vpop.f32.mrf.mxu1  ;;  %7195 = vmatprep.subr.bf16.mxu1 %v10072_v60  ;;  %v4164_v29 = vld [vmem:[#allocation8 + $0x400] sm:$0xff]  ;;  %v9904_v34 = vcombine.high %v4036_v26, %v4040_v28  ;;  %v9903_v45 = vcombine.low %v4036_v26, %v4040_v28 }
 0x26e   :  { %7155 = vmatpush1.bf16.msra.mxu0 %v9943_v49  ;;  %v4168_v30 = vld [vmem:[#allocation8 + $0x420] sm:$0xff] }
 0x26f   :  { %7156 = vmatprep.subr.bf16.mxu0 %v9936_v50  ;;  %v10032_v38 = vcombine.high %v4164_v29, %v4168_v30  ;;  %v4156_v40 = vld [vmem:[#allocation8 + $0x3c0] sm:$0xff]  ;;  %v10031_v5 = vcombine.low %v4164_v29, %v4168_v30 }
 0x270   :  { %7196 = vmatpush1.bf16.msra.mxu1 %v10071_v37  ;;  %v4160_v60 = vld [vmem:[#allocation8 + $0x3e0] sm:$0xff] }
 0x271   :  { %7197 = vmatprep.subr.bf16.mxu1 %v10064_v54  ;;  %v10024_v61 = vcombine.high %v4156_v40, %v4160_v60  ;;  %v4148_v49 = vld [vmem:[#allocation8 + $0x380] sm:$0xff]  ;;  %v10023_v52 = vcombine.low %v4156_v40, %v4160_v60  ;;  %v10151_v54 = vcombine.low %v4284_v41, %v4288_v43 }
 0x272   :  { %7157 = vmatpush1.bf16.msra.mxu0 %v9935_v1  ;;  %v4152_v39 = vld [vmem:[#allocation8 + $0x3a0] sm:$0xff] }
 0x273   :  { %7158 = vmatprep.subr.bf16.mxu0 %v9928_v2  ;;  %v4276_v37 = vld [vmem:[#allocation8 + $0x780] sm:$0xff]  ;;  %v10016_v55 = vcombine.high %v4148_v49, %v4152_v39  ;;  %v10015_v2 = vcombine.low %v4148_v49, %v4152_v39 }
 0x274   :  { %7198 = vmatpush1.bf16.msra.mxu1 %v10063_v6  ;;  %v4280_v50 = vld [vmem:[#allocation8 + $0x7a0] sm:$0xff] }
 0x275   :  { %7199 = vmatprep.subr.bf16.mxu1 %v10056_v3  ;;  %v10144_v56 = vcombine.high %v4276_v37, %v4280_v50  ;;  %v4144_v62 = vld [vmem:[#allocation8 + $0x360] sm:$0xff]  ;;  %v10143_v3 = vcombine.low %v4276_v37, %v4280_v50 }
 0x276   :  { %7159 = vmatpush1.bf16.msra.mxu0 %v9927_v11  ;;  %v4268_v1 = vld [vmem:[#allocation8 + $0x740] sm:$0xff]  ;;  %v10008_v7 = vcombine.high %v4140_v58, %v4144_v62 }
 0x277   :  { %7160 = vmatprep.subr.bf16.mxu0 %v9920_v9  ;;  %v4272_v6 = vld [vmem:[#allocation8 + $0x760] sm:$0xff]  ;;  %v10007_v9 = vcombine.low %v4140_v58, %v4144_v62 }
 0x278   :  { %7200 = vmatpush1.bf16.msra.mxu1 %v10055_v8  ;;  %v10136_v22 = vcombine.high %v4268_v1, %v4272_v6  ;;  %v4132_v25 = vld [vmem:[#allocation8 + $0x300] sm:$0xff] }
 0x279   :  { %7201 = vmatprep.subr.bf16.mxu1 %v10048_v10  ;;  %v4136_v14 = vld [vmem:[#allocation8 + $0x320] sm:$0xff]  ;;  %v10135_v10 = vcombine.low %v4268_v1, %v4272_v6 }
 0x27a   :  { %7161 = vmatpush1.bf16.msra.mxu0 %v9919_v18  ;;  %v4260_v11 = vld [vmem:[#allocation8 + $0x700] sm:$0xff]  ;;  %v10000_v16 = vcombine.high %v4132_v25, %v4136_v14 }
 0x27b   :  { %7162 = vmatprep.subr.bf16.mxu0 %v9912_v23  ;;  %v4264_v8 = vld [vmem:[#allocation8 + $0x720] sm:$0xff]  ;;  %v9999_v23 = vcombine.low %v4132_v25, %v4136_v14 }
 0x27c   :  { %7202 = vmatpush1.bf16.msra.mxu1 %v10047_v19  ;;  %v10128_v12 = vcombine.high %v4260_v11, %v4264_v8  ;;  %v4124_v13 = vld [vmem:[#allocation8 + $0x2c0] sm:$0xff] }
 0x27d   :  { %7203 = vmatprep.subr.bf16.mxu1 %v10040_v24  ;;  %v4128_v15 = vld [vmem:[#allocation8 + $0x2e0] sm:$0xff]  ;;  %v10127_v24 = vcombine.low %v4260_v11, %v4264_v8 }
 0x27e   :  { %7163 = vmatpush1.bf16.msra.mxu0 %v9911_v31  ;;  %v4252_v18 = vld [vmem:[#allocation8 + $0x6c0] sm:$0xff]  ;;  %v9992_v26 = vcombine.high %v4124_v13, %v4128_v15 }
 0x27f   :  { %7164 = vmatprep.subr.bf16.mxu0 %v9904_v34  ;;  %v4256_v19 = vld [vmem:[#allocation8 + $0x6e0] sm:$0xff]  ;;  %v9991_v34 = vcombine.low %v4124_v13, %v4128_v15  ;;  %v11381_v15 = vpack.c.bf16 %v11341_v0, %v11341_v0 }
 0x280   :  { %7204 = vmatpush1.bf16.msra.mxu1 %v10039_v32  ;;  %v10120_v28 = vcombine.high %v4252_v18, %v4256_v19  ;;  %v4116_v29 = vld [vmem:[#allocation8 + $0x280] sm:$0xff] }
 0x281   :  { %7205 = vmatprep.subr.bf16.mxu1 %v10032_v38  ;;  %v4120_v30 = vld [vmem:[#allocation8 + $0x2a0] sm:$0xff]  ;;  %v10119_v38 = vcombine.low %v4252_v18, %v4256_v19 }
 0x282   :  { %7165 = vmatpush1.bf16.msra.mxu0 %v9903_v45  ;;  %v4244_v31 = vld [vmem:[#allocation8 + $0x680] sm:$0xff]  ;;  %v9984_v40 = vcombine.high %v4116_v29, %v4120_v30 }
 0x283   :  { %7166 = vmatprep.subr.bf16.mxu0 %v10024_v61  ;;  %v4248_v32 = vld [vmem:[#allocation8 + $0x6a0] sm:$0xff]  ;;  %v9983_v61 = vcombine.low %v4116_v29, %v4120_v30 }
 0x284   :  { %7206 = vmatpush1.bf16.msra.mxu1 %v10031_v5  ;;  %v10112_v60 = vcombine.high %v4244_v31, %v4248_v32  ;;  %v4108_v41 = vld [vmem:[#allocation8 + $0x240] sm:$0xff]  ;;  %v10111_v49 = vcombine.low %v4244_v31, %v4248_v32 }
 0x285   :  { %7207 = vmatprep.subr.bf16.mxu1 %v10152_v48  ;;  %v4112_v43 = vld [vmem:[#allocation8 + $0x260] sm:$0xff] }
 0x286   :  { %7167 = vmatpush2.bf16.msra.mxu0 %v10023_v52  ;;  %v4236_v45 = vld [vmem:[#allocation8 + $0x640] sm:$0xff]  ;;  %v9976_v39 = vcombine.high %v4108_v41, %v4112_v43  ;;  %v9975_v58 = vcombine.low %v4108_v41, %v4112_v43 }
 0x287   :  { %7168 = vmatprep.subr.bf16.mxu0 %v10016_v55  ;;  %v4240_v5 = vld [vmem:[#allocation8 + $0x660] sm:$0xff] }
 0x288   :  { %7208 = vmatpush2.bf16.msra.mxu1 %v10151_v54  ;;  %v3983_v48 = vld [vmem:[%s11701_s1 + $0x8] sm:$0xff]  ;;  %v10104_v37 = vcombine.high %v4236_v45, %v4240_v5  ;;  %v10103_v62 = vcombine.low %v4236_v45, %v4240_v5 }
 0x289   :  { %7209 = vmatprep.subr.bf16.mxu1 %v10144_v56  ;;  %v4100_v50 = vld [vmem:[#allocation8 + $0x200] sm:$0xff]  ;;  %v4003_v56 = vcombine.high %v3983_v48, %v3983_v48 }
 0x28a   :  { %7169 = vmatpush2.bf16.msra.mxu0 %v10015_v2  ;;  %v4104_v52 = vld [vmem:[#allocation8 + $0x220] sm:$0xff] }
 0x28b   :  { %7170 = vmatprep.subr.bf16.mxu0 %v10008_v7  ;;  %v4228_v54 = vld [vmem:[#allocation8 + $0x600] sm:$0xff]  ;;  %v9968_v1 = vcombine.high %v4100_v50, %v4104_v52  ;;  %v11372_v7 = vrot.slane %v3983_v48, %v11217_v53  ;;  %v11375_v14 = vrot.slane %v4003_v56, %v11217_v53  ;;  %v9967_v11 = vcombine.low %v4100_v50, %v4104_v52 }
 0x28c   :  { %7210 = vmatpush2.bf16.msra.mxu1 %v10143_v3  ;;  %v4232_v55 = vld [vmem:[#allocation8 + $0x620] sm:$0xff] }
 0x28d   :  { %7211 = vmatprep.subr.bf16.mxu1 %v10136_v22  ;;  %v10096_v6 = vcombine.high %v4228_v54, %v4232_v55  ;;  %v4348_v2 = vld [vmem:[#allocation8 + $0x9c0] sm:$0xff]  ;;  %v10095_v8 = vcombine.low %v4228_v54, %v4232_v55  ;;  %v4018_v13 = vcombine.high %v11372_v7, %v11372_v7  ;;  %v4019_v19 = vcombine.high %v11375_v14, %v11375_v14 }
 0x28e   :  { %7171 = vmatpush2.bf16.msra.mxu0 %v10007_v9  ;;  %v4352_v3 = vld [vmem:[#allocation8 + $0x9e0] sm:$0xff] }
 0x28f   :  { %7172 = vmatprep.subr.bf16.mxu0 %v10000_v16  ;;  %v4476_v22 = vld [vmem:[#allocation8 + $0xdc0] sm:$0xff]  ;;  %v10216_v9 = vcombine.high %v4348_v2, %v4352_v3  ;;  %v11389_v31 = vpack.c.bf16 %v4018_v13, %v4018_v13 }
 0x290   :  { %7212 = vmatpush2.bf16.msra.mxu1 %v10135_v10  ;;  %v4480_v25 = vld [vmem:[#allocation8 + $0xde0] sm:$0xff] }
 0x291   :  { %7213 = vmatprep.subr.bf16.mxu1 %v10128_v12  ;;  %v10344_v10 = vcombine.high %v4476_v22, %v4480_v25  ;;  %v4340_v16 = vld [vmem:[#allocation8 + $0x980] sm:$0xff] }
 0x292   :  { %7173 = vmatpush2.bf16.msra.mxu0 %v9999_v23  ;;  %v4344_v12 = vld [vmem:[#allocation8 + $0x9a0] sm:$0xff]  ;;  %v11387_v23 = vpack.c.bf16 %v11344_v59, %v11344_v59 }
 0x293   :  { %7174 = vmatprep.subr.bf16.mxu0 %v9992_v26  ;;  %v4468_v18 = vld [vmem:[#allocation8 + $0xd80] sm:$0xff]  ;;  %v10343_v26 = vcombine.low %v4476_v22, %v4480_v25  ;;  %v10207_v41 = vcombine.low %v4340_v16, %v4344_v12 }
 0x294   :  { %7214 = vmatpush2.bf16.msra.mxu1 %v10127_v24  ;;  %v4472_v53 = vld [vmem:[#allocation8 + $0xda0] sm:$0xff]  ;;  %v10215_v24 = vcombine.low %v4348_v2, %v4352_v3 }
 0x295   :  { %7215 = vmatprep.subr.bf16.mxu1 %v10120_v28  ;;  %v10208_v28 = vcombine.high %v4340_v16, %v4344_v12  ;;  %v10336_v29 = vcombine.high %v4468_v18, %v4472_v53  ;;  %v4332_v30 = vld [vmem:[#allocation8 + $0x940] sm:$0xff]  ;;  %v10335_v45 = vcombine.low %v4468_v18, %v4472_v53 }
 0x296   :  { %7175 = vmatpush2.bf16.msra.mxu0 %v9991_v34  ;;  %v4336_v0 = vld [vmem:[#allocation8 + $0x960] sm:$0xff] }
 0x297   :  { %7176 = vmatprep.subr.bf16.mxu0 %v9984_v40  ;;  %v4460_v34 = vld [vmem:[#allocation8 + $0xd40] sm:$0xff]  ;;  %v11392_v40 = vpack.c.bf16 %v4019_v19, %v4019_v19  ;;  %v10200_v5 = vcombine.high %v4332_v30, %v4336_v0 }
 0x298   :  { %7216 = vmatpush2.bf16.msra.mxu1 %v10119_v38  ;;  %v4464_v38 = vld [vmem:[#allocation8 + $0xd60] sm:$0xff] }
 0x299   :  { %7217 = vmatprep.subr.bf16.mxu1 %v10112_v60  ;;  %v4328_v50 = vld [vmem:[#allocation8 + $0x920] sm:$0xff] }
 0x29a   :  { %7177 = vmatpush2.bf16.msra.mxu0 %v9983_v61  ;;  %v4452_v52 = vld [vmem:[#allocation8 + $0xd00] sm:$0xff] }
 0x29b   :  { %7178 = vmatprep.subr.bf16.mxu0 %v9976_v39  ;;  %v10328_v39 = vcombine.high %v4460_v34, %v4464_v38  ;;  %v4456_v54 = vld [vmem:[#allocation8 + $0xd20] sm:$0xff] }
 0x29c   :  { %7218 = vmatpush2.bf16.msra.mxu1 %v10111_v49  ;;  %v10320_v2 = vcombine.high %v4452_v52, %v4456_v54  ;;  %v4316_v3 = vld [vmem:[#allocation8 + $0x8c0] sm:$0xff] }
 0x29d   :  { %7219 = vmatprep.subr.bf16.mxu1 %v10104_v37  ;;  %v4324_v37 = vld [vmem:[#allocation8 + $0x900] sm:$0xff] }
 0x29e   :  { %7179 = vmatpush2.bf16.msra.mxu0 %v9975_v58  ;;  %v10199_v58 = vcombine.low %v4332_v30, %v4336_v0  ;;  %v4320_v22 = vld [vmem:[#allocation8 + $0x8e0] sm:$0xff] }
 0x29f   :  { %7180 = vmatprep.subr.bf16.mxu0 %v9968_v1  ;;  %v10192_v1 = vcombine.high %v4324_v37, %v4328_v50  ;;  %v4444_v25 = vld [vmem:[#allocation8 + $0xcc0] sm:$0xff]  ;;  %v10183_v19 = vcombine.low %v4316_v3, %v4320_v22 }
 0x2a0   :  { %7220 = vmatpush2.bf16.msra.mxu1 %v10103_v62  ;;  %v4308_v12 = vld [vmem:[#allocation8 + $0x880] sm:$0xff] }
 0x2a1   :  { %7221 = vmatprep.subr.bf16.mxu1 %v10096_v6  ;;  %v4312_v13 = vld [vmem:[#allocation8 + $0x8a0] sm:$0xff] }
 0x2a2   :  { %7181 = vmatpush2.bf16.msra.mxu0 %v9967_v11  ;;  %v4448_v11 = vld [vmem:[#allocation8 + $0xce0] sm:$0xff] }
 0x2a3   :  { %7232 = vmatprep.subr.bf16.mxu0 %v10216_v9  ;;  %v10319_v9 = vcombine.low %v4452_v52, %v4456_v54  ;;  %v10312_v16 = vcombine.high %v4444_v25, %v4448_v11  ;;  %v4436_v18 = vld [vmem:[#allocation8 + $0xc80] sm:$0xff] }
 0x2a4   :  { %7222 = vmatpush2.bf16.msra.mxu1 %v10095_v8  ;;  %v10191_v8 = vcombine.low %v4324_v37, %v4328_v50  ;;  %v4440_v53 = vld [vmem:[#allocation8 + $0xca0] sm:$0xff] }
 0x2a5   :  { %7273 = vmatprep.subr.bf16.mxu1 %v10344_v10  ;;  %v3762_v32 = vpop.f32.mrf.mxu0  ;;  %7183 = vmatmul.mubr.bf16.vlgmr.msra.gmra.mxu0 %v11381_v15  ;;  %v10184_v10 = vcombine.high %v4316_v3, %v4320_v22  ;;  %v4304_v30 = vld [vmem:[#allocation8 + $0x860] sm:$0xff] }
 0x2a6   :  { %v3763_v59 = vadd.f32 %v3762_v32, %v11362_v35  ;;  %7233 = vmatpush1.bf16.msra.mxu0 %v10215_v24  ;;  %7264 = vmatprep.mubr.bf16.mxu0 %v11389_v31  ;;  %v10311_v24 = vcombine.low %v4444_v25, %v4448_v11  ;;  %v4428_v0 = vld [vmem:[#allocation8 + $0xc40] sm:$0xff] }
 0x2a7   :  { %v3803_v60 = vpop.f32.mrf.mxu1  ;;  %7224 = vmatmul.mubr.bf16.vlgmr.msra.gmra.mxu1 %v11387_v23  ;;  %v3764_v43 = vpop.f32.mrf.mxu0  ;;  %7234 = vmatprep.subr.bf16.mxu0 %v10208_v28  ;;  %v10304_v28 = vcombine.high %v4436_v18, %v4440_v53  ;;  %v4432_v32 = vld [vmem:[#allocation8 + $0xc60] sm:$0xff] }
 0x2a8   :  { %7274 = vmatpush1.bf16.msra.mxu1 %v10343_v26  ;;  %v11396_v61 = vadd.f32 %v3803_v60, %v3763_v59  ;;  %v3765_v48 = vadd.f32 %v3764_v43, %v11366_v33  ;;  %7305 = vmatprep.mubr.bf16.mxu1 %v11392_v40  ;;  %v10327_v33 = vcombine.low %v4460_v34, %v4464_v38  ;;  %v4296_v43 = vld [vmem:[#allocation8 + $0x820] sm:$0xff] }
 0x2a9   :  { %v3805_v49 = vpop.f32.mrf.mxu1  ;;  %7275 = vmatprep.subr.bf16.mxu1 %v10336_v29  ;;  %v3766_v35 = vpop.f32.mrf.mxu0  ;;  %v10176_v26 = vcombine.high %v4308_v12, %v4312_v13  ;;  %v4300_v29 = vld [vmem:[#allocation8 + $0x840] sm:$0xff]  ;;  %v10175_v34 = vcombine.low %v4308_v12, %v4312_v13  ;;  %v10303_v38 = vcombine.low %v4436_v18, %v4440_v53  ;;  %v10296_v60 = vcombine.high %v4428_v0, %v4432_v32 }
 0x2aa   :  { %v11401_v55 = vadd.f32 %v3805_v49, %v3765_v48  ;;  %7235 = vmatpush1.bf16.msra.mxu0 %v10207_v41  ;;  %v10168_v59 = vcombine.high %v4300_v29, %v4304_v30  ;;  %v4292_v41 = vld [vmem:[#allocation8 + $0x800] sm:$0xff]  ;;  %v10167_v48 = vcombine.low %v4300_v29, %v4304_v30  ;;  %v10295_v49 = vcombine.low %v4428_v0, %v4432_v32 }
 0x2ab   :  { %v3807_v56 = vpop.f32.mrf.mxu1  ;;  %v3767_v62 = vpop.f32.mrf.mxu0  ;;  %7236 = vmatprep.subr.bf16.mxu0 %v10200_v5  ;;  %v4424_v5 = vld [vmem:[#allocation8 + $0xc20] sm:$0xff]  ;;  %10885 = vtanh.f32 %v11396_v61 }
 0x2ac   :  { %7276 = vmatpush1.bf16.msra.mxu1 %v10335_v45  ;;  %v4420_v45 = vld [vmem:[#allocation8 + $0xc00] sm:$0xff]  ;;  %v10159_v56 = vcombine.low %v4292_v41, %v4296_v43  ;;  %10887 = vtanh.f32 %v11401_v55 }
 0x2ad   :  { %v3808_v6 = vpop.f32.mrf.mxu1  ;;  %7277 = vmatprep.subr.bf16.mxu1 %v10328_v39  ;;  %v10160_v39 = vcombine.high %v4292_v41, %v4296_v43  ;;  %v10288_v37 = vcombine.high %v4420_v45, %v4424_v5  ;;  %v4412_v50 = vld [vmem:[#allocation8 + $0xbc0] sm:$0xff] }
 0x2ae   :  { %7237 = vmatpush1.bf16.msra.mxu0 %v10199_v58  ;;  %v4416_v35 = vld [vmem:[#allocation8 + $0xbe0] sm:$0xff]  ;;  %v10287_v58 = vcombine.low %v4420_v45, %v4424_v5 }
 0x2af   :  { %7238 = vmatprep.subr.bf16.mxu0 %v10192_v1  ;;  %v4540_v52 = vld [vmem:[#allocation8 + $0xfc0] sm:$0xff]  ;;  %v10280_v62 = vcombine.high %v4412_v50, %v4416_v35  ;;  %v10279_v22 = vcombine.low %v4412_v50, %v4416_v35 }
 0x2b0   :  { %7278 = vmatpush1.bf16.msra.mxu1 %v10327_v33  ;;  %v4544_v54 = vld [vmem:[#allocation8 + $0xfe0] sm:$0xff] }
 0x2b1   :  { %7279 = vmatprep.subr.bf16.mxu1 %v10320_v2  ;;  %v10408_v33 = vcombine.high %v4540_v52, %v4544_v54  ;;  %v4404_v1 = vld [vmem:[#allocation8 + $0xb80] sm:$0xff]  ;;  %v10407_v25 = vcombine.low %v4540_v52, %v4544_v54 }
 0x2b2   :  { %7239 = vmatpush1.bf16.msra.mxu0 %v10191_v8  ;;  %v4408_v6 = vld [vmem:[#allocation8 + $0xba0] sm:$0xff] }
 0x2b3   :  { %7240 = vmatprep.subr.bf16.mxu0 %v10184_v10  ;;  %v4532_v2 = vld [vmem:[#allocation8 + $0xf80] sm:$0xff]  ;;  %v10272_v11 = vcombine.high %v4404_v1, %v4408_v6  ;;  %v10271_v13 = vcombine.low %v4404_v1, %v4408_v6 }
 0x2b4   :  { %7280 = vmatpush1.bf16.msra.mxu1 %v10319_v9  ;;  %v4536_v3 = vld [vmem:[#allocation8 + $0xfa0] sm:$0xff] }
 0x2b5   :  { %7281 = vmatprep.subr.bf16.mxu1 %v10312_v16  ;;  %v10400_v8 = vcombine.high %v4532_v2, %v4536_v3  ;;  %v4396_v9 = vld [vmem:[#allocation8 + $0xb40] sm:$0xff]  ;;  %v10399_v18 = vcombine.low %v4532_v2, %v4536_v3 }
 0x2b6   :  { %7241 = vmatpush1.bf16.msra.mxu0 %v10183_v19  ;;  %v4400_v10 = vld [vmem:[#allocation8 + $0xb60] sm:$0xff] }
 0x2b7   :  { %7242 = vmatprep.subr.bf16.mxu0 %v10176_v26  ;;  %v4524_v16 = vld [vmem:[#allocation8 + $0xf40] sm:$0xff]  ;;  %v10264_v53 = vcombine.high %v4396_v9, %v4400_v10  ;;  %v10263_v30 = vcombine.low %v4396_v9, %v4400_v10 }
 0x2b8   :  { %7282 = vmatpush1.bf16.msra.mxu1 %v10311_v24  ;;  %v4528_v12 = vld [vmem:[#allocation8 + $0xf60] sm:$0xff] }
 0x2b9   :  { %7283 = vmatprep.subr.bf16.mxu1 %v10304_v28  ;;  %v10392_v19 = vcombine.high %v4524_v16, %v4528_v12  ;;  %v4388_v24 = vld [vmem:[#allocation8 + $0xb00] sm:$0xff]  ;;  %v10391_v0 = vcombine.low %v4524_v16, %v4528_v12 }
 0x2ba   :  { %7243 = vmatpush1.bf16.msra.mxu0 %v10175_v34  ;;  %v4392_v26 = vld [vmem:[#allocation8 + $0xb20] sm:$0xff] }
 0x2bb   :  { %7244 = vmatprep.subr.bf16.mxu0 %v10168_v59  ;;  %v4516_v28 = vld [vmem:[#allocation8 + $0xf00] sm:$0xff]  ;;  %v10256_v32 = vcombine.high %v4388_v24, %v4392_v26  ;;  %v10255_v43 = vcombine.low %v4388_v24, %v4392_v26  ;;  %v4225_v24 = vld [vmem:[#allocation8 + $0x5e8] sm:$0xff] }
 0x2bc   :  { %7284 = vmatpush1.bf16.msra.mxu1 %v10303_v38  ;;  %v4520_v29 = vld [vmem:[#allocation8 + $0xf20] sm:$0xff] }
 0x2bd   :  { %7285 = vmatprep.subr.bf16.mxu1 %v10296_v60  ;;  %v10384_v34 = vcombine.high %v4516_v28, %v4520_v29  ;;  %v4380_v38 = vld [vmem:[#allocation8 + $0xac0] sm:$0xff]  ;;  %v10383_v45 = vcombine.low %v4516_v28, %v4520_v29 }
 0x2be   :  { %7245 = vmatpush1.bf16.msra.mxu0 %v10167_v48  ;;  %v4384_v59 = vld [vmem:[#allocation8 + $0xae0] sm:$0xff] }
 0x2bf   :  { %7246 = vmatprep.subr.bf16.mxu0 %v10160_v39  ;;  %v4508_v60 = vld [vmem:[#allocation8 + $0xec0] sm:$0xff]  ;;  %v10248_v5 = vcombine.high %v4380_v38, %v4384_v59  ;;  %v10247_v35 = vcombine.low %v4380_v38, %v4384_v59  ;;  %v4213_v38 = vld [vmem:[#allocation8 + $0x588] sm:$0xff] }
 0x2c0   :  { %7286 = vmatpush1.bf16.msra.mxu1 %v10295_v49  ;;  %v4512_v41 = vld [vmem:[#allocation8 + $0xee0] sm:$0xff]  ;;  %v4217_v59 = vld [vmem:[#allocation8 + $0x5a8] sm:$0xff] }
 0x2c1   :  { %7287 = vmatprep.subr.bf16.mxu1 %v10288_v37  ;;  %v10376_v48 = vcombine.high %v4508_v60, %v4512_v41  ;;  %v4372_v49 = vld [vmem:[#allocation8 + $0xa80] sm:$0xff]  ;;  %v10375_v52 = vcombine.low %v4508_v60, %v4512_v41  ;;  %v11409_v60 = vpack.c.bf16 %v11375_v14, %v11375_v14 }
 0x2c2   :  { %7247 = vmatpush1.bf16.msra.mxu0 %v10159_v56  ;;  %v4376_v39 = vld [vmem:[#allocation8 + $0xaa0] sm:$0xff] }
 0x2c3   :  { %7248 = vmatprep.subr.bf16.mxu0 %v10280_v62  ;;  %v4500_v37 = vld [vmem:[#allocation8 + $0xe80] sm:$0xff]  ;;  %v10240_v54 = vcombine.high %v4372_v49, %v4376_v39  ;;  %v10239_v6 = vcombine.low %v4372_v49, %v4376_v39  ;;  %v4081_v49 = vld [vmem:[#allocation8 + $0x168] sm:$0xff] }
 0x2c4   :  { %7288 = vmatpush1.bf16.msra.mxu1 %v10287_v58  ;;  %v4504_v50 = vld [vmem:[#allocation8 + $0xea0] sm:$0xff] }
 0x2c5   :  { %7289 = vmatprep.subr.bf16.mxu1 %v10408_v33  ;;  %v10368_v56 = vcombine.high %v4500_v37, %v4504_v50  ;;  %v4364_v58 = vld [vmem:[#allocation8 + $0xa40] sm:$0xff]  ;;  %v10367_v2 = vcombine.low %v4500_v37, %v4504_v50  ;;  %v4209_v37 = vld [vmem:[#allocation8 + $0x568] sm:$0xff] }
 0x2c6   :  { %7249 = vmatpush2.bf16.msra.mxu0 %v10279_v22  ;;  %v4368_v62 = vld [vmem:[#allocation8 + $0xa60] sm:$0xff] }
 0x2c7   :  { %7250 = vmatprep.subr.bf16.mxu0 %v10272_v11  ;;  %v4492_v33 = vld [vmem:[#allocation8 + $0xe40] sm:$0xff]  ;;  %v10232_v3 = vcombine.high %v4364_v58, %v4368_v62  ;;  %v10231_v10 = vcombine.low %v4364_v58, %v4368_v62  ;;  %v4069_v62 = vld [vmem:[#allocation8 + $0x108] sm:$0xff] }
 0x2c8   :  { %7290 = vmatpush2.bf16.msra.mxu1 %v10407_v25  ;;  %v4496_v1 = vld [vmem:[#allocation8 + $0xe60] sm:$0xff] }
 0x2c9   :  { %7291 = vmatprep.subr.bf16.mxu1 %v10400_v8  ;;  %v10360_v22 = vcombine.high %v4492_v33, %v4496_v1  ;;  %v4356_v25 = vld [vmem:[#allocation8 + $0xa00] sm:$0xff]  ;;  %v10359_v16 = vcombine.low %v4492_v33, %v4496_v1  ;;  %v4073_v33 = vld [vmem:[#allocation8 + $0x128] sm:$0xff] }
 0x2ca   :  { %7251 = vmatpush2.bf16.msra.mxu0 %v10271_v13  ;;  %v4360_v11 = vld [vmem:[#allocation8 + $0xa20] sm:$0xff] }
 0x2cb   :  { %7252 = vmatprep.subr.bf16.mxu0 %v10264_v53  ;;  %v4484_v8 = vld [vmem:[#allocation8 + $0xe00] sm:$0xff]  ;;  %v10224_v12 = vcombine.high %v4356_v25, %v4360_v11  ;;  %v4097_v53 = vld [vmem:[#allocation8 + $0x1e8] sm:$0xff]  ;;  %v10223_v26 = vcombine.low %v4356_v25, %v4360_v11 }
 0x2cc   :  { %7292 = vmatpush2.bf16.msra.mxu1 %v10399_v18  ;;  %v4488_v9 = vld [vmem:[#allocation8 + $0xe20] sm:$0xff]  ;;  %v4093_v18 = vld [vmem:[#allocation8 + $0x1c8] sm:$0xff] }
 0x2cd   :  { %7293 = vmatprep.subr.bf16.mxu1 %v10392_v19  ;;  %v10352_v13 = vcombine.high %v4484_v8, %v4488_v9  ;;  %v4221_v19 = vld [vmem:[#allocation8 + $0x5c8] sm:$0xff]  ;;  %v10351_v28 = vcombine.low %v4484_v8, %v4488_v9  ;;  %v9962_v29 = vcombine.high %v4093_v18, %v4097_v53  ;;  %v9961_v41 = vcombine.low %v4093_v18, %v4097_v53 }
 0x2ce   :  { %7253 = vmatpush2.bf16.msra.mxu0 %v10263_v30  ;;  %v10090_v30 = vcombine.high %v4221_v19, %v4225_v24  ;;  %v9938_v8 = vcombine.high %v4069_v62, %v4073_v33  ;;  %v4193_v18 = vld [vmem:[#allocation8 + $0x4e8] sm:$0xff]  ;;  %v9937_v53 = vcombine.low %v4069_v62, %v4073_v33 }
 0x2cf   :  { %7254 = vmatprep.subr.bf16.mxu0 %v10256_v32  ;;  %v4089_v32 = vld [vmem:[#allocation8 + $0x1a8] sm:$0xff] }
 0x2d0   :  { %7294 = vmatpush2.bf16.msra.mxu1 %v10391_v0  ;;  %v4085_v0 = vld [vmem:[#allocation8 + $0x188] sm:$0xff] }
 0x2d1   :  { %7295 = vmatprep.subr.bf16.mxu1 %v10384_v34  ;;  %v11405_v34 = vpack.c.bf16 %v11372_v7, %v11372_v7  ;;  %v4205_v7 = vld [vmem:[#allocation8 + $0x548] sm:$0xff]  ;;  %v9953_v14 = vcombine.low %v4085_v0, %v4089_v32 }
 0x2d2   :  { %7255 = vmatpush2.bf16.msra.mxu0 %v10255_v43  ;;  %v10089_v43 = vcombine.low %v4221_v19, %v4225_v24  ;;  %v10074_v58 = vcombine.high %v4205_v7, %v4209_v37  ;;  %v10073_v11 = vcombine.low %v4205_v7, %v4209_v37  ;;  %v4169_v62 = vld [vmem:[#allocation8 + $0x428] sm:$0xff] }
 0x2d3   :  { %7256 = vmatprep.subr.bf16.mxu0 %v10248_v5  ;;  %v10082_v5 = vcombine.high %v4213_v38, %v4217_v59 }
 0x2d4   :  { %7296 = vmatpush2.bf16.msra.mxu1 %v10383_v45  ;;  %v9954_v45 = vcombine.high %v4085_v0, %v4089_v32  ;;  %v4185_v0 = vld [vmem:[#allocation8 + $0x4a8] sm:$0xff] }
 0x2d5   :  { %7297 = vmatprep.subr.bf16.mxu1 %v10376_v48  ;;  %v4077_v48 = vld [vmem:[#allocation8 + $0x148] sm:$0xff] }
 0x2d6   :  { %7257 = vmatpush2.bf16.msra.mxu0 %v10247_v35 }
 0x2d7   :  { %7258 = vmatprep.subr.bf16.mxu0 %v10240_v54  ;;  %v9946_v54 = vcombine.high %v4077_v48, %v4081_v49 }
 0x2d8   :  { %7298 = vmatpush2.bf16.msra.mxu1 %v10375_v52  ;;  %v10081_v52 = vcombine.low %v4213_v38, %v4217_v59 }
 0x2d9   :  { %7299 = vmatprep.subr.bf16.mxu1 %v10368_v56 }
 0x2da   :  { %7259 = vmatpush2.bf16.msra.mxu0 %v10239_v6  ;;  %v4197_v6 = vld [vmem:[#allocation8 + $0x508] sm:$0xff] }
 0x2db   :  { %7260 = vmatprep.subr.bf16.mxu0 %v10232_v3 }
 0x2dc   :  { %7300 = vmatpush2.bf16.msra.mxu1 %v10367_v2  ;;  %v4201_v2 = vld [vmem:[#allocation8 + $0x528] sm:$0xff] }
 0x2dd   :  { %7301 = vmatprep.subr.bf16.mxu1 %v10360_v22  ;;  %v9945_v22 = vcombine.low %v4077_v48, %v4081_v49  ;;  %v10065_v19 = vcombine.low %v4197_v6, %v4201_v2  ;;  %v4177_v48 = vld [vmem:[#allocation8 + $0x468] sm:$0xff] }
 0x2de   :  { %7261 = vmatpush2.bf16.msra.mxu0 %v10231_v10  ;;  %v10066_v10 = vcombine.high %v4197_v6, %v4201_v2 }
 0x2df   :  { %7262 = vmatprep.subr.bf16.mxu0 %v10224_v12  ;;  %v4065_v12 = vld [vmem:[#allocation8 + $0xe8] sm:$0xff] }
 0x2e0   :  { %7302 = vmatpush2.bf16.msra.mxu1 %v10359_v16  ;;  %v4061_v16 = vld [vmem:[#allocation8 + $0xc8] sm:$0xff] }
 0x2e1   :  { %7303 = vmatprep.subr.bf16.mxu1 %v10352_v13  ;;  %v4189_v13 = vld [vmem:[#allocation8 + $0x4c8] sm:$0xff]  ;;  %v9930_v24 = vcombine.high %v4061_v16, %v4065_v12  ;;  %v9929_v32 = vcombine.low %v4061_v16, %v4065_v12 }
 0x2e2   :  { %7263 = vmatpush2.bf16.msra.mxu0 %v10223_v26  ;;  %v10058_v26 = vcombine.high %v4189_v13, %v4193_v18  ;;  %v10057_v38 = vcombine.low %v4189_v13, %v4193_v18  ;;  %v4149_v12 = vld [vmem:[#allocation8 + $0x388] sm:$0xff] }
 0x2e3   :  { %7314 = vmatprep.subr.bf16.mxu0 %v9962_v29  ;;  %v4057_v29 = vld [vmem:[#allocation8 + $0xa8] sm:$0xff] }
 0x2e4   :  { %7304 = vmatpush2.bf16.msra.mxu1 %v10351_v28  ;;  %v4053_v28 = vld [vmem:[#allocation8 + $0x88] sm:$0xff] }
 0x2e5   :  { %7355 = vmatprep.subr.bf16.mxu1 %v10090_v30  ;;  %v11411_v39 = vpop.f32.mrf.mxu0  ;;  %7265 = vmatmul.mubr.bf16.vlgmr.msra.gmra.mxu0 %v11405_v34  ;;  %v4181_v30 = vld [vmem:[#allocation8 + $0x488] sm:$0xff]  ;;  %v9922_v59 = vcombine.high %v4053_v28, %v4057_v29  ;;  %v9921_v49 = vcombine.low %v4053_v28, %v4057_v29 }
 0x2e6   :  { %7315 = vmatpush1.bf16.msra.mxu0 %v9961_v41  ;;  %7346 = vmatprep.mubr.bf16.mxu0 %v11356_v20  ;;  %v10050_v41 = vcombine.high %v4181_v30, %v4185_v0  ;;  %v10049_v7 = vcombine.low %v4181_v30, %v4185_v0  ;;  %v4153_v13 = vld [vmem:[#allocation8 + $0x3a8] sm:$0xff] }
 0x2e7   :  { %v11414_v50 = vpop.f32.mrf.mxu1  ;;  %7306 = vmatmul.mubr.bf16.vlgmr.msra.gmra.mxu1 %v11409_v60  ;;  %v11417_v35 = vpop.f32.mrf.mxu0  ;;  %7316 = vmatprep.subr.bf16.mxu0 %v9954_v45  ;;  %v4049_v45 = vld [vmem:[#allocation8 + $0x68] sm:$0xff] }
 0x2e8   :  { %7356 = vmatpush1.bf16.msra.mxu1 %v10089_v43  ;;  %7387 = vmatprep.mubr.bf16.mxu1 %v11359_v27  ;;  %v4045_v43 = vld [vmem:[#allocation8 + $0x48] sm:$0xff] }
 0x2e9   :  { %v11419_v56 = vpop.f32.mrf.mxu1  ;;  %7357 = vmatprep.subr.bf16.mxu1 %v10082_v5  ;;  %v3848_v1 = vpop.f32.mrf.mxu0  ;;  %v4173_v5 = vld [vmem:[#allocation8 + $0x448] sm:$0xff]  ;;  %v9914_v37 = vcombine.high %v4045_v43, %v4049_v45  ;;  %v9913_v33 = vcombine.low %v4045_v43, %v4049_v45 }
 0x2ea   :  { %7317 = vmatpush1.bf16.msra.mxu0 %v9953_v14  ;;  %v10042_v14 = vcombine.high %v4173_v5, %v4177_v48  ;;  %v10041_v1 = vcombine.low %v4173_v5, %v4177_v48  ;;  %v4277_v18 = vld [vmem:[#allocation8 + $0x788] sm:$0xff] }
 0x2eb   :  { %v3889_v3 = vpop.f32.mrf.mxu1  ;;  %v3849_v25 = vpop.f32.mrf.mxu0  ;;  %7318 = vmatprep.subr.bf16.mxu0 %v9946_v54  ;;  %v4041_v54 = vld [vmem:[#allocation8 + $0x28] sm:$0xff] }
 0x2ec   :  { %7358 = vmatpush1.bf16.msra.mxu1 %v10081_v52  ;;  %v4037_v52 = vld [vmem:[#allocation8 + $0x8] sm:$0xff] }
 0x2ed   :  { %v3890_v9 = vpop.f32.mrf.mxu1  ;;  %7359 = vmatprep.subr.bf16.mxu1 %v10074_v58  ;;  %v4165_v58 = vld [vmem:[#allocation8 + $0x408] sm:$0xff]  ;;  %v9906_v6 = vcombine.high %v4037_v52, %v4041_v54 }
 0x2ee   :  { %7319 = vmatpush1.bf16.msra.mxu0 %v9945_v22  ;;  %v10034_v2 = vcombine.high %v4165_v58, %v4169_v62  ;;  %v4157_v3 = vld [vmem:[#allocation8 + $0x3c8] sm:$0xff]  ;;  %v10033_v9 = vcombine.low %v4165_v58, %v4169_v62 }
 0x2ef   :  { %7320 = vmatprep.subr.bf16.mxu0 %v9938_v8  ;;  %v4161_v22 = vld [vmem:[#allocation8 + $0x3e8] sm:$0xff]  ;;  %v9905_v8 = vcombine.low %v4037_v52, %v4041_v54 }
 0x2f0   :  { %7360 = vmatpush1.bf16.msra.mxu1 %v10073_v11  ;;  %v4285_v25 = vld [vmem:[#allocation8 + $0x7c8] sm:$0xff] }
 0x2f1   :  { %7361 = vmatprep.subr.bf16.mxu1 %v10066_v10  ;;  %v4289_v11 = vld [vmem:[#allocation8 + $0x7e8] sm:$0xff]  ;;  %v10026_v10 = vcombine.high %v4157_v3, %v4161_v22 }
 0x2f2   :  { %7321 = vmatpush1.bf16.msra.mxu0 %v9937_v53  ;;  %v10154_v16 = vcombine.high %v4285_v25, %v4289_v11  ;;  %v4281_v53 = vld [vmem:[#allocation8 + $0x7a8] sm:$0xff] }
 0x2f3   :  { %7322 = vmatprep.subr.bf16.mxu0 %v9930_v24  ;;  %v10153_v24 = vcombine.low %v4285_v25, %v4289_v11  ;;  %v10146_v28 = vcombine.high %v4277_v18, %v4281_v53  ;;  %v4141_v29 = vld [vmem:[#allocation8 + $0x348] sm:$0xff] }
 0x2f4   :  { %7362 = vmatpush1.bf16.msra.mxu1 %v10065_v19  ;;  %v10025_v19 = vcombine.low %v4157_v3, %v4161_v22  ;;  %v4145_v30 = vld [vmem:[#allocation8 + $0x368] sm:$0xff] }
 0x2f5   :  { %7363 = vmatprep.subr.bf16.mxu1 %v10058_v26  ;;  %v10018_v26 = vcombine.high %v4149_v12, %v4153_v13  ;;  %v4269_v0 = vld [vmem:[#allocation8 + $0x748] sm:$0xff] }
 0x2f6   :  { %7323 = vmatpush1.bf16.msra.mxu0 %v9929_v32  ;;  %v4273_v32 = vld [vmem:[#allocation8 + $0x768] sm:$0xff] }
 0x2f7   :  { %7324 = vmatprep.subr.bf16.mxu0 %v9922_v59  ;;  %v10145_v59 = vcombine.low %v4277_v18, %v4281_v53  ;;  %v10138_v43 = vcombine.high %v4269_v0, %v4273_v32  ;;  %v4133_v45 = vld [vmem:[#allocation8 + $0x308] sm:$0xff] }
 0x2f8   :  { %7364 = vmatpush1.bf16.msra.mxu1 %v10057_v38  ;;  %v10017_v38 = vcombine.low %v4149_v12, %v4153_v13  ;;  %v4137_v5 = vld [vmem:[#allocation8 + $0x328] sm:$0xff] }
 0x2f9   :  { %7365 = vmatprep.subr.bf16.mxu1 %v10050_v41  ;;  %v10010_v41 = vcombine.high %v4141_v29, %v4145_v30  ;;  %v4261_v48 = vld [vmem:[#allocation8 + $0x708] sm:$0xff] }
 0x2fa   :  { %7325 = vmatpush1.bf16.msra.mxu0 %v9921_v49  ;;  %v4265_v49 = vld [vmem:[#allocation8 + $0x728] sm:$0xff] }
 0x2fb   :  { %7326 = vmatprep.subr.bf16.mxu0 %v9914_v37  ;;  %v10137_v37 = vcombine.low %v4269_v0, %v4273_v32  ;;  %v10130_v52 = vcombine.high %v4261_v48, %v4265_v49  ;;  %v4125_v54 = vld [vmem:[#allocation8 + $0x2c8] sm:$0xff] }
 0x2fc   :  { %7366 = vmatpush1.bf16.msra.mxu1 %v10049_v7  ;;  %v10009_v7 = vcombine.low %v4141_v29, %v4145_v30  ;;  %v4129_v58 = vld [vmem:[#allocation8 + $0x2e8] sm:$0xff]  ;;  %v744_v29 = vsub.s32 6, %v11214_v44 }
 0x2fd   :  { %7367 = vmatprep.subr.bf16.mxu1 %v10042_v14  ;;  %v10002_v14 = vcombine.high %v4133_v45, %v4137_v5  ;;  %v4253_v62 = vld [vmem:[#allocation8 + $0x6c8] sm:$0xff] }
 0x2fe   :  { %7327 = vmatpush1.bf16.msra.mxu0 %v9913_v33  ;;  %v4257_v33 = vld [vmem:[#allocation8 + $0x6e8] sm:$0xff] }
 0x2ff   :  { %7328 = vmatprep.subr.bf16.mxu0 %v9906_v6  ;;  %v10129_v6 = vcombine.low %v4261_v48, %v4265_v49  ;;  %v10122_v3 = vcombine.high %v4253_v62, %v4257_v33  ;;  %v4117_v22 = vld [vmem:[#allocation8 + $0x288] sm:$0xff] }
 0x300   :  { %7368 = vmatpush1.bf16.msra.mxu1 %v10041_v1  ;;  %v10001_v1 = vcombine.low %v4133_v45, %v4137_v5  ;;  %v4121_v25 = vld [vmem:[#allocation8 + $0x2a8] sm:$0xff]  ;;  %v10914_v5 = vld [vmem:[#allocation6] sm:$0xff] }
 0x301   :  { %7369 = vmatprep.subr.bf16.mxu1 %v10034_v2  ;;  %v9994_v2 = vcombine.high %v4125_v54, %v4129_v58  ;;  %v4245_v11 = vld [vmem:[#allocation8 + $0x688] sm:$0xff]  ;;  %v745_v48 = vrot.slane %v10914_v5, %v744_v29 }
 0x302   :  { %7329 = vmatpush1.bf16.msra.mxu0 %v9905_v8  ;;  %v4249_v8 = vld [vmem:[#allocation8 + $0x6a8] sm:$0xff] }
 0x303   :  { %7330 = vmatprep.subr.bf16.mxu0 %v10026_v10  ;;  %v10121_v10 = vcombine.low %v4253_v62, %v4257_v33  ;;  %v10114_v12 = vcombine.high %v4245_v11, %v4249_v8  ;;  %v4109_v13 = vld [vmem:[#allocation8 + $0x248] sm:$0xff]  ;;  %v3845_v62 = vadd.f32 %v11411_v39, %v745_v48 }
 0x304   :  { %7370 = vmatpush1.bf16.msra.mxu1 %v10033_v9  ;;  %v9993_v9 = vcombine.low %v4125_v54, %v4129_v58  ;;  %v4113_v18 = vld [vmem:[#allocation8 + $0x268] sm:$0xff] }
 0x305   :  { %7371 = vmatprep.subr.bf16.mxu1 %v10154_v16  ;;  %v9986_v16 = vcombine.high %v4117_v22, %v4121_v25  ;;  %v4237_v53 = vld [vmem:[#allocation8 + $0x648] sm:$0xff]  ;;  %v3886_v61 = vadd.f32 %v11414_v50, %v3845_v62 }
 0x306   :  { %7331 = vmatpush2.bf16.msra.mxu0 %v10025_v19  ;;  %v4241_v19 = vld [vmem:[#allocation8 + $0x668] sm:$0xff] }
 0x307   :  { %7332 = vmatprep.subr.bf16.mxu0 %v10018_v26  ;;  %v10113_v26 = vcombine.low %v4245_v11, %v4249_v8  ;;  %v10106_v30 = vcombine.high %v4237_v53, %v4241_v19  ;;  %v4101_v0 = vld [vmem:[#allocation8 + $0x208] sm:$0xff]  ;;  %v10105_v45 = vcombine.low %v4237_v53, %v4241_v19 }
 0x308   :  { %7372 = vmatpush2.bf16.msra.mxu1 %v10153_v24  ;;  %v9985_v24 = vcombine.low %v4117_v22, %v4121_v25  ;;  %v4105_v32 = vld [vmem:[#allocation8 + $0x228] sm:$0xff] }
 0x309   :  { %7373 = vmatprep.subr.bf16.mxu1 %v10146_v28  ;;  %v9978_v28 = vcombine.high %v4109_v13, %v4113_v18  ;;  %v9970_v4 = vcombine.high %v4101_v0, %v4105_v32  ;;  %v4333_v8 = vld [vmem:[#allocation8 + $0x948] sm:$0xff] }
 0x30a   :  { %7333 = vmatpush2.bf16.msra.mxu0 %v10017_v38  ;;  %v4229_v38 = vld [vmem:[#allocation8 + $0x608] sm:$0xff] }
 0x30b   :  { %7334 = vmatprep.subr.bf16.mxu0 %v10010_v41  ;;  %v748_v41 = vsub.s32 7, %v11214_v44 }
 0x30c   :  { %7374 = vmatpush2.bf16.msra.mxu1 %v10145_v59  ;;  %v4233_v59 = vld [vmem:[#allocation8 + $0x628] sm:$0xff] }
 0x30d   :  { %7375 = vmatprep.subr.bf16.mxu1 %v10138_v43  ;;  %v9977_v43 = vcombine.low %v4109_v13, %v4113_v18  ;;  %v10098_v49 = vcombine.high %v4229_v38, %v4233_v59  ;;  %v749_v63 = vrot.slane %v10914_v5, %v748_v41  ;;  %v10097_v54 = vcombine.low %v4229_v38, %v4233_v59  ;;  %v4329_v59 = vld [vmem:[#allocation8 + $0x928] sm:$0xff] }
 0x30e   :  { %7335 = vmatpush2.bf16.msra.mxu0 %v10009_v7  ;;  %v4349_v7 = vld [vmem:[#allocation8 + $0x9c8] sm:$0xff] }
 0x30f   :  { %7336 = vmatprep.subr.bf16.mxu0 %v10002_v14  ;;  %v4481_v14 = vld [vmem:[#allocation8 + $0xde8] sm:$0xff]  ;;  %v10218_v58 = vcombine.high %v4349_v7, %v4353_v57  ;;  %v3847_v51 = vadd.f32 %v11417_v35, %v749_v63  ;;  %v10217_v22 = vcombine.low %v4349_v7, %v4353_v57 }
 0x310   :  { %7376 = vmatpush2.bf16.msra.mxu1 %v10137_v37  ;;  %v4477_v37 = vld [vmem:[#allocation8 + $0xdc8] sm:$0xff] }
 0x311   :  { %7377 = vmatprep.subr.bf16.mxu1 %v10130_v52  ;;  %v9969_v52 = vcombine.low %v4101_v0, %v4105_v32  ;;  %v10346_v33 = vcombine.high %v4477_v37, %v4481_v14  ;;  %v10345_v25 = vcombine.low %v4477_v37, %v4481_v14  ;;  %v4461_v35 = vld [vmem:[#allocation8 + $0xd48] sm:$0xff]  ;;  %v3888_v18 = vadd.f32 %v11419_v56, %v3847_v51 }
 0x312   :  { %7337 = vmatpush2.bf16.msra.mxu0 %v10001_v1  ;;  %v4341_v1 = vld [vmem:[#allocation8 + $0x988] sm:$0xff] }
 0x313   :  { %7338 = vmatprep.subr.bf16.mxu0 %v9994_v2  ;;  %v4469_v2 = vld [vmem:[#allocation8 + $0xd88] sm:$0xff] }
 0x314   :  { %7378 = vmatpush2.bf16.msra.mxu1 %v10129_v6  ;;  %v4345_v6 = vld [vmem:[#allocation8 + $0x9a8] sm:$0xff] }
 0x315   :  { %7379 = vmatprep.subr.bf16.mxu1 %v10122_v3  ;;  %v4473_v3 = vld [vmem:[#allocation8 + $0xda8] sm:$0xff]  ;;  %v10210_v11 = vcombine.high %v4341_v1, %v4345_v6  ;;  %v10209_v55 = vcombine.low %v4341_v1, %v4345_v6 }
 0x316   :  { %7339 = vmatpush2.bf16.msra.mxu0 %v9993_v9  ;;  %v10338_v39 = vcombine.high %v4469_v2, %v4473_v3  ;;  %v4337_v9 = vld [vmem:[#allocation8 + $0x968] sm:$0xff] }
 0x317   :  { %7340 = vmatprep.subr.bf16.mxu0 %v9986_v16  ;;  %v4325_v56 = vld [vmem:[#allocation8 + $0x908] sm:$0xff]  ;;  %v10201_v57 = vcombine.low %v4333_v8, %v4337_v9 }
 0x318   :  { %7380 = vmatpush2.bf16.msra.mxu1 %v10121_v10  ;;  %v11438_v10 = vpop.eup %10877  ;;  %v4457_v5 = vld [vmem:[#allocation8 + $0xd28] sm:$0xff] }
 0x319   :  { %7381 = vmatprep.subr.bf16.mxu1 %v10114_v12  ;;  %v4465_v12 = vld [vmem:[#allocation8 + $0xd68] sm:$0xff]  ;;  %v11441_v13 = vpop.eup %10879 }
 0x31a   :  { %7341 = vmatpush2.bf16.msra.mxu0 %v9985_v24  ;;  %v11445_v50 = vpop.eup %10881  ;;  %v10330_v38 = vcombine.high %v4461_v35, %v4465_v12  ;;  %v7815_v48 = vsel %vm7814_vm0, %v11441_v13, 0.0  ;;  %v4317_v1 = vld [vmem:[#allocation8 + $0x8c8] sm:$0xff] }
 0x31b   :  { %7342 = vmatprep.subr.bf16.mxu0 %v9978_v28  ;;  %v10202_v28 = vcombine.high %v4333_v8, %v4337_v9  ;;  %v7818_v37 = vsel %vm7814_vm0, %v11445_v50, 0.0  ;;  %v11455_v14 = vpop.eup %10883  ;;  %v4321_v6 = vld [vmem:[#allocation8 + $0x8e8] sm:$0xff] }
 0x31c   :  { %7382 = vmatpush2.bf16.msra.mxu1 %v10113_v26  ;;  %v10337_v26 = vcombine.low %v4469_v2, %v4473_v3  ;;  %v11457_v2 = vpop.eup %10885  ;;  %v4445_v3 = vld [vmem:[#allocation8 + $0xcc8] sm:$0xff] }
 0x31d   :  { %7383 = vmatprep.subr.bf16.mxu1 %v10106_v30  ;;  %v4449_v51 = vld [vmem:[#allocation8 + $0xce8] sm:$0xff] }
 0x31e   :  { %7343 = vmatpush2.bf16.msra.mxu0 %v9977_v43  ;;  %v7816_v43 = vsel %vm7814_vm0, %v11438_v10, 0.0  ;;  %v10314_v8 = vcombine.high %v4445_v3, %v4449_v51  ;;  %v4309_v9 = vld [vmem:[#allocation8 + $0x888] sm:$0xff] }
 0x31f   :  { %7344 = vmatprep.subr.bf16.mxu0 %v9970_v4  ;;  %v4453_v4 = vld [vmem:[#allocation8 + $0xd08] sm:$0xff] }
 0x320   :  { %7384 = vmatpush2.bf16.msra.mxu1 %v10105_v45 }
 0x321   :  { %7385 = vmatprep.subr.bf16.mxu1 %v10098_v49 }
 0x322   :  { %7345 = vmatpush2.bf16.msra.mxu0 %v9969_v52  ;;  %v10329_v52 = vcombine.low %v4461_v35, %v4465_v12  ;;  %v7822_v35 = vsel %vm7814_vm0, %v11457_v2, 0.0  ;;  %v11463_v12 = vpop.eup %10887 }
 0x323   :  { %7396 = vmatprep.subr.bf16.mxu0 %v10218_v58  ;;  %v7817_v58 = vadd.f32 %v7816_v43, %v7815_v48 }
 0x324   :  { %7386 = vmatpush2.bf16.msra.mxu1 %v10097_v54  ;;  %v10194_v54 = vcombine.high %v4325_v56, %v4329_v59 }
 0x325   :  { %7437 = vmatprep.subr.bf16.mxu1 %v10346_v33  ;;  %v3926_v16 = vpop.f32.mrf.mxu0  ;;  %7347 = vmatmul.mubr.bf16.vlgmr.msra.gmra.mxu0 %v11381_v15  ;;  %v10322_v33 = vcombine.high %v4453_v4, %v4457_v5 }
 0x326   :  { %v3927_v53 = vadd.f32 %v3926_v16, %v3886_v61  ;;  %7397 = vmatpush1.bf16.msra.mxu0 %v10217_v22  ;;  %7428 = vmatprep.mubr.bf16.mxu0 %v11389_v31  ;;  %v7819_v22 = vadd.f32 %v7818_v37, %v7817_v58  ;;  %v10321_v61 = vcombine.low %v4453_v4, %v4457_v5  ;;  %v4313_v16 = vld [vmem:[#allocation8 + $0x8a8] sm:$0xff] }
 0x327   :  { %v3967_v19 = vpop.f32.mrf.mxu1  ;;  %7388 = vmatmul.mubr.bf16.vlgmr.msra.gmra.mxu1 %v11387_v23  ;;  %v3928_v24 = vpop.f32.mrf.mxu0  ;;  %7398 = vmatprep.subr.bf16.mxu0 %v10210_v11  ;;  %v7820_v11 = vsel %vm7814_vm0, %v11455_v14, 0.0  ;;  %v10177_v43 = vcombine.low %v4309_v9, %v4313_v16  ;;  %v4297_v37 = vld [vmem:[#allocation8 + $0x828] sm:$0xff] }
 0x328   :  { %7438 = vmatpush1.bf16.msra.mxu1 %v10345_v25  ;;  %v3968_v30 = vadd.f32 %v3967_v19, %v3927_v53  ;;  %v3929_v0 = vadd.f32 %v3928_v24, %v3888_v18  ;;  %7469 = vmatprep.mubr.bf16.mxu1 %v11392_v40  ;;  %v10193_v25 = vcombine.low %v4325_v56, %v4329_v59  ;;  %v4437_v18 = vld [vmem:[#allocation8 + $0xc88] sm:$0xff] }
 0x329   :  { %v3969_v32 = vpop.f32.mrf.mxu1  ;;  %7439 = vmatprep.subr.bf16.mxu1 %v10338_v39  ;;  %v3930_v45 = vpop.f32.mrf.mxu0  ;;  %v10186_v39 = vcombine.high %v4317_v1, %v4321_v6  ;;  %v4441_v53 = vld [vmem:[#allocation8 + $0xca8] sm:$0xff]  ;;  %v7821_v19 = vadd.f32 %v7820_v11, %v7819_v22  ;;  %v10313_v24 = vcombine.low %v4445_v3, %v4449_v51 }
 0x32a   :  { %10889 = vtanh.f32 %v3968_v30  ;;  %v3970_v49 = vadd.f32 %v3969_v32, %v3929_v0  ;;  %7399 = vmatpush1.bf16.msra.mxu0 %v10209_v55  ;;  %v10185_v55 = vcombine.low %v4317_v1, %v4321_v6  ;;  %v10306_v30 = vcombine.high %v4437_v18, %v4441_v53  ;;  %v4301_v0 = vld [vmem:[#allocation8 + $0x848] sm:$0xff] }
 0x32b   :  { %v3971_v7 = vpop.f32.mrf.mxu1  ;;  %v3931_v63 = vpop.f32.mrf.mxu0  ;;  %7400 = vmatprep.subr.bf16.mxu0 %v10202_v28  ;;  %v7823_v28 = vadd.f32 %v7822_v35, %v7821_v19  ;;  %v4305_v32 = vld [vmem:[#allocation8 + $0x868] sm:$0xff]  ;;  %v10305_v4 = vcombine.low %v4437_v18, %v4441_v53 }
 0x32c   :  { %7440 = vmatpush1.bf16.msra.mxu1 %v10337_v26  ;;  %10891 = vtanh.f32 %v3970_v49  ;;  %v10178_v26 = vcombine.high %v4309_v9, %v4313_v16  ;;  %v4429_v56 = vld [vmem:[#allocation8 + $0xc48] sm:$0xff]  ;;  %v10170_v5 = vcombine.high %v4301_v0, %v4305_v32 }
 0x32d   :  { %v3972_v62 = vpop.f32.mrf.mxu1  ;;  %7441 = vmatprep.subr.bf16.mxu1 %v10330_v38  ;;  %v7824_v38 = vsel %vm7814_vm0, %v11463_v12, 0.0  ;;  %v4433_v59 = vld [vmem:[#allocation8 + $0xc68] sm:$0xff] }
 0x32e   :  { %7401 = vmatpush1.bf16.msra.mxu0 %v10201_v57  ;;  %v7825_v48 = vadd.f32 %v7824_v38, %v7823_v28  ;;  %v10298_v49 = vcombine.high %v4429_v56, %v4433_v59  ;;  %v4293_v57 = vld [vmem:[#allocation8 + $0x808] sm:$0xff]  ;;  %v10169_v62 = vcombine.low %v4301_v0, %v4305_v32  ;;  %v10297_v1 = vcombine.low %v4429_v56, %v4433_v59 }
 0x32f   :  { %7402 = vmatprep.subr.bf16.mxu0 %v10194_v54  ;;  %v4421_v54 = vld [vmem:[#allocation8 + $0xc08] sm:$0xff]  ;;  %v10162_v3 = vcombine.high %v4293_v57, %v4297_v37 }
 0x330   :  { %7442 = vmatpush1.bf16.msra.mxu1 %v10329_v52  ;;  %v4425_v58 = vld [vmem:[#allocation8 + $0xc28] sm:$0xff] }
 0x331   :  { %7443 = vmatprep.subr.bf16.mxu1 %v10322_v33  ;;  %v10290_v51 = vcombine.high %v4421_v54, %v4425_v58  ;;  %v4413_v22 = vld [vmem:[#allocation8 + $0xbc8] sm:$0xff] }
 0x332   :  { %7403 = vmatpush1.bf16.msra.mxu0 %v10193_v25  ;;  %v4417_v25 = vld [vmem:[#allocation8 + $0xbe8] sm:$0xff] }
 0x333   :  { %7404 = vmatprep.subr.bf16.mxu0 %v10186_v39  ;;  %v4541_v11 = vld [vmem:[#allocation8 + $0xfc8] sm:$0xff]  ;;  %v10161_v39 = vcombine.low %v4293_v57, %v4297_v37  ;;  %v10282_v9 = vcombine.high %v4413_v22, %v4417_v25 }
 0x334   :  { %7444 = vmatpush1.bf16.msra.mxu1 %v10321_v61  ;;  %v4545_v61 = vld [vmem:[#allocation8 + $0xfe8] sm:$0xff] }
 0x335   :  { %7445 = vmatprep.subr.bf16.mxu1 %v10314_v8  ;;  %v10289_v8 = vcombine.low %v4421_v54, %v4425_v58  ;;  %v10410_v16 = vcombine.high %v4541_v11, %v4545_v61  ;;  %v4405_v35 = vld [vmem:[#allocation8 + $0xb88] sm:$0xff] }
 0x336   :  { %7405 = vmatpush1.bf16.msra.mxu0 %v10185_v55  ;;  %v4409_v18 = vld [vmem:[#allocation8 + $0xba8] sm:$0xff]  ;;  %v10281_v55 = vcombine.low %v4413_v22, %v4417_v25 }
 0x337   :  { %v11467_v45 = vpop.eup %10889  ;;  %7406 = vmatprep.subr.bf16.mxu0 %v10178_v26  ;;  %v4533_v53 = vld [vmem:[#allocation8 + $0xf88] sm:$0xff]  ;;  %v10274_v26 = vcombine.high %v4405_v35, %v4409_v18  ;;  %v10273_v56 = vcombine.low %v4405_v35, %v4409_v18 }
 0x338   :  { %7446 = vmatpush1.bf16.msra.mxu1 %v10313_v24  ;;  %v7826_v7 = vsel %vm7814_vm0, %v11467_v45, 0.0  ;;  %v4537_v19 = vld [vmem:[#allocation8 + $0xfa8] sm:$0xff]  ;;  %v10409_v24 = vcombine.low %v4541_v11, %v4545_v61 }
 0x339   :  { %7447 = vmatprep.subr.bf16.mxu1 %v10306_v30  ;;  %v11471_v63 = vpop.eup %10891  ;;  %v7827_v52 = vadd.f32 %v7826_v7, %v7825_v48  ;;  %v10402_v28 = vcombine.high %v4533_v53, %v4537_v19  ;;  %v4397_v30 = vld [vmem:[#allocation8 + $0xb48] sm:$0xff]  ;;  %v10401_v59 = vcombine.low %v4533_v53, %v4537_v19 }
 0x33a   :  { %7407 = vmatpush1.bf16.msra.mxu0 %v10177_v43  ;;  %v7828_v33 = vsel %vm7814_vm0, %v11471_v63, 0.0  ;;  %v4401_v0 = vld [vmem:[#allocation8 + $0xb68] sm:$0xff] }
 0x33b   :  { %7408 = vmatprep.subr.bf16.mxu0 %v10170_v5  ;;  %v7829_v6 = vadd.f32 %v7828_v33, %v7827_v52  ;;  %v4525_v32 = vld [vmem:[#allocation8 + $0xf48] sm:$0xff]  ;;  %v10266_v43 = vcombine.high %v4397_v30, %v4401_v0  ;;  %v10265_v57 = vcombine.low %v4397_v30, %v4401_v0 }
 0x33c   :  { %7448 = vmatpush1.bf16.msra.mxu1 %v10305_v4  ;;  %v4529_v38 = vld [vmem:[#allocation8 + $0xf68] sm:$0xff] }
 0x33d   :  { %7449 = vmatprep.subr.bf16.mxu1 %v10298_v49  ;;  %7830 = vadd.xlane.f32.xlu0 %v7829_v6  ;;  %v10394_v4 = vcombine.high %v4525_v32, %v4529_v38  ;;  %v4389_v5 = vld [vmem:[#allocation8 + $0xb08] sm:$0xff]  ;;  %v10393_v37 = vcombine.low %v4525_v32, %v4529_v38 }
 0x33e   :  { %7409 = vmatpush1.bf16.msra.mxu0 %v10169_v62  ;;  %v4393_v48 = vld [vmem:[#allocation8 + $0xb28] sm:$0xff] }
 0x33f   :  { %7410 = vmatprep.subr.bf16.mxu0 %v10162_v3  ;;  %v4517_v49 = vld [vmem:[#allocation8 + $0xf08] sm:$0xff]  ;;  %v10258_v52 = vcombine.high %v4389_v5, %v4393_v48  ;;  %v10257_v6 = vcombine.low %v4389_v5, %v4393_v48  ;;  %v4094_v48 = vld [vmem:[#allocation8 + $0x1d0] sm:$0xff] }
 0x340   :  { %7450 = vmatpush1.bf16.msra.mxu1 %v10297_v1  ;;  %v4521_v7 = vld [vmem:[#allocation8 + $0xf28] sm:$0xff] }
 0x341   :  { %7451 = vmatprep.subr.bf16.mxu1 %v10290_v51  ;;  %v10386_v54 = vcombine.high %v4517_v49, %v4521_v7  ;;  %v4381_v58 = vld [vmem:[#allocation8 + $0xac8] sm:$0xff]  ;;  %v10385_v3 = vcombine.low %v4517_v49, %v4521_v7  ;;  %v4098_v49 = vld [vmem:[#allocation8 + $0x1f0] sm:$0xff] }
 0x342   :  { %7411 = vmatpush1.bf16.msra.mxu0 %v10161_v39  ;;  %v4385_v62 = vld [vmem:[#allocation8 + $0xae8] sm:$0xff]  ;;  %v4222_v7 = vld [vmem:[#allocation8 + $0x5d0] sm:$0xff] }
 0x343   :  { %7412 = vmatprep.subr.bf16.mxu0 %v10282_v9  ;;  %v4509_v33 = vld [vmem:[#allocation8 + $0xec8] sm:$0xff]  ;;  %v10250_v51 = vcombine.high %v4381_v58, %v4385_v62 }
 0x344   :  { %7452 = vmatpush1.bf16.msra.mxu1 %v10289_v8  ;;  %v4513_v1 = vld [vmem:[#allocation8 + $0xee8] sm:$0xff]  ;;  %v10249_v8 = vcombine.low %v4381_v58, %v4385_v62  ;;  %v9964_v58 = vcombine.high %v4094_v48, %v4098_v49 }
 0x345   :  { %7453 = vmatprep.subr.bf16.mxu1 %v10410_v16  ;;  %v10378_v22 = vcombine.high %v4509_v33, %v4513_v1  ;;  %v4373_v25 = vld [vmem:[#allocation8 + $0xa88] sm:$0xff]  ;;  %v10377_v9 = vcombine.low %v4509_v33, %v4513_v1  ;;  %v4086_v33 = vld [vmem:[#allocation8 + $0x190] sm:$0xff] }
 0x346   :  { %7413 = vmatpush2.bf16.msra.mxu0 %v10281_v55  ;;  %v4377_v11 = vld [vmem:[#allocation8 + $0xaa8] sm:$0xff]  ;;  %v4090_v1 = vld [vmem:[#allocation8 + $0x1b0] sm:$0xff] }
 0x347   :  { %7414 = vmatprep.subr.bf16.mxu0 %v10274_v26  ;;  %v4501_v61 = vld [vmem:[#allocation8 + $0xe88] sm:$0xff]  ;;  %v10242_v16 = vcombine.high %v4373_v25, %v4377_v11 }
 0x348   :  { %7454 = vmatpush2.bf16.msra.mxu1 %v10409_v24  ;;  %v4505_v39 = vld [vmem:[#allocation8 + $0xea8] sm:$0xff]  ;;  %v10241_v24 = vcombine.low %v4373_v25, %v4377_v11  ;;  %v9956_v11 = vcombine.high %v4086_v33, %v4090_v1 }
 0x349   :  { %7455 = vmatprep.subr.bf16.mxu1 %v10402_v28  ;;  %v10370_v35 = vcombine.high %v4501_v61, %v4505_v39  ;;  %v4365_v18 = vld [vmem:[#allocation8 + $0xa48] sm:$0xff]  ;;  %v10369_v26 = vcombine.low %v4501_v61, %v4505_v39 }
 0x34a   :  { %7415 = vmatpush2.bf16.msra.mxu0 %v10273_v56  ;;  %v4369_v53 = vld [vmem:[#allocation8 + $0xa68] sm:$0xff] }
 0x34b   :  { %7416 = vmatprep.subr.bf16.mxu0 %v10266_v43  ;;  %v4493_v19 = vld [vmem:[#allocation8 + $0xe48] sm:$0xff]  ;;  %v10234_v28 = vcombine.high %v4365_v18, %v4369_v53 }
 0x34c   :  { %7456 = vmatpush2.bf16.msra.mxu1 %v10401_v59  ;;  %v4497_v55 = vld [vmem:[#allocation8 + $0xe68] sm:$0xff]  ;;  %v10233_v59 = vcombine.low %v4365_v18, %v4369_v53  ;;  %v4210_v18 = vld [vmem:[#allocation8 + $0x570] sm:$0xff] }
 0x34d   :  { %7457 = vmatprep.subr.bf16.mxu1 %v10394_v4  ;;  %v10362_v30 = vcombine.high %v4493_v19, %v4497_v55  ;;  %v4357_v0 = vld [vmem:[#allocation8 + $0xa08] sm:$0xff]  ;;  %v10361_v43 = vcombine.low %v4493_v19, %v4497_v55  ;;  %v9955_v19 = vcombine.low %v4086_v33, %v4090_v1  ;;  %v4190_v33 = vld [vmem:[#allocation8 + $0x4d0] sm:$0xff] }
 0x34e   :  { %7417 = vmatpush2.bf16.msra.mxu0 %v10265_v57  ;;  %v4361_v32 = vld [vmem:[#allocation8 + $0xa28] sm:$0xff]  ;;  %v4226_v57 = vld [vmem:[#allocation8 + $0x5f0] sm:$0xff] }
 0x34f   :  { %7418 = vmatprep.subr.bf16.mxu0 %v10258_v52  ;;  %v4485_v38 = vld [vmem:[#allocation8 + $0xe08] sm:$0xff]  ;;  %v10226_v4 = vcombine.high %v4357_v0, %v4361_v32  ;;  %v10092_v62 = vcombine.high %v4222_v7, %v4226_v57  ;;  %v10091_v25 = vcombine.low %v4222_v7, %v4226_v57  ;;  %v4194_v1 = vld [vmem:[#allocation8 + $0x4f0] sm:$0xff] }
 0x350   :  { %7458 = vmatpush2.bf16.msra.mxu1 %v10393_v37  ;;  %v4489_v56 = vld [vmem:[#allocation8 + $0xe28] sm:$0xff]  ;;  %v10225_v37 = vcombine.low %v4357_v0, %v4361_v32  ;;  %v4070_v32 = vld [vmem:[#allocation8 + $0x110] sm:$0xff] }
 0x351   :  { %7459 = vmatprep.subr.bf16.mxu1 %v10386_v54  ;;  %v10354_v5 = vcombine.high %v4485_v38, %v4489_v56  ;;  %v10353_v52 = vcombine.low %v4485_v38, %v4489_v56  ;;  %v11475_v54 = vld [vmem:[#allocation9] sm:$0xff]  ;;  %v4074_v38 = vld [vmem:[#allocation8 + $0x130] sm:$0xff] }
 0x352   :  { %7419 = vmatpush2.bf16.msra.mxu0 %v10257_v6  ;;  %v4214_v6 = vld [vmem:[#allocation8 + $0x590] sm:$0xff]  ;;  %v4557_v61 = vrot.slane %v11475_v54, %v724_v42  ;;  %v9940_v57 = vcombine.high %v4070_v32, %v4074_v38 }
 0x353   :  { %7420 = vmatprep.subr.bf16.mxu0 %v10250_v51  ;;  %v4553_v51 = vrot.slane %v11475_v54, %v720_v36 }
 0x354   :  { %7460 = vmatpush2.bf16.msra.mxu1 %v10385_v3  ;;  %v4218_v3 = vld [vmem:[#allocation8 + $0x5b0] sm:$0xff] }
 0x355   :  { %7461 = vmatprep.subr.bf16.mxu1 %v10378_v22  ;;  %v9963_v22 = vcombine.low %v4094_v48, %v4098_v49  ;;  %v10084_v39 = vcombine.high %v4214_v6, %v4218_v3 }
 0x356   :  { %7421 = vmatpush2.bf16.msra.mxu0 %v10249_v8  ;;  %v4078_v8 = vld [vmem:[#allocation8 + $0x150] sm:$0xff] }
 0x357   :  { %7422 = vmatprep.subr.bf16.mxu0 %v10242_v16 }
 0x358   :  { %7462 = vmatpush2.bf16.msra.mxu1 %v10377_v9  ;;  %v4082_v9 = vld [vmem:[#allocation8 + $0x170] sm:$0xff] }
 0x359   :  { %7463 = vmatprep.subr.bf16.mxu1 %v10370_v35  ;;  %v4206_v35 = vld [vmem:[#allocation8 + $0x550] sm:$0xff]  ;;  %v9947_v48 = vcombine.low %v4078_v8, %v4082_v9 }
 0x35a   :  { %7423 = vmatpush2.bf16.msra.mxu0 %v10241_v24  ;;  %v10083_v24 = vcombine.low %v4214_v6, %v4218_v3  ;;  %v10076_v0 = vcombine.high %v4206_v35, %v4210_v18  ;;  %v10075_v7 = vcombine.low %v4206_v35, %v4210_v18  ;;  %v9939_v6 = vcombine.low %v4070_v32, %v4074_v38  ;;  %v4046_v18 = vld [vmem:[#allocation8 + $0x50] sm:$0xff] }
 0x35b   :  { %7424 = vmatprep.subr.bf16.mxu0 %v10234_v28  ;;  %v4166_v32 = vld [vmem:[#allocation8 + $0x410] sm:$0xff] }
 0x35c   :  { %7464 = vmatpush2.bf16.msra.mxu1 %v10369_v26  ;;  %v9948_v26 = vcombine.high %v4078_v8, %v4082_v9  ;;  %v10059_v9 = vcombine.low %v4190_v33, %v4194_v1  ;;  %v4170_v38 = vld [vmem:[#allocation8 + $0x430] sm:$0xff] }
 0x35d   :  { %7465 = vmatprep.subr.bf16.mxu1 %v10362_v30 }
 0x35e   :  { %7425 = vmatpush2.bf16.msra.mxu0 %v10233_v59  ;;  %v4198_v59 = vld [vmem:[#allocation8 + $0x510] sm:$0xff] }
 0x35f   :  { %7426 = vmatprep.subr.bf16.mxu0 %v10226_v4 }
 0x360   :  { %7466 = vmatpush2.bf16.msra.mxu1 %v10361_v43  ;;  %v4202_v43 = vld [vmem:[#allocation8 + $0x530] sm:$0xff] }
 0x361   :  { %7467 = vmatprep.subr.bf16.mxu1 %v10354_v5  ;;  %v10067_v3 = vcombine.low %v4198_v59, %v4202_v43 }
 0x362   :  { %7427 = vmatpush2.bf16.msra.mxu0 %v10225_v37 }
 0x363   :  { %7478 = vmatprep.subr.bf16.mxu0 %v9964_v58  ;;  %v4062_v58 = vld [vmem:[#allocation8 + $0xd0] sm:$0xff] }
 0x364   :  { %7468 = vmatpush2.bf16.msra.mxu1 %v10353_v52  ;;  %v10068_v52 = vcombine.high %v4198_v59, %v4202_v43 }
 0x365   :  { %7519 = vmatprep.subr.bf16.mxu1 %v10092_v62  ;;  %v7184_v16 = vpop.f32.mrf.mxu0  ;;  %7429 = vmatmul.mubr.bf16.vlgmr.msra.gmra.mxu0 %v11405_v34  ;;  %v4066_v62 = vld [vmem:[#allocation8 + $0xf0] sm:$0xff] }
 0x366   :  { %v7185_v53 = vadd.f32 %v7184_v16, %v4553_v51  ;;  %7479 = vmatpush1.bf16.msra.mxu0 %v9963_v22  ;;  %7510 = vmatprep.mubr.bf16.mxu0 %v11356_v20  ;;  %v9932_v51 = vcombine.high %v4062_v58, %v4066_v62  ;;  %v10060_v22 = vcombine.high %v4190_v33, %v4194_v1  ;;  %v4150_v33 = vld [vmem:[#allocation8 + $0x390] sm:$0xff] }
 0x367   :  { %v7225_v36 = vpop.f32.mrf.mxu1  ;;  %7470 = vmatmul.mubr.bf16.vlgmr.msra.gmra.mxu1 %v11409_v60  ;;  %v7186_v55 = vpop.f32.mrf.mxu0  ;;  %7480 = vmatprep.subr.bf16.mxu0 %v9956_v11  ;;  %v4058_v11 = vld [vmem:[#allocation8 + $0xb0] sm:$0xff]  ;;  %v9931_v8 = vcombine.low %v4062_v58, %v4066_v62 }
 0x368   :  { %7520 = vmatpush1.bf16.msra.mxu1 %v10091_v25  ;;  %v11485_v42 = vadd.f32 %v7225_v36, %v7185_v53  ;;  %v7187_v28 = vadd.f32 %v7186_v55, %v4557_v61  ;;  %7551 = vmatprep.mubr.bf16.mxu1 %v11359_v27  ;;  %v4054_v25 = vld [vmem:[#allocation8 + $0x90] sm:$0xff] }
 0x369   :  { %v7227_v30 = vpop.f32.mrf.mxu1  ;;  %7521 = vmatprep.subr.bf16.mxu1 %v10084_v39  ;;  %v7188_v56 = vpop.f32.mrf.mxu0  ;;  %v4182_v61 = vld [vmem:[#allocation8 + $0x490] sm:$0xff]  ;;  %v9924_v16 = vcombine.high %v4054_v25, %v4058_v11  ;;  %v9923_v55 = vcombine.low %v4054_v25, %v4058_v11 }
 0x36a   :  { %v11489_v4 = vadd.f32 %v7227_v30, %v7187_v28  ;;  %7481 = vmatpush1.bf16.msra.mxu0 %v9955_v19  ;;  %v4186_v39 = vld [vmem:[#allocation8 + $0x4b0] sm:$0xff] }
 0x36b   :  { %v7229_v5 = vpop.f32.mrf.mxu1  ;;  %v7189_v49 = vpop.f32.mrf.mxu0  ;;  %7482 = vmatprep.subr.bf16.mxu0 %v9948_v26  ;;  %v10052_v35 = vcombine.high %v4182_v61, %v4186_v39  ;;  %v4050_v53 = vld [vmem:[#allocation8 + $0x70] sm:$0xff] }
 0x36c   :  { %7522 = vmatpush1.bf16.msra.mxu1 %v10083_v24  ;;  %v4174_v36 = vld [vmem:[#allocation8 + $0x450] sm:$0xff]  ;;  %v10051_v24 = vcombine.low %v4182_v61, %v4186_v39  ;;  %v9916_v26 = vcombine.high %v4046_v18, %v4050_v53  ;;  %v9915_v56 = vcombine.low %v4046_v18, %v4050_v53  ;;  %v10036_v5 = vcombine.high %v4166_v32, %v4170_v38 }
 0x36d   :  { %v7230_v37 = vpop.f32.mrf.mxu1  ;;  %7523 = vmatprep.subr.bf16.mxu1 %v10076_v0  ;;  %v4178_v19 = vld [vmem:[#allocation8 + $0x470] sm:$0xff] }
 0x36e   :  { %7483 = vmatpush1.bf16.msra.mxu0 %v9947_v48  ;;  %v10044_v28 = vcombine.high %v4174_v36, %v4178_v19  ;;  %v4038_v30 = vld [vmem:[#allocation8 + $0x10] sm:$0xff]  ;;  %v10043_v59 = vcombine.low %v4174_v36, %v4178_v19 }
 0x36f   :  { %7484 = vmatprep.subr.bf16.mxu0 %v9940_v57  ;;  %v4042_v0 = vld [vmem:[#allocation8 + $0x30] sm:$0xff] }
 0x370   :  { %7524 = vmatpush1.bf16.msra.mxu1 %v10075_v7  ;;  %v9908_v43 = vcombine.high %v4038_v30, %v4042_v0  ;;  %v4158_v48 = vld [vmem:[#allocation8 + $0x3d0] sm:$0xff]  ;;  %v9907_v37 = vcombine.low %v4038_v30, %v4042_v0 }
 0x371   :  { %7525 = vmatprep.subr.bf16.mxu1 %v10068_v52  ;;  %v4162_v49 = vld [vmem:[#allocation8 + $0x3f0] sm:$0xff]  ;;  %v10035_v52 = vcombine.low %v4166_v32, %v4170_v38 }
 0x372   :  { %7485 = vmatpush1.bf16.msra.mxu0 %v9939_v6  ;;  %v4286_v7 = vld [vmem:[#allocation8 + $0x7d0] sm:$0xff]  ;;  %v10028_v58 = vcombine.high %v4158_v48, %v4162_v49 }
 0x373   :  { %7486 = vmatprep.subr.bf16.mxu0 %v9932_v51  ;;  %v4290_v57 = vld [vmem:[#allocation8 + $0x7f0] sm:$0xff]  ;;  %v10027_v51 = vcombine.low %v4158_v48, %v4162_v49 }
 0x374   :  { %7526 = vmatpush1.bf16.msra.mxu1 %v10067_v3  ;;  %v10156_v62 = vcombine.high %v4286_v7, %v4290_v57  ;;  %v4154_v1 = vld [vmem:[#allocation8 + $0x3b0] sm:$0xff] }
 0x375   :  { %7527 = vmatprep.subr.bf16.mxu1 %v10060_v22  ;;  %v4278_v6 = vld [vmem:[#allocation8 + $0x790] sm:$0xff]  ;;  %v10155_v22 = vcombine.low %v4286_v7, %v4290_v57  ;;  %v10020_v25 = vcombine.high %v4150_v33, %v4154_v1 }
 0x376   :  { %7487 = vmatpush1.bf16.msra.mxu0 %v9931_v8  ;;  %v4282_v3 = vld [vmem:[#allocation8 + $0x7b0] sm:$0xff] }
 0x377   :  { %7488 = vmatprep.subr.bf16.mxu0 %v9924_v16  ;;  %v10148_v11 = vcombine.high %v4278_v6, %v4282_v3  ;;  %v4142_v61 = vld [vmem:[#allocation8 + $0x350] sm:$0xff]  ;;  %v10019_v16 = vcombine.low %v4150_v33, %v4154_v1 }
 0x378   :  { %7528 = vmatpush1.bf16.msra.mxu1 %v10059_v9  ;;  %v4146_v39 = vld [vmem:[#allocation8 + $0x370] sm:$0xff] }
 0x379   :  { %7529 = vmatprep.subr.bf16.mxu1 %v10052_v35  ;;  %v4270_v8 = vld [vmem:[#allocation8 + $0x750] sm:$0xff]  ;;  %v10147_v35 = vcombine.low %v4278_v6, %v4282_v3  ;;  %v10012_v18 = vcombine.high %v4142_v61, %v4146_v39 }
 0x37a   :  { %7489 = vmatpush1.bf16.msra.mxu0 %v9923_v55  ;;  %v4274_v9 = vld [vmem:[#allocation8 + $0x770] sm:$0xff] }
 0x37b   :  { %7490 = vmatprep.subr.bf16.mxu0 %v9916_v26  ;;  %v10140_v53 = vcombine.high %v4270_v8, %v4274_v9  ;;  %v4134_v36 = vld [vmem:[#allocation8 + $0x310] sm:$0xff]  ;;  %v10011_v26 = vcombine.low %v4142_v61, %v4146_v39 }
 0x37c   :  { %7530 = vmatpush1.bf16.msra.mxu1 %v10051_v24  ;;  %v4138_v19 = vld [vmem:[#allocation8 + $0x330] sm:$0xff] }
 0x37d   :  { %7531 = vmatprep.subr.bf16.mxu1 %v10044_v28  ;;  %v4262_v55 = vld [vmem:[#allocation8 + $0x710] sm:$0xff]  ;;  %v10139_v28 = vcombine.low %v4270_v8, %v4274_v9  ;;  %v10004_v30 = vcombine.high %v4134_v36, %v4138_v19 }
 0x37e   :  { %7491 = vmatpush1.bf16.msra.mxu0 %v9915_v56  ;;  %v4266_v24 = vld [vmem:[#allocation8 + $0x730] sm:$0xff] }
 0x37f   :  { %7492 = vmatprep.subr.bf16.mxu0 %v9908_v43  ;;  %v10132_v0 = vcombine.high %v4262_v55, %v4266_v24  ;;  %v4126_v32 = vld [vmem:[#allocation8 + $0x2d0] sm:$0xff]  ;;  %v10003_v43 = vcombine.low %v4134_v36, %v4138_v19 }
 0x380   :  { %7532 = vmatpush1.bf16.msra.mxu1 %v10043_v59  ;;  %v4130_v38 = vld [vmem:[#allocation8 + $0x2f0] sm:$0xff] }
 0x381   :  { %7533 = vmatprep.subr.bf16.mxu1 %v10036_v5  ;;  %v4254_v56 = vld [vmem:[#allocation8 + $0x6d0] sm:$0xff]  ;;  %v10131_v5 = vcombine.low %v4262_v55, %v4266_v24  ;;  %v9996_v48 = vcombine.high %v4126_v32, %v4130_v38 }
 0x382   :  { %7493 = vmatpush1.bf16.msra.mxu0 %v9907_v37  ;;  %v4258_v59 = vld [vmem:[#allocation8 + $0x6f0] sm:$0xff] }
 0x383   :  { %7494 = vmatprep.subr.bf16.mxu0 %v10028_v58  ;;  %v10124_v49 = vcombine.high %v4254_v56, %v4258_v59  ;;  %v4118_v7 = vld [vmem:[#allocation8 + $0x290] sm:$0xff]  ;;  %v9995_v58 = vcombine.low %v4126_v32, %v4130_v38 }
 0x384   :  { %7534 = vmatpush1.bf16.msra.mxu1 %v10035_v52  ;;  %v4122_v57 = vld [vmem:[#allocation8 + $0x2b0] sm:$0xff] }
 0x385   :  { %7535 = vmatprep.subr.bf16.mxu1 %v10156_v62  ;;  %v4246_v37 = vld [vmem:[#allocation8 + $0x690] sm:$0xff]  ;;  %v10123_v62 = vcombine.low %v4254_v56, %v4258_v59  ;;  %v9988_v33 = vcombine.high %v4118_v7, %v4122_v57 }
 0x386   :  { %7495 = vmatpush2.bf16.msra.mxu0 %v10027_v51  ;;  %v4250_v52 = vld [vmem:[#allocation8 + $0x6b0] sm:$0xff] }
 0x387   :  { %7496 = vmatprep.subr.bf16.mxu0 %v10020_v25  ;;  %v10116_v1 = vcombine.high %v4246_v37, %v4250_v52  ;;  %v4110_v6 = vld [vmem:[#allocation8 + $0x250] sm:$0xff]  ;;  %v9987_v25 = vcombine.low %v4118_v7, %v4122_v57 }
 0x388   :  { %7536 = vmatpush2.bf16.msra.mxu1 %v10155_v22  ;;  %v4114_v3 = vld [vmem:[#allocation8 + $0x270] sm:$0xff] }
 0x389   :  { %7537 = vmatprep.subr.bf16.mxu1 %v10148_v11  ;;  %v4238_v51 = vld [vmem:[#allocation8 + $0x650] sm:$0xff]  ;;  %v10115_v11 = vcombine.low %v4246_v37, %v4250_v52  ;;  %v9980_v61 = vcombine.high %v4110_v6, %v4114_v3 }
 0x38a   :  { %7497 = vmatpush2.bf16.msra.mxu0 %v10019_v16  ;;  %v4242_v22 = vld [vmem:[#allocation8 + $0x670] sm:$0xff] }
 0x38b   :  { %7498 = vmatprep.subr.bf16.mxu0 %v10012_v18  ;;  %v10108_v39 = vcombine.high %v4238_v51, %v4242_v22  ;;  %v4102_v8 = vld [vmem:[#allocation8 + $0x210] sm:$0xff]  ;;  %v9979_v18 = vcombine.low %v4110_v6, %v4114_v3 }
 0x38c   :  { %7538 = vmatpush2.bf16.msra.mxu1 %v10147_v35  ;;  %v4106_v9 = vld [vmem:[#allocation8 + $0x230] sm:$0xff] }
 0x38d   :  { %7539 = vmatprep.subr.bf16.mxu1 %v10140_v53  ;;  %v4230_v16 = vld [vmem:[#allocation8 + $0x610] sm:$0xff]  ;;  %v10107_v53 = vcombine.low %v4238_v51, %v4242_v22  ;;  %v9972_v36 = vcombine.high %v4102_v8, %v4106_v9 }
 0x38e   :  { %7499 = vmatpush2.bf16.msra.mxu0 %v10011_v26  ;;  %v4234_v35 = vld [vmem:[#allocation8 + $0x630] sm:$0xff] }
 0x38f   :  { %7500 = vmatprep.subr.bf16.mxu0 %v10004_v30  ;;  %v10100_v19 = vcombine.high %v4230_v16, %v4234_v35  ;;  %v4350_v55 = vld [vmem:[#allocation8 + $0x9d0] sm:$0xff]  ;;  %v9971_v30 = vcombine.low %v4102_v8, %v4106_v9 }
 0x390   :  { %7540 = vmatpush2.bf16.msra.mxu1 %v10139_v28  ;;  %v4354_v24 = vld [vmem:[#allocation8 + $0x9f0] sm:$0xff] }
 0x391   :  { %7541 = vmatprep.subr.bf16.mxu1 %v10132_v0  ;;  %v4478_v26 = vld [vmem:[#allocation8 + $0xdd0] sm:$0xff]  ;;  %v10099_v0 = vcombine.low %v4230_v16, %v4234_v35  ;;  %v10220_v32 = vcombine.high %v4350_v55, %v4354_v24 }
 0x392   :  { %7501 = vmatpush2.bf16.msra.mxu0 %v10003_v43  ;;  %v4482_v28 = vld [vmem:[#allocation8 + $0xdf0] sm:$0xff] }
 0x393   :  { %7502 = vmatprep.subr.bf16.mxu0 %v9996_v48  ;;  %v10348_v38 = vcombine.high %v4478_v26, %v4482_v28  ;;  %v4342_v56 = vld [vmem:[#allocation8 + $0x990] sm:$0xff]  ;;  %v10219_v48 = vcombine.low %v4350_v55, %v4354_v24 }
 0x394   :  { %7542 = vmatpush2.bf16.msra.mxu1 %v10131_v5  ;;  %v4346_v59 = vld [vmem:[#allocation8 + $0x9b0] sm:$0xff] }
 0x395   :  { %7543 = vmatprep.subr.bf16.mxu1 %v10124_v49  ;;  %v4470_v43 = vld [vmem:[#allocation8 + $0xd90] sm:$0xff]  ;;  %v10347_v49 = vcombine.low %v4478_v26, %v4482_v28  ;;  %v10212_v7 = vcombine.high %v4342_v56, %v4346_v59  ;;  %v10211_v3 = vcombine.low %v4342_v56, %v4346_v59 }
 0x396   :  { %7503 = vmatpush2.bf16.msra.mxu0 %v9995_v58  ;;  %v4474_v5 = vld [vmem:[#allocation8 + $0xdb0] sm:$0xff] }
 0x397   :  { %7504 = vmatprep.subr.bf16.mxu0 %v9988_v33  ;;  %v10340_v57 = vcombine.high %v4470_v43, %v4474_v5  ;;  %v4334_v37 = vld [vmem:[#allocation8 + $0x950] sm:$0xff]  ;;  %v10339_v22 = vcombine.low %v4470_v43, %v4474_v5 }
 0x398   :  { %7544 = vmatpush2.bf16.msra.mxu1 %v10123_v62  ;;  %v4338_v52 = vld [vmem:[#allocation8 + $0x970] sm:$0xff] }
 0x399   :  { %7545 = vmatprep.subr.bf16.mxu1 %v10116_v1  ;;  %v4462_v62 = vld [vmem:[#allocation8 + $0xd50] sm:$0xff] }
 0x39a   :  { %7505 = vmatpush2.bf16.msra.mxu0 %v9987_v25  ;;  %v4466_v33 = vld [vmem:[#allocation8 + $0xd70] sm:$0xff]  ;;  %v10204_v25 = vcombine.high %v4334_v37, %v4338_v52 }
 0x39b   :  { %7506 = vmatprep.subr.bf16.mxu0 %v9980_v61  ;;  %v10332_v8 = vcombine.high %v4462_v62, %v4466_v33  ;;  %v4326_v9 = vld [vmem:[#allocation8 + $0x910] sm:$0xff] }
 0x39c   :  { %7546 = vmatpush2.bf16.msra.mxu1 %v10115_v11  ;;  %v4330_v16 = vld [vmem:[#allocation8 + $0x930] sm:$0xff] }
 0x39d   :  { %7547 = vmatprep.subr.bf16.mxu1 %v10108_v39  ;;  %v4454_v35 = vld [vmem:[#allocation8 + $0xd10] sm:$0xff]  ;;  %v10196_v24 = vcombine.high %v4326_v9, %v4330_v16  ;;  %v10195_v56 = vcombine.low %v4326_v9, %v4330_v16 }
 0x39e   :  { %7507 = vmatpush2.bf16.msra.mxu0 %v9979_v18  ;;  %v4458_v18 = vld [vmem:[#allocation8 + $0xd30] sm:$0xff] }
 0x39f   :  { %7508 = vmatprep.subr.bf16.mxu0 %v9972_v36  ;;  %v10324_v28 = vcombine.high %v4454_v35, %v4458_v18  ;;  %v10323_v59 = vcombine.low %v4454_v35, %v4458_v18  ;;  %v4422_v9 = vld [vmem:[#allocation8 + $0xc10] sm:$0xff] }
 0x3a0   :  { %7548 = vmatpush2.bf16.msra.mxu1 %v10107_v53  ;;  %v4426_v16 = vld [vmem:[#allocation8 + $0xc30] sm:$0xff] }
 0x3a1   :  { %7549 = vmatprep.subr.bf16.mxu1 %v10100_v19  ;;  %v10203_v19 = vcombine.low %v4334_v37, %v4338_v52 }
 0x3a2   :  { %7509 = vmatpush2.bf16.msra.mxu0 %v9971_v30  ;;  %v4318_v30 = vld [vmem:[#allocation8 + $0x8d0] sm:$0xff] }
 0x3a3   :  { %7560 = vmatprep.subr.bf16.mxu0 %v10220_v32  ;;  %v4446_v32 = vld [vmem:[#allocation8 + $0xcd0] sm:$0xff] }
 0x3a4   :  { %7550 = vmatpush2.bf16.msra.mxu1 %v10099_v0  ;;  %v4322_v0 = vld [vmem:[#allocation8 + $0x8f0] sm:$0xff] }
 0x3a5   :  { %7601 = vmatprep.subr.bf16.mxu1 %v10348_v38  ;;  %v7266_v58 = vpop.f32.mrf.mxu0  ;;  %7511 = vmatmul.mubr.bf16.vlgmr.msra.gmra.mxu0 %v11381_v15  ;;  %v4450_v38 = vld [vmem:[#allocation8 + $0xcf0] sm:$0xff]  ;;  %v10188_v43 = vcombine.high %v4318_v30, %v4322_v0  ;;  %v10187_v37 = vcombine.low %v4318_v30, %v4322_v0 }
 0x3a6   :  { %v7267_v1 = vadd.f32 %v7266_v58, %v11485_v42  ;;  %7561 = vmatpush1.bf16.msra.mxu0 %v10219_v48  ;;  %7592 = vmatprep.mubr.bf16.mxu0 %v11389_v31  ;;  %v10316_v5 = vcombine.high %v4446_v32, %v4450_v38  ;;  %v4310_v48 = vld [vmem:[#allocation8 + $0x890] sm:$0xff]  ;;  %v10315_v52 = vcombine.low %v4446_v32, %v4450_v38 }
 0x3a7   :  { %v7307_v6 = vpop.f32.mrf.mxu1  ;;  %7552 = vmatmul.mubr.bf16.vlgmr.msra.gmra.mxu1 %v11387_v23  ;;  %v7268_v51 = vpop.f32.mrf.mxu0  ;;  %7562 = vmatprep.subr.bf16.mxu0 %v10212_v7  ;;  %v4438_v7 = vld [vmem:[#allocation8 + $0xc90] sm:$0xff] }
 0x3a8   :  { %7602 = vmatpush1.bf16.msra.mxu1 %v10347_v49  ;;  %v11494_v11 = vadd.f32 %v7307_v6, %v7267_v1  ;;  %v7269_v61 = vadd.f32 %v7268_v51, %v11489_v4  ;;  %7633 = vmatprep.mubr.bf16.mxu1 %v11392_v40  ;;  %v10331_v4 = vcombine.low %v4462_v62, %v4466_v33  ;;  %v4314_v49 = vld [vmem:[#allocation8 + $0x8b0] sm:$0xff] }
 0x3a9   :  { %v7309_v39 = vpop.f32.mrf.mxu1  ;;  %7603 = vmatprep.subr.bf16.mxu1 %v10340_v57  ;;  %v7270_v42 = vpop.f32.mrf.mxu0  ;;  %v4442_v57 = vld [vmem:[#allocation8 + $0xcb0] sm:$0xff]  ;;  %v10180_v58 = vcombine.high %v4310_v48, %v4314_v49  ;;  %v10179_v51 = vcombine.low %v4310_v48, %v4314_v49 }
 0x3aa   :  { %v11499_v53 = vadd.f32 %v7309_v39, %v7269_v61  ;;  %7563 = vmatpush1.bf16.msra.mxu0 %v10211_v3  ;;  %v10308_v62 = vcombine.high %v4438_v7, %v4442_v57  ;;  %v4302_v33 = vld [vmem:[#allocation8 + $0x850] sm:$0xff] }
 0x3ab   :  { %v7311_v36 = vpop.f32.mrf.mxu1  ;;  %v7271_v55 = vpop.f32.mrf.mxu0  ;;  %7564 = vmatprep.subr.bf16.mxu0 %v10204_v25  ;;  %v4306_v1 = vld [vmem:[#allocation8 + $0x870] sm:$0xff] }
 0x3ac   :  { %7604 = vmatpush1.bf16.msra.mxu1 %v10339_v22  ;;  %v4430_v6 = vld [vmem:[#allocation8 + $0xc50] sm:$0xff]  ;;  %v10307_v22 = vcombine.low %v4438_v7, %v4442_v57  ;;  %v10172_v25 = vcombine.high %v4302_v33, %v4306_v1  ;;  %v10171_v42 = vcombine.low %v4302_v33, %v4306_v1  ;;  %v10292_v36 = vcombine.high %v4422_v9, %v4426_v16 }
 0x3ad   :  { %v7312_v26 = vpop.f32.mrf.mxu1  ;;  %7605 = vmatprep.subr.bf16.mxu1 %v10332_v8  ;;  %v4434_v3 = vld [vmem:[#allocation8 + $0xc70] sm:$0xff] }
 0x3ae   :  { %7565 = vmatpush1.bf16.msra.mxu0 %v10203_v19  ;;  %v10300_v61 = vcombine.high %v4430_v6, %v4434_v3  ;;  %v4294_v39 = vld [vmem:[#allocation8 + $0x810] sm:$0xff]  ;;  %v10299_v35 = vcombine.low %v4430_v6, %v4434_v3 }
 0x3af   :  { %7566 = vmatprep.subr.bf16.mxu0 %v10196_v24  ;;  %v4298_v8 = vld [vmem:[#allocation8 + $0x830] sm:$0xff] }
 0x3b0   :  { %7606 = vmatpush1.bf16.msra.mxu1 %v10331_v4  ;;  %v10164_v18 = vcombine.high %v4294_v39, %v4298_v8  ;;  %v4414_v19 = vld [vmem:[#allocation8 + $0xbd0] sm:$0xff]  ;;  %v10163_v26 = vcombine.low %v4294_v39, %v4298_v8 }
 0x3b1   :  { %7607 = vmatprep.subr.bf16.mxu1 %v10324_v28  ;;  %v4418_v55 = vld [vmem:[#allocation8 + $0xbf0] sm:$0xff]  ;;  %v10291_v28 = vcombine.low %v4422_v9, %v4426_v16 }
 0x3b2   :  { %7567 = vmatpush1.bf16.msra.mxu0 %v10195_v56  ;;  %v4542_v4 = vld [vmem:[#allocation8 + $0xfd0] sm:$0xff]  ;;  %v10284_v30 = vcombine.high %v4414_v19, %v4418_v55 }
 0x3b3   :  { %7568 = vmatprep.subr.bf16.mxu0 %v10188_v43  ;;  %v4546_v24 = vld [vmem:[#allocation8 + $0xff0] sm:$0xff]  ;;  %v10283_v43 = vcombine.low %v4414_v19, %v4418_v55 }
 0x3b4   :  { %7608 = vmatpush1.bf16.msra.mxu1 %v10323_v59  ;;  %v10412_v0 = vcombine.high %v4542_v4, %v4546_v24  ;;  %v4406_v32 = vld [vmem:[#allocation8 + $0xb90] sm:$0xff] }
 0x3b5   :  { %7609 = vmatprep.subr.bf16.mxu1 %v10316_v5  ;;  %v4410_v38 = vld [vmem:[#allocation8 + $0xbb0] sm:$0xff]  ;;  %v10411_v5 = vcombine.low %v4542_v4, %v4546_v24 }
 0x3b6   :  { %7569 = vmatpush1.bf16.msra.mxu0 %v10187_v37  ;;  %v4534_v56 = vld [vmem:[#allocation8 + $0xf90] sm:$0xff]  ;;  %v10276_v48 = vcombine.high %v4406_v32, %v4410_v38 }
 0x3b7   :  { %7570 = vmatprep.subr.bf16.mxu0 %v10180_v58  ;;  %v4538_v59 = vld [vmem:[#allocation8 + $0xfb0] sm:$0xff] }
 0x3b8   :  { %7610 = vmatpush1.bf16.msra.mxu1 %v10315_v52  ;;  %v10404_v49 = vcombine.high %v4534_v56, %v4538_v59  ;;  %v4398_v7 = vld [vmem:[#allocation8 + $0xb50] sm:$0xff]  ;;  %v10403_v1 = vcombine.low %v4534_v56, %v4538_v59 }
 0x3b9   :  { %7611 = vmatprep.subr.bf16.mxu1 %v10308_v62  ;;  %v4402_v57 = vld [vmem:[#allocation8 + $0xb70] sm:$0xff]  ;;  %v10275_v62 = vcombine.low %v4406_v32, %v4410_v38 }
 0x3ba   :  { %7571 = vmatpush1.bf16.msra.mxu0 %v10179_v51  ;;  %v4526_v37 = vld [vmem:[#allocation8 + $0xf50] sm:$0xff]  ;;  %v10268_v6 = vcombine.high %v4398_v7, %v4402_v57  ;;  %v10267_v8 = vcombine.low %v4398_v7, %v4402_v57 }
 0x3bb   :  { %7572 = vmatprep.subr.bf16.mxu0 %v10172_v25  ;;  %v4530_v52 = vld [vmem:[#allocation8 + $0xf70] sm:$0xff] }
 0x3bc   :  { %7612 = vmatpush1.bf16.msra.mxu1 %v10307_v22  ;;  %v10396_v3 = vcombine.high %v4526_v37, %v4530_v52  ;;  %v4390_v51 = vld [vmem:[#allocation8 + $0xb10] sm:$0xff]  ;;  %v10395_v16 = vcombine.low %v4526_v37, %v4530_v52 }
 0x3bd   :  { %7613 = vmatprep.subr.bf16.mxu1 %v10300_v61  ;;  %v4394_v22 = vld [vmem:[#allocation8 + $0xb30] sm:$0xff] }
 0x3be   :  { %7573 = vmatpush1.bf16.msra.mxu0 %v10171_v42  ;;  %v4518_v61 = vld [vmem:[#allocation8 + $0xf10] sm:$0xff]  ;;  %v10260_v42 = vcombine.high %v4390_v51, %v4394_v22  ;;  %v10259_v24 = vcombine.low %v4390_v51, %v4394_v22 }
 0x3bf   :  { %7574 = vmatprep.subr.bf16.mxu0 %v10164_v18  ;;  %v4522_v39 = vld [vmem:[#allocation8 + $0xf30] sm:$0xff] }
 0x3c0   :  { %7614 = vmatpush1.bf16.msra.mxu1 %v10299_v35  ;;  %v10388_v35 = vcombine.high %v4518_v61, %v4522_v39  ;;  %v4382_v18 = vld [vmem:[#allocation8 + $0xad0] sm:$0xff] }
 0x3c1   :  { %7615 = vmatprep.subr.bf16.mxu1 %v10292_v36  ;;  %v4386_v36 = vld [vmem:[#allocation8 + $0xaf0] sm:$0xff] }
 0x3c2   :  { %7575 = vmatpush1.bf16.msra.mxu0 %v10163_v26  ;;  %v4510_v55 = vld [vmem:[#allocation8 + $0xed0] sm:$0xff]  ;;  %v10387_v26 = vcombine.low %v4518_v61, %v4522_v39 }
 0x3c3   :  { %7576 = vmatprep.subr.bf16.mxu0 %v10284_v30  ;;  %v4514_v4 = vld [vmem:[#allocation8 + $0xef0] sm:$0xff]  ;;  %v10252_v30 = vcombine.high %v4382_v18, %v4386_v36 }
 0x3c4   :  { %7616 = vmatpush1.bf16.msra.mxu1 %v10291_v28  ;;  %v4374_v32 = vld [vmem:[#allocation8 + $0xa90] sm:$0xff] }
 0x3c5   :  { %7617 = vmatprep.subr.bf16.mxu1 %v10412_v0  ;;  %v10380_v0 = vcombine.high %v4510_v55, %v4514_v4  ;;  %v4378_v38 = vld [vmem:[#allocation8 + $0xab0] sm:$0xff] }
 0x3c6   :  { %7577 = vmatpush2.bf16.msra.mxu0 %v10283_v43  ;;  %v7831_v58 = vpop.xlane.xlu0 %7830  ;;  %v4502_v59 = vld [vmem:[#allocation8 + $0xe90] sm:$0xff] }
 0x3c7   :  { %v7832_v33 = vrot.slane %v7831_v58, 4  ;;  %7578 = vmatprep.subr.bf16.mxu0 %v10276_v48  ;;  %v4506_v43 = vld [vmem:[#allocation8 + $0xeb0] sm:$0xff]  ;;  %v10379_v48 = vcombine.low %v4510_v55, %v4514_v4 }
 0x3c8   :  { %7618 = vmatpush2.bf16.msra.mxu1 %v10411_v5  ;;  %v10251_v5 = vcombine.low %v4382_v18, %v4386_v36  ;;  %v10372_v7 = vcombine.high %v4502_v59, %v4506_v43  ;;  %v4366_v57 = vld [vmem:[#allocation8 + $0xa50] sm:$0xff]  ;;  %v4227_v18 = vld [vmem:[#allocation8 + $0x5f8] sm:$0xff] }
 0x3c9   :  { %7619 = vmatprep.subr.bf16.mxu1 %v10404_v49  ;;  %v7833_v25 = vadd.f32 %v7832_v33, %v7831_v58  ;;  %v10244_v49 = vcombine.high %v4374_v32, %v4378_v38  ;;  %v4370_v37 = vld [vmem:[#allocation8 + $0xa70] sm:$0xff]  ;;  %v10371_v33 = vcombine.low %v4502_v59, %v4506_v43  ;;  %v4565_v59 = vrot.slane %v11475_v54, %v732_v21 }
 0x3ca   :  { %7579 = vmatpush2.bf16.msra.mxu0 %v10275_v62  ;;  %v4494_v52 = vld [vmem:[#allocation8 + $0xe50] sm:$0xff]  ;;  %v10243_v62 = vcombine.low %v4374_v32, %v4378_v38  ;;  %v10235_v61 = vcombine.low %v4366_v57, %v4370_v37 }
 0x3cb   :  { %v7834_v9 = vrot.slane %v7833_v25, 2  ;;  %7580 = vmatprep.subr.bf16.mxu0 %v10268_v6  ;;  %v4498_v58 = vld [vmem:[#allocation8 + $0xe70] sm:$0xff] }
 0x3cc   :  { %7620 = vmatpush2.bf16.msra.mxu1 %v10403_v1  ;;  %v10236_v1 = vcombine.high %v4366_v57, %v4370_v37  ;;  %v10364_v6 = vcombine.high %v4494_v52, %v4498_v58  ;;  %v4362_v51 = vld [vmem:[#allocation8 + $0xa30] sm:$0xff]  ;;  %v10363_v39 = vcombine.low %v4494_v52, %v4498_v58  ;;  %v4211_v57 = vld [vmem:[#allocation8 + $0x578] sm:$0xff] }
 0x3cd   :  { %7621 = vmatprep.subr.bf16.mxu1 %v10396_v3  ;;  %v7835_v19 = vadd.f32 %v7834_v9, %v7833_v25  ;;  %v4358_v3 = vld [vmem:[#allocation8 + $0xa10] sm:$0xff] }
 0x3ce   :  { %7581 = vmatpush2.bf16.msra.mxu0 %v10267_v8  ;;  %v4486_v22 = vld [vmem:[#allocation8 + $0xe10] sm:$0xff]  ;;  %v10228_v8 = vcombine.high %v4358_v3, %v4362_v51  ;;  %v10227_v36 = vcombine.low %v4358_v3, %v4362_v51  ;;  %v4071_v3 = vld [vmem:[#allocation8 + $0x118] sm:$0xff] }
 0x3cf   :  { %7582 = vmatprep.subr.bf16.mxu0 %v10260_v42  ;;  %v7836_v28 = vrot.slane %v7835_v19, 1  ;;  %v4490_v25 = vld [vmem:[#allocation8 + $0xe30] sm:$0xff]  ;;  %v4099_v42 = vld [vmem:[#allocation8 + $0x1f8] sm:$0xff] }
 0x3d0   :  { %7622 = vmatpush2.bf16.msra.mxu1 %v10395_v16  ;;  %v10356_v9 = vcombine.high %v4486_v22, %v4490_v25  ;;  %v4095_v16 = vld [vmem:[#allocation8 + $0x1d8] sm:$0xff] }
 0x3d1   :  { %7623 = vmatprep.subr.bf16.mxu1 %v10388_v35  ;;  %v7837_v56 = vadd.f32 %v7836_v28, %v7835_v19  ;;  %v4223_v35 = vld [vmem:[#allocation8 + $0x5d8] sm:$0xff]  ;;  %v10355_v19 = vcombine.low %v4486_v22, %v4490_v25  ;;  %v9966_v55 = vcombine.high %v4095_v16, %v4099_v42  ;;  %v9965_v32 = vcombine.low %v4095_v16, %v4099_v42 }
 0x3d2   :  { %7583 = vmatpush2.bf16.msra.mxu0 %v10259_v24  ;;  %v10094_v4 = vcombine.high %v4223_v35, %v4227_v18  ;;  %v4087_v24 = vld [vmem:[#allocation8 + $0x198] sm:$0xff]  ;;  %v10093_v38 = vcombine.low %v4223_v35, %v4227_v18 }
 0x3d3   :  { %10722 = vpush %v7837_v56  ;;  %7584 = vmatprep.subr.bf16.mxu0 %v10252_v30  ;;  %v4215_v28 = vld [vmem:[#allocation8 + $0x598] sm:$0xff] }
 0x3d4   :  { %7624 = vmatpush2.bf16.msra.mxu1 %v10387_v26  ;;  %v4091_v26 = vld [vmem:[#allocation8 + $0x1b8] sm:$0xff] }
 0x3d5   :  { %7625 = vmatprep.subr.bf16.mxu1 %v10380_v0  ;;  %v4219_v30 = vld [vmem:[#allocation8 + $0x5b8] sm:$0xff]  ;;  %v4561_v0 = vrot.slane %v11475_v54, %v728_v17  ;;  %v9958_v56 = vcombine.high %v4087_v24, %v4091_v26  ;;  %v9957_v52 = vcombine.low %v4087_v24, %v4091_v26 }
 0x3d6   :  { %7585 = vmatpush2.bf16.msra.mxu0 %v10251_v5  ;;  %v10086_v43 = vcombine.high %v4215_v28, %v4219_v30  ;;  %v4079_v5 = vld [vmem:[#allocation8 + $0x158] sm:$0xff] }
 0x3d7   :  { %7586 = vmatprep.subr.bf16.mxu0 %v10244_v49  ;;  %v4075_v51 = vld [vmem:[#allocation8 + $0x138] sm:$0xff] }
 0x3d8   :  { %7626 = vmatpush2.bf16.msra.mxu1 %v10379_v48  ;;  %v4083_v48 = vld [vmem:[#allocation8 + $0x178] sm:$0xff]  ;;  %v9942_v35 = vcombine.high %v4071_v3, %v4075_v51  ;;  %v9941_v24 = vcombine.low %v4071_v3, %v4075_v51 }
 0x3d9   :  { %7627 = vmatprep.subr.bf16.mxu1 %v10372_v7  ;;  %v4207_v7 = vld [vmem:[#allocation8 + $0x558] sm:$0xff] }
 0x3da   :  { %7587 = vmatpush2.bf16.msra.mxu0 %v10243_v62  ;;  %v10085_v62 = vcombine.low %v4215_v28, %v4219_v30  ;;  %v4199_v25 = vld [vmem:[#allocation8 + $0x518] sm:$0xff]  ;;  %v10077_v42 = vcombine.low %v4207_v7, %v4211_v57 }
 0x3db   :  { %7588 = vmatprep.subr.bf16.mxu0 %v10236_v1  ;;  %v4055_v30 = vld [vmem:[#allocation8 + $0x98] sm:$0xff] }
 0x3dc   :  { %7628 = vmatpush2.bf16.msra.mxu1 %v10371_v33  ;;  %v9950_v33 = vcombine.high %v4079_v5, %v4083_v48 }
 0x3dd   :  { %7629 = vmatprep.subr.bf16.mxu1 %v10364_v6  ;;  %v10078_v6 = vcombine.high %v4207_v7, %v4211_v57  ;;  %v4175_v7 = vld [vmem:[#allocation8 + $0x458] sm:$0xff] }
 0x3de   :  { %7589 = vmatpush2.bf16.msra.mxu0 %v10235_v61  ;;  %v4203_v61 = vld [vmem:[#allocation8 + $0x538] sm:$0xff] }
 0x3df   :  { %7590 = vmatprep.subr.bf16.mxu0 %v10228_v8  ;;  %v4179_v57 = vld [vmem:[#allocation8 + $0x478] sm:$0xff] }
 0x3e0   :  { %7630 = vmatpush2.bf16.msra.mxu1 %v10363_v39  ;;  %v10045_v3 = vcombine.low %v4175_v7, %v4179_v57 }
 0x3e1   :  { %7631 = vmatprep.subr.bf16.mxu1 %v10356_v9  ;;  %v9949_v9 = vcombine.low %v4079_v5, %v4083_v48  ;;  %v4047_v48 = vld [vmem:[#allocation8 + $0x58] sm:$0xff] }
 0x3e2   :  { %7591 = vmatpush2.bf16.msra.mxu0 %v10227_v36  ;;  %v10070_v36 = vcombine.high %v4199_v25, %v4203_v61 }
 0x3e3   :  { %7642 = vmatprep.subr.bf16.mxu0 %v9966_v55  ;;  %v4191_v55 = vld [vmem:[#allocation8 + $0x4d8] sm:$0xff] }
 0x3e4   :  { %7632 = vmatpush2.bf16.msra.mxu1 %v10355_v19  ;;  %v4063_v19 = vld [vmem:[#allocation8 + $0xd8] sm:$0xff] }
 0x3e5   :  { %7683 = vmatprep.subr.bf16.mxu1 %v10094_v4  ;;  %v7348_v49 = vpop.f32.mrf.mxu0  ;;  %7593 = vmatmul.mubr.bf16.vlgmr.msra.gmra.mxu0 %v11405_v34  ;;  %v4195_v4 = vld [vmem:[#allocation8 + $0x4f8] sm:$0xff] }
 0x3e6   :  { %v7349_v37 = vadd.f32 %v7348_v49, %v4561_v0  ;;  %7643 = vmatpush1.bf16.msra.mxu0 %v9965_v32  ;;  %7674 = vmatprep.mubr.bf16.mxu0 %v11356_v20  ;;  %v4067_v20 = vld [vmem:[#allocation8 + $0xf8] sm:$0xff]  ;;  %v10062_v28 = vcombine.high %v4191_v55, %v4195_v4 }
 0x3e7   :  { %v7389_v17 = vpop.f32.mrf.mxu1  ;;  %7634 = vmatmul.mubr.bf16.vlgmr.msra.gmra.mxu1 %v11409_v60  ;;  %v7350_v58 = vpop.f32.mrf.mxu0  ;;  %7644 = vmatprep.subr.bf16.mxu0 %v9958_v56  ;;  %v9934_v26 = vcombine.high %v4063_v19, %v4067_v20  ;;  %v4059_v0 = vld [vmem:[#allocation8 + $0xb8] sm:$0xff]  ;;  %v9933_v56 = vcombine.low %v4063_v19, %v4067_v20 }
 0x3e8   :  { %7684 = vmatpush1.bf16.msra.mxu1 %v10093_v38  ;;  %v11509_v21 = vadd.f32 %v7389_v17, %v7349_v37  ;;  %v7351_v54 = vadd.f32 %v7350_v58, %v4565_v59  ;;  %7715 = vmatprep.mubr.bf16.mxu1 %v11359_v27  ;;  %v10069_v27 = vcombine.low %v4199_v25, %v4203_v61  ;;  %v4183_v32 = vld [vmem:[#allocation8 + $0x498] sm:$0xff] }
 0x3e9   :  { %v7391_v1 = vpop.f32.mrf.mxu1  ;;  %7685 = vmatprep.subr.bf16.mxu1 %v10086_v43  ;;  %v7352_v22 = vpop.f32.mrf.mxu0  ;;  %v4187_v38 = vld [vmem:[#allocation8 + $0x4b8] sm:$0xff]  ;;  %v10061_v59 = vcombine.low %v4191_v55, %v4195_v4  ;;  %v9926_v43 = vcombine.high %v4055_v30, %v4059_v0  ;;  %v9925_v37 = vcombine.low %v4055_v30, %v4059_v0  ;;  %v10046_v58 = vcombine.high %v4175_v7, %v4179_v57 }
 0x3ea   :  { %v11513_v39 = vadd.f32 %v7391_v1, %v7351_v54  ;;  %7645 = vmatpush1.bf16.msra.mxu0 %v9957_v52  ;;  %v10054_v5 = vcombine.high %v4183_v32, %v4187_v38  ;;  %v4051_v49 = vld [vmem:[#allocation8 + $0x78] sm:$0xff]  ;;  %v10053_v17 = vcombine.low %v4183_v32, %v4187_v38 }
 0x3eb   :  { %v7393_v8 = vpop.f32.mrf.mxu1  ;;  %v7353_v16 = vpop.f32.mrf.mxu0  ;;  %7646 = vmatprep.subr.bf16.mxu0 %v9950_v33  ;;  %v9918_v52 = vcombine.high %v4047_v48, %v4051_v49  ;;  %v4043_v33 = vld [vmem:[#allocation8 + $0x38] sm:$0xff] }
 0x3ec   :  { %7686 = vmatpush1.bf16.msra.mxu1 %v10085_v62  ;;  %v4039_v62 = vld [vmem:[#allocation8 + $0x18] sm:$0xff] }
 0x3ed   :  { %v7394_v18 = vpop.f32.mrf.mxu1  ;;  %7687 = vmatprep.subr.bf16.mxu1 %v10078_v6  ;;  %v4167_v54 = vld [vmem:[#allocation8 + $0x418] sm:$0xff]  ;;  %v9917_v6 = vcombine.low %v4047_v48, %v4051_v49  ;;  %v9910_v51 = vcombine.high %v4039_v62, %v4043_v33  ;;  %v9909_v16 = vcombine.low %v4039_v62, %v4043_v33 }
 0x3ee   :  { %7647 = vmatpush1.bf16.msra.mxu0 %v9949_v9  ;;  %v4171_v1 = vld [vmem:[#allocation8 + $0x438] sm:$0xff] }
 0x3ef   :  { %7648 = vmatprep.subr.bf16.mxu0 %v9942_v35  ;;  %v10038_v22 = vcombine.high %v4167_v54, %v4171_v1  ;;  %v4159_v25 = vld [vmem:[#allocation8 + $0x3d8] sm:$0xff] }
 0x3f0   :  { %7688 = vmatpush1.bf16.msra.mxu1 %v10077_v42  ;;  %v4163_v61 = vld [vmem:[#allocation8 + $0x3f8] sm:$0xff]  ;;  %v10037_v42 = vcombine.low %v4167_v54, %v4171_v1 }
 0x3f1   :  { %7689 = vmatprep.subr.bf16.mxu1 %v10070_v36  ;;  %v4287_v8 = vld [vmem:[#allocation8 + $0x7d8] sm:$0xff]  ;;  %v10030_v35 = vcombine.high %v4159_v25, %v4163_v61  ;;  %v10029_v4 = vcombine.low %v4159_v25, %v4163_v61 }
 0x3f2   :  { %7649 = vmatpush1.bf16.msra.mxu0 %v9941_v24  ;;  %v4291_v9 = vld [vmem:[#allocation8 + $0x7f8] sm:$0xff] }
 0x3f3   :  { %7650 = vmatprep.subr.bf16.mxu0 %v9934_v26  ;;  %v10158_v18 = vcombine.high %v4287_v8, %v4291_v9  ;;  %v4151_v36 = vld [vmem:[#allocation8 + $0x398] sm:$0xff]  ;;  %v10157_v24 = vcombine.low %v4287_v8, %v4291_v9 }
 0x3f4   :  { %7690 = vmatpush1.bf16.msra.mxu1 %v10069_v27  ;;  %v4155_v19 = vld [vmem:[#allocation8 + $0x3b8] sm:$0xff] }
 0x3f5   :  { %7691 = vmatprep.subr.bf16.mxu1 %v10062_v28  ;;  %v4279_v20 = vld [vmem:[#allocation8 + $0x798] sm:$0xff]  ;;  %v10022_v27 = vcombine.high %v4151_v36, %v4155_v19 }
 0x3f6   :  { %7651 = vmatpush1.bf16.msra.mxu0 %v9933_v56  ;;  %v4283_v55 = vld [vmem:[#allocation8 + $0x7b8] sm:$0xff] }
 0x3f7   :  { %7652 = vmatprep.subr.bf16.mxu0 %v9926_v43  ;;  %v4143_v26 = vld [vmem:[#allocation8 + $0x358] sm:$0xff]  ;;  %v10150_v28 = vcombine.high %v4279_v20, %v4283_v55  ;;  %v10149_v43 = vcombine.low %v4279_v20, %v4283_v55 }
 0x3f8   :  { %7692 = vmatpush1.bf16.msra.mxu1 %v10061_v59  ;;  %v4147_v30 = vld [vmem:[#allocation8 + $0x378] sm:$0xff]  ;;  %v10021_v59 = vcombine.low %v4151_v36, %v4155_v19 }
 0x3f9   :  { %7693 = vmatprep.subr.bf16.mxu1 %v10054_v5  ;;  %v4271_v0 = vld [vmem:[#allocation8 + $0x758] sm:$0xff]  ;;  %v10014_v5 = vcombine.high %v4143_v26, %v4147_v30  ;;  %v10013_v33 = vcombine.low %v4143_v26, %v4147_v30 }
 0x3fa   :  { %7653 = vmatpush1.bf16.msra.mxu0 %v9925_v37  ;;  %v4275_v32 = vld [vmem:[#allocation8 + $0x778] sm:$0xff] }
 0x3fb   :  { %7654 = vmatprep.subr.bf16.mxu0 %v9918_v52  ;;  %v10142_v48 = vcombine.high %v4271_v0, %v4275_v32  ;;  %v4135_v49 = vld [vmem:[#allocation8 + $0x318] sm:$0xff] }
 0x3fc   :  { %7694 = vmatpush1.bf16.msra.mxu1 %v10053_v17  ;;  %v4139_v7 = vld [vmem:[#allocation8 + $0x338] sm:$0xff] }
 0x3fd   :  { %7695 = vmatprep.subr.bf16.mxu1 %v10046_v58  ;;  %v4263_v57 = vld [vmem:[#allocation8 + $0x718] sm:$0xff]  ;;  %v10005_v20 = vcombine.low %v4135_v49, %v4139_v7 }
 0x3fe   :  { %7655 = vmatpush1.bf16.msra.mxu0 %v9917_v6  ;;  %v4267_v37 = vld [vmem:[#allocation8 + $0x738] sm:$0xff] }
 0x3ff   :  { %7656 = vmatprep.subr.bf16.mxu0 %v9910_v51  ;;  %v10141_v51 = vcombine.low %v4271_v0, %v4275_v32  ;;  %v10134_v25 = vcombine.high %v4263_v57, %v4267_v37  ;;  %v4127_v61 = vld [vmem:[#allocation8 + $0x2d8] sm:$0xff] }
 0x400   :  { %7696 = vmatpush1.bf16.msra.mxu1 %v10045_v3  ;;  %v4131_v8 = vld [vmem:[#allocation8 + $0x2f8] sm:$0xff] }
 0x401   :  { %7697 = vmatprep.subr.bf16.mxu1 %v10038_v22  ;;  %v10006_v22 = vcombine.high %v4135_v49, %v4139_v7  ;;  %v4259_v36 = vld [vmem:[#allocation8 + $0x6f8] sm:$0xff]  ;;  %v9998_v26 = vcombine.high %v4127_v61, %v4131_v8  ;;  %v9997_v7 = vcombine.low %v4127_v61, %v4131_v8 }
 0x402   :  { %7657 = vmatpush1.bf16.msra.mxu0 %v9909_v16  ;;  %v4119_v0 = vld [vmem:[#allocation8 + $0x298] sm:$0xff] }
 0x403   :  { %7658 = vmatprep.subr.bf16.mxu0 %v10030_v35  ;;  %v4123_v32 = vld [vmem:[#allocation8 + $0x2b8] sm:$0xff] }
 0x404   :  { %7698 = vmatpush1.bf16.msra.mxu1 %v10037_v42  ;;  %s10723_s1 = spop %10722 }
 0x405   :  { %7699 = vmatprep.subr.bf16.mxu1 %v10158_v18  ;;  %v7839_v38 = vstv %s10723_s1  ;;  %v4255_v18 = vld [vmem:[#allocation8 + $0x6d8] sm:$0xff] }
 0x406   :  { %v11515_v56 = vmul.f32 0.00048828125, %v7839_v38  ;;  %7659 = vmatpush2.bf16.msra.mxu0 %v10029_v4  ;;  %v10126_v30 = vcombine.high %v4255_v18, %v4259_v36 }
 0x407   :  { %7660 = vmatprep.subr.bf16.mxu0 %v10022_v27  ;;  %v10133_v27 = vcombine.low %v4263_v57, %v4267_v37  ;;  %v10125_v37 = vcombine.low %v4255_v18, %v4259_v36  ;;  %v4103_v18 = vld [vmem:[#allocation8 + $0x218] sm:$0xff] }
 0x408   :  { %7700 = vmatpush2.bf16.msra.mxu1 %v10157_v24  ;;  %v7842_v17 = vsub.f32 %v11441_v13, %v11515_v56  ;;  %v7843_v52 = vsub.f32 %v11438_v10, %v11515_v56  ;;  %v7844_v58 = vsub.f32 %v11445_v50, %v11515_v56  ;;  %v7845_v62 = vsub.f32 %v11455_v14, %v11515_v56  ;;  %v4107_v36 = vld [vmem:[#allocation8 + $0x238] sm:$0xff] }
 0x409   :  { %7701 = vmatprep.subr.bf16.mxu1 %v10150_v28  ;;  %v7846_v54 = vsub.f32 %v11457_v2, %v11515_v56  ;;  %v7847_v9 = vsub.f32 %v11463_v12, %v11515_v56  ;;  %v7848_v55 = vsub.f32 %v11467_v45, %v11515_v56  ;;  %v7849_v38 = vsub.f32 %v11471_v63, %v11515_v56 }
 0x40a   :  { %7661 = vmatpush2.bf16.msra.mxu0 %v10021_v59  ;;  %v7850_v1 = vmul.f32 %v7842_v17, %v7842_v17  ;;  %v7851_v6 = vmul.f32 %v7843_v52, %v7843_v52  ;;  %v7852_v3 = vmul.f32 %v7844_v58, %v7844_v58  ;;  %v7853_v16 = vmul.f32 %v7845_v62, %v7845_v62 }
 0x40b   :  { %7662 = vmatprep.subr.bf16.mxu0 %v10014_v5  ;;  %v7854_v4 = vmul.f32 %v7846_v54, %v7846_v54  ;;  %v7855_v59 = vmul.f32 %v7847_v9, %v7847_v9  ;;  %v4247_v5 = vld [vmem:[#allocation8 + $0x698] sm:$0xff]  ;;  %v7856_v17 = vmul.f32 %v7848_v55, %v7848_v55  ;;  %v9990_v52 = vcombine.high %v4119_v0, %v4123_v32 }
 0x40c   :  { %7702 = vmatpush2.bf16.msra.mxu1 %v10149_v43  ;;  %v7858_v42 = vsel %vm7814_vm0, %v7850_v1, 0.0  ;;  %v7859_v35 = vsel %vm7814_vm0, %v7851_v6, 0.0  ;;  %v7861_v24 = vsel %vm7814_vm0, %v7852_v3, 0.0  ;;  %v7863_v43 = vsel %vm7814_vm0, %v7853_v16, 0.0  ;;  %v4111_v1 = vld [vmem:[#allocation8 + $0x258] sm:$0xff] }
 0x40d   :  { %7703 = vmatprep.subr.bf16.mxu1 %v10142_v48  ;;  %v7860_v19 = vadd.f32 %v7859_v35, %v7858_v42  ;;  %v4251_v48 = vld [vmem:[#allocation8 + $0x6b8] sm:$0xff]  ;;  %v7865_v57 = vsel %vm7814_vm0, %v7854_v4, 0.0  ;;  %v7867_v54 = vsel %vm7814_vm0, %v7855_v59, 0.0  ;;  %v7869_v61 = vsel %vm7814_vm0, %v7856_v17, 0.0 }
 0x40e   :  { %7663 = vmatpush2.bf16.msra.mxu0 %v10013_v33  ;;  %v10118_v62 = vcombine.high %v4247_v5, %v4251_v48  ;;  %v7857_v33 = vmul.f32 %v7849_v38, %v7849_v38  ;;  %v4115_v3 = vld [vmem:[#allocation8 + $0x278] sm:$0xff]  ;;  %v10117_v8 = vcombine.low %v4247_v5, %v4251_v48  ;;  %v9973_v38 = vcombine.low %v4103_v18, %v4107_v36 }
 0x40f   :  { %7664 = vmatprep.subr.bf16.mxu0 %v10006_v22  ;;  %v7862_v28 = vadd.f32 %v7861_v24, %v7860_v19  ;;  %v4243_v22 = vld [vmem:[#allocation8 + $0x678] sm:$0xff]  ;;  %v9982_v42 = vcombine.high %v4111_v1, %v4115_v3  ;;  %v9981_v4 = vcombine.low %v4111_v1, %v4115_v3 }
 0x410   :  { %7704 = vmatpush2.bf16.msra.mxu1 %v10141_v51  ;;  %v4239_v51 = vld [vmem:[#allocation8 + $0x658] sm:$0xff]  ;;  %v7871_v16 = vsel %vm7814_vm0, %v7857_v33, 0.0 }
 0x411   :  { %7705 = vmatprep.subr.bf16.mxu1 %v10134_v25  ;;  %v7864_v49 = vadd.f32 %v7863_v43, %v7862_v28  ;;  %v9989_v25 = vcombine.low %v4119_v0, %v4123_v32  ;;  %v10110_v35 = vcombine.high %v4239_v51, %v4243_v22  ;;  %v4235_v55 = vld [vmem:[#allocation8 + $0x638] sm:$0xff]  ;;  %v10109_v24 = vcombine.low %v4239_v51, %v4243_v22 }
 0x412   :  { %7665 = vmatpush2.bf16.msra.mxu0 %v10005_v20  ;;  %v4231_v20 = vld [vmem:[#allocation8 + $0x618] sm:$0xff] }
 0x413   :  { %7666 = vmatprep.subr.bf16.mxu0 %v9998_v26  ;;  %v7866_v58 = vadd.f32 %v7865_v57, %v7864_v49  ;;  %v10102_v26 = vcombine.high %v4231_v20, %v4235_v55  ;;  %v4351_v28 = vld [vmem:[#allocation8 + $0x9d8] sm:$0xff]  ;;  %v10101_v59 = vcombine.low %v4231_v20, %v4235_v55 }
 0x414   :  { %7706 = vmatpush2.bf16.msra.mxu1 %v10133_v27  ;;  %v9974_v27 = vcombine.high %v4103_v18, %v4107_v36  ;;  %v4479_v0 = vld [vmem:[#allocation8 + $0xdd8] sm:$0xff] }
 0x415   :  { %7707 = vmatprep.subr.bf16.mxu1 %v10126_v30  ;;  %v7868_v6 = vadd.f32 %v7867_v54, %v7866_v58  ;;  %v4355_v30 = vld [vmem:[#allocation8 + $0x9f8] sm:$0xff] }
 0x416   :  { %7667 = vmatpush2.bf16.msra.mxu0 %v9997_v7  ;;  %v4483_v32 = vld [vmem:[#allocation8 + $0xdf8] sm:$0xff]  ;;  %v10222_v43 = vcombine.high %v4351_v28, %v4355_v30  ;;  %v10221_v57 = vcombine.low %v4351_v28, %v4355_v30 }
 0x417   :  { %7668 = vmatprep.subr.bf16.mxu0 %v9990_v52  ;;  %v7870_v9 = vadd.f32 %v7869_v61, %v7868_v6  ;;  %v10350_v5 = vcombine.high %v4479_v0, %v4483_v32  ;;  %v4343_v48 = vld [vmem:[#allocation8 + $0x998] sm:$0xff] }
 0x418   :  { %7708 = vmatpush2.bf16.msra.mxu1 %v10125_v37  ;;  %v4347_v49 = vld [vmem:[#allocation8 + $0x9b8] sm:$0xff]  ;;  %v10349_v37 = vcombine.low %v4479_v0, %v4483_v32 }
 0x419   :  { %7709 = vmatprep.subr.bf16.mxu1 %v10118_v62  ;;  %v7872_v19 = vadd.f32 %v7871_v16, %v7870_v9  ;;  %v4471_v7 = vld [vmem:[#allocation8 + $0xd98] sm:$0xff]  ;;  %v10214_v52 = vcombine.high %v4343_v48, %v4347_v49  ;;  %v10213_v22 = vcombine.low %v4343_v48, %v4347_v49 }
 0x41a   :  { %7669 = vmatpush2.bf16.msra.mxu0 %v9989_v25  ;;  %v4475_v17 = vld [vmem:[#allocation8 + $0xdb8] sm:$0xff] }
 0x41b   :  { %7873 = vadd.xlane.f32.xlu0 %v7872_v19  ;;  %7670 = vmatprep.subr.bf16.mxu0 %v9982_v42  ;;  %v10342_v58 = vcombine.high %v4471_v7, %v4475_v17  ;;  %v4335_v62 = vld [vmem:[#allocation8 + $0x958] sm:$0xff]  ;;  %v10341_v61 = vcombine.low %v4471_v7, %v4475_v17 }
 0x41c   :  { %7710 = vmatpush2.bf16.msra.mxu1 %v10117_v8  ;;  %v4339_v33 = vld [vmem:[#allocation8 + $0x978] sm:$0xff] }
 0x41d   :  { %7711 = vmatprep.subr.bf16.mxu1 %v10110_v35  ;;  %v4463_v1 = vld [vmem:[#allocation8 + $0xd58] sm:$0xff]  ;;  %v10206_v8 = vcombine.high %v4335_v62, %v4339_v33  ;;  %v10205_v55 = vcombine.low %v4335_v62, %v4339_v33 }
 0x41e   :  { %7671 = vmatpush2.bf16.msra.mxu0 %v9981_v4  ;;  %v4467_v6 = vld [vmem:[#allocation8 + $0xd78] sm:$0xff] }
 0x41f   :  { %7672 = vmatprep.subr.bf16.mxu0 %v9974_v27  ;;  %v4327_v35 = vld [vmem:[#allocation8 + $0x918] sm:$0xff] }
 0x420   :  { %7712 = vmatpush2.bf16.msra.mxu1 %v10109_v24  ;;  %v4331_v18 = vld [vmem:[#allocation8 + $0x938] sm:$0xff] }
 0x421   :  { %7713 = vmatprep.subr.bf16.mxu1 %v10102_v26  ;;  %v4459_v36 = vld [vmem:[#allocation8 + $0xd38] sm:$0xff]  ;;  %v10198_v24 = vcombine.high %v4327_v35, %v4331_v18  ;;  %v10197_v32 = vcombine.low %v4327_v35, %v4331_v18 }
 0x422   :  { %7673 = vmatpush2.bf16.msra.mxu0 %v9973_v38  ;;  %v4319_v28 = vld [vmem:[#allocation8 + $0x8d8] sm:$0xff] }
 0x423   :  { %7724 = vmatprep.subr.bf16.mxu0 %v10222_v43  ;;  %v4447_v30 = vld [vmem:[#allocation8 + $0xcd8] sm:$0xff] }
 0x424   :  { %7714 = vmatpush2.bf16.msra.mxu1 %v10101_v59  ;;  %v4451_v0 = vld [vmem:[#allocation8 + $0xcf8] sm:$0xff] }
 0x425   :  { %7765 = vmatprep.subr.bf16.mxu1 %v10350_v5  ;;  %v7430_v54 = vpop.f32.mrf.mxu0  ;;  %7675 = vmatmul.mubr.bf16.vlgmr.msra.gmra.mxu0 %v11381_v15  ;;  %v10334_v15 = vcombine.high %v4463_v1, %v4467_v6  ;;  %v10318_v59 = vcombine.high %v4447_v30, %v4451_v0  ;;  %v4311_v43 = vld [vmem:[#allocation8 + $0x898] sm:$0xff]  ;;  %v10317_v17 = vcombine.low %v4447_v30, %v4451_v0 }
 0x426   :  { %v7431_v3 = vadd.f32 %v7430_v54, %v11509_v21  ;;  %7725 = vmatpush1.bf16.msra.mxu0 %v10221_v57  ;;  %7756 = vmatprep.mubr.bf16.mxu0 %v11389_v31  ;;  %v4323_v31 = vld [vmem:[#allocation8 + $0x8f8] sm:$0xff] }
 0x427   :  { %v7471_v51 = vpop.f32.mrf.mxu1  ;;  %7716 = vmatmul.mubr.bf16.vlgmr.msra.gmra.mxu1 %v11387_v23  ;;  %v7432_v25 = vpop.f32.mrf.mxu0  ;;  %7726 = vmatprep.subr.bf16.mxu0 %v10214_v52  ;;  %v4455_v23 = vld [vmem:[#allocation8 + $0xd18] sm:$0xff]  ;;  %v10190_v38 = vcombine.high %v4319_v28, %v4323_v31  ;;  %v10189_v7 = vcombine.low %v4319_v28, %v4323_v31 }
 0x428   :  { %7766 = vmatpush1.bf16.msra.mxu1 %v10349_v37  ;;  %v11544_v9 = vadd.f32 %v7471_v51, %v7431_v3  ;;  %v7433_v16 = vadd.f32 %v7432_v25, %v11513_v39  ;;  %7797 = vmatprep.mubr.bf16.mxu1 %v11392_v40  ;;  %v10333_v39 = vcombine.low %v4463_v1, %v4467_v6  ;;  %v4315_v5 = vld [vmem:[#allocation8 + $0x8b8] sm:$0xff] }
 0x429   :  { %v7473_v42 = vpop.f32.mrf.mxu1  ;;  %7767 = vmatprep.subr.bf16.mxu1 %v10342_v58  ;;  %v7434_v21 = vpop.f32.mrf.mxu0  ;;  %v10326_v26 = vcombine.high %v4455_v23, %v4459_v36  ;;  %v10325_v40 = vcombine.low %v4455_v23, %v4459_v36  ;;  %v4439_v48 = vld [vmem:[#allocation8 + $0xc98] sm:$0xff]  ;;  %v10182_v57 = vcombine.high %v4311_v43, %v4315_v5  ;;  %v10181_v54 = vcombine.low %v4311_v43, %v4315_v5 }
 0x42a   :  { %v11549_v19 = vadd.f32 %v7473_v42, %v7433_v16  ;;  %7727 = vmatpush1.bf16.msra.mxu0 %v10213_v22  ;;  %v4443_v49 = vld [vmem:[#allocation8 + $0xcb8] sm:$0xff] }
 0x42b   :  { %v7475_v20 = vpop.f32.mrf.mxu1  ;;  %v7435_v4 = vpop.f32.mrf.mxu0  ;;  %7728 = vmatprep.subr.bf16.mxu0 %v10206_v8  ;;  %v10310_v37 = vcombine.high %v4439_v48, %v4443_v49  ;;  %v4303_v52 = vld [vmem:[#allocation8 + $0x858] sm:$0xff]  ;;  %v10309_v1 = vcombine.low %v4439_v48, %v4443_v49 }
 0x42c   :  { %7768 = vmatpush1.bf16.msra.mxu1 %v10341_v61  ;;  %v4307_v58 = vld [vmem:[#allocation8 + $0x878] sm:$0xff] }
 0x42d   :  { %v7476_v27 = vpop.f32.mrf.mxu1  ;;  %7769 = vmatprep.subr.bf16.mxu1 %v10334_v15  ;;  %v4431_v62 = vld [vmem:[#allocation8 + $0xc58] sm:$0xff]  ;;  %v10174_v6 = vcombine.high %v4303_v52, %v4307_v58  ;;  %v10173_v8 = vcombine.low %v4303_v52, %v4307_v58 }
 0x42e   :  { %7729 = vmatpush1.bf16.msra.mxu0 %v10205_v55  ;;  %v4435_v33 = vld [vmem:[#allocation8 + $0xc78] sm:$0xff] }
 0x42f   :  { %7730 = vmatprep.subr.bf16.mxu0 %v10198_v24  ;;  %v10302_v3 = vcombine.high %v4431_v62, %v4435_v33  ;;  %v4295_v51 = vld [vmem:[#allocation8 + $0x818] sm:$0xff]  ;;  %v10301_v16 = vcombine.low %v4431_v62, %v4435_v33 }
 0x430   :  { %7770 = vmatpush1.bf16.msra.mxu1 %v10333_v39  ;;  %v4299_v22 = vld [vmem:[#allocation8 + $0x838] sm:$0xff] }
 0x431   :  { %7771 = vmatprep.subr.bf16.mxu1 %v10326_v26  ;;  %v4423_v25 = vld [vmem:[#allocation8 + $0xc18] sm:$0xff]  ;;  %v10166_v42 = vcombine.high %v4295_v51, %v4299_v22  ;;  %v10165_v36 = vcombine.low %v4295_v51, %v4299_v22 }
 0x432   :  { %7731 = vmatpush1.bf16.msra.mxu0 %v10197_v32  ;;  %v4427_v61 = vld [vmem:[#allocation8 + $0xc38] sm:$0xff] }
 0x433   :  { %7732 = vmatprep.subr.bf16.mxu0 %v10190_v38  ;;  %v10294_v15 = vcombine.high %v4423_v25, %v4427_v61  ;;  %v4415_v35 = vld [vmem:[#allocation8 + $0xbd8] sm:$0xff]  ;;  %v10293_v20 = vcombine.low %v4423_v25, %v4427_v61 }
 0x434   :  { %7772 = vmatpush1.bf16.msra.mxu1 %v10325_v40  ;;  %v4419_v18 = vld [vmem:[#allocation8 + $0xbf8] sm:$0xff] }
 0x435   :  { %7773 = vmatprep.subr.bf16.mxu1 %v10318_v59  ;;  %v4543_v21 = vld [vmem:[#allocation8 + $0xfd8] sm:$0xff]  ;;  %v10286_v55 = vcombine.high %v4415_v35, %v4419_v18  ;;  %v10285_v28 = vcombine.low %v4415_v35, %v4419_v18 }
 0x436   :  { %7733 = vmatpush1.bf16.msra.mxu0 %v10189_v7  ;;  %v4547_v23 = vld [vmem:[#allocation8 + $0xff8] sm:$0xff] }
 0x437   :  { %7734 = vmatprep.subr.bf16.mxu0 %v10182_v57  ;;  %v10414_v4 = vcombine.high %v4543_v21, %v4547_v23  ;;  %v4407_v39 = vld [vmem:[#allocation8 + $0xb98] sm:$0xff]  ;;  %v10413_v31 = vcombine.low %v4543_v21, %v4547_v23 }
 0x438   :  { %7774 = vmatpush1.bf16.msra.mxu1 %v10317_v17  ;;  %v4411_v24 = vld [vmem:[#allocation8 + $0xbb8] sm:$0xff] }
 0x439   :  { %7775 = vmatprep.subr.bf16.mxu1 %v10310_v37  ;;  %v4535_v27 = vld [vmem:[#allocation8 + $0xf98] sm:$0xff]  ;;  %v10278_v30 = vcombine.high %v4407_v39, %v4411_v24  ;;  %v10277_v43 = vcombine.low %v4407_v39, %v4411_v24 }
 0x43a   :  { %7735 = vmatpush1.bf16.msra.mxu0 %v10181_v54  ;;  %v4539_v26 = vld [vmem:[#allocation8 + $0xfb8] sm:$0xff] }
 0x43b   :  { %7736 = vmatprep.subr.bf16.mxu0 %v10174_v6  ;;  %v10406_v0 = vcombine.high %v4535_v27, %v4539_v26  ;;  %v4399_v32 = vld [vmem:[#allocation8 + $0xb58] sm:$0xff]  ;;  %v10405_v5 = vcombine.low %v4535_v27, %v4539_v26 }
 0x43c   :  { %7776 = vmatpush1.bf16.msra.mxu1 %v10309_v1  ;;  %v4403_v40 = vld [vmem:[#allocation8 + $0xb78] sm:$0xff] }
 0x43d   :  { %7777 = vmatprep.subr.bf16.mxu1 %v10302_v3  ;;  %v4527_v38 = vld [vmem:[#allocation8 + $0xf58] sm:$0xff]  ;;  %v10270_v48 = vcombine.high %v4399_v32, %v4403_v40  ;;  %v10269_v52 = vcombine.low %v4399_v32, %v4403_v40 }
 0x43e   :  { %7737 = vmatpush1.bf16.msra.mxu0 %v10173_v8  ;;  %v4531_v59 = vld [vmem:[#allocation8 + $0xf78] sm:$0xff] }
 0x43f   :  { %7738 = vmatprep.subr.bf16.mxu0 %v10166_v42  ;;  %v10398_v49 = vcombine.high %v4527_v38, %v4531_v59  ;;  %v4391_v7 = vld [vmem:[#allocation8 + $0xb18] sm:$0xff]  ;;  %v10397_v58 = vcombine.low %v4527_v38, %v4531_v59 }
 0x440   :  { %7778 = vmatpush1.bf16.msra.mxu1 %v10301_v16  ;;  %v4395_v17 = vld [vmem:[#allocation8 + $0xb38] sm:$0xff] }
 0x441   :  { %7779 = vmatprep.subr.bf16.mxu1 %v10294_v15  ;;  %v4519_v57 = vld [vmem:[#allocation8 + $0xf18] sm:$0xff]  ;;  %v10262_v62 = vcombine.high %v4391_v7, %v4395_v17  ;;  %v10261_v51 = vcombine.low %v4391_v7, %v4395_v17 }
 0x442   :  { %7739 = vmatpush1.bf16.msra.mxu0 %v10165_v36  ;;  %v4523_v37 = vld [vmem:[#allocation8 + $0xf38] sm:$0xff] }
 0x443   :  { %7740 = vmatprep.subr.bf16.mxu0 %v10286_v55  ;;  %v10390_v33 = vcombine.high %v4519_v57, %v4523_v37  ;;  %v4383_v54 = vld [vmem:[#allocation8 + $0xad8] sm:$0xff]  ;;  %v10389_v22 = vcombine.low %v4519_v57, %v4523_v37 }
 0x444   :  { %7780 = vmatpush1.bf16.msra.mxu1 %v10293_v20  ;;  %v4387_v1 = vld [vmem:[#allocation8 + $0xaf8] sm:$0xff] }
 0x445   :  { %7781 = vmatprep.subr.bf16.mxu1 %v10414_v4  ;;  %v4511_v6 = vld [vmem:[#allocation8 + $0xed8] sm:$0xff]  ;;  %v10254_v25 = vcombine.high %v4383_v54, %v4387_v1  ;;  %v10253_v35 = vcombine.low %v4383_v54, %v4387_v1 }
 0x446   :  { %7741 = vmatpush2.bf16.msra.mxu0 %v10285_v28  ;;  %v4515_v3 = vld [vmem:[#allocation8 + $0xef8] sm:$0xff] }
 0x447   :  { %7742 = vmatprep.subr.bf16.mxu0 %v10278_v30  ;;  %v10382_v61 = vcombine.high %v4511_v6, %v4515_v3  ;;  %v4375_v8 = vld [vmem:[#allocation8 + $0xa98] sm:$0xff]  ;;  %v10381_v18 = vcombine.low %v4511_v6, %v4515_v3 }
 0x448   :  { %7782 = vmatpush2.bf16.msra.mxu1 %v10413_v31  ;;  %v4379_v16 = vld [vmem:[#allocation8 + $0xab8] sm:$0xff] }
 0x449   :  { %7783 = vmatprep.subr.bf16.mxu1 %v10406_v0  ;;  %v4503_v42 = vld [vmem:[#allocation8 + $0xe98] sm:$0xff]  ;;  %v10246_v21 = vcombine.high %v4375_v8, %v4379_v16  ;;  %v10245_v39 = vcombine.low %v4375_v8, %v4379_v16 }
 0x44a   :  { %7743 = vmatpush2.bf16.msra.mxu0 %v10277_v43  ;;  %v4507_v15 = vld [vmem:[#allocation8 + $0xeb8] sm:$0xff] }
 0x44b   :  { %7744 = vmatprep.subr.bf16.mxu0 %v10270_v48  ;;  %v10374_v23 = vcombine.high %v4503_v42, %v4507_v15  ;;  %v4367_v36 = vld [vmem:[#allocation8 + $0xa58] sm:$0xff]  ;;  %v10373_v24 = vcombine.low %v4503_v42, %v4507_v15  ;;  %v11551_v48 = vld [vmem:[#allocation9] sm:$0xff] }
 0x44c   :  { %7784 = vmatpush2.bf16.msra.mxu1 %v10405_v5  ;;  %v4371_v20 = vld [vmem:[#allocation8 + $0xa78] sm:$0xff]  ;;  %v4573_v7 = vrot.slane %v11551_v48, %v740_v47 }
 0x44d   :  { %7785 = vmatprep.subr.bf16.mxu1 %v10398_v49  ;;  %v4495_v55 = vld [vmem:[#allocation8 + $0xe58] sm:$0xff]  ;;  %v10238_v27 = vcombine.high %v4367_v36, %v4371_v20  ;;  %v10237_v32 = vcombine.low %v4367_v36, %v4371_v20  ;;  %v4569_v49 = vrot.slane %v11551_v48, %v736_v46 }
 0x44e   :  { %7745 = vmatpush2.bf16.msra.mxu0 %v10269_v52  ;;  %v4499_v4 = vld [vmem:[#allocation8 + $0xe78] sm:$0xff] }
 0x44f   :  { %7746 = vmatprep.subr.bf16.mxu0 %v10262_v62  ;;  %v10366_v26 = vcombine.high %v4495_v55, %v4499_v4  ;;  %v4359_v28 = vld [vmem:[#allocation8 + $0xa18] sm:$0xff]  ;;  %v10365_v40 = vcombine.low %v4495_v55, %v4499_v4 }
 0x450   :  { %7786 = vmatpush2.bf16.msra.mxu1 %v10397_v58  ;;  %v4363_v31 = vld [vmem:[#allocation8 + $0xa38] sm:$0xff] }
 0x451   :  { %7787 = vmatprep.subr.bf16.mxu1 %v10390_v33  ;;  %v4487_v30 = vld [vmem:[#allocation8 + $0xe18] sm:$0xff]  ;;  %v10230_v38 = vcombine.high %v4359_v28, %v4363_v31  ;;  %v10229_v43 = vcombine.low %v4359_v28, %v4363_v31 }
 0x452   :  { %7747 = vmatpush2.bf16.msra.mxu0 %v10261_v51  ;;  %v4491_v0 = vld [vmem:[#allocation8 + $0xe38] sm:$0xff] }
 0x453   :  { %7748 = vmatprep.subr.bf16.mxu0 %v10254_v25  ;;  %v10358_v59 = vcombine.high %v4487_v30, %v4491_v0  ;;  %v10357_v5 = vcombine.low %v4487_v30, %v4491_v0 }
 0x454   :  { %7788 = vmatpush2.bf16.msra.mxu1 %v10389_v22 }
 0x455   :  { %7789 = vmatprep.subr.bf16.mxu1 %v10382_v61 }
 0x456   :  { %7749 = vmatpush2.bf16.msra.mxu0 %v10253_v35 }
 0x457   :  { %7750 = vmatprep.subr.bf16.mxu0 %v10246_v21 }
 0x458   :  { %7790 = vmatpush2.bf16.msra.mxu1 %v10381_v18 }
 0x459   :  { %7791 = vmatprep.subr.bf16.mxu1 %v10374_v23 }
 0x45a   :  { %7751 = vmatpush2.bf16.msra.mxu0 %v10245_v39 }
 0x45b   :  { %7752 = vmatprep.subr.bf16.mxu0 %v10238_v27 }
 0x45c   :  { %7792 = vmatpush2.bf16.msra.mxu1 %v10373_v24 }
 0x45d   :  { %7793 = vmatprep.subr.bf16.mxu1 %v10366_v26 }
 0x45e   :  { %7753 = vmatpush2.bf16.msra.mxu0 %v10237_v32 }
 0x45f   :  { %7754 = vmatprep.subr.bf16.mxu0 %v10230_v38 }
 0x460   :  { %7794 = vmatpush2.bf16.msra.mxu1 %v10365_v40 }
 0x461   :  { %7795 = vmatprep.subr.bf16.mxu1 %v10358_v59  ;;  %v7955_v59 = vstv %s7952_s22 }
 0x462   :  { %7755 = vmatpush2.bf16.msra.mxu0 %v10229_v43 }
 0x464   :  { %7796 = vmatpush2.bf16.msra.mxu1 %v10357_v5 }
 0x465   :  { %v7512_v17 = vpop.f32.mrf.mxu0  ;;  %7757 = vmatmul.mubr.bf16.vlgmr.msra.gmra.mxu0 %v11405_v34 }
 0x466   :  { %v7513_v57 = vadd.f32 %v7512_v17, %v4569_v49  ;;  %v7964_v49 = vstv %s7962_s23 }
 0x467   :  { %v7553_v37 = vpop.f32.mrf.mxu1  ;;  %7798 = vmatmul.mubr.bf16.vlgmr.msra.gmra.mxu1 %v11409_v60  ;;  %v7514_v52 = vpop.f32.mrf.mxu0 }
 0x468   :  { %v7554_v58 = vadd.f32 %v7553_v37, %v7513_v57  ;;  %v7515_v62 = vadd.f32 %v7514_v52, %v4573_v7 }
 0x469   :  { %v7555_v33 = vpop.f32.mrf.mxu1  ;;  %v7516_v54 = vpop.f32.mrf.mxu0 }
 0x46a   :  { %v7556_v1 = vadd.f32 %v7555_v33, %v7515_v62 }
 0x46b   :  { %v7557_v6 = vpop.f32.mrf.mxu1  ;;  %v7517_v46 = vpop.f32.mrf.mxu0 }
 0x46d   :  { %v7558_v3 = vpop.f32.mrf.mxu1 }
 0x4a4   :  { %v7874_v51 = vpop.xlane.xlu0 %7873 }
 0x4a5   :  { %v7875_v22 = vrot.slane %v7874_v51, 4  ;;  %v7594_v25 = vpop.f32.mrf.mxu0 }
 0x4a6   :  { %v7595_v47 = vadd.f32 %v7594_v25, %v7554_v58 }
 0x4a7   :  { %v7635_v61 = vpop.f32.mrf.mxu1  ;;  %v7876_v8 = vadd.f32 %v7875_v22, %v7874_v51  ;;  %v7596_v34 = vpop.f32.mrf.mxu0 }
 0x4a8   :  { %v7636_v16 = vadd.f32 %v7635_v61, %v7595_v47  ;;  %v7597_v42 = vadd.f32 %v7596_v34, %v7556_v1 }
 0x4a9   :  { %v7637_v15 = vpop.f32.mrf.mxu1  ;;  %v7877_v60 = vrot.slane %v7876_v8, 2  ;;  %v7598_v35 = vpop.f32.mrf.mxu0 }
 0x4aa   :  { %v7638_v18 = vadd.f32 %v7637_v15, %v7597_v42 }
 0x4ab   :  { %v7639_v21 = vpop.f32.mrf.mxu1  ;;  %v7878_v23 = vadd.f32 %v7877_v60, %v7876_v8  ;;  %v7599_v36 = vpop.f32.mrf.mxu0 }
 0x4ad   :  { %v7640_v20 = vpop.f32.mrf.mxu1  ;;  %v7879_v55 = vrot.slane %v7878_v23, 1 }
 0x4af   :  { %v7880_v4 = vadd.f32 %v7879_v55, %v7878_v23 }
 0x4b1   :  { %10724 = vpush %v7880_v4 }
 0x4e2   :  { %s10725_s21 = spop %10724 }
 0x4e3   :  { %v7882_v39 = vstv %s10725_s21 }
 0x4e4   :  { %v7883_v24 = vmul.f32 0.00048828125, %v7882_v39 }
 0x4e5   :  { %v7676_v27 = vpop.f32.mrf.mxu0 }
 0x4e6   :  { %v7953_v26 = vadd.f32 1e-05, %v7883_v24 }
 0x4e7   :  { %v7717_v28 = vpop.f32.mrf.mxu1  ;;  %v7678_v31 = vpop.f32.mrf.mxu0 }
 0x4e8   :  { %10893 = vrsqrt.f32 %v7953_v26 }
 0x4e9   :  { %v7719_v30 = vpop.f32.mrf.mxu1  ;;  %v7680_v0 = vpop.f32.mrf.mxu0  ;;  %10895 = vtanh.f32 %v11499_v53 }
 0x4ea   :  { %10897 = vtanh.f32 %v11494_v11 }
 0x4eb   :  { %v7721_v32 = vpop.f32.mrf.mxu1  ;;  %v7681_v40 = vpop.f32.mrf.mxu0  ;;  %10899 = vtanh.f32 %v11544_v9 }
 0x4ec   :  { %10901 = vtanh.f32 %v11549_v19 }
 0x4ed   :  { %v7722_v38 = vpop.f32.mrf.mxu1  ;;  %10903 = vtanh.f32 %v7636_v16 }
 0x4ee   :  { %10905 = vtanh.f32 %v7638_v18 }
 0x4f5   :  { %v10894_v43 = vpop.eup %10893 }
 0x4f6   :  { %v11561_v5 = vmul.f32 %v10894_v43, %v7955_v59  ;;  %v11587_v53 = vpop.eup %10895 }
 0x4f7   :  { %v11589_v54 = vpop.eup %10897 }
 0x4f8   :  { %v7963_v7 = vmul.f32 %v11561_v5, %v11515_v56  ;;  %v7974_v57 = vmul.f32 %v11457_v2, %v11561_v5  ;;  %v7976_v37 = vmul.f32 %v11467_v45, %v11561_v5  ;;  %v4577_v56 = vrot.slane %v11551_v48, %v744_v29  ;;  %v11591_v29 = vpop.eup %10899 }
 0x4f9   :  { %v4581_v2 = vrot.slane %v11551_v48, %v748_v41  ;;  %v7885_v41 = vsel %vm7814_vm0, %v11587_v53, 0.0  ;;  %v7884_v25 = vsel %vm7814_vm0, %v11589_v54, 0.0  ;;  %v7887_v47 = vsel %vm7814_vm0, %v11591_v29, 0.0  ;;  %v11599_v61 = vpop.eup %10901 }
 0x4fa   :  { %v11565_v17 = vsub.f32 %v7964_v49, %v7963_v7  ;;  %v7677_v45 = vadd.f32 %v7676_v27, %v4577_v56  ;;  %v7886_v34 = vadd.f32 %v7885_v41, %v7884_v25  ;;  %v11601_v42 = vpop.eup %10903  ;;  %v7889_v60 = vsel %vm7814_vm0, %v11599_v61, 0.0 }
 0x4fb   :  { %v7679_v62 = vadd.f32 %v7678_v31, %v4581_v2  ;;  %v7891_v35 = vsel %vm7814_vm0, %v11601_v42, 0.0  ;;  %v11607_v18 = vpop.eup %10905 }
 0x4fc   :  { %v11572_v52 = vadd.f32 %v7974_v57, %v11565_v17  ;;  %v11575_v58 = vadd.f32 %v7976_v37, %v11565_v17  ;;  %v7718_v33 = vadd.f32 %v7717_v28, %v7677_v45  ;;  %v7888_v15 = vadd.f32 %v7887_v47, %v7886_v34 }
 0x4fd   :  { %v7720_v9 = vadd.f32 %v7719_v30, %v7679_v62  ;;  %v7893_v36 = vsel %vm7814_vm0, %v11607_v18, 0.0 }
 0x4fe   :  { %v7890_v21 = vadd.f32 %v7889_v60, %v7888_v15 }
 0x500   :  { %v7892_v23 = vadd.f32 %v7891_v35, %v7890_v21 }
 0x502   :  { %v7894_v55 = vadd.f32 %v7893_v36, %v7892_v23  ;;  %v10749_v36 = vld [vmem:[#allocation12 + $0x78] sm:$0xff]  }
 0x503   :  { %10546 = vmatprep.subr.bf16.mxu0 %v10749_v36 }
 0x525   :  { %v7758_v11 = vpop.f32.mrf.mxu0 }
 0x526   :  { %v7759_v1 = vadd.f32 %v7758_v11, %v7718_v33 }
 0x527   :  { %v7799_v6 = vpop.f32.mrf.mxu1  ;;  %v7760_v19 = vpop.f32.mrf.mxu0 }
 0x528   :  { %v7800_v46 = vadd.f32 %v7799_v6, %v7759_v1  ;;  %v7761_v44 = vadd.f32 %v7760_v19, %v7720_v9 }
 0x529   :  { %v7801_v3 = vpop.f32.mrf.mxu1  ;;  %v7762_v48 = vpop.f32.mrf.mxu0 }
 0x52a   :  { %10907 = vtanh.f32 %v7800_v46  ;;  %v7802_v51 = vadd.f32 %v7801_v3, %v7761_v44 }
 0x52b   :  { %v7803_v22 = vpop.f32.mrf.mxu1  ;;  %v7763_v8 = vpop.f32.mrf.mxu0 }
 0x52c   :  { %10909 = vtanh.f32 %v7802_v51 }
 0x52d   :  { %v7804_v16 = vpop.f32.mrf.mxu1 }
 0x537   :  { %v11611_v20 = vpop.eup %10907 }
 0x538   :  { %v7895_v4 = vsel %vm7814_vm0, %v11611_v20, 0.0 }
 0x539   :  { %v11615_v39 = vpop.eup %10909  ;;  %v7896_v24 = vadd.f32 %v7895_v4, %v7894_v55  ;;  %v10750_v55 = vld [vmem:[#allocation12 + $0xf8] sm:$0xff]  }
 0x53a   :  { %v7897_v27 = vsel %vm7814_vm0, %v11615_v39, 0.0  ;;  %v10751_v4 = vld [vmem:[#allocation12 + $0x38] sm:$0xff]   ;;  %10568 = vmatprep.subr.bf16.mxu1 %v10750_v55 }
 0x53b   :  { %v7898_v26 = vadd.f32 %v7897_v27, %v7896_v24  ;;  %v10752_v24 = vld [vmem:[#allocation12 + $0xb8] sm:$0xff]   ;;  %10547 = vmatpush3.bf16.msra.mxu0 %v10751_v4  ;;  %v10753_v27 = vld [vmem:[#allocation12 + $0x70] sm:$0xff]   ;;  %v7968_v4 = vstv %s10416_s26 }
 0x53c   :  { %10569 = vmatpush3.bf16.msra.mxu1 %v10752_v24  ;;  %10548 = vmatprep.subr.bf16.mxu0 %v10753_v27 }
 0x53d   :  { %7899 = vadd.xlane.f32.xlu1 %v7898_v26  ;;  %v10754_v26 = vld [vmem:[#allocation12 + $0xf0] sm:$0xff]  }
 0x53e   :  { %10570 = vmatprep.subr.bf16.mxu1 %v10754_v26 }
 0x5c6   :  { %v7900_v28 = vpop.xlane.xlu1 %7899 }
 0x5c7   :  { %v7901_v31 = vrot.slane %v7900_v28, 4 }
 0x5c9   :  { %v7902_v30 = vadd.f32 %v7901_v31, %v7900_v28  ;;  %v10755_v28 = vld [vmem:[#allocation12 + $0x30] sm:$0xff]  }
 0x5ca   :  { %v10756_v31 = vld [vmem:[#allocation12 + $0xb0] sm:$0xff]   ;;  %10549 = vmatpush3.bf16.msra.mxu0 %v10755_v28 }
 0x5cb   :  { %v7903_v0 = vrot.slane %v7902_v30, 2  ;;  %10571 = vmatpush3.bf16.msra.mxu1 %v10756_v31 }
 0x5cd   :  { %v7904_v32 = vadd.f32 %v7903_v0, %v7902_v30  ;;  %v10757_v30 = vld [vmem:[#allocation12 + $0x68] sm:$0xff]  }
 0x5ce   :  { %v10758_v0 = vld [vmem:[#allocation12 + $0xe8] sm:$0xff]   ;;  %10550 = vmatprep.subr.bf16.mxu0 %v10757_v30 }
 0x5cf   :  { %v7905_v40 = vrot.slane %v7904_v32, 1  ;;  %10572 = vmatprep.subr.bf16.mxu1 %v10758_v0 }
 0x5d1   :  { %v7906_v38 = vadd.f32 %v7905_v40, %v7904_v32  ;;  %v10759_v32 = vld [vmem:[#allocation12 + $0x28] sm:$0xff]  }
 0x5d2   :  { %v10760_v40 = vld [vmem:[#allocation12 + $0xa8] sm:$0xff]   ;;  %10551 = vmatpush3.bf16.msra.mxu0 %v10759_v32 }
 0x5d3   :  { %10726 = vpush %v7906_v38  ;;  %10573 = vmatpush3.bf16.msra.mxu1 %v10760_v40  ;;  %v10761_v38 = vld [vmem:[#allocation12 + $0x60] sm:$0xff]  }
 0x5d4   :  { %10552 = vmatprep.subr.bf16.mxu0 %v10761_v38 }
 0x604   :  { %s10727_s7 = spop %10726 }
 0x605   :  { %v7908_v59 = vstv %s10727_s7 }
 0x606   :  { %v11619_v43 = vmul.f32 0.00048828125, %v7908_v59  ;;  %v10762_v59 = vld [vmem:[#allocation12 + $0xe0] sm:$0xff]  }
 0x607   :  { %10574 = vmatprep.subr.bf16.mxu1 %v10762_v59 }
 0x608   :  { %v7910_v49 = vsub.f32 %v11589_v54, %v11619_v43  ;;  %v7911_v7 = vsub.f32 %v11587_v53, %v11619_v43  ;;  %v7912_v57 = vsub.f32 %v11591_v29, %v11619_v43  ;;  %v7913_v37 = vsub.f32 %v11599_v61, %v11619_v43 }
 0x609   :  { %v7914_v56 = vsub.f32 %v11601_v42, %v11619_v43  ;;  %v7915_v33 = vsub.f32 %v11607_v18, %v11619_v43  ;;  %v7916_v19 = vsub.f32 %v11611_v20, %v11619_v43  ;;  %v7917_v41 = vsub.f32 %v11615_v39, %v11619_v43 }
 0x60a   :  { %v7918_v2 = vmul.f32 %v7910_v49, %v7910_v49  ;;  %v7919_v45 = vmul.f32 %v7911_v7, %v7911_v7  ;;  %v7920_v62 = vmul.f32 %v7912_v57, %v7912_v57  ;;  %v7921_v11 = vmul.f32 %v7913_v37, %v7913_v37  ;;  %v10763_v49 = vld [vmem:[#allocation12 + $0x20] sm:$0xff]   ;;  %v10765_v57 = vld [vmem:[#allocation12 + $0x58] sm:$0xff]  }
 0x60b   :  { %v7922_v46 = vmul.f32 %v7914_v56, %v7914_v56  ;;  %v7923_v48 = vmul.f32 %v7915_v33, %v7915_v33  ;;  %v7924_v25 = vmul.f32 %v7916_v19, %v7916_v19  ;;  %v7925_v34 = vmul.f32 %v7917_v41, %v7917_v41  ;;  %v10764_v7 = vld [vmem:[#allocation12 + $0xa0] sm:$0xff]   ;;  %10553 = vmatpush3.bf16.msra.mxu0 %v10763_v49  ;;  %v10766_v37 = vld [vmem:[#allocation12 + $0xd8] sm:$0xff]   ;;  %v10771_v33 = vld [vmem:[#allocation12 + $0x10] sm:$0xff]  }
 0x60c   :  { %v7926_v9 = vsel %vm7814_vm0, %v7918_v2, 0.0  ;;  %v7927_v1 = vsel %vm7814_vm0, %v7919_v45, 0.0  ;;  %v7929_v44 = vsel %vm7814_vm0, %v7920_v62, 0.0  ;;  %v7931_v51 = vsel %vm7814_vm0, %v7921_v11, 0.0  ;;  %10575 = vmatpush3.bf16.msra.mxu1 %v10764_v7  ;;  %v10767_v56 = vld [vmem:[#allocation12 + $0x18] sm:$0xff]   ;;  %10554 = vmatprep.subr.bf16.mxu0 %v10765_v57  ;;  %v10769_v45 = vld [vmem:[#allocation12 + $0x50] sm:$0xff]  }
 0x60d   :  { %v7928_v6 = vadd.f32 %v7927_v1, %v7926_v9  ;;  %v7933_v47 = vsel %vm7814_vm0, %v7922_v46, 0.0  ;;  %v7935_v16 = vsel %vm7814_vm0, %v7923_v48, 0.0  ;;  %v7937_v60 = vsel %vm7814_vm0, %v7924_v25, 0.0  ;;  %v10768_v2 = vld [vmem:[#allocation12 + $0x98] sm:$0xff]   ;;  %10576 = vmatprep.subr.bf16.mxu1 %v10766_v37  ;;  %v10770_v62 = vld [vmem:[#allocation12 + $0xd0] sm:$0xff]   ;;  %v10773_v9 = vld [vmem:[#allocation12 + $0x48] sm:$0xff]  }
 0x60e   :  { %v7939_v21 = vsel %vm7814_vm0, %v7925_v34, 0.0  ;;  %v10772_v11 = vld [vmem:[#allocation12 + $0x90] sm:$0xff]   ;;  %v10774_v1 = vld [vmem:[#allocation12 + $0xc8] sm:$0xff]   ;;  %v10777_v46 = vld [vmem:[#allocation12 + $0x40] sm:$0xff]  }
 0x60f   :  { %v7930_v3 = vadd.f32 %v7929_v44, %v7928_v6  ;;  %10555 = vmatpush3.bf16.msra.mxu0 %v10767_v56  ;;  %v10775_v6 = vld [vmem:[#allocation12 + $0x8] sm:$0xff]   ;;  %v10778_v44 = vld [vmem:[#allocation12 + $0xc0] sm:$0xff]   ;;  %v10781_v48 = vld [vmem:[#allocation12 + $0x178] sm:$0xff]  }
 0x610   :  { %10577 = vmatpush3.bf16.msra.mxu1 %v10768_v2  ;;  %10556 = vmatprep.subr.bf16.mxu0 %v10769_v45  ;;  %v10776_v19 = vld [vmem:[#allocation12 + $0x88] sm:$0xff]   ;;  %v10780_v41 = vld [vmem:[#allocation12 + $0x80] sm:$0xff]   ;;  %v10784_v57 = vld [vmem:[#allocation12 + $0x1b8] sm:$0xff]  }
 0x611   :  { %v7932_v22 = vadd.f32 %v7931_v51, %v7930_v3  ;;  %10578 = vmatprep.subr.bf16.mxu1 %v10770_v62  ;;  %v10779_v3 = vld [vmem:[#allocation12] sm:$0xff]   ;;  %v10782_v51 = vld [vmem:[#allocation12 + $0x1f8] sm:$0xff]   ;;  %v10786_v37 = vld [vmem:[#allocation12 + $0x1f0] sm:$0xff]  }
 0x612   :  { %v10787_v45 = vld [vmem:[#allocation12 + $0x130] sm:$0xff]  }
 0x613   :  { %v7934_v8 = vadd.f32 %v7933_v47, %v7932_v22  ;;  %10557 = vmatpush3.bf16.msra.mxu0 %v10771_v33  ;;  %v10788_v62 = vld [vmem:[#allocation12 + $0x1b0] sm:$0xff]   ;;  %v10789_v33 = vld [vmem:[#allocation12 + $0x168] sm:$0xff]  }
 0x614   :  { %10579 = vmatpush3.bf16.msra.mxu1 %v10772_v11  ;;  %10558 = vmatprep.subr.bf16.mxu0 %v10773_v9  ;;  %v10790_v11 = vld [vmem:[#allocation12 + $0x1e8] sm:$0xff]  }
 0x615   :  { %v7936_v15 = vadd.f32 %v7935_v16, %v7934_v8  ;;  %10580 = vmatprep.subr.bf16.mxu1 %v10774_v1  ;;  %v10791_v9 = vld [vmem:[#allocation12 + $0x128] sm:$0xff]  }
 0x616   :  { %v10792_v1 = vld [vmem:[#allocation12 + $0x1a8] sm:$0xff]  }
 0x617   :  { %v7938_v35 = vadd.f32 %v7937_v60, %v7936_v15  ;;  %10559 = vmatpush3.bf16.msra.mxu0 %v10775_v6  ;;  %v10793_v6 = vld [vmem:[#allocation12 + $0x160] sm:$0xff]  }
 0x618   :  { %10581 = vmatpush3.bf16.msra.mxu1 %v10776_v19  ;;  %10560 = vmatprep.subr.bf16.mxu0 %v10777_v46  ;;  %v10794_v19 = vld [vmem:[#allocation12 + $0x1e0] sm:$0xff]  }
 0x619   :  { %v7940_v23 = vadd.f32 %v7939_v21, %v7938_v35  ;;  %10582 = vmatprep.subr.bf16.mxu1 %v10778_v44  ;;  %v10795_v46 = vld [vmem:[#allocation12 + $0x120] sm:$0xff]  }
 0x61a   :  { %v10796_v44 = vld [vmem:[#allocation12 + $0x1a0] sm:$0xff]  }
 0x61b   :  { %7941 = vadd.xlane.f32.xlu1 %v7940_v23  ;;  %10561 = vmatpush3.bf16.msra.mxu0 %v10779_v3  ;;  %v7960_v23 = vstv %s10415_s25  ;;  %v10797_v3 = vld [vmem:[#allocation12 + $0x158] sm:$0xff]  }
 0x61c   :  { %10583 = vmatpush3.bf16.msra.mxu1 %v10780_v41  ;;  %10590 = vmatprep.subr.bf16.mxu0 %v10781_v48  ;;  %v10798_v41 = vld [vmem:[#allocation12 + $0x1d8] sm:$0xff]  }
 0x61d   :  { %10612 = vmatprep.subr.bf16.mxu1 %v10782_v51  ;;  %v10799_v48 = vld [vmem:[#allocation12 + $0x118] sm:$0xff]  }
 0x61e   :  { %v10800_v51 = vld [vmem:[#allocation12 + $0x198] sm:$0xff]  }
 0x6a4   :  { %v7942_v22 = vpop.xlane.xlu1 %7941 }
 0x6a5   :  { %v7943_v25 = vrot.slane %v7942_v22, 4 }
 0x6a7   :  { %v7944_v47 = vadd.f32 %v7943_v25, %v7942_v22  ;;  %v10801_v22 = vld [vmem:[#allocation12 + $0x150] sm:$0xff]  }
 0x6a8   :  { %v10802_v25 = vld [vmem:[#allocation12 + $0x1d0] sm:$0xff]  }
 0x6a9   :  { %v7945_v8 = vrot.slane %v7944_v47, 2 }
 0x6ab   :  { %v7946_v34 = vadd.f32 %v7945_v8, %v7944_v47  ;;  %v10803_v47 = vld [vmem:[#allocation12 + $0x110] sm:$0xff]  }
 0x6ac   :  { %v10804_v8 = vld [vmem:[#allocation12 + $0x190] sm:$0xff]  }
 0x6ad   :  { %v7947_v16 = vrot.slane %v7946_v34, 1 }
 0x6af   :  { %v7948_v15 = vadd.f32 %v7947_v16, %v7946_v34  ;;  %v10805_v34 = vld [vmem:[#allocation12 + $0x148] sm:$0xff]  }
 0x6b0   :  { %v10806_v16 = vld [vmem:[#allocation12 + $0x1c8] sm:$0xff]  }
 0x6b1   :  { %10728 = vpush %v7948_v15  ;;  %v10807_v15 = vld [vmem:[#allocation12 + $0x108] sm:$0xff]  }
 0x6e2   :  { %s10729_s24 = spop %10728 }
 0x6e3   :  { %v7950_v60 = vstv %s10729_s24 }
 0x6e4   :  { %v7951_v35 = vmul.f32 0.00048828125, %v7950_v60  ;;  %v10808_v60 = vld [vmem:[#allocation12 + $0x188] sm:$0xff]  }
 0x6e6   :  { %v7958_v21 = vadd.f32 1e-05, %v7951_v35  ;;  %v10809_v35 = vld [vmem:[#allocation12 + $0x140] sm:$0xff]  }
 0x6e8   :  { %10911 = vrsqrt.f32 %v7958_v21  ;;  %v10810_v21 = vld [vmem:[#allocation12 + $0x1c0] sm:$0xff]  }
 0x6f5   :  { %v10912_v36 = vpop.eup %10911 }
 0x6f6   :  { %v11645_v55 = vmul.f32 %v10912_v36, %v7960_v23 }
 0x6f8   :  { %v7967_v24 = vmul.f32 %v11645_v55, %v11619_v43  ;;  %v7995_v27 = vmul.f32 %v11587_v53, %v11645_v55  ;;  %v7997_v28 = vmul.f32 %v11599_v61, %v11645_v55  ;;  %v7994_v31 = vmul.f32 %v11589_v54, %v11645_v55 }
 0x6f9   :  { %v7996_v30 = vmul.f32 %v11591_v29, %v11645_v55  ;;  %v7999_v0 = vmul.f32 %v11607_v18, %v11645_v55  ;;  %v8001_v43 = vmul.f32 %v11615_v39, %v11645_v55  ;;  %v10783_v18 = vld [vmem:[#allocation12 + $0x138] sm:$0xff]   ;;  %v10785_v39 = vld [vmem:[#allocation12 + $0x170] sm:$0xff]   ;;  %v7998_v23 = vmul.f32 %v11601_v42, %v11645_v55 }
 0x6fa   :  { %v11651_v26 = vsub.f32 %v7968_v4, %v7967_v24  ;;  %v8000_v36 = vmul.f32 %v11611_v20, %v11645_v55  ;;  %v10811_v4 = vld [vmem:[#allocation12 + $0x100] sm:$0xff]   ;;  %v7973_v42 = vmul.f32 %v11455_v14, %v11561_v5  ;;  %v10819_v14 = vld [vmem:[#allocation11 + $0x30] sm:$0xff]  }
 0x6fb   :  { %v10812_v24 = vld [vmem:[#allocation12 + $0x180] sm:$0xff]  }
 0x6fc   :  { %v8003_v32 = vadd.f32 %v7995_v27, %v11651_v26  ;;  %v8005_v53 = vadd.f32 %v7997_v28, %v11651_v26  ;;  %v8002_v40 = vadd.f32 %v7994_v31, %v11651_v26  ;;  %v8004_v61 = vadd.f32 %v7996_v30, %v11651_v26  ;;  %v10813_v30 = vld [vmem:[#allocation11 + $0x78] sm:$0xff]  }
 0x6fd   :  { %v8007_v38 = vadd.f32 %v7999_v0, %v11651_v26  ;;  %v8009_v54 = vadd.f32 %v8001_v43, %v11651_v26  ;;  %v7971_v27 = vmul.f32 %v11438_v10, %v11561_v5  ;;  %v8006_v28 = vadd.f32 %v7998_v23, %v11651_v26  ;;  %v10814_v0 = vld [vmem:[#allocation11 + $0xf8] sm:$0xff]  }
 0x6fe   :  { %v8011_v59 = vpack.c.bf16 %v8003_v32, %v8003_v32  ;;  %v8013_v29 = vpack.c.bf16 %v8005_v53, %v8005_v53  ;;  %v8010_v49 = vpack.c.bf16 %v8002_v40, %v8002_v40  ;;  %v8012_v7 = vpack.c.bf16 %v8004_v61, %v8004_v61  ;;  %v10815_v43 = vld [vmem:[#allocation11 + $0x38] sm:$0xff]   ;;  %v10817_v61 = vld [vmem:[#allocation11 + $0x70] sm:$0xff]  }
 0x6ff   :  { %v8015_v56 = vpack.c.bf16 %v8007_v38, %v8007_v38  ;;  %v8017_v2 = vpack.c.bf16 %v8009_v54, %v8009_v54  ;;  %v8008_v31 = vadd.f32 %v8000_v36, %v11651_v26  ;;  %v7979_v20 = vadd.f32 %v7971_v27, %v11565_v17  ;;  %v10816_v53 = vld [vmem:[#allocation11 + $0xb8] sm:$0xff]   ;;  %v10818_v26 = vld [vmem:[#allocation11 + $0xf0] sm:$0xff]  }
 0x700   :  { %8690 = vmatprep.mubr.bf16.mxu0 %v8011_v59  ;;  %8730 = vmatprep.mubr.bf16.mxu1 %v8013_v29  ;;  %v7981_v55 = vadd.f32 %v7973_v42, %v11565_v17  ;;  %v8014_v32 = vpack.c.bf16 %v8006_v28, %v8006_v28  ;;  %v10820_v54 = vld [vmem:[#allocation11 + $0xb0] sm:$0xff]   ;;  %v10821_v59 = vld [vmem:[#allocation11 + $0x68] sm:$0xff]   ;;  %v10848_v23 = vld [vmem:[#allocation11 + $0x1b8] sm:$0xff]  }
 0x701   :  { %8691 = vmatmul.mubr.bf16.vlgmr.msra.gmra.mxu0 %v8010_v49  ;;  %8731 = vmatmul.mubr.bf16.vlgmr.msra.gmra.mxu1 %v8012_v7  ;;  %v8016_v10 = vpack.c.bf16 %v8008_v31, %v8008_v31  ;;  %v7987_v40 = vpack.c.bf16 %v7979_v20, %v7979_v20  ;;  %v10822_v29 = vld [vmem:[#allocation11 + $0xe8] sm:$0xff]   ;;  %v10858_v42 = vld [vmem:[#allocation11 + $0x1e0] sm:$0xff]  }
 0x702   :  { %10591 = vmatpush3.bf16.msra.mxu0 %v10783_v18  ;;  %10613 = vmatpush3.bf16.msra.mxu1 %v10784_v57  ;;  %v7989_v38 = vpack.c.bf16 %v7981_v55, %v7981_v55  ;;  %v10823_v49 = vld [vmem:[#allocation11 + $0x28] sm:$0xff]   ;;  %v10825_v18 = vld [vmem:[#allocation11 + $0x60] sm:$0xff]  }
 0x703   :  { %8770 = vmatprep.mubr.bf16.mxu0 %v8015_v56  ;;  %8810 = vmatprep.mubr.bf16.mxu1 %v8017_v2  ;;  %v10824_v7 = vld [vmem:[#allocation11 + $0xa8] sm:$0xff]   ;;  %v10826_v57 = vld [vmem:[#allocation11 + $0xe0] sm:$0xff]   ;;  %v10829_v56 = vld [vmem:[#allocation11 + $0x58] sm:$0xff]  }
 0x704   :  { %10592 = vmatprep.subr.bf16.mxu0 %v10785_v39  ;;  %10614 = vmatprep.subr.bf16.mxu1 %v10786_v37  ;;  %v10827_v39 = vld [vmem:[#allocation11 + $0x20] sm:$0xff]   ;;  %v10830_v2 = vld [vmem:[#allocation11 + $0xd8] sm:$0xff]   ;;  %v10853_v28 = vld [vmem:[#allocation11 + $0x168] sm:$0xff]  }
 0x705   :  { %v10828_v37 = vld [vmem:[#allocation11 + $0xa0] sm:$0xff]   ;;  %v10855_v31 = vld [vmem:[#allocation11 + $0x128] sm:$0xff]  }
 0x706   :  { %10593 = vmatpush3.bf16.msra.mxu0 %v10787_v45  ;;  %10615 = vmatpush3.bf16.msra.mxu1 %v10788_v62  ;;  %v10831_v45 = vld [vmem:[#allocation11 + $0x18] sm:$0xff]   ;;  %v10859_v20 = vld [vmem:[#allocation11 + $0x120] sm:$0xff]  }
 0x707   :  { %10594 = vmatprep.subr.bf16.mxu0 %v10789_v33  ;;  %10616 = vmatprep.subr.bf16.mxu1 %v10790_v11  ;;  %v10832_v62 = vld [vmem:[#allocation11 + $0x98] sm:$0xff]   ;;  %v10833_v33 = vld [vmem:[#allocation11 + $0x50] sm:$0xff]   ;;  %v10860_v55 = vld [vmem:[#allocation11 + $0x1a0] sm:$0xff]  }
 0x708   :  { %v10834_v11 = vld [vmem:[#allocation11 + $0xd0] sm:$0xff]  }
 0x70a   :  { %10595 = vmatpush3.bf16.msra.mxu0 %v10791_v9  ;;  %10617 = vmatpush3.bf16.msra.mxu1 %v10792_v1  ;;  %v10835_v9 = vld [vmem:[#allocation11 + $0x10] sm:$0xff]  }
 0x70b   :  { %10596 = vmatprep.subr.bf16.mxu0 %v10793_v6  ;;  %10618 = vmatprep.subr.bf16.mxu1 %v10794_v19  ;;  %v10836_v1 = vld [vmem:[#allocation11 + $0x90] sm:$0xff]   ;;  %v10837_v6 = vld [vmem:[#allocation11 + $0x48] sm:$0xff]  }
 0x70c   :  { %v10838_v19 = vld [vmem:[#allocation11 + $0xc8] sm:$0xff]  }
 0x70e   :  { %10597 = vmatpush3.bf16.msra.mxu0 %v10795_v46  ;;  %10619 = vmatpush3.bf16.msra.mxu1 %v10796_v44  ;;  %v10839_v46 = vld [vmem:[#allocation11 + $0x8] sm:$0xff]  }
 0x70f   :  { %10598 = vmatprep.subr.bf16.mxu0 %v10797_v3  ;;  %10620 = vmatprep.subr.bf16.mxu1 %v10798_v41  ;;  %v10840_v44 = vld [vmem:[#allocation11 + $0x88] sm:$0xff]   ;;  %v10841_v3 = vld [vmem:[#allocation11 + $0x40] sm:$0xff]  }
 0x710   :  { %v10842_v41 = vld [vmem:[#allocation11 + $0xc0] sm:$0xff]  }
 0x712   :  { %10599 = vmatpush3.bf16.msra.mxu0 %v10799_v48  ;;  %10621 = vmatpush3.bf16.msra.mxu1 %v10800_v51  ;;  %v7970_v48 = vmul.f32 %v11441_v13, %v11561_v5  ;;  %v10843_v51 = vld [vmem:[#allocation11] sm:$0xff]   ;;  %v7977_v13 = vmul.f32 %v11471_v63, %v11561_v5  ;;  %v10851_v63 = vld [vmem:[#allocation11 + $0x130] sm:$0xff]  }
 0x713   :  { %10600 = vmatprep.subr.bf16.mxu0 %v10801_v22  ;;  %10622 = vmatprep.subr.bf16.mxu1 %v10802_v25  ;;  %v7972_v22 = vmul.f32 %v11445_v50, %v11561_v5  ;;  %v10844_v25 = vld [vmem:[#allocation11 + $0x80] sm:$0xff]   ;;  %v10847_v50 = vld [vmem:[#allocation11 + $0x138] sm:$0xff]  }
 0x716   :  { %10601 = vmatpush3.bf16.msra.mxu0 %v10803_v47  ;;  %10623 = vmatpush3.bf16.msra.mxu1 %v10804_v8  ;;  %v7978_v47 = vadd.f32 %v7970_v48, %v11565_v17  ;;  %v10845_v8 = vld [vmem:[#allocation11 + $0x178] sm:$0xff]  }
 0x717   :  { %10602 = vmatprep.subr.bf16.mxu0 %v10805_v34  ;;  %10624 = vmatprep.subr.bf16.mxu1 %v10806_v16  ;;  %v7975_v34 = vmul.f32 %v11463_v12, %v11561_v5  ;;  %v7980_v16 = vadd.f32 %v7972_v22, %v11565_v17  ;;  %v10849_v12 = vld [vmem:[#allocation11 + $0x170] sm:$0xff]  }
 0x718   :  { %v10852_v5 = vld [vmem:[#allocation11 + $0x1b0] sm:$0xff]  }
 0x719   :  { %v7988_v36 = vpack.c.bf16 %v7980_v16, %v7980_v16 }
 0x71a   :  { %10603 = vmatpush3.bf16.msra.mxu0 %v10807_v15  ;;  %10625 = vmatpush3.bf16.msra.mxu1 %v10808_v60  ;;  %v10846_v15 = vld [vmem:[#allocation11 + $0x1f8] sm:$0xff]   ;;  %v7983_v60 = vadd.f32 %v7975_v34, %v11565_v17 }
 0x71b   :  { %10604 = vmatprep.subr.bf16.mxu0 %v10809_v35  ;;  %10626 = vmatprep.subr.bf16.mxu1 %v10810_v21  ;;  %v7985_v35 = vadd.f32 %v7977_v13, %v11565_v17  ;;  %v7986_v21 = vpack.c.bf16 %v7978_v47, %v7978_v47  ;;  %v10854_v17 = vld [vmem:[#allocation11 + $0x1e8] sm:$0xff]  }
 0x71d   :  { %v7993_v27 = vpack.c.bf16 %v7985_v35, %v7985_v35 }
 0x71e   :  { %10605 = vmatpush3.bf16.msra.mxu0 %v10811_v4  ;;  %10627 = vmatpush3.bf16.msra.mxu1 %v10812_v24  ;;  %v7991_v4 = vpack.c.bf16 %v7983_v60, %v7983_v60  ;;  %v10850_v24 = vld [vmem:[#allocation11 + $0x1f0] sm:$0xff]  }
 0x71f   :  { %10634 = vmatprep.subr.bf16.mxu0 %v10813_v30  ;;  %10656 = vmatprep.subr.bf16.mxu1 %v10814_v0  ;;  %v10856_v30 = vld [vmem:[#allocation11 + $0x1a8] sm:$0xff]   ;;  %v10857_v0 = vld [vmem:[#allocation11 + $0x160] sm:$0xff]  }
 0x721   :  { %8771 = vmatmul.mubr.bf16.vlgmr.msra.gmra.mxu0 %v8014_v32  ;;  %8811 = vmatmul.mubr.bf16.vlgmr.msra.gmra.mxu1 %v8016_v10  ;;  %v10862_v32 = vld [vmem:[#allocation11 + $0x1d8] sm:$0xff]  }
 0x722   :  { %10635 = vmatpush3.bf16.msra.mxu0 %v10815_v43  ;;  %9234 = vmatprep.mubr.bf16.mxu0 %v7987_v40  ;;  %v10861_v43 = vld [vmem:[#allocation11 + $0x158] sm:$0xff]   ;;  %v10865_v40 = vld [vmem:[#allocation11 + $0x150] sm:$0xff]  }
 0x723   :  { %10657 = vmatpush3.bf16.msra.mxu1 %v10816_v53  ;;  %9274 = vmatprep.mubr.bf16.mxu1 %v7989_v38  ;;  %v10863_v10 = vld [vmem:[#allocation11 + $0x118] sm:$0xff]   ;;  %v10868_v38 = vld [vmem:[#allocation11 + $0x190] sm:$0xff]  }
 0x724   :  { %10636 = vmatprep.subr.bf16.mxu0 %v10817_v61  ;;  %10658 = vmatprep.subr.bf16.mxu1 %v10818_v26  ;;  %v10864_v53 = vld [vmem:[#allocation11 + $0x198] sm:$0xff]   ;;  %v10866_v61 = vld [vmem:[#allocation11 + $0x1d0] sm:$0xff]  }
 0x725   :  { %v10867_v26 = vld [vmem:[#allocation11 + $0x110] sm:$0xff]  }
 0x726   :  { %10637 = vmatpush3.bf16.msra.mxu0 %v10819_v14  ;;  %v10869_v14 = vld [vmem:[#allocation11 + $0x148] sm:$0xff]  }
 0x727   :  { %10659 = vmatpush3.bf16.msra.mxu1 %v10820_v54  ;;  %10638 = vmatprep.subr.bf16.mxu0 %v10821_v59  ;;  %v10870_v54 = vld [vmem:[#allocation11 + $0x1c8] sm:$0xff]  }
 0x728   :  { %10660 = vmatprep.subr.bf16.mxu1 %v10822_v29  ;;  %v10871_v59 = vld [vmem:[#allocation11 + $0x108] sm:$0xff]  }
 0x729   :  { %v10872_v29 = vld [vmem:[#allocation11 + $0x188] sm:$0xff]  }
 0x72a   :  { %10639 = vmatpush3.bf16.msra.mxu0 %v10823_v49  ;;  %v10873_v49 = vld [vmem:[#allocation11 + $0x140] sm:$0xff]  }
 0x72b   :  { %10661 = vmatpush3.bf16.msra.mxu1 %v10824_v7  ;;  %10640 = vmatprep.subr.bf16.mxu0 %v10825_v18  ;;  %v10874_v7 = vld [vmem:[#allocation11 + $0x1c0] sm:$0xff]  }
 0x72c   :  { %10662 = vmatprep.subr.bf16.mxu1 %v10826_v57  ;;  %v10875_v18 = vld [vmem:[#allocation11 + $0x100] sm:$0xff]  }
 0x72d   :  { %v10876_v57 = vld [vmem:[#allocation11 + $0x180] sm:$0xff]  }
 0x72e   :  { %10641 = vmatpush3.bf16.msra.mxu0 %v10827_v39  ;;  %v7990_v39 = vpack.c.bf16 %v11572_v52, %v11572_v52 }
 0x72f   :  { %10663 = vmatpush3.bf16.msra.mxu1 %v10828_v37  ;;  %10642 = vmatprep.subr.bf16.mxu0 %v10829_v56  ;;  %v7992_v37 = vpack.c.bf16 %v11575_v58, %v11575_v58 }
 0x730   :  { %10664 = vmatprep.subr.bf16.mxu1 %v10830_v2 }
 0x732   :  { %10643 = vmatpush3.bf16.msra.mxu0 %v10831_v45 }
 0x733   :  { %10665 = vmatpush3.bf16.msra.mxu1 %v10832_v62  ;;  %10644 = vmatprep.subr.bf16.mxu0 %v10833_v33 }
 0x734   :  { %10666 = vmatprep.subr.bf16.mxu1 %v10834_v11 }
 0x736   :  { %10645 = vmatpush3.bf16.msra.mxu0 %v10835_v9 }
 0x737   :  { %10667 = vmatpush3.bf16.msra.mxu1 %v10836_v1  ;;  %10646 = vmatprep.subr.bf16.mxu0 %v10837_v6 }
 0x738   :  { %10668 = vmatprep.subr.bf16.mxu1 %v10838_v19 }
 0x73a   :  { %10647 = vmatpush3.bf16.msra.mxu0 %v10839_v46 }
 0x73b   :  { %10669 = vmatpush3.bf16.msra.mxu1 %v10840_v44  ;;  %10648 = vmatprep.subr.bf16.mxu0 %v10841_v3 }
 0x73c   :  { %10670 = vmatprep.subr.bf16.mxu1 %v10842_v41 }
 0x73e   :  { %10649 = vmatpush3.bf16.msra.mxu0 %v10843_v51 }
 0x73f   :  { %10671 = vmatpush3.bf16.msra.mxu1 %v10844_v25  ;;  %10678 = vmatprep.subr.bf16.mxu0 %v10845_v8 }
 0x740   :  { %10700 = vmatprep.subr.bf16.mxu1 %v10846_v15 }
 0x741   :  { %9235 = vmatmul.mubr.bf16.vlgmr.msra.gmra.mxu0 %v7986_v21 }
 0x742   :  { %9275 = vmatmul.mubr.bf16.vlgmr.msra.gmra.mxu1 %v7988_v36  ;;  %10679 = vmatpush3.bf16.msra.mxu0 %v10847_v50 }
 0x743   :  { %9314 = vmatprep.mubr.bf16.mxu0 %v7991_v4  ;;  %10701 = vmatpush3.bf16.msra.mxu1 %v10848_v23 }
 0x744   :  { %9354 = vmatprep.mubr.bf16.mxu1 %v7993_v27  ;;  %10680 = vmatprep.subr.bf16.mxu0 %v10849_v12 }
 0x745   :  { %10702 = vmatprep.subr.bf16.mxu1 %v10850_v24 }
 0x746   :  { %10681 = vmatpush3.bf16.msra.mxu0 %v10851_v63 }
 0x747   :  { %10703 = vmatpush3.bf16.msra.mxu1 %v10852_v5  ;;  %10682 = vmatprep.subr.bf16.mxu0 %v10853_v28 }
 0x748   :  { %10704 = vmatprep.subr.bf16.mxu1 %v10854_v17 }
 0x74a   :  { %10683 = vmatpush3.bf16.msra.mxu0 %v10855_v31 }
 0x74b   :  { %10705 = vmatpush3.bf16.msra.mxu1 %v10856_v30  ;;  %10684 = vmatprep.subr.bf16.mxu0 %v10857_v0 }
 0x74c   :  { %10706 = vmatprep.subr.bf16.mxu1 %v10858_v42 }
 0x74e   :  { %10685 = vmatpush3.bf16.msra.mxu0 %v10859_v20 }
 0x74f   :  { %10707 = vmatpush3.bf16.msra.mxu1 %v10860_v55  ;;  %10686 = vmatprep.subr.bf16.mxu0 %v10861_v43  ;;  %v10545_v55 = vld [vmem:[#allocation14] ss:$0 sm:$0xff] }
 0x750   :  { %10708 = vmatprep.subr.bf16.mxu1 %v10862_v32 }
 0x752   :  { %10687 = vmatpush3.bf16.msra.mxu0 %v10863_v10 }
 0x753   :  { %10709 = vmatpush3.bf16.msra.mxu1 %v10864_v53  ;;  %10688 = vmatprep.subr.bf16.mxu0 %v10865_v40 }
 0x754   :  { %10710 = vmatprep.subr.bf16.mxu1 %v10866_v61 }
 0x756   :  { %10689 = vmatpush3.bf16.msra.mxu0 %v10867_v26 }
 0x757   :  { %10711 = vmatpush3.bf16.msra.mxu1 %v10868_v38  ;;  %10690 = vmatprep.subr.bf16.mxu0 %v10869_v14 }
 0x758   :  { %10712 = vmatprep.subr.bf16.mxu1 %v10870_v54 }
 0x75a   :  { %10691 = vmatpush3.bf16.msra.mxu0 %v10871_v59 }
 0x75b   :  { %10713 = vmatpush3.bf16.msra.mxu1 %v10872_v29  ;;  %10692 = vmatprep.subr.bf16.mxu0 %v10873_v49 }
 0x75c   :  { %10714 = vmatprep.subr.bf16.mxu1 %v10874_v7 }
 0x75e   :  { %10693 = vmatpush3.bf16.msra.mxu0 %v10875_v18 }
 0x75f   :  { %10715 = vmatpush3.bf16.msra.mxu1 %v10876_v57 }
 0x761   :  { %9315 = vmatmul.mubr.bf16.vlgmr.msra.gmra.mxu0 %v7990_v39 }
 0x762   :  { %9355 = vmatmul.mubr.bf16.vlgmr.msra.gmra.mxu1 %v7992_v37 }
 0x7c1   :  { %v10562_v56 = vpop.f32.mrf.mxu0  ;;  %v10584_v2 = vpop.f32.mrf.mxu1 }
 0x7c3   :  { %v10563_v45 = vpop.f32.mrf.mxu0  ;;  %v10585_v62 = vpop.f32.mrf.mxu1 }
 0x7c4   :  { %v10564_v33 = vadd.f32 %v10563_v45, %v10562_v56  ;;  %v10586_v11 = vadd.f32 %v10585_v62, %v10584_v2 }
 0x7c5   :  { %v10565_v9 = vpop.f32.mrf.mxu0  ;;  %v10587_v1 = vpop.f32.mrf.mxu1 }
 0x7c6   :  { %v8733_v6 = vadd.f32 %v10586_v11, %v10564_v33 }
 0x7c7   :  { %v10566_v19 = vpop.f32.mrf.mxu0  ;;  %v10588_v46 = vpop.f32.mrf.mxu1 }
 0x7e1   :  { %v10606_v44 = vpop.f32.mrf.mxu0  ;;  %v10628_v3 = vpop.f32.mrf.mxu1 }
 0x7e3   :  { %v10607_v41 = vpop.f32.mrf.mxu0  ;;  %v10629_v52 = vpop.f32.mrf.mxu1 }
 0x7e4   :  { %v10608_v50 = vadd.f32 %v10607_v41, %v10606_v44  ;;  %v10630_v21 = vadd.f32 %v10629_v52, %v10628_v3 }
 0x7e5   :  { %v10609_v48 = vpop.f32.mrf.mxu0  ;;  %v10631_v51 = vpop.f32.mrf.mxu1 }
 0x7e6   :  { %v8773_v35 = vadd.f32 %v10608_v50, %v8733_v6 }
 0x7e7   :  { %v10610_v58 = vpop.f32.mrf.mxu0  ;;  %v10632_v22 = vpop.f32.mrf.mxu1 }
 0x7e8   :  { %v8813_v36 = vadd.f32 %v10630_v21, %v8773_v35 }
 0x801   :  { %v10650_v25 = vpop.f32.mrf.mxu0 }
 0x802   :  { %v10672_v47 = vpop.f32.mrf.mxu1 }
 0x803   :  { %v10651_v8 = vpop.f32.mrf.mxu0 }
 0x804   :  { %v10673_v34 = vpop.f32.mrf.mxu1  ;;  %v10652_v23 = vadd.f32 %v10651_v8, %v10650_v25 }
 0x805   :  { %v10653_v16 = vpop.f32.mrf.mxu0  ;;  %v10674_v24 = vadd.f32 %v10673_v34, %v10672_v47 }
 0x806   :  { %v10675_v15 = vpop.f32.mrf.mxu1  ;;  %v9237_v12 = vadd.f32 %v10652_v23, %v8813_v36 }
 0x807   :  { %v10654_v13 = vpop.f32.mrf.mxu0 }
 0x808   :  { %v10676_v60 = vpop.f32.mrf.mxu1  ;;  %v9277_v5 = vadd.f32 %v10674_v24, %v9237_v12 }
 0x821   :  { %v10694_v4 = vpop.f32.mrf.mxu0 }
 0x822   :  { %v10716_v27 = vpop.f32.mrf.mxu1 }
 0x823   :  { %v10695_v63 = vpop.f32.mrf.mxu0 }
 0x824   :  { %v10696_v28 = vadd.f32 %v10695_v63, %v10694_v4  ;;  %v10717_v17 = vpop.f32.mrf.mxu1 }
 0x825   :  { %v10697_v31 = vpop.f32.mrf.mxu0  ;;  %v10718_v0 = vadd.f32 %v10717_v17, %v10716_v27 }
 0x826   :  { %v9317_v30 = vadd.f32 %v10696_v28, %v9277_v5  ;;  %v10719_v42 = vpop.f32.mrf.mxu1 }
 0x827   :  { %v10698_v20 = vpop.f32.mrf.mxu0 }
 0x828   :  { %v9357_v43 = vadd.f32 %v10718_v0, %v9317_v30  ;;  %v10720_v32 = vpop.f32.mrf.mxu1 }
 0x82a   :  { %v9369_v10 = vadd.f32 %v10545_v55, %v9357_v43 }
 0x82c   :  { %9370 = vst [vmem:[#allocation18] sm:$0x3] %v9369_v10 }
 0x82d   :  { %11083 = shalt.err (!%p11080_p11)
}
 0x82e   :  { %9380 = dma.vmem_to_hbm [thread:$0]  %s9378_s27, 32, %s11711_s11, [#allocation4]  }
 0x82f   :  { %11104 = dma.done.wait [#allocation4], 32  }
 0x830   :  { %11105 = vsyncadd [#allocation4], 4294967264 }
 0x831   :  { %9384 = vsyncpa [#allocation3], 1 }
 0x832   :  { %9385 = vsyncpa [#allocation7], 1 }
 0x833   :  { %9386 = vsyncpa [#allocation10], 1 }
 0x834   :  { %9387 = vsyncpa [#allocation13], 1 }
 0x835   :  { %9388 = vsyncpa [#allocation4], 1 }
 0x836   :  { %9389 = vsyncpa [#allocation5], 1 }
 0x837   :  { %9390 = vsyncpa [#allocation17], 1 }

</bundles_post_ra>
